<compile_context>
chip_gen: v7x
topology: tpu7x:2x2x1
jax: 0.10.0
libtpu: 0.0.40
codegen_flags: <defaults>
</compile_context>

<pallas_src>
import math
import functools

import numpy as np
import jax
import jax.numpy as jnp
from jax import lax
from jax.experimental import pallas as pl
from jax.experimental.pallas import tpu as pltpu

EPS = 1e-5        # both the custom LayerNormalization and nn.LayerNorm use eps=1e-5
HP = 128          # per-head lane padding (one full vreg lane-tile)


def _full_spec(shape):
    nd = len(shape)
    return pl.BlockSpec(shape, lambda *_: (0,) * nd)


def _vpack_layout(s_pad, num_heads):
    """Row offsets inside the packed small-parameter buffer (host & kernel share)."""
    off = {'pos': 0, 'bqkv': s_pad}
    base = s_pad + num_heads
    names = ('emb_b', 'g1', 'be1', 'bo', 'g2', 'be2', 'bf1', 'bf2',
             'head_g', 'head_b', 'head_bw')
    for i, n in enumerate(names):
        off[n] = base + i
    off['rows'] = base + len(names)
    return off


# ----------------------------------------------------------------------------
# Fused kernel: embedding (conv∘input_fc) + positional add + the one live
# EncoderLayer (pre-LN fused-head MHA, residual, LN, FFN, residual) + masked
# mean-pool + LayerNorm/Linear/ReLU head.  One batch TILE per grid step.
# ----------------------------------------------------------------------------
def ctts_kernel(patch_ref, vpack_ref, embw_ref, wqkv_ref, wo_ref,
                w1_ref, w2_ref, hw_ref, o_ref, *, s_real):
    TB, S, F = patch_ref.shape            # S is the padded sequence length
    H, LP, D = wo_ref.shape               # heads, per-head lane pad, model dim
    dff = w1_ref.shape[1]
    M = TB * S
    off = _vpack_layout(S, H)

    def vrow(name, w):                    # [1, w] row from the packed buffer
        i = off[name]
        return vpack_ref[i:i + 1, 0:w]

    def layer_norm(z, gname, bname):
        g = vrow(gname, z.shape[-1])
        b = vrow(bname, z.shape[-1])
        mu = jnp.mean(z, axis=-1, keepdims=True)
        var = jnp.mean((z - mu) ** 2, axis=-1, keepdims=True)   # unbiased=False
        return (z - mu) * lax.rsqrt(var + EPS) * g + b

    # --- tokenizer conv (pre-composed with input_fc) + positional encoding ---
    p = patch_ref[...].reshape(M, F)                               # [M, Cin*K]
    emb = (jnp.dot(p, embw_ref[...], preferred_element_type=jnp.float32)
           + vrow('emb_b', D))                                     # [M, D]
    pos = vpack_ref[off['pos']:off['pos'] + S, 0:D]                # [S, D]
    emb = (emb.reshape(TB, S, D) + pos[None]).reshape(M, D)

    # --- multi-head self attention on norm1(emb) ---
    xn = layer_norm(emb, 'g1', 'be1')
    kmask = lax.broadcasted_iota(jnp.int32, (1, S, S), 2) < s_real  # valid keys

    att = vrow('bo', D)                     # accumulate heads into output proj
    for h in range(H):
        # lane-aligned padded QKV for head h: [M, 3*LP] (scale folded into wq/bq)
        qkv = (jnp.dot(xn, wqkv_ref[h], preferred_element_type=jnp.float32)
               + vpack_ref[off['bqkv'] + h:off['bqkv'] + h + 1, :])
        q = qkv[:, 0:LP].reshape(TB, S, LP)
        k = qkv[:, LP:2 * LP].reshape(TB, S, LP)
        v = qkv[:, 2 * LP:3 * LP].reshape(TB, S, LP)

        s = jnp.einsum('bsd,btd->bst', q, k,
                       preferred_element_type=jnp.float32)         # [TB, S, S]
        s = jnp.where(kmask, s, -1e30)                             # mask pad keys
        s = s - jnp.max(s, axis=-1, keepdims=True)
        e = jnp.where(kmask, jnp.exp(s), 0.0)
        denom = jnp.sum(e, axis=-1, keepdims=True)
        r = pl.reciprocal(denom, approx=True)
        r = r * (2.0 - denom * r)            # one Newton step -> f32 accuracy
        pw = e * r                                                  # softmax
        o = jnp.einsum('bst,btd->bsd', pw, v,
                       preferred_element_type=jnp.float32)          # [TB, S, LP]
        att = att + jnp.dot(o.reshape(M, LP), wo_ref[h],
                            preferred_element_type=jnp.float32)     # [M, D]
    x1 = att + emb                                # residual (dropout = identity)

    # --- position-wise FFN on norm2(x1) ---
    xn2 = layer_norm(x1, 'g2', 'be2')
    hdn = jnp.maximum(
        jnp.dot(xn2, w1_ref[...], preferred_element_type=jnp.float32)
        + vrow('bf1', dff), 0.0)
    ff = jnp.dot(hdn, w2_ref[...], preferred_element_type=jnp.float32) + vrow('bf2', D)
    hidden = (ff + x1).reshape(TB, S, D)

    # --- masked mean pool over the REAL sequence + head (LN -> Linear -> ReLU) ---
    rmask = (lax.broadcasted_iota(jnp.int32, (1, S, 1), 1) < s_real
             ).astype(jnp.float32)
    pooled = jnp.sum(hidden * rmask, axis=1) * (1.0 / s_real)       # [TB, D]
    nrm = layer_norm(pooled, 'head_g', 'head_b')
    y = jnp.dot(nrm, hw_ref[...], preferred_element_type=jnp.float32) + vrow('head_bw', D)
    o_ref[...] = jnp.maximum(y, 0.0)[:, None, :]                    # [TB, 1, D]


def ctts_pallas(patches_padded, FP, *, tb, s_real):
    Bp, S_pad, F = patches_padded.shape
    D = FP['emb_w'].shape[1]
    H, hp = FP['wo_p'].shape[0], FP['wo_p'].shape[1]
    d_ff = FP['w1'].shape[1]

    kern = functools.partial(ctts_kernel, s_real=s_real)
    args = (patches_padded, FP['vpack'], FP['emb_w'], FP['wqkv_p'], FP['wo_p'],
            FP['w1'], FP['w2'], FP['head_w'])
    in_specs = ([pl.BlockSpec((tb, S_pad, F), lambda i: (i, 0, 0))]
                + [_full_spec(a.shape) for a in args[1:]])

    m_tot = Bp * S_pad
    flops = int(2 * m_tot * F * D
                + 2 * m_tot * D * 3 * H * hp
                + 2 * Bp * H * S_pad * S_pad * 2 * hp
                + 2 * m_tot * hp * D * H
                + 4 * m_tot * D * d_ff
                + 2 * Bp * D * D)
    transcendentals = int(Bp * H * S_pad * S_pad)
    bytes_accessed = int(4 * (patches_padded.size + Bp * D
                              + sum(FP[k].size for k in
                                    ('vpack', 'emb_w', 'wqkv_p', 'wo_p',
                                     'w1', 'w2', 'head_w'))))

    out = pl.pallas_call(
        kern,
        out_shape=jax.ShapeDtypeStruct((Bp, 1, D), jnp.float32),
        grid=(Bp // tb,),
        in_specs=in_specs,
        out_specs=pl.BlockSpec((tb, 1, D), lambda i: (i, 0, 0)),
        compiler_params=pltpu.CompilerParams(
            dimension_semantics=("parallel",),
            vmem_limit_bytes=32 * 1024 * 1024),
        cost_estimate=pl.CostEstimate(flops=flops,
                                      transcendentals=transcendentals,
                                      bytes_accessed=bytes_accessed),
    )(*args)
    return out.reshape(Bp, D)


# ----------------------------------------------------------------------------
# Host-side glue: im2col, parameter composition / packing, tiling choice
# ----------------------------------------------------------------------------
def im2col(x, kernel_size, stride):
    B, L, Cin = x.shape
    Lout = (L - kernel_size) // stride + 1
    patches = jnp.stack(
        [x[:, k: k + (Lout - 1) * stride + 1: stride, :] for k in range(kernel_size)],
        axis=-1)                                       # [B, Lout, Cin, K]
    return patches.reshape(B, Lout, Cin * kernel_size), Lout


def _choose_batch_tile(B, s_pad, target_m=128):
    tb = max(1, target_m // s_pad)                     # aim for M = tb*s_pad ~ 128
    if B < 2 * tb:                                     # keep >= 2 grid steps (v7x 2 TCs)
        tb = max(1, (B + 1) // 2)
    return tb


def fuse_params(P, num_heads, s_pad, hp=HP):
    """Compose conv∘input_fc, build lane-padded per-head QKV/out-proj weights,
    and pack every small vector parameter into one buffer."""
    lyr = P['layers'][-1]            # only the last layer contributes (Encoder quirk)
    D = P['fc_w'].shape[0]
    dh = D // num_heads
    scale = 1.0 / math.sqrt(dh)

    emb_w = P['conv_w'] @ P['fc_w']
    emb_b = P['conv_b'] @ P['fc_w'] + P['fc_b']                        # [1, D]

    wqkv_p = jnp.zeros((num_heads, D, 3 * hp), jnp.float32)
    bqkv_p = jnp.zeros((num_heads, 3 * hp), jnp.float32)
    wo_p = jnp.zeros((num_heads, hp, D), jnp.float32)
    for h in range(num_heads):
        sl = slice(h * dh, (h + 1) * dh)
        wqkv_p = wqkv_p.at[h, :, 0:dh].set(lyr['wq'][:, sl] * scale)
        wqkv_p = wqkv_p.at[h, :, hp:hp + dh].set(lyr['wk'][:, sl])
        wqkv_p = wqkv_p.at[h, :, 2 * hp:2 * hp + dh].set(lyr['wv'][:, sl])
        bqkv_p = bqkv_p.at[h, 0:dh].set(lyr['bq'][0, sl] * scale)
        bqkv_p = bqkv_p.at[h, hp:hp + dh].set(lyr['bk'][0, sl])
        bqkv_p = bqkv_p.at[h, 2 * hp:2 * hp + dh].set(lyr['bv'][0, sl])
        wo_p = wo_p.at[h, 0:dh, :].set(lyr['wo'][sl, :])

    off = _vpack_layout(s_pad, num_heads)
    rows_total = ((off['rows'] + 7) // 8) * 8
    vp = jnp.zeros((rows_total, 3 * hp), jnp.float32)
    vp = vp.at[off['pos']:off['pos'] + s_pad, 0:D].set(P['pos'][:s_pad])
    vp = vp.at[off['bqkv']:off['bqkv'] + num_heads, :].set(bqkv_p)
    small = dict(emb_b=emb_b, g1=lyr['g1'], be1=lyr['be1'], bo=lyr['bo'],
                 g2=lyr['g2'], be2=lyr['be2'], bf1=lyr['bf1'], bf2=lyr['bf2'],
                 head_g=P['head_g'], head_b=P['head_b'], head_bw=P['head_bw'])
    for name, vec in small.items():
        w = vec.shape[-1]
        vp = vp.at[off[name], 0:w].set(vec.reshape(w))

    return dict(vpack=vp, emb_w=emb_w, wqkv_p=wqkv_p, wo_p=wo_p,
                w1=lyr['w1'], w2=lyr['w2'], head_w=P['head_w'])


def ctts_forward(x, P, *, kernel_size, stride, num_heads):
    B = x.shape[0]
    patches, l_out = im2col(x, kernel_size, stride)
    s_pad = ((l_out + 7) // 8) * 8                     # sublane-friendly sequence pad
    tb = _choose_batch_tile(B, s_pad)
    b_pad = ((B + tb - 1) // tb) * tb
    patches = jnp.pad(patches, ((0, b_pad - B), (0, s_pad - l_out), (0, 0)))
    FP = fuse_params(P, num_heads, s_pad)
    out = ctts_pallas(patches, FP, tb=tb, s_real=l_out)
    return out[:B]


# ----------------------------------------------------------------------------
# Deterministic parameter init (PyTorch Linear/Conv1d-style uniform bounds)
# ----------------------------------------------------------------------------
def init_params(key, input_dim, embed_dim, kernel_size, num_layers, num_heads,
                d_ff, max_len=128):
    D = embed_dim
    kit = iter(jax.random.split(key, 8 + 12 * num_layers))

    def lin(fan_in, fan_out):
        bound = 1.0 / math.sqrt(fan_in)
        w = jax.random.uniform(next(kit), (fan_in, fan_out), jnp.float32, -bound, bound)
        b = jax.random.uniform(next(kit), (1, fan_out), jnp.float32, -bound, bound)
        return w, b

    conv_w, conv_b = lin(input_dim * kernel_size, D)   # flattened [Cin*K, E]
    fc_w, fc_b = lin(D, D)

    pos = jnp.arange(max_len, dtype=jnp.float32).reshape(-1, 1)
    w_vec = 10000.0 ** (-2.0 * jnp.arange(D // 2, dtype=jnp.float32) / D)
    pe = jnp.zeros((max_len, D), jnp.float32)
    pe = pe.at[:, 0::2].set(jnp.cos(pos * w_vec))
    pe = pe.at[:, 1::2].set(jnp.sin(pos * w_vec))

    layers = []
    for _ in range(num_layers):
        wq, bq = lin(D, D)
        wk, bk = lin(D, D)
        wv, bv = lin(D, D)
        wo, bo = lin(D, D)
        w1, bf1 = lin(D, d_ff)
        w2, bf2 = lin(d_ff, D)
        layers.append(dict(
            g1=jnp.ones((1, D), jnp.float32), be1=jnp.zeros((1, D), jnp.float32),
            g2=jnp.ones((1, D), jnp.float32), be2=jnp.zeros((1, D), jnp.float32),
            wq=wq, bq=bq, wk=wk, bk=bk, wv=wv, bv=bv, wo=wo, bo=bo,
            w1=w1, bf1=bf1, w2=w2, bf2=bf2))

    head_w, head_bw = lin(D, D)
    return dict(conv_w=conv_w, conv_b=conv_b, fc_w=fc_w, fc_b=fc_b, pos=pe,
                layers=layers,
                head_g=jnp.ones((1, D), jnp.float32),
                head_b=jnp.zeros((1, D), jnp.float32),
                head_w=head_w, head_bw=head_bw)


# ----------------------------------------------------------------------------
# Pure-JAX reference (mirrors the PyTorch forward, incl. the layer-loop quirk)
# ----------------------------------------------------------------------------
def ref_forward(x, P, kernel_size, stride, num_heads):
    B, L, Cin = x.shape
    patches, Lout = im2col(x, kernel_size, stride)
    tok = patches @ P['conv_w'] + P['conv_b']
    emb = tok @ P['fc_w'] + P['fc_b'] + P['pos'][:Lout][None]
    H = num_heads
    D = emb.shape[-1]
    dh = D // H

    def ln(z, g, b):
        mu = z.mean(-1, keepdims=True)
        var = ((z - mu) ** 2).mean(-1, keepdims=True)
        return (z - mu) / jnp.sqrt(var + EPS) * g + b

    hidden = emb
    for lp in P['layers']:
        xn = ln(emb, lp['g1'], lp['be1'])
        q = xn @ lp['wq'] + lp['bq']
        k = xn @ lp['wk'] + lp['bk']
        v = xn @ lp['wv'] + lp['bv']

        def split(t):
            return t.reshape(B, Lout, H, dh).transpose(0, 2, 1, 3)

        qh, kh, vh = split(q), split(k), split(v)
        s = (qh @ kh.transpose(0, 1, 3, 2)) / math.sqrt(dh)
        w = jax.nn.softmax(s, axis=-1)
        av = (w @ vh).transpose(0, 2, 1, 3).reshape(B, Lout, D)
        att = av @ lp['wo'] + lp['bo']
        x1 = att + emb
        xn2 = ln(x1, lp['g2'], lp['be2'])
        ff = jax.nn.relu(xn2 @ lp['w1'] + lp['bf1']) @ lp['w2'] + lp['bf2']
        hidden = ff + x1

    pooled = hidden.mean(axis=1)
    normed = ln(pooled, P['head_g'], P['head_b'])
    return jax.nn.relu(normed @ P['head_w'] + P['head_bw'])


if __name__ == "__main__":
    B, L = 16, 16
    input_dim, embed_dim = 4, 16
    kernel_size, stride = 4, 1
    num_layers, num_heads, d_ff = 3, 4, 64

    key = jax.random.PRNGKey(0)
    kp, kx = jax.random.split(key)
    P = init_params(kp, input_dim, embed_dim, kernel_size, num_layers, num_heads,
                    d_ff, max_len=128)
    x = jax.random.normal(kx, (B, L, input_dim), jnp.float32)

    fwd = jax.jit(functools.partial(ctts_forward, kernel_size=kernel_size,
                                    stride=stride, num_heads=num_heads))
    out = jax.block_until_ready(fwd(x, P))

    ref = ref_forward(x, P, kernel_size, stride, num_heads)
    np.testing.assert_allclose(np.asarray(out), np.asarray(ref),
                               rtol=1e-3, atol=1e-4)
    print("KERNEL_OK")
</pallas_src>

<mosaic_0001>
module attributes {stable_mosaic.version = 11 : i64} {
  func.func @ctts_kernel(%arg0: i32, %arg1: memref<8x16x16xf32, #tpu.memory_space<vmem>>, %arg2: memref<32x384xf32, #tpu.memory_space<vmem>>, %arg3: memref<16x16xf32, #tpu.memory_space<vmem>>, %arg4: memref<4x16x384xf32, #tpu.memory_space<vmem>>, %arg5: memref<4x128x16xf32, #tpu.memory_space<vmem>>, %arg6: memref<16x64xf32, #tpu.memory_space<vmem>>, %arg7: memref<64x16xf32, #tpu.memory_space<vmem>>, %arg8: memref<16x16xf32, #tpu.memory_space<vmem>>, %arg9: memref<8x1x16xf32, #tpu.memory_space<vmem>>) attributes {dimension_semantics = [#tpu.dimension_semantics<parallel>], iteration_bounds = array<i64: 2>, scalar_prefetch = 0 : i64, scratch_operands = 0 : i64, tpu.core_type = #tpu.core_type<tc>, window_params = [{transform_indices = @transform_0, window_bounds = array<i64: 8, 16, 16>}, {pipeline_mode = #tpu.pipeline_mode<synchronous>, transform_indices = @transform_1, window_bounds = array<i64: 32, 384>}, {pipeline_mode = #tpu.pipeline_mode<synchronous>, transform_indices = @transform_2, window_bounds = array<i64: 16, 16>}, {pipeline_mode = #tpu.pipeline_mode<synchronous>, transform_indices = @transform_3, window_bounds = array<i64: 4, 16, 384>}, {pipeline_mode = #tpu.pipeline_mode<synchronous>, transform_indices = @transform_4, window_bounds = array<i64: 4, 128, 16>}, {pipeline_mode = #tpu.pipeline_mode<synchronous>, transform_indices = @transform_5, window_bounds = array<i64: 16, 64>}, {pipeline_mode = #tpu.pipeline_mode<synchronous>, transform_indices = @transform_6, window_bounds = array<i64: 64, 16>}, {pipeline_mode = #tpu.pipeline_mode<synchronous>, transform_indices = @transform_7, window_bounds = array<i64: 16, 16>}, {transform_indices = @transform_8, window_bounds = array<i64: 8, 1, 16>}]} {
    %c0 = arith.constant 0 : index
    %c0_0 = arith.constant 0 : index
    %c0_1 = arith.constant 0 : index
    %0 = vector.load %arg1[%c0, %c0_0, %c0_1] : memref<8x16x16xf32, #tpu.memory_space<vmem>>, vector<8x16x16xf32>
    %1 = vector.shape_cast %0 : vector<8x16x16xf32> to vector<128x16xf32>
    %c0_2 = arith.constant 0 : index
    %c0_3 = arith.constant 0 : index
    %2 = vector.load %arg3[%c0_2, %c0_3] : memref<16x16xf32, #tpu.memory_space<vmem>>, vector<16x16xf32>
    %cst = arith.constant dense<0.000000e+00> : vector<128x16xf32>
    %3 = tpu.matmul %1, %2, %cst {dimension_numbers = #tpu.dot_dimension_numbers<[1], [0], [0], [1], [0, 0, 1, 1], [], []>} : vector<128x16xf32>, vector<16x16xf32>, vector<128x16xf32> -> vector<128x16xf32>
    %c20 = arith.constant 20 : index
    %c0_4 = arith.constant 0 : index
    %4 = vector.load %arg2[%c20, %c0_4] : memref<32x384xf32, #tpu.memory_space<vmem>>, vector<1x16xf32>
    %5 = vector.broadcast %4 : vector<1x16xf32> to vector<128x16xf32>
    %6 = arith.addf %3, %5 : vector<128x16xf32>
    %c0_5 = arith.constant 0 : index
    %c0_6 = arith.constant 0 : index
    %7 = vector.load %arg2[%c0_5, %c0_6] : memref<32x384xf32, #tpu.memory_space<vmem>>, vector<16x16xf32>
    %8 = vector.shape_cast %6 : vector<128x16xf32> to vector<8x16x16xf32>
    %9 = vector.shape_cast %7 : vector<16x16xf32> to vector<1x16x16xf32>
    %10 = vector.broadcast %9 : vector<1x16x16xf32> to vector<8x16x16xf32>
    %11 = arith.addf %8, %10 : vector<8x16x16xf32>
    %12 = vector.shape_cast %11 : vector<8x16x16xf32> to vector<128x16xf32>
    %c21 = arith.constant 21 : index
    %c0_7 = arith.constant 0 : index
    %13 = vector.load %arg2[%c21, %c0_7] : memref<32x384xf32, #tpu.memory_space<vmem>>, vector<1x16xf32>
    %c22 = arith.constant 22 : index
    %c0_8 = arith.constant 0 : index
    %14 = vector.load %arg2[%c22, %c0_8] : memref<32x384xf32, #tpu.memory_space<vmem>>, vector<1x16xf32>
    %cst_9 = arith.constant dense<0.000000e+00> : vector<128xf32>
    %15 = vector.multi_reduction <add>, %12, %cst_9 [1] : vector<128x16xf32> to vector<128xf32>
    %16 = vector.shape_cast %15 : vector<128xf32> to vector<128x1xf32>
    %cst_10 = arith.constant 1.600000e+01 : f32
    %17 = vector.broadcast %cst_10 : f32 to vector<128x1xf32>
    %18 = arith.divf %16, %17 : vector<128x1xf32>
    %19 = vector.broadcast %18 : vector<128x1xf32> to vector<128x16xf32>
    %20 = arith.subf %12, %19 : vector<128x16xf32>
    %21 = arith.mulf %20, %20 : vector<128x16xf32>
    %cst_11 = arith.constant dense<0.000000e+00> : vector<128xf32>
    %22 = vector.multi_reduction <add>, %21, %cst_11 [1] : vector<128x16xf32> to vector<128xf32>
    %23 = vector.shape_cast %22 : vector<128xf32> to vector<128x1xf32>
    %cst_12 = arith.constant 1.600000e+01 : f32
    %24 = vector.broadcast %cst_12 : f32 to vector<128x1xf32>
    %25 = arith.divf %23, %24 : vector<128x1xf32>
    %26 = vector.broadcast %18 : vector<128x1xf32> to vector<128x16xf32>
    %27 = arith.subf %12, %26 : vector<128x16xf32>
    %cst_13 = arith.constant 9.99999974E-6 : f32
    %28 = vector.broadcast %cst_13 : f32 to vector<128x1xf32>
    %29 = arith.addf %25, %28 : vector<128x1xf32>
    %30 = math.rsqrt %29 : vector<128x1xf32>
    %31 = vector.broadcast %30 : vector<128x1xf32> to vector<128x16xf32>
    %32 = arith.mulf %27, %31 : vector<128x16xf32>
    %33 = vector.broadcast %13 : vector<1x16xf32> to vector<128x16xf32>
    %34 = arith.mulf %32, %33 : vector<128x16xf32>
    %35 = vector.broadcast %14 : vector<1x16xf32> to vector<128x16xf32>
    %36 = arith.addf %34, %35 : vector<128x16xf32>
    %37 = tpu.iota {dimensions = array<i32: 2>} : vector<1x16x16xi32>
    %c13_i32 = arith.constant 13 : i32
    %38 = vector.broadcast %c13_i32 : i32 to vector<1x16x16xi32>
    %39 = arith.cmpi slt, %37, %38 : vector<1x16x16xi32>
    %c23 = arith.constant 23 : index
    %c0_14 = arith.constant 0 : index
    %40 = vector.load %arg2[%c23, %c0_14] : memref<32x384xf32, #tpu.memory_space<vmem>>, vector<1x16xf32>
    %c0_15 = arith.constant 0 : index
    %c0_16 = arith.constant 0 : index
    %c0_17 = arith.constant 0 : index
    %41 = vector.load %arg4[%c0_15, %c0_16, %c0_17] : memref<4x16x384xf32, #tpu.memory_space<vmem>>, vector<1x16x384xf32>
    %42 = vector.shape_cast %41 : vector<1x16x384xf32> to vector<16x384xf32>
    %cst_18 = arith.constant dense<0.000000e+00> : vector<128x384xf32>
    %43 = tpu.matmul %36, %42, %cst_18 {dimension_numbers = #tpu.dot_dimension_numbers<[1], [0], [0], [1], [0, 0, 1, 1], [], []>} : vector<128x16xf32>, vector<16x384xf32>, vector<128x384xf32> -> vector<128x384xf32>
    %c16 = arith.constant 16 : index
    %c0_19 = arith.constant 0 : index
    %44 = vector.load %arg2[%c16, %c0_19] : memref<32x384xf32, #tpu.memory_space<vmem>>, vector<1x384xf32>
    %45 = vector.broadcast %44 : vector<1x384xf32> to vector<128x384xf32>
    %46 = arith.addf %43, %45 : vector<128x384xf32>
    %47 = vector.extract_strided_slice %46 {offsets = [0, 0], sizes = [128, 128], strides = [1, 1]} : vector<128x384xf32> to vector<128x128xf32>
    %48 = vector.shape_cast %47 : vector<128x128xf32> to vector<8x16x128xf32>
    %49 = vector.extract_strided_slice %46 {offsets = [0, 128], sizes = [128, 128], strides = [1, 1]} : vector<128x384xf32> to vector<128x128xf32>
    %50 = vector.shape_cast %49 : vector<128x128xf32> to vector<8x16x128xf32>
    %51 = vector.extract_strided_slice %46 {offsets = [0, 256], sizes = [128, 128], strides = [1, 1]} : vector<128x384xf32> to vector<128x128xf32>
    %52 = vector.shape_cast %51 : vector<128x128xf32> to vector<8x16x128xf32>
    "tpu.trace_start"() <{level = 10 : i32, message = "bsd,btd->bst"}> : () -> ()
    %cst_20 = arith.constant dense<0.000000e+00> : vector<8x16x16xf32>
    %53 = tpu.matmul %48, %50, %cst_20 {dimension_numbers = #tpu.dot_dimension_numbers<[2], [2], [1], [1], [0, 0, 0, 1, 1, 1], [0], [0]>} : vector<8x16x128xf32>, vector<8x16x128xf32>, vector<8x16x16xf32> -> vector<8x16x16xf32>
    %cst_21 = arith.constant -1.000000e+30 : f32
    "tpu.trace_stop"() : () -> ()
    %54 = vector.shape_cast %39 : vector<1x16x16xi1> to vector<1x16x16xi1>
    %55 = vector.broadcast %54 : vector<1x16x16xi1> to vector<8x16x16xi1>
    %56 = vector.broadcast %cst_21 : f32 to vector<8x16x16xf32>
    %57 = arith.select %55, %53, %56 : vector<8x16x16xi1>, vector<8x16x16xf32>
    %cst_22 = arith.constant dense<0xFF800000> : vector<8x16xf32>
    %58 = vector.multi_reduction <maximumf>, %57, %cst_22 [2] : vector<8x16x16xf32> to vector<8x16xf32>
    %59 = vector.shape_cast %58 : vector<8x16xf32> to vector<8x16x1xf32>
    %60 = vector.broadcast %59 : vector<8x16x1xf32> to vector<8x16x16xf32>
    %61 = arith.subf %57, %60 : vector<8x16x16xf32>
    %62 = math.exp %61 : vector<8x16x16xf32>
    %cst_23 = arith.constant 0.000000e+00 : f32
    %63 = vector.shape_cast %39 : vector<1x16x16xi1> to vector<1x16x16xi1>
    %64 = vector.broadcast %63 : vector<1x16x16xi1> to vector<8x16x16xi1>
    %65 = vector.broadcast %cst_23 : f32 to vector<8x16x16xf32>
    %66 = arith.select %64, %62, %65 : vector<8x16x16xi1>, vector<8x16x16xf32>
    %cst_24 = arith.constant dense<0.000000e+00> : vector<8x16xf32>
    %67 = vector.multi_reduction <add>, %66, %cst_24 [2] : vector<8x16x16xf32> to vector<8x16xf32>
    %68 = vector.shape_cast %67 : vector<8x16xf32> to vector<8x16x1xf32>
    %69 = tpu.reciprocal %68 {approx = true} : vector<8x16x1xf32> -> vector<8x16x1xf32>
    %70 = arith.mulf %68, %69 : vector<8x16x1xf32>
    %cst_25 = arith.constant 2.000000e+00 : f32
    %71 = vector.broadcast %cst_25 : f32 to vector<8x16x1xf32>
    %72 = arith.subf %71, %70 : vector<8x16x1xf32>
    %73 = arith.mulf %69, %72 : vector<8x16x1xf32>
    %74 = vector.broadcast %73 : vector<8x16x1xf32> to vector<8x16x16xf32>
    %75 = arith.mulf %66, %74 : vector<8x16x16xf32>
    "tpu.trace_start"() <{level = 10 : i32, message = "bst,btd->bsd"}> : () -> ()
    %cst_26 = arith.constant dense<0.000000e+00> : vector<8x16x128xf32>
    %76 = tpu.matmul %75, %52, %cst_26 {dimension_numbers = #tpu.dot_dimension_numbers<[2], [1], [1], [2], [0, 0, 0, 1, 1, 2], [0], [0]>} : vector<8x16x16xf32>, vector<8x16x128xf32>, vector<8x16x128xf32> -> vector<8x16x128xf32>
    "tpu.trace_stop"() : () -> ()
    %77 = vector.shape_cast %76 : vector<8x16x128xf32> to vector<128x128xf32>
    %c0_27 = arith.constant 0 : index
    %c0_28 = arith.constant 0 : index
    %c0_29 = arith.constant 0 : index
    %78 = vector.load %arg5[%c0_27, %c0_28, %c0_29] : memref<4x128x16xf32, #tpu.memory_space<vmem>>, vector<1x128x16xf32>
    %79 = vector.shape_cast %78 : vector<1x128x16xf32> to vector<128x16xf32>
    %cst_30 = arith.constant dense<0.000000e+00> : vector<128x16xf32>
    %80 = tpu.matmul %77, %79, %cst_30 {dimension_numbers = #tpu.dot_dimension_numbers<[1], [0], [0], [1], [0, 0, 1, 1], [], []>} : vector<128x128xf32>, vector<128x16xf32>, vector<128x16xf32> -> vector<128x16xf32>
    %81 = vector.broadcast %40 : vector<1x16xf32> to vector<128x16xf32>
    %82 = arith.addf %81, %80 : vector<128x16xf32>
    %c1 = arith.constant 1 : index
    %c0_31 = arith.constant 0 : index
    %c0_32 = arith.constant 0 : index
    %83 = vector.load %arg4[%c1, %c0_31, %c0_32] : memref<4x16x384xf32, #tpu.memory_space<vmem>>, vector<1x16x384xf32>
    %84 = vector.shape_cast %83 : vector<1x16x384xf32> to vector<16x384xf32>
    %cst_33 = arith.constant dense<0.000000e+00> : vector<128x384xf32>
    %85 = tpu.matmul %36, %84, %cst_33 {dimension_numbers = #tpu.dot_dimension_numbers<[1], [0], [0], [1], [0, 0, 1, 1], [], []>} : vector<128x16xf32>, vector<16x384xf32>, vector<128x384xf32> -> vector<128x384xf32>
    %c17 = arith.constant 17 : index
    %c0_34 = arith.constant 0 : index
    %86 = vector.load %arg2[%c17, %c0_34] : memref<32x384xf32, #tpu.memory_space<vmem>>, vector<1x384xf32>
    %87 = vector.broadcast %86 : vector<1x384xf32> to vector<128x384xf32>
    %88 = arith.addf %85, %87 : vector<128x384xf32>
    %89 = vector.extract_strided_slice %88 {offsets = [0, 0], sizes = [128, 128], strides = [1, 1]} : vector<128x384xf32> to vector<128x128xf32>
    %90 = vector.shape_cast %89 : vector<128x128xf32> to vector<8x16x128xf32>
    %91 = vector.extract_strided_slice %88 {offsets = [0, 128], sizes = [128, 128], strides = [1, 1]} : vector<128x384xf32> to vector<128x128xf32>
    %92 = vector.shape_cast %91 : vector<128x128xf32> to vector<8x16x128xf32>
    %93 = vector.extract_strided_slice %88 {offsets = [0, 256], sizes = [128, 128], strides = [1, 1]} : vector<128x384xf32> to vector<128x128xf32>
    %94 = vector.shape_cast %93 : vector<128x128xf32> to vector<8x16x128xf32>
    "tpu.trace_start"() <{level = 10 : i32, message = "bsd,btd->bst"}> : () -> ()
    %cst_35 = arith.constant dense<0.000000e+00> : vector<8x16x16xf32>
    %95 = tpu.matmul %90, %92, %cst_35 {dimension_numbers = #tpu.dot_dimension_numbers<[2], [2], [1], [1], [0, 0, 0, 1, 1, 1], [0], [0]>} : vector<8x16x128xf32>, vector<8x16x128xf32>, vector<8x16x16xf32> -> vector<8x16x16xf32>
    %cst_36 = arith.constant -1.000000e+30 : f32
    "tpu.trace_stop"() : () -> ()
    %96 = vector.shape_cast %39 : vector<1x16x16xi1> to vector<1x16x16xi1>
    %97 = vector.broadcast %96 : vector<1x16x16xi1> to vector<8x16x16xi1>
    %98 = vector.broadcast %cst_36 : f32 to vector<8x16x16xf32>
    %99 = arith.select %97, %95, %98 : vector<8x16x16xi1>, vector<8x16x16xf32>
    %cst_37 = arith.constant dense<0xFF800000> : vector<8x16xf32>
    %100 = vector.multi_reduction <maximumf>, %99, %cst_37 [2] : vector<8x16x16xf32> to vector<8x16xf32>
    %101 = vector.shape_cast %100 : vector<8x16xf32> to vector<8x16x1xf32>
    %102 = vector.broadcast %101 : vector<8x16x1xf32> to vector<8x16x16xf32>
    %103 = arith.subf %99, %102 : vector<8x16x16xf32>
    %104 = math.exp %103 : vector<8x16x16xf32>
    %cst_38 = arith.constant 0.000000e+00 : f32
    %105 = vector.shape_cast %39 : vector<1x16x16xi1> to vector<1x16x16xi1>
    %106 = vector.broadcast %105 : vector<1x16x16xi1> to vector<8x16x16xi1>
    %107 = vector.broadcast %cst_38 : f32 to vector<8x16x16xf32>
    %108 = arith.select %106, %104, %107 : vector<8x16x16xi1>, vector<8x16x16xf32>
    %cst_39 = arith.constant dense<0.000000e+00> : vector<8x16xf32>
    %109 = vector.multi_reduction <add>, %108, %cst_39 [2] : vector<8x16x16xf32> to vector<8x16xf32>
    %110 = vector.shape_cast %109 : vector<8x16xf32> to vector<8x16x1xf32>
    %111 = tpu.reciprocal %110 {approx = true} : vector<8x16x1xf32> -> vector<8x16x1xf32>
    %112 = arith.mulf %110, %111 : vector<8x16x1xf32>
    %cst_40 = arith.constant 2.000000e+00 : f32
    %113 = vector.broadcast %cst_40 : f32 to vector<8x16x1xf32>
    %114 = arith.subf %113, %112 : vector<8x16x1xf32>
    %115 = arith.mulf %111, %114 : vector<8x16x1xf32>
    %116 = vector.broadcast %115 : vector<8x16x1xf32> to vector<8x16x16xf32>
    %117 = arith.mulf %108, %116 : vector<8x16x16xf32>
    "tpu.trace_start"() <{level = 10 : i32, message = "bst,btd->bsd"}> : () -> ()
    %cst_41 = arith.constant dense<0.000000e+00> : vector<8x16x128xf32>
    %118 = tpu.matmul %117, %94, %cst_41 {dimension_numbers = #tpu.dot_dimension_numbers<[2], [1], [1], [2], [0, 0, 0, 1, 1, 2], [0], [0]>} : vector<8x16x16xf32>, vector<8x16x128xf32>, vector<8x16x128xf32> -> vector<8x16x128xf32>
    "tpu.trace_stop"() : () -> ()
    %119 = vector.shape_cast %118 : vector<8x16x128xf32> to vector<128x128xf32>
    %c1_42 = arith.constant 1 : index
    %c0_43 = arith.constant 0 : index
    %c0_44 = arith.constant 0 : index
    %120 = vector.load %arg5[%c1_42, %c0_43, %c0_44] : memref<4x128x16xf32, #tpu.memory_space<vmem>>, vector<1x128x16xf32>
    %121 = vector.shape_cast %120 : vector<1x128x16xf32> to vector<128x16xf32>
    %cst_45 = arith.constant dense<0.000000e+00> : vector<128x16xf32>
    %122 = tpu.matmul %119, %121, %cst_45 {dimension_numbers = #tpu.dot_dimension_numbers<[1], [0], [0], [1], [0, 0, 1, 1], [], []>} : vector<128x128xf32>, vector<128x16xf32>, vector<128x16xf32> -> vector<128x16xf32>
    %123 = arith.addf %82, %122 : vector<128x16xf32>
    %c2 = arith.constant 2 : index
    %c0_46 = arith.constant 0 : index
    %c0_47 = arith.constant 0 : index
    %124 = vector.load %arg4[%c2, %c0_46, %c0_47] : memref<4x16x384xf32, #tpu.memory_space<vmem>>, vector<1x16x384xf32>
    %125 = vector.shape_cast %124 : vector<1x16x384xf32> to vector<16x384xf32>
    %cst_48 = arith.constant dense<0.000000e+00> : vector<128x384xf32>
    %126 = tpu.matmul %36, %125, %cst_48 {dimension_numbers = #tpu.dot_dimension_numbers<[1], [0], [0], [1], [0, 0, 1, 1], [], []>} : vector<128x16xf32>, vector<16x384xf32>, vector<128x384xf32> -> vector<128x384xf32>
    %c18 = arith.constant 18 : index
    %c0_49 = arith.constant 0 : index
    %127 = vector.load %arg2[%c18, %c0_49] : memref<32x384xf32, #tpu.memory_space<vmem>>, vector<1x384xf32>
    %128 = vector.broadcast %127 : vector<1x384xf32> to vector<128x384xf32>
    %129 = arith.addf %126, %128 : vector<128x384xf32>
    %130 = vector.extract_strided_slice %129 {offsets = [0, 0], sizes = [128, 128], strides = [1, 1]} : vector<128x384xf32> to vector<128x128xf32>
    %131 = vector.shape_cast %130 : vector<128x128xf32> to vector<8x16x128xf32>
    %132 = vector.extract_strided_slice %129 {offsets = [0, 128], sizes = [128, 128], strides = [1, 1]} : vector<128x384xf32> to vector<128x128xf32>
    %133 = vector.shape_cast %132 : vector<128x128xf32> to vector<8x16x128xf32>
    %134 = vector.extract_strided_slice %129 {offsets = [0, 256], sizes = [128, 128], strides = [1, 1]} : vector<128x384xf32> to vector<128x128xf32>
    %135 = vector.shape_cast %134 : vector<128x128xf32> to vector<8x16x128xf32>
    "tpu.trace_start"() <{level = 10 : i32, message = "bsd,btd->bst"}> : () -> ()
    %cst_50 = arith.constant dense<0.000000e+00> : vector<8x16x16xf32>
    %136 = tpu.matmul %131, %133, %cst_50 {dimension_numbers = #tpu.dot_dimension_numbers<[2], [2], [1], [1], [0, 0, 0, 1, 1, 1], [0], [0]>} : vector<8x16x128xf32>, vector<8x16x128xf32>, vector<8x16x16xf32> -> vector<8x16x16xf32>
    %cst_51 = arith.constant -1.000000e+30 : f32
    "tpu.trace_stop"() : () -> ()
    %137 = vector.shape_cast %39 : vector<1x16x16xi1> to vector<1x16x16xi1>
    %138 = vector.broadcast %137 : vector<1x16x16xi1> to vector<8x16x16xi1>
    %139 = vector.broadcast %cst_51 : f32 to vector<8x16x16xf32>
    %140 = arith.select %138, %136, %139 : vector<8x16x16xi1>, vector<8x16x16xf32>
    %cst_52 = arith.constant dense<0xFF800000> : vector<8x16xf32>
    %141 = vector.multi_reduction <maximumf>, %140, %cst_52 [2] : vector<8x16x16xf32> to vector<8x16xf32>
    %142 = vector.shape_cast %141 : vector<8x16xf32> to vector<8x16x1xf32>
    %143 = vector.broadcast %142 : vector<8x16x1xf32> to vector<8x16x16xf32>
    %144 = arith.subf %140, %143 : vector<8x16x16xf32>
    %145 = math.exp %144 : vector<8x16x16xf32>
    %cst_53 = arith.constant 0.000000e+00 : f32
    %146 = vector.shape_cast %39 : vector<1x16x16xi1> to vector<1x16x16xi1>
    %147 = vector.broadcast %146 : vector<1x16x16xi1> to vector<8x16x16xi1>
    %148 = vector.broadcast %cst_53 : f32 to vector<8x16x16xf32>
    %149 = arith.select %147, %145, %148 : vector<8x16x16xi1>, vector<8x16x16xf32>
    %cst_54 = arith.constant dense<0.000000e+00> : vector<8x16xf32>
    %150 = vector.multi_reduction <add>, %149, %cst_54 [2] : vector<8x16x16xf32> to vector<8x16xf32>
    %151 = vector.shape_cast %150 : vector<8x16xf32> to vector<8x16x1xf32>
    %152 = tpu.reciprocal %151 {approx = true} : vector<8x16x1xf32> -> vector<8x16x1xf32>
    %153 = arith.mulf %151, %152 : vector<8x16x1xf32>
    %cst_55 = arith.constant 2.000000e+00 : f32
    %154 = vector.broadcast %cst_55 : f32 to vector<8x16x1xf32>
    %155 = arith.subf %154, %153 : vector<8x16x1xf32>
    %156 = arith.mulf %152, %155 : vector<8x16x1xf32>
    %157 = vector.broadcast %156 : vector<8x16x1xf32> to vector<8x16x16xf32>
    %158 = arith.mulf %149, %157 : vector<8x16x16xf32>
    "tpu.trace_start"() <{level = 10 : i32, message = "bst,btd->bsd"}> : () -> ()
    %cst_56 = arith.constant dense<0.000000e+00> : vector<8x16x128xf32>
    %159 = tpu.matmul %158, %135, %cst_56 {dimension_numbers = #tpu.dot_dimension_numbers<[2], [1], [1], [2], [0, 0, 0, 1, 1, 2], [0], [0]>} : vector<8x16x16xf32>, vector<8x16x128xf32>, vector<8x16x128xf32> -> vector<8x16x128xf32>
    "tpu.trace_stop"() : () -> ()
    %160 = vector.shape_cast %159 : vector<8x16x128xf32> to vector<128x128xf32>
    %c2_57 = arith.constant 2 : index
    %c0_58 = arith.constant 0 : index
    %c0_59 = arith.constant 0 : index
    %161 = vector.load %arg5[%c2_57, %c0_58, %c0_59] : memref<4x128x16xf32, #tpu.memory_space<vmem>>, vector<1x128x16xf32>
    %162 = vector.shape_cast %161 : vector<1x128x16xf32> to vector<128x16xf32>
    %cst_60 = arith.constant dense<0.000000e+00> : vector<128x16xf32>
    %163 = tpu.matmul %160, %162, %cst_60 {dimension_numbers = #tpu.dot_dimension_numbers<[1], [0], [0], [1], [0, 0, 1, 1], [], []>} : vector<128x128xf32>, vector<128x16xf32>, vector<128x16xf32> -> vector<128x16xf32>
    %164 = arith.addf %123, %163 : vector<128x16xf32>
    %c3 = arith.constant 3 : index
    %c0_61 = arith.constant 0 : index
    %c0_62 = arith.constant 0 : index
    %165 = vector.load %arg4[%c3, %c0_61, %c0_62] : memref<4x16x384xf32, #tpu.memory_space<vmem>>, vector<1x16x384xf32>
    %166 = vector.shape_cast %165 : vector<1x16x384xf32> to vector<16x384xf32>
    %cst_63 = arith.constant dense<0.000000e+00> : vector<128x384xf32>
    %167 = tpu.matmul %36, %166, %cst_63 {dimension_numbers = #tpu.dot_dimension_numbers<[1], [0], [0], [1], [0, 0, 1, 1], [], []>} : vector<128x16xf32>, vector<16x384xf32>, vector<128x384xf32> -> vector<128x384xf32>
    %c19 = arith.constant 19 : index
    %c0_64 = arith.constant 0 : index
    %168 = vector.load %arg2[%c19, %c0_64] : memref<32x384xf32, #tpu.memory_space<vmem>>, vector<1x384xf32>
    %169 = vector.broadcast %168 : vector<1x384xf32> to vector<128x384xf32>
    %170 = arith.addf %167, %169 : vector<128x384xf32>
    %171 = vector.extract_strided_slice %170 {offsets = [0, 0], sizes = [128, 128], strides = [1, 1]} : vector<128x384xf32> to vector<128x128xf32>
    %172 = vector.shape_cast %171 : vector<128x128xf32> to vector<8x16x128xf32>
    %173 = vector.extract_strided_slice %170 {offsets = [0, 128], sizes = [128, 128], strides = [1, 1]} : vector<128x384xf32> to vector<128x128xf32>
    %174 = vector.shape_cast %173 : vector<128x128xf32> to vector<8x16x128xf32>
    %175 = vector.extract_strided_slice %170 {offsets = [0, 256], sizes = [128, 128], strides = [1, 1]} : vector<128x384xf32> to vector<128x128xf32>
    %176 = vector.shape_cast %175 : vector<128x128xf32> to vector<8x16x128xf32>
    "tpu.trace_start"() <{level = 10 : i32, message = "bsd,btd->bst"}> : () -> ()
    %cst_65 = arith.constant dense<0.000000e+00> : vector<8x16x16xf32>
    %177 = tpu.matmul %172, %174, %cst_65 {dimension_numbers = #tpu.dot_dimension_numbers<[2], [2], [1], [1], [0, 0, 0, 1, 1, 1], [0], [0]>} : vector<8x16x128xf32>, vector<8x16x128xf32>, vector<8x16x16xf32> -> vector<8x16x16xf32>
    %cst_66 = arith.constant -1.000000e+30 : f32
    "tpu.trace_stop"() : () -> ()
    %178 = vector.shape_cast %39 : vector<1x16x16xi1> to vector<1x16x16xi1>
    %179 = vector.broadcast %178 : vector<1x16x16xi1> to vector<8x16x16xi1>
    %180 = vector.broadcast %cst_66 : f32 to vector<8x16x16xf32>
    %181 = arith.select %179, %177, %180 : vector<8x16x16xi1>, vector<8x16x16xf32>
    %cst_67 = arith.constant dense<0xFF800000> : vector<8x16xf32>
    %182 = vector.multi_reduction <maximumf>, %181, %cst_67 [2] : vector<8x16x16xf32> to vector<8x16xf32>
    %183 = vector.shape_cast %182 : vector<8x16xf32> to vector<8x16x1xf32>
    %184 = vector.broadcast %183 : vector<8x16x1xf32> to vector<8x16x16xf32>
    %185 = arith.subf %181, %184 : vector<8x16x16xf32>
    %186 = math.exp %185 : vector<8x16x16xf32>
    %cst_68 = arith.constant 0.000000e+00 : f32
    %187 = vector.shape_cast %39 : vector<1x16x16xi1> to vector<1x16x16xi1>
    %188 = vector.broadcast %187 : vector<1x16x16xi1> to vector<8x16x16xi1>
    %189 = vector.broadcast %cst_68 : f32 to vector<8x16x16xf32>
    %190 = arith.select %188, %186, %189 : vector<8x16x16xi1>, vector<8x16x16xf32>
    %cst_69 = arith.constant dense<0.000000e+00> : vector<8x16xf32>
    %191 = vector.multi_reduction <add>, %190, %cst_69 [2] : vector<8x16x16xf32> to vector<8x16xf32>
    %192 = vector.shape_cast %191 : vector<8x16xf32> to vector<8x16x1xf32>
    %193 = tpu.reciprocal %192 {approx = true} : vector<8x16x1xf32> -> vector<8x16x1xf32>
    %194 = arith.mulf %192, %193 : vector<8x16x1xf32>
    %cst_70 = arith.constant 2.000000e+00 : f32
    %195 = vector.broadcast %cst_70 : f32 to vector<8x16x1xf32>
    %196 = arith.subf %195, %194 : vector<8x16x1xf32>
    %197 = arith.mulf %193, %196 : vector<8x16x1xf32>
    %198 = vector.broadcast %197 : vector<8x16x1xf32> to vector<8x16x16xf32>
    %199 = arith.mulf %190, %198 : vector<8x16x16xf32>
    "tpu.trace_start"() <{level = 10 : i32, message = "bst,btd->bsd"}> : () -> ()
    %cst_71 = arith.constant dense<0.000000e+00> : vector<8x16x128xf32>
    %200 = tpu.matmul %199, %176, %cst_71 {dimension_numbers = #tpu.dot_dimension_numbers<[2], [1], [1], [2], [0, 0, 0, 1, 1, 2], [0], [0]>} : vector<8x16x16xf32>, vector<8x16x128xf32>, vector<8x16x128xf32> -> vector<8x16x128xf32>
    "tpu.trace_stop"() : () -> ()
    %201 = vector.shape_cast %200 : vector<8x16x128xf32> to vector<128x128xf32>
    %c3_72 = arith.constant 3 : index
    %c0_73 = arith.constant 0 : index
    %c0_74 = arith.constant 0 : index
    %202 = vector.load %arg5[%c3_72, %c0_73, %c0_74] : memref<4x128x16xf32, #tpu.memory_space<vmem>>, vector<1x128x16xf32>
    %203 = vector.shape_cast %202 : vector<1x128x16xf32> to vector<128x16xf32>
    %cst_75 = arith.constant dense<0.000000e+00> : vector<128x16xf32>
    %204 = tpu.matmul %201, %203, %cst_75 {dimension_numbers = #tpu.dot_dimension_numbers<[1], [0], [0], [1], [0, 0, 1, 1], [], []>} : vector<128x128xf32>, vector<128x16xf32>, vector<128x16xf32> -> vector<128x16xf32>
    %205 = arith.addf %164, %204 : vector<128x16xf32>
    %206 = arith.addf %205, %12 : vector<128x16xf32>
    %c24 = arith.constant 24 : index
    %c0_76 = arith.constant 0 : index
    %207 = vector.load %arg2[%c24, %c0_76] : memref<32x384xf32, #tpu.memory_space<vmem>>, vector<1x16xf32>
    %c25 = arith.constant 25 : index
    %c0_77 = arith.constant 0 : index
    %208 = vector.load %arg2[%c25, %c0_77] : memref<32x384xf32, #tpu.memory_space<vmem>>, vector<1x16xf32>
    %cst_78 = arith.constant dense<0.000000e+00> : vector<128xf32>
    %209 = vector.multi_reduction <add>, %206, %cst_78 [1] : vector<128x16xf32> to vector<128xf32>
    %210 = vector.shape_cast %209 : vector<128xf32> to vector<128x1xf32>
    %cst_79 = arith.constant 1.600000e+01 : f32
    %211 = vector.broadcast %cst_79 : f32 to vector<128x1xf32>
    %212 = arith.divf %210, %211 : vector<128x1xf32>
    %213 = vector.broadcast %212 : vector<128x1xf32> to vector<128x16xf32>
    %214 = arith.subf %206, %213 : vector<128x16xf32>
    %215 = arith.mulf %214, %214 : vector<128x16xf32>
    %cst_80 = arith.constant dense<0.000000e+00> : vector<128xf32>
    %216 = vector.multi_reduction <add>, %215, %cst_80 [1] : vector<128x16xf32> to vector<128xf32>
    %217 = vector.shape_cast %216 : vector<128xf32> to vector<128x1xf32>
    %cst_81 = arith.constant 1.600000e+01 : f32
    %218 = vector.broadcast %cst_81 : f32 to vector<128x1xf32>
    %219 = arith.divf %217, %218 : vector<128x1xf32>
    %220 = vector.broadcast %212 : vector<128x1xf32> to vector<128x16xf32>
    %221 = arith.subf %206, %220 : vector<128x16xf32>
    %cst_82 = arith.constant 9.99999974E-6 : f32
    %222 = vector.broadcast %cst_82 : f32 to vector<128x1xf32>
    %223 = arith.addf %219, %222 : vector<128x1xf32>
    %224 = math.rsqrt %223 : vector<128x1xf32>
    %225 = vector.broadcast %224 : vector<128x1xf32> to vector<128x16xf32>
    %226 = arith.mulf %221, %225 : vector<128x16xf32>
    %227 = vector.broadcast %207 : vector<1x16xf32> to vector<128x16xf32>
    %228 = arith.mulf %226, %227 : vector<128x16xf32>
    %229 = vector.broadcast %208 : vector<1x16xf32> to vector<128x16xf32>
    %230 = arith.addf %228, %229 : vector<128x16xf32>
    %c0_83 = arith.constant 0 : index
    %c0_84 = arith.constant 0 : index
    %231 = vector.load %arg6[%c0_83, %c0_84] : memref<16x64xf32, #tpu.memory_space<vmem>>, vector<16x64xf32>
    %cst_85 = arith.constant dense<0.000000e+00> : vector<128x64xf32>
    %232 = tpu.matmul %230, %231, %cst_85 {dimension_numbers = #tpu.dot_dimension_numbers<[1], [0], [0], [1], [0, 0, 1, 1], [], []>} : vector<128x16xf32>, vector<16x64xf32>, vector<128x64xf32> -> vector<128x64xf32>
    %c26 = arith.constant 26 : index
    %c0_86 = arith.constant 0 : index
    %233 = vector.load %arg2[%c26, %c0_86] : memref<32x384xf32, #tpu.memory_space<vmem>>, vector<1x64xf32>
    %234 = vector.broadcast %233 : vector<1x64xf32> to vector<128x64xf32>
    %235 = arith.addf %232, %234 : vector<128x64xf32>
    %cst_87 = arith.constant 0.000000e+00 : f32
    %236 = vector.broadcast %cst_87 : f32 to vector<128x64xf32>
    %237 = arith.maximumf %235, %236 : vector<128x64xf32>
    %c0_88 = arith.constant 0 : index
    %c0_89 = arith.constant 0 : index
    %238 = vector.load %arg7[%c0_88, %c0_89] : memref<64x16xf32, #tpu.memory_space<vmem>>, vector<64x16xf32>
    %cst_90 = arith.constant dense<0.000000e+00> : vector<128x16xf32>
    %239 = tpu.matmul %237, %238, %cst_90 {dimension_numbers = #tpu.dot_dimension_numbers<[1], [0], [0], [1], [0, 0, 1, 1], [], []>} : vector<128x64xf32>, vector<64x16xf32>, vector<128x16xf32> -> vector<128x16xf32>
    %c27 = arith.constant 27 : index
    %c0_91 = arith.constant 0 : index
    %240 = vector.load %arg2[%c27, %c0_91] : memref<32x384xf32, #tpu.memory_space<vmem>>, vector<1x16xf32>
    %241 = vector.broadcast %240 : vector<1x16xf32> to vector<128x16xf32>
    %242 = arith.addf %239, %241 : vector<128x16xf32>
    %243 = arith.addf %242, %206 : vector<128x16xf32>
    %244 = vector.shape_cast %243 : vector<128x16xf32> to vector<8x16x16xf32>
    %245 = tpu.iota {dimensions = array<i32: 1>} : vector<1x16x1xi32>
    %c13_i32_92 = arith.constant 13 : i32
    %246 = vector.broadcast %c13_i32_92 : i32 to vector<1x16x1xi32>
    %247 = arith.cmpi slt, %245, %246 : vector<1x16x1xi32>
    %248 = arith.extui %247 : vector<1x16x1xi1> to vector<1x16x1xi32>
    %249 = arith.sitofp %248 : vector<1x16x1xi32> to vector<1x16x1xf32>
    %250 = vector.broadcast %249 : vector<1x16x1xf32> to vector<8x16x16xf32>
    %251 = arith.mulf %244, %250 : vector<8x16x16xf32>
    %cst_93 = arith.constant dense<0.000000e+00> : vector<8x16xf32>
    %252 = vector.multi_reduction <add>, %251, %cst_93 [1] : vector<8x16x16xf32> to vector<8x16xf32>
    %cst_94 = arith.constant 0.0769230798 : f32
    %253 = vector.broadcast %cst_94 : f32 to vector<8x16xf32>
    %254 = arith.mulf %252, %253 : vector<8x16xf32>
    %c28 = arith.constant 28 : index
    %c0_95 = arith.constant 0 : index
    %255 = vector.load %arg2[%c28, %c0_95] : memref<32x384xf32, #tpu.memory_space<vmem>>, vector<1x16xf32>
    %c29 = arith.constant 29 : index
    %c0_96 = arith.constant 0 : index
    %256 = vector.load %arg2[%c29, %c0_96] : memref<32x384xf32, #tpu.memory_space<vmem>>, vector<1x16xf32>
    %cst_97 = arith.constant dense<0.000000e+00> : vector<8xf32>
    %257 = vector.multi_reduction <add>, %254, %cst_97 [1] : vector<8x16xf32> to vector<8xf32>
    %258 = vector.shape_cast %257 : vector<8xf32> to vector<8x1xf32>
    %cst_98 = arith.constant 1.600000e+01 : f32
    %259 = vector.broadcast %cst_98 : f32 to vector<8x1xf32>
    %260 = arith.divf %258, %259 : vector<8x1xf32>
    %261 = vector.broadcast %260 : vector<8x1xf32> to vector<8x16xf32>
    %262 = arith.subf %254, %261 : vector<8x16xf32>
    %263 = arith.mulf %262, %262 : vector<8x16xf32>
    %cst_99 = arith.constant dense<0.000000e+00> : vector<8xf32>
    %264 = vector.multi_reduction <add>, %263, %cst_99 [1] : vector<8x16xf32> to vector<8xf32>
    %265 = vector.shape_cast %264 : vector<8xf32> to vector<8x1xf32>
    %cst_100 = arith.constant 1.600000e+01 : f32
    %266 = vector.broadcast %cst_100 : f32 to vector<8x1xf32>
    %267 = arith.divf %265, %266 : vector<8x1xf32>
    %268 = vector.broadcast %260 : vector<8x1xf32> to vector<8x16xf32>
    %269 = arith.subf %254, %268 : vector<8x16xf32>
    %cst_101 = arith.constant 9.99999974E-6 : f32
    %270 = vector.broadcast %cst_101 : f32 to vector<8x1xf32>
    %271 = arith.addf %267, %270 : vector<8x1xf32>
    %272 = math.rsqrt %271 : vector<8x1xf32>
    %273 = vector.broadcast %272 : vector<8x1xf32> to vector<8x16xf32>
    %274 = arith.mulf %269, %273 : vector<8x16xf32>
    %275 = vector.broadcast %255 : vector<1x16xf32> to vector<8x16xf32>
    %276 = arith.mulf %274, %275 : vector<8x16xf32>
    %277 = vector.broadcast %256 : vector<1x16xf32> to vector<8x16xf32>
    %278 = arith.addf %276, %277 : vector<8x16xf32>
    %c0_102 = arith.constant 0 : index
    %c0_103 = arith.constant 0 : index
    %279 = vector.load %arg8[%c0_102, %c0_103] : memref<16x16xf32, #tpu.memory_space<vmem>>, vector<16x16xf32>
    %cst_104 = arith.constant dense<0.000000e+00> : vector<8x16xf32>
    %280 = tpu.matmul %278, %279, %cst_104 {dimension_numbers = #tpu.dot_dimension_numbers<[1], [0], [0], [1], [0, 0, 1, 1], [], []>} : vector<8x16xf32>, vector<16x16xf32>, vector<8x16xf32> -> vector<8x16xf32>
    %c30 = arith.constant 30 : index
    %c0_105 = arith.constant 0 : index
    %281 = vector.load %arg2[%c30, %c0_105] : memref<32x384xf32, #tpu.memory_space<vmem>>, vector<1x16xf32>
    %282 = vector.broadcast %281 : vector<1x16xf32> to vector<8x16xf32>
    %283 = arith.addf %280, %282 : vector<8x16xf32>
    %cst_106 = arith.constant 0.000000e+00 : f32
    %284 = vector.broadcast %cst_106 : f32 to vector<8x16xf32>
    %285 = arith.maximumf %283, %284 : vector<8x16xf32>
    %286 = vector.shape_cast %285 : vector<8x16xf32> to vector<8x1x16xf32>
    %c0_107 = arith.constant 0 : index
    %c0_108 = arith.constant 0 : index
    %c0_109 = arith.constant 0 : index
    %287 = vector.load %arg9[%c0_107, %c0_108, %c0_109] : memref<8x1x16xf32, #tpu.memory_space<vmem>>, vector<8x1x16xf32>
    tpu.vector_store %arg9[%c0_107, %c0_108, %c0_109], %286 {strides = array<i32>} : memref<8x1x16xf32, #tpu.memory_space<vmem>>, vector<8x1x16xf32>,
    return
  }
  func.func @transform_0(%arg0: i32) -> (i32, i32, i32) {
    %c0_i32 = arith.constant 0 : i32
    %c0_i32_0 = arith.constant 0 : i32
    %c0_i32_1 = arith.constant 0 : i32
    return %arg0, %c0_i32, %c0_i32_0 : i32, i32, i32
  }
  func.func @transform_1(%arg0: i32) -> (i32, i32) {
    %c0_i32 = arith.constant 0 : i32
    %c0_i32_0 = arith.constant 0 : i32
    %c0_i32_1 = arith.constant 0 : i32
    return %c0_i32, %c0_i32_0 : i32, i32
  }
  func.func @transform_2(%arg0: i32) -> (i32, i32) {
    %c0_i32 = arith.constant 0 : i32
    %c0_i32_0 = arith.constant 0 : i32
    %c0_i32_1 = arith.constant 0 : i32
    return %c0_i32, %c0_i32_0 : i32, i32
  }
  func.func @transform_3(%arg0: i32) -> (i32, i32, i32) {
    %c0_i32 = arith.constant 0 : i32
    %c0_i32_0 = arith.constant 0 : i32
    %c0_i32_1 = arith.constant 0 : i32
    %c0_i32_2 = arith.constant 0 : i32
    return %c0_i32, %c0_i32_0, %c0_i32_1 : i32, i32, i32
  }
  func.func @transform_4(%arg0: i32) -> (i32, i32, i32) {
    %c0_i32 = arith.constant 0 : i32
    %c0_i32_0 = arith.constant 0 : i32
    %c0_i32_1 = arith.constant 0 : i32
    %c0_i32_2 = arith.constant 0 : i32
    return %c0_i32, %c0_i32_0, %c0_i32_1 : i32, i32, i32
  }
  func.func @transform_5(%arg0: i32) -> (i32, i32) {
    %c0_i32 = arith.constant 0 : i32
    %c0_i32_0 = arith.constant 0 : i32
    %c0_i32_1 = arith.constant 0 : i32
    return %c0_i32, %c0_i32_0 : i32, i32
  }
  func.func @transform_6(%arg0: i32) -> (i32, i32) {
    %c0_i32 = arith.constant 0 : i32
    %c0_i32_0 = arith.constant 0 : i32
    %c0_i32_1 = arith.constant 0 : i32
    return %c0_i32, %c0_i32_0 : i32, i32
  }
  func.func @transform_7(%arg0: i32) -> (i32, i32) {
    %c0_i32 = arith.constant 0 : i32
    %c0_i32_0 = arith.constant 0 : i32
    %c0_i32_1 = arith.constant 0 : i32
    return %c0_i32, %c0_i32_0 : i32, i32
  }
  func.func @transform_8(%arg0: i32) -> (i32, i32, i32) {
    %c0_i32 = arith.constant 0 : i32
    %c0_i32_0 = arith.constant 0 : i32
    %c0_i32_1 = arith.constant 0 : i32
    return %arg0, %c0_i32, %c0_i32_0 : i32, i32, i32
  }
}

</mosaic_0001>

<bundles_post_ra>
// kernel: ctts_forward.1
= control target key start
LH: loop header
LB: loop body
LE: loop exit
PB: predicated region body
PF: predicated region fallthrough
CT: control target
= control target key end

     0   :  { %13 = vsyncpa [#allocation3], 0  ;;  %s15575_s0 = inlined_call_operand.vmem [shape: f32[16,16,16], index: 0, kind: input, shape index: {}]   ;;  %s15576_s1 = inlined_call_operand.vmem [shape: f32[32,384], index: 1, kind: input, shape index: {}]   ;;  %s15577_s2 = inlined_call_operand.vmem [shape: f32[16,16], index: 2, kind: input, shape index: {}]   ;;  %s15578_s3 = inlined_call_operand.vmem [shape: f32[4,16,384], index: 3, kind: input, shape index: {}]   ;;  %s15579_s4 = inlined_call_operand.vmem [shape: f32[4,128,16], index: 4, kind: input, shape index: {}]   ;;  %s15580_s5 = inlined_call_operand.vmem [shape: f32[16,64], index: 5, kind: input, shape index: {}]   ;;  %s15581_s6 = inlined_call_operand.vmem [shape: f32[64,16], index: 6, kind: input, shape index: {}]   ;;  %s15582_s7 = inlined_call_operand.vmem [shape: f32[16,16], index: 7, kind: input, shape index: {}]   ;;  %s15583_s8 = inlined_call_operand.hbm [shape: f32[16,1,16], index: 8, kind: output, shape index: {}]  }
   0x1   :  { %15 = vsyncpa [#allocation3 + $0x1], 0  ;;  %s12776_s27 = smov 0   ;;  %s12778_s28 = smov 0  }
   0x2   :  { %s12780_s29 = smov 0   ;;  %s12782_s30 = smov 0  }
   0x3 LB: > { %s12797_s9 = sadd.s32 4294967295, %s12722_s30   ;;  %s10053_s10 = sadd.s32 4294967294, %s12722_s30   ;;  %s12722_s30 = sphi %s12782_s30, %s15654_s30   ;;  %s12718_s29 = sphi %s12780_s29, %s15653_s29   ;;  %s12714_s28 = sphi %s12778_s28, %s15652_s28   ;;  %s12710_s27 = sphi %s12776_s27, %s15651_s27  }
   0x4   : > { %s12801_s11 = sadd.s32 1, %s12722_s30   ;;  %s201_s12 = sadd.s32 1, %s12718_s29 }
   0x5   : > { %s198_s13 = ssub.s32 %s12722_s30, %s12801_s11  ;;  %p211_p0 = scmp.ne.s32.totalorder %s12718_s29, %s12714_s28 }
   0x6   : > { %p199_p1 = scmp.eq.s32.totalorder %s198_s13, 0  ;;  %p212_p2 = scmp.eq.s32.totalorder %s12797_s9, 1 }
   0x7   : > { %p217_p3 = scmp.ne.s32.totalorder %s12714_s28, %s12710_s27  ;;  %p218_p4 = scmp.eq.s32.totalorder %s10053_s10, 1 }
   0x8   : > { %s12812_s14 = scalar_select %p199_p1, %s12718_s29, %s201_s12  }
   0x9   : > { %p12814_p5 = por %p212_p2, %p211_p0  ;;  %p12818_p6 = por %p218_p4, %p217_p3 }
   0xa   : > { %p10056_p7 = scmp.ge.s32.totalorder %s12722_s30, 1  ;;  %p267_p8 = scmp.lt.s32.totalorder %s12722_s30, 3 }
   0xc   : > { %p268_p9 = pnand %p10056_p7, %p267_p8 }
   0xe   : > { %271 = sbr.rel (%p268_p9) target bundleno = 5623 (0x15f7), region = 52 }
  0x15   : > { %v326_v0 = vld [vmem:[%s15577_s2] sm:$0xff]  ;;  %v327_v1 = vld [vmem:[%s15577_s2 + $0x8] sm:$0xff]  ;;  %s10058_s21 = sshll.u32 %s12797_s9, 3  ;;  %vm329_vm0 = vcmask 130048   ;;  %v12871_v19 = vld [vmem:[%s15576_s1 + $0x34] ss:$0 sm:$0xff] }
  0x16   : > { %v11786_v2 = vpack.c.bf16 %v327_v1, %v326_v0  ;;  %p303_p10 = scmp.lt.s32.totalorder %s10058_s21, 15  ;;  %v12876_v22 = vld [vmem:[%s15576_s1] sm:$0xff]  ;;  %v12883_v25 = vld [vmem:[%s15576_s1 + $0x18] sm:$0xff]  ;;  %vm9367_vm2 = vcmask 523264   ;;  %vm9692_vm4 = vcmask 1041409   ;;  %vm9694_vm5 = vcmask 1042434  }
  0x17   : > { %vm9696_vm6 = vcmask 1043459   ;;  %vm9698_vm7 = vcmask 1044484   ;;  %vm9700_vm8 = vcmask 1045509   ;;  %vm9702_vm9 = vcmask 1046534   ;;  %s299_s26 = sand.u32 1, %s12714_s28   ;;  %s10379_s13 = sshll.u32 %s12797_s9, 7 }
  0x18   : > { %11787 = vmatprep.subr.bf16.mxu0 %v11786_v2  ;;  %s15656_s21 = smov (!%p303_p10, %s10058_s21), 15  ;;  %vm9704_vm10 = vcmask 1047559   ;;  %vm12726_vm11 = vmmov 0   ;;  %s10057_s10 = sshll.u32 %s299_s26, 3  ;;  %vm9968_vm12 = vcmask 122880  }
  0x19   : > { %11789 = vmatpush3.bf16.msra.mxu0 %v11786_v2  ;;  %s10378_s22 = sshll.u32 %s15656_s21, 4  ;;  %s301_s12 = scalar_lea.vmem [#allocation2], %s10057_s10 }
  0x1a   : > { %s12834_s25 = scalar_lea.vmem %s15575_s0, %s10378_s22  ;;  %s9991_s17 = sshll.u32 %s301_s12, 4  ;;  %s15526_s17 = int_to_ptr.vmem [resolvable:$true] %s9991_s17 }
  0x1b   : > { %v310_v3 = vld [vmem:[%s12834_s25] sm:$0xff]  ;;  %v311_v4 = vld [vmem:[%s12834_s25 + $0x8] sm:$0xff]  ;;  %v312_v5 = vld [vmem:[%s12834_s25 + $0x10] sm:$0xff]  ;;  %s15524_s20 = scalar_lea.hbm %s15583_s8, %s10379_s13  ;;  %s15534_s9 = scalar_lea.sflag [#allocation3], %s299_s26 }
  0x1c   : > { %10903 = vmatprep.mubr.msk.f32.mxu0 %vm329_vm0, %v310_v3  ;;  %v313_v6 = vld [vmem:[%s12834_s25 + $0x18] sm:$0xff]  ;;  %v314_v7 = vld [vmem:[%s12834_s25 + $0x20] sm:$0xff]  ;;  %v315_v8 = vld [vmem:[%s12834_s25 + $0x28] sm:$0xff]  ;;  %s12660_s21 = scalar_lea.vmem %s15526_s17, 128  ;;  %s12728_s22 = smov [#allocation2]  }
  0x1d   : > { %10904 = vmatmul.mubr.msk.f32.vlgmr.msra.gmra.mrb[0].mxu0 %vm329_vm0, %v311_v4  ;;  %v316_v9 = vld [vmem:[%s12834_s25 + $0x30] sm:$0xff]  ;;  %v317_v10 = vld [vmem:[%s12834_s25 + $0x38] sm:$0xff]  ;;  %v318_v11 = vld [vmem:[%s12834_s25 + $0x40] sm:$0xff]  ;;  %p12661_p11 = scmp.ne.s32.totalorder %s15526_s17, %s12660_s21  ;;  %s12664_s23 = sshll.u32 %s12728_s22, 4  ;;  %s12665_s23 = int_to_ptr.vmem [resolvable:$false] %s12664_s23 }
  0x1e   : > { %10906 = vmatprep.mubr.msk.f32.mxu0 %vm329_vm0, %v312_v5  ;;  %v319_v12 = vld [vmem:[%s12834_s25 + $0x48] sm:$0xff]  ;;  %v320_v13 = vld [vmem:[%s12834_s25 + $0x50] sm:$0xff]  ;;  %v321_v14 = vld [vmem:[%s12834_s25 + $0x58] sm:$0xff]  ;;  %s12666_s24 = scalar_lea.vmem %s12665_s23, 256  ;;  %p12667_p0 = scmp.lt.s32.totalorder %s15526_s17, %s12665_s23 }
  0x1f   : > { %v322_v15 = vld [vmem:[%s12834_s25 + $0x60] sm:$0xff]  ;;  %v323_v16 = vld [vmem:[%s12834_s25 + $0x68] sm:$0xff]  ;;  %v324_v17 = vld [vmem:[%s12834_s25 + $0x70] sm:$0xff]  ;;  %p12662_p12 = pnand %p12661_p11, %p12814_p5  ;;  %p12668_p1 = scmp.lt.s32.totalorder %s12666_s24, %s12660_s21 }
  0x20   : > { %v325_v18 = vld [vmem:[%s12834_s25 + $0x78] sm:$0xff] }
  0x21   : > { %10907 = vmatmul.mubr.msk.f32.gmra.mrb[2].mxu0 %vm329_vm0, %v313_v6  ;;  %p12663_p13 = pneg %p12662_p12  ;;  %p12669_p2 = por %p12668_p1, %p12667_p0 }
  0x22   : > { %10909 = vmatprep.mubr.msk.f32.mxu0 %vm329_vm0, %v314_v7 }
  0x23   : > { %p12670_p3 = pnand %p12669_p2, %p12663_p13 }
  0x25   : > { %10910 = vmatmul.mubr.msk.f32.gmra.mrb[4].mxu0 %vm329_vm0, %v315_v8 }
  0x26   : > { %10912 = vmatprep.mubr.msk.f32.mxu0 %vm329_vm0, %v316_v9 }
  0x29   : > { %10913 = vmatmul.mubr.msk.f32.gmra.mrb[6].mxu0 %vm329_vm0, %v317_v10 }
  0x2a   : > { %10915 = vmatprep.mubr.msk.f32.mxu0 %vm329_vm0, %v318_v11 }
  0x2d   : > { %10916 = vmatmul.mubr.msk.f32.gmra.mrb[8].mxu0 %vm329_vm0, %v319_v12 }
  0x2e   : > { %10918 = vmatprep.mubr.msk.f32.mxu0 %vm329_vm0, %v320_v13 }
  0x31   : > { %10919 = vmatmul.mubr.msk.f32.gmra.mrb[10].mxu0 %vm329_vm0, %v321_v14 }
  0x32   : > { %10921 = vmatprep.mubr.msk.f32.mxu0 %vm329_vm0, %v322_v15 }
  0x35   : > { %10922 = vmatmul.mubr.msk.f32.gmra.mrb[12].mxu0 %vm329_vm0, %v323_v16 }
  0x36   : > { %10924 = vmatprep.mubr.msk.f32.mxu0 %vm329_vm0, %v324_v17 }
  0x39   : > { %10925 = vmatmul.mubr.msk.f32.gmra.mrb[14].mxu0 %vm329_vm0, %v325_v18 }
  0xf0   : > { %v10905_v20 = vpop.f32.mrb[0].mxu0 }
  0xf1   : > { %v444_v21 = vpop.f32.mrb[1].mxu0  ;;  %v450_v23 = vadd.f32 %v10905_v20, %v12871_v19 }
  0xf2   : > { %v445_v24 = vadd.f32 %v444_v21, %v12871_v19 }
  0xf3   : > { %v12890_v30 = vadd.f32 %v12883_v25, %v450_v23 }
  0xf4   : > { %v12886_v26 = vadd.f32 %v12876_v22, %v445_v24  ;;  %v10908_v27 = vpop.f32.mrb[2].mxu0 }
  0xf5   : > { %v460_v28 = vadd.f32 %v10908_v27, %v12871_v19  ;;  %v454_v29 = vpop.f32.mrb[3].mxu0  ;;  %15612 = vst [vmem:[#allocation6_spill] sm:$0xff] %v12890_v30  ;;  %v546_v40 = vsel %vm329_vm0, %v12890_v30, 0.0 }
  0xf6   : > { %15611 = vst [vmem:[#allocation5_spill] sm:$0xff] %v12886_v26  ;;  %v455_v31 = vadd.f32 %v454_v29, %v12871_v19  ;;  %v543_v32 = vsel %vm329_vm0, %v12886_v26, 0.0 }
  0xf7   : > { %544 = vadd.xlane.f32.xlu0 %v543_v32  ;;  %v12896_v33 = vadd.f32 %v12883_v25, %v460_v28 }
  0xf8   : > { %v12899_v34 = vadd.f32 %v12876_v22, %v455_v31  ;;  %v10911_v35 = vpop.f32.mrb[4].mxu0 }
  0xf9   : > { %15613 = vst [vmem:[#allocation7_spill] sm:$0xff] %v12896_v33  ;;  %v470_v36 = vadd.f32 %v10911_v35, %v12871_v19  ;;  %v464_v37 = vpop.f32.mrb[5].mxu0  ;;  %v552_v44 = vsel %vm329_vm0, %v12896_v33, 0.0 }
  0xfa   : > { %15614 = vst [vmem:[#allocation8_spill] sm:$0xff] %v12899_v34  ;;  %v465_v38 = vadd.f32 %v464_v37, %v12871_v19  ;;  %v549_v39 = vsel %vm329_vm0, %v12899_v34, 0.0 }
  0xfb   : > { %550 = vadd.xlane.f32.xlu1 %v549_v39  ;;  %547 = vadd.xlane.f32.xlu0 %v546_v40  ;;  %v12908_v41 = vadd.f32 %v12883_v25, %v470_v36 }
  0xfc   : > { %v12911_v42 = vadd.f32 %v12876_v22, %v465_v38  ;;  %v10914_v43 = vpop.f32.mrb[6].mxu0 }
  0xfd   : > { %15615 = vst [vmem:[#allocation9_spill] sm:$0xff] %v12908_v41  ;;  %v480_v45 = vadd.f32 %v10914_v43, %v12871_v19  ;;  %v474_v46 = vpop.f32.mrb[7].mxu0  ;;  %v558_v52 = vsel %vm329_vm0, %v12908_v41, 0.0 }
  0xfe   : > { %15616 = vst [vmem:[#allocation10_spill] sm:$0xff] %v12911_v42  ;;  %v475_v47 = vadd.f32 %v474_v46, %v12871_v19  ;;  %v555_v48 = vsel %vm329_vm0, %v12911_v42, 0.0 }
  0xff   : > { %553 = vadd.xlane.f32.xlu1 %v552_v44  ;;  %556 = vadd.xlane.f32.xlu0 %v555_v48  ;;  %v12920_v49 = vadd.f32 %v12883_v25, %v480_v45 }
 0x100   : > { %v12923_v50 = vadd.f32 %v12876_v22, %v475_v47  ;;  %v10917_v51 = vpop.f32.mrb[8].mxu0 }
 0x101   : > { %15617 = vst [vmem:[#allocation11_spill] sm:$0xff] %v12920_v49  ;;  %v490_v53 = vadd.f32 %v10917_v51, %v12871_v19  ;;  %v484_v54 = vpop.f32.mrb[9].mxu0  ;;  %v564_v60 = vsel %vm329_vm0, %v12920_v49, 0.0 }
 0x102   : > { %15618 = vst [vmem:[#allocation12_spill] sm:$0xff] %v12923_v50  ;;  %v485_v55 = vadd.f32 %v484_v54, %v12871_v19  ;;  %v561_v56 = vsel %vm329_vm0, %v12923_v50, 0.0 }
 0x103   : > { %559 = vadd.xlane.f32.xlu1 %v558_v52  ;;  %562 = vadd.xlane.f32.xlu0 %v561_v56  ;;  %v12932_v57 = vadd.f32 %v12883_v25, %v490_v53 }
 0x104   : > { %v12935_v58 = vadd.f32 %v12876_v22, %v485_v55  ;;  %v10920_v59 = vpop.f32.mrb[10].mxu0 }
 0x105   : > { %15619 = vst [vmem:[#allocation13_spill] sm:$0xff] %v12932_v57  ;;  %v500_v61 = vadd.f32 %v10920_v59, %v12871_v19  ;;  %v494_v62 = vpop.f32.mrb[11].mxu0  ;;  %v570_v4 = vsel %vm329_vm0, %v12932_v57, 0.0 }
 0x106   : > { %15620 = vst [vmem:[#allocation14_spill] sm:$0xff] %v12935_v58  ;;  %v495_v63 = vadd.f32 %v494_v62, %v12871_v19  ;;  %v567_v0 = vsel %vm329_vm0, %v12935_v58, 0.0 }
 0x107   : > { %565 = vadd.xlane.f32.xlu1 %v564_v60  ;;  %568 = vadd.xlane.f32.xlu0 %v567_v0  ;;  %v12944_v1 = vadd.f32 %v12883_v25, %v500_v61 }
 0x108   : > { %v12947_v2 = vadd.f32 %v12876_v22, %v495_v63  ;;  %v10923_v3 = vpop.f32.mrb[12].mxu0 }
 0x109   : > { %15621 = vst [vmem:[#allocation15_spill] sm:$0xff] %v12944_v1  ;;  %v510_v5 = vadd.f32 %v10923_v3, %v12871_v19  ;;  %v504_v6 = vpop.f32.mrb[13].mxu0  ;;  %v576_v12 = vsel %vm329_vm0, %v12944_v1, 0.0 }
 0x10a   : > { %15622 = vst [vmem:[#allocation16_spill] sm:$0xff] %v12947_v2  ;;  %v505_v7 = vadd.f32 %v504_v6, %v12871_v19  ;;  %v573_v8 = vsel %vm329_vm0, %v12947_v2, 0.0 }
 0x10b   : > { %571 = vadd.xlane.f32.xlu1 %v570_v4  ;;  %574 = vadd.xlane.f32.xlu0 %v573_v8  ;;  %v12956_v9 = vadd.f32 %v12883_v25, %v510_v5 }
 0x10c   : > { %v12959_v10 = vadd.f32 %v12876_v22, %v505_v7  ;;  %v10926_v11 = vpop.f32.mrb[14].mxu0 }
 0x10d   : > { %15623 = vst [vmem:[#allocation17_spill] sm:$0xff] %v12956_v9  ;;  %v520_v13 = vadd.f32 %v10926_v11, %v12871_v19  ;;  %v514_v14 = vpop.f32.mrb[15].mxu0  ;;  %v582_v20 = vsel %vm329_vm0, %v12956_v9, 0.0 }
 0x10e   : > { %15624 = vst [vmem:[#allocation18_spill] sm:$0xff] %v12959_v10  ;;  %v515_v15 = vadd.f32 %v514_v14, %v12871_v19  ;;  %v579_v16 = vsel %vm329_vm0, %v12959_v10, 0.0 }
 0x10f   : > { %577 = vadd.xlane.f32.xlu1 %v576_v12  ;;  %580 = vadd.xlane.f32.xlu0 %v579_v16  ;;  %v12968_v17 = vadd.f32 %v12883_v25, %v520_v13 }
 0x110   : > { %v12971_v18 = vadd.f32 %v12876_v22, %v515_v15 }
 0x111   : > { %15625 = vst [vmem:[#allocation19_spill] sm:$0xff] %v12968_v17  ;;  %v588_v19 = vsel %vm329_vm0, %v12968_v17, 0.0 }
 0x112   : > { %15626 = vst [vmem:[#allocation20_spill] sm:$0xff] %v12971_v18  ;;  %v585_v21 = vsel %vm329_vm0, %v12971_v18, 0.0 }
 0x113   : > { %583 = vadd.xlane.f32.xlu1 %v582_v20  ;;  %586 = vadd.xlane.f32.xlu0 %v585_v21 }
 0x117   : > { %589 = vadd.xlane.f32.xlu1 %v588_v19 }
 0x184   : > { %v545_v23 = vpop.xlane.xlu0 %544 }
 0x185   : > { %v592_v24 = vmul.f32 0.0625, %v545_v23 }
 0x187   : > { %v12980_v25 = vsub.f32 %v12886_v26, %v592_v24 }
 0x188   : > { %v551_v27 = vpop.xlane.xlu1 %550  ;;  %v548_v22 = vpop.xlane.xlu0 %547 }
 0x189   : > { %v594_v28 = vmul.f32 0.0625, %v551_v27  ;;  %v593_v29 = vmul.f32 0.0625, %v548_v22  ;;  %v624_v31 = vmul.f32 %v12980_v25, %v12980_v25 }
 0x18b   : > { %v12985_v32 = vsub.f32 %v12899_v34, %v594_v28  ;;  %v12988_v35 = vsub.f32 %v12890_v30, %v593_v29  ;;  %v640_v36 = vsel %vm329_vm0, %v624_v31, 0.0 }
 0x18c   : > { %v554_v37 = vpop.xlane.xlu1 %553  ;;  %641 = vadd.xlane.f32.xlu0 %v640_v36  ;;  %v557_v38 = vpop.xlane.xlu0 %556 }
 0x18d   : > { %v595_v39 = vmul.f32 0.0625, %v554_v37  ;;  %v596_v40 = vmul.f32 0.0625, %v557_v38  ;;  %v626_v43 = vmul.f32 %v12985_v32, %v12985_v32  ;;  %v625_v44 = vmul.f32 %v12988_v35, %v12988_v35 }
 0x18f   : > { %v12996_v45 = vsub.f32 %v12896_v33, %v595_v39  ;;  %v12999_v46 = vsub.f32 %v12911_v42, %v596_v40  ;;  %v646_v47 = vsel %vm329_vm0, %v626_v43, 0.0  ;;  %v643_v48 = vsel %vm329_vm0, %v625_v44, 0.0 }
 0x190   : > { %v560_v51 = vpop.xlane.xlu1 %559  ;;  %647 = vadd.xlane.f32.xlu0 %v646_v47  ;;  %644 = vadd.xlane.f32.xlu1 %v643_v48  ;;  %v563_v52 = vpop.xlane.xlu0 %562 }
 0x191   : > { %v597_v53 = vmul.f32 0.0625, %v560_v51  ;;  %v598_v54 = vmul.f32 0.0625, %v563_v52  ;;  %v627_v55 = vmul.f32 %v12996_v45, %v12996_v45  ;;  %v628_v56 = vmul.f32 %v12999_v46, %v12999_v46 }
 0x193   : > { %v13008_v59 = vsub.f32 %v12908_v41, %v597_v53  ;;  %v13011_v60 = vsub.f32 %v12923_v50, %v598_v54  ;;  %v649_v61 = vsel %vm329_vm0, %v627_v55, 0.0  ;;  %v652_v62 = vsel %vm329_vm0, %v628_v56, 0.0 }
 0x194   : > { %v566_v63 = vpop.xlane.xlu1 %565  ;;  %650 = vadd.xlane.f32.xlu1 %v649_v61  ;;  %653 = vadd.xlane.f32.xlu0 %v652_v62  ;;  %v569_v0 = vpop.xlane.xlu0 %568 }
 0x195   : > { %v599_v3 = vmul.f32 0.0625, %v566_v63  ;;  %v600_v4 = vmul.f32 0.0625, %v569_v0  ;;  %v629_v5 = vmul.f32 %v13008_v59, %v13008_v59  ;;  %v630_v6 = vmul.f32 %v13011_v60, %v13011_v60 }
 0x197   : > { %v13020_v7 = vsub.f32 %v12920_v49, %v599_v3  ;;  %v13023_v8 = vsub.f32 %v12935_v58, %v600_v4  ;;  %v655_v11 = vsel %vm329_vm0, %v629_v5, 0.0  ;;  %v658_v12 = vsel %vm329_vm0, %v630_v6, 0.0 }
 0x198   : > { %v572_v13 = vpop.xlane.xlu1 %571  ;;  %656 = vadd.xlane.f32.xlu1 %v655_v11  ;;  %659 = vadd.xlane.f32.xlu0 %v658_v12  ;;  %v575_v14 = vpop.xlane.xlu0 %574  ;;  %v789_v12 = vld [vmem:[%s15578_s3 + $0x8] sm:$0xff] }
 0x199   : > { %v601_v15 = vmul.f32 0.0625, %v572_v13  ;;  %v602_v16 = vmul.f32 0.0625, %v575_v14  ;;  %v631_v20 = vmul.f32 %v13020_v7, %v13020_v7  ;;  %v632_v21 = vmul.f32 %v13023_v8, %v13023_v8  ;;  %v792_v13 = vld [vmem:[%s15578_s3 + $0x20] sm:$0xff] }
 0x19a   : > { %v11790_v14 = vpack.c.bf16 %v792_v13, %v789_v12 }
 0x19b   : > { %v13032_v19 = vsub.f32 %v12932_v57, %v601_v15  ;;  %v13035_v23 = vsub.f32 %v12947_v2, %v602_v16  ;;  %v661_v24 = vsel %vm329_vm0, %v631_v20, 0.0  ;;  %v664_v27 = vsel %vm329_vm0, %v632_v21, 0.0  ;;  %v788_v15 = vld [vmem:[%s15578_s3] sm:$0xff]  ;;  %v791_v16 = vld [vmem:[%s15578_s3 + $0x18] sm:$0xff] }
 0x19c   : > { %v578_v22 = vpop.xlane.xlu1 %577  ;;  %662 = vadd.xlane.f32.xlu1 %v661_v24  ;;  %665 = vadd.xlane.f32.xlu0 %v664_v27  ;;  %v581_v28 = vpop.xlane.xlu0 %580  ;;  %v11792_v21 = vpack.c.bf16 %v791_v16, %v788_v15  ;;  %v790_v24 = vld [vmem:[%s15578_s3 + $0x10] sm:$0xff]  ;;  %v793_v27 = vld [vmem:[%s15578_s3 + $0x28] sm:$0xff] }
 0x19d   : > { %v603_v29 = vmul.f32 0.0625, %v578_v22  ;;  %v604_v31 = vmul.f32 0.0625, %v581_v28  ;;  %v633_v36 = vmul.f32 %v13032_v19, %v13032_v19  ;;  %v634_v37 = vmul.f32 %v13035_v23, %v13035_v23  ;;  %11791 = vmatprep.subr.bf16.mxu1 %v11790_v14 }
 0x19e   : > { %11793 = vmatpush1.bf16.msra.mxu1 %v11792_v21  ;;  %v11794_v22 = vpack.c.bf16 %v793_v27, %v790_v24  ;;  %v15584_v28 = vmov 0.0  }
 0x19f   : > { %v13044_v38 = vsub.f32 %v12944_v1, %v603_v29  ;;  %v13047_v39 = vsub.f32 %v12959_v10, %v604_v31  ;;  %v667_v40 = vsel %vm329_vm0, %v633_v36, 0.0  ;;  %v670_v43 = vsel %vm329_vm0, %v634_v37, 0.0  ;;  %924 = vmatprep.mubr.f32.mxu1 %v15584_v28 }
 0x1a0   : > { %v584_v44 = vpop.xlane.xlu1 %583  ;;  %668 = vadd.xlane.f32.xlu1 %v667_v40  ;;  %671 = vadd.xlane.f32.xlu0 %v670_v43  ;;  %v587_v47 = vpop.xlane.xlu0 %586 }
 0x1a1   : > { %v605_v48 = vmul.f32 0.0625, %v584_v44  ;;  %v606_v51 = vmul.f32 0.0625, %v587_v47  ;;  %v635_v52 = vmul.f32 %v13044_v38, %v13044_v38  ;;  %v636_v53 = vmul.f32 %v13047_v39, %v13047_v39  ;;  %11795 = vmatprep.subr.bf16.mxu0 %v11794_v22 }
 0x1a2   : > { %11797 = vmatpush3.bf16.msra.mxu0 %v11794_v22 }
 0x1a3   : > { %v13056_v54 = vsub.f32 %v12956_v9, %v605_v48  ;;  %v13059_v55 = vsub.f32 %v12971_v18, %v606_v51  ;;  %v673_v56 = vsel %vm329_vm0, %v635_v52, 0.0  ;;  %v676_v61 = vsel %vm329_vm0, %v636_v53, 0.0 }
 0x1a4   : > { %v590_v62 = vpop.xlane.xlu1 %589  ;;  %674 = vadd.xlane.f32.xlu1 %v673_v56  ;;  %677 = vadd.xlane.f32.xlu0 %v676_v61 }
 0x1a5   : > { %v607_v63 = vmul.f32 0.0625, %v590_v62  ;;  %v637_v0 = vmul.f32 %v13056_v54, %v13056_v54  ;;  %v638_v3 = vmul.f32 %v13059_v55, %v13059_v55 }
 0x1a7   : > { %v13068_v4 = vsub.f32 %v12968_v17, %v607_v63  ;;  %v679_v5 = vsel %vm329_vm0, %v637_v0, 0.0  ;;  %v682_v6 = vsel %vm329_vm0, %v638_v3, 0.0 }
 0x1a8   : > { %680 = vadd.xlane.f32.xlu1 %v679_v5  ;;  %683 = vadd.xlane.f32.xlu0 %v682_v6 }
 0x1a9   : > { %v639_v11 = vmul.f32 %v13068_v4, %v13068_v4 }
 0x1ab   : > { %v685_v20 = vsel %vm329_vm0, %v639_v11, 0.0  ;;  %v13097_v11 = vld [vmem:[%s15576_s1 + $0x35] ss:$0 sm:$0xff] }
 0x1ac   : > { %686 = vadd.xlane.f32.xlu1 %v685_v20  ;;  %v13103_v20 = vld [vmem:[%s15576_s1 + $0x36] ss:$0 sm:$0xff] }
 0x219   : > { %v642_v29 = vpop.xlane.xlu0 %641 }
 0x21a   : > { %v688_v31 = vmul.f32 0.0625, %v642_v29 }
 0x21c   : > { %v704_v36 = vadd.f32 1e-05, %v688_v31 }
 0x21d   : > { %v645_v37 = vpop.xlane.xlu1 %644  ;;  %v648_v40 = vpop.xlane.xlu0 %647 }
 0x21e   : > { %12338 = vrsqrt.f32 %v704_v36  ;;  %v689_v43 = vmul.f32 0.0625, %v645_v37  ;;  %v690_v44 = vmul.f32 0.0625, %v648_v40 }
 0x220   : > { %v705_v47 = vadd.f32 1e-05, %v689_v43  ;;  %v706_v48 = vadd.f32 1e-05, %v690_v44 }
 0x221   : > { %v651_v51 = vpop.xlane.xlu1 %650  ;;  %v654_v52 = vpop.xlane.xlu0 %653 }
 0x222   : > { %12340 = vrsqrt.f32 %v705_v47  ;;  %v691_v53 = vmul.f32 0.0625, %v651_v51  ;;  %v692_v56 = vmul.f32 0.0625, %v654_v52 }
 0x223   : > { %12342 = vrsqrt.f32 %v706_v48 }
 0x224   : > { %v707_v61 = vadd.f32 1e-05, %v691_v53  ;;  %v708_v62 = vadd.f32 1e-05, %v692_v56 }
 0x225   : > { %v657_v63 = vpop.xlane.xlu1 %656  ;;  %v660_v0 = vpop.xlane.xlu0 %659 }
 0x226   : > { %12344 = vrsqrt.f32 %v707_v61  ;;  %v693_v3 = vmul.f32 0.0625, %v657_v63  ;;  %v694_v5 = vmul.f32 0.0625, %v660_v0 }
 0x227   : > { %12346 = vrsqrt.f32 %v708_v62 }
 0x228   : > { %v12339_v6 = vpop.eup %12338  ;;  %v709_v12 = vadd.f32 1e-05, %v693_v3  ;;  %v710_v13 = vadd.f32 1e-05, %v694_v5 }
 0x229   : > { %v736_v14 = vmul.f32 %v12339_v6, %v12980_v25  ;;  %v663_v15 = vpop.xlane.xlu1 %662  ;;  %v666_v16 = vpop.xlane.xlu0 %665 }
 0x22a   : > { %12348 = vrsqrt.f32 %v709_v12  ;;  %v695_v21 = vmul.f32 0.0625, %v663_v15  ;;  %v696_v24 = vmul.f32 0.0625, %v666_v16 }
 0x22b   : > { %v752_v27 = vmul.f32 %v736_v14, %v13097_v11  ;;  %12350 = vrsqrt.f32 %v710_v13 }
 0x22c   : > { %v12341_v22 = vpop.eup %12340  ;;  %v711_v29 = vadd.f32 1e-05, %v695_v21  ;;  %v712_v31 = vadd.f32 1e-05, %v696_v24 }
 0x22d   : > { %v12343_v36 = vpop.eup %12342  ;;  %v13107_v37 = vadd.f32 %v752_v27, %v13103_v20  ;;  %v737_v25 = vmul.f32 %v12341_v22, %v12988_v35  ;;  %v669_v40 = vpop.xlane.xlu1 %668 }
 0x22e   : > { %v672_v43 = vpop.xlane.xlu0 %671  ;;  %v738_v44 = vmul.f32 %v12343_v36, %v12985_v32  ;;  %12352 = vrsqrt.f32 %v711_v29  ;;  %v697_v47 = vmul.f32 0.0625, %v669_v40 }
 0x22f   : > { %v698_v48 = vmul.f32 0.0625, %v672_v43  ;;  %v753_v51 = vmul.f32 %v737_v25, %v13097_v11  ;;  %12354 = vrsqrt.f32 %v712_v31  ;;  %10078 = vmatmul.mubr.msk.f32.vlgmr.msra.gmra.mrb[0].mxu1 %vm329_vm0, %v13107_v37  ;;  %10931 = vmatprep.mubr.msk.f32.mxu0 %vm329_vm0, %v13107_v37 }
 0x230   : > { %v12345_v52 = vpop.eup %12344  ;;  %v754_v53 = vmul.f32 %v738_v44, %v13097_v11  ;;  %v713_v35 = vadd.f32 1e-05, %v697_v47  ;;  %930 = vmatprep.mubr.f32.mxu1 %v15584_v28 }
 0x231   : > { %v714_v56 = vadd.f32 1e-05, %v698_v48  ;;  %v12347_v32 = vpop.eup %12346  ;;  %v13119_v61 = vadd.f32 %v753_v51, %v13103_v20  ;;  %v739_v62 = vmul.f32 %v12345_v52, %v12996_v45  ;;  %v675_v63 = vpop.xlane.xlu1 %674 }
 0x232   : > { %v678_v0 = vpop.xlane.xlu0 %677  ;;  %v13123_v3 = vadd.f32 %v754_v53, %v13103_v20  ;;  %v740_v5 = vmul.f32 %v12347_v32, %v12999_v46  ;;  %12356 = vrsqrt.f32 %v713_v35  ;;  %v699_v6 = vmul.f32 0.0625, %v675_v63 }
 0x233   : > { %v755_v12 = vmul.f32 %v739_v62, %v13097_v11  ;;  %12358 = vrsqrt.f32 %v714_v56  ;;  %v700_v13 = vmul.f32 0.0625, %v678_v0  ;;  %10079 = vmatmul.mubr.msk.f32.gmra.mrb[2].mxu1 %vm329_vm0, %v13119_v61  ;;  %10932 = vmatmul.mubr.msk.f32.vlgmr.msra.gmra.mrb[16].mxu0 %vm329_vm0, %v13119_v61 }
 0x234   : > { %v12349_v45 = vpop.eup %12348  ;;  %v756_v14 = vmul.f32 %v740_v5, %v13097_v11  ;;  %v715_v15 = vadd.f32 1e-05, %v699_v6  ;;  %10934 = vmatprep.mubr.msk.f32.mxu0 %vm329_vm0, %v13123_v3  ;;  %936 = vmatprep.mubr.f32.mxu1 %v15584_v28 }
 0x235   : > { %v12351_v46 = vpop.eup %12350  ;;  %v13136_v16 = vadd.f32 %v755_v12, %v13103_v20  ;;  %v741_v21 = vmul.f32 %v12349_v45, %v13008_v59  ;;  %v716_v24 = vadd.f32 1e-05, %v700_v13  ;;  %v681_v27 = vpop.xlane.xlu1 %680 }
 0x236   : > { %v684_v22 = vpop.xlane.xlu0 %683  ;;  %v13140_v29 = vadd.f32 %v756_v14, %v13103_v20  ;;  %v742_v31 = vmul.f32 %v12351_v46, %v13011_v60  ;;  %12360 = vrsqrt.f32 %v715_v15  ;;  %v701_v36 = vmul.f32 0.0625, %v681_v27 }
 0x237   : > { %v757_v25 = vmul.f32 %v741_v21, %v13097_v11  ;;  %12362 = vrsqrt.f32 %v716_v24  ;;  %v702_v40 = vmul.f32 0.0625, %v684_v22  ;;  %10080 = vmatmul.mubr.msk.f32.gmra.mrb[4].mxu1 %vm329_vm0, %v13123_v3  ;;  %10935 = vmatmul.mubr.msk.f32.gmra.mrb[18].mxu0 %vm329_vm0, %v13136_v16 }
 0x238   : > { %v12353_v59 = vpop.eup %12352  ;;  %v758_v43 = vmul.f32 %v742_v31, %v13097_v11  ;;  %v717_v44 = vadd.f32 1e-05, %v701_v36  ;;  %10937 = vmatprep.mubr.msk.f32.mxu0 %vm329_vm0, %v13140_v29  ;;  %942 = vmatprep.mubr.f32.mxu1 %v15584_v28 }
 0x239   : > { %v12355_v60 = vpop.eup %12354  ;;  %v13153_v47 = vadd.f32 %v757_v25, %v13103_v20  ;;  %v743_v48 = vmul.f32 %v12353_v59, %v13020_v7  ;;  %v718_v51 = vadd.f32 1e-05, %v702_v40  ;;  %v687_v52 = vpop.xlane.xlu1 %686 }
 0x23a   : > { %v13157_v53 = vadd.f32 %v758_v43, %v13103_v20  ;;  %v744_v35 = vmul.f32 %v12355_v60, %v13023_v8  ;;  %12364 = vrsqrt.f32 %v717_v44  ;;  %v703_v56 = vmul.f32 0.0625, %v687_v52 }
 0x23b   : > { %v759_v32 = vmul.f32 %v743_v48, %v13097_v11  ;;  %12366 = vrsqrt.f32 %v718_v51  ;;  %10081 = vmatmul.mubr.msk.f32.gmra.mrb[6].mxu1 %vm329_vm0, %v13136_v16  ;;  %10938 = vmatmul.mubr.msk.f32.gmra.mrb[20].mxu0 %vm329_vm0, %v13153_v47  ;;  %v10077_v51 = vld [vmem:[%s15576_s1 + $0x30] ss:$8 sm:$0x7] }
 0x23c   : > { %v12357_v62 = vpop.eup %12356  ;;  %v760_v7 = vmul.f32 %v744_v35, %v13097_v11  ;;  %v719_v63 = vadd.f32 1e-05, %v703_v56  ;;  %10940 = vmatprep.mubr.msk.f32.mxu0 %vm329_vm0, %v13157_v53  ;;  %948 = vmatprep.mubr.f32.mxu1 %v15584_v28 }
 0x23d   : > { %v12359_v8 = vpop.eup %12358  ;;  %v13170_v0 = vadd.f32 %v759_v32, %v13103_v20  ;;  %v745_v5 = vmul.f32 %v12357_v62, %v13032_v19 }
 0x23e   : > { %v13174_v6 = vadd.f32 %v760_v7, %v13103_v20  ;;  %v746_v12 = vmul.f32 %v12359_v8, %v13035_v23  ;;  %12368 = vrsqrt.f32 %v719_v63 }
 0x23f   : > { %v761_v13 = vmul.f32 %v745_v5, %v13097_v11  ;;  %10082 = vmatmul.mubr.msk.f32.gmra.mrb[8].mxu1 %vm329_vm0, %v13140_v29  ;;  %10941 = vmatmul.mubr.msk.f32.gmra.mrb[22].mxu0 %vm329_vm0, %v13170_v0 }
 0x240   : > { %v12361_v45 = vpop.eup %12360  ;;  %v762_v14 = vmul.f32 %v746_v12, %v13097_v11  ;;  %10943 = vmatprep.mubr.msk.f32.mxu0 %vm329_vm0, %v13174_v6  ;;  %954 = vmatprep.mubr.f32.mxu1 %v15584_v28 }
 0x241   : > { %v12363_v19 = vpop.eup %12362  ;;  %v13187_v23 = vadd.f32 %v761_v13, %v13103_v20  ;;  %v747_v15 = vmul.f32 %v12361_v45, %v13044_v38 }
 0x242   : > { %v13191_v46 = vadd.f32 %v762_v14, %v13103_v20  ;;  %v748_v21 = vmul.f32 %v12363_v19, %v13047_v39 }
 0x243   : > { %v763_v24 = vmul.f32 %v747_v15, %v13097_v11  ;;  %10083 = vmatmul.mubr.msk.f32.gmra.mrb[10].mxu1 %vm329_vm0, %v13153_v47  ;;  %10944 = vmatmul.mubr.msk.f32.gmra.mrb[24].mxu0 %vm329_vm0, %v13187_v23 }
 0x244   : > { %v12365_v27 = vpop.eup %12364  ;;  %v764_v22 = vmul.f32 %v748_v21, %v13097_v11  ;;  %10946 = vmatprep.mubr.msk.f32.mxu0 %vm329_vm0, %v13191_v46  ;;  %960 = vmatprep.mubr.f32.mxu1 %v15584_v28 }
 0x245   : > { %v12367_v38 = vpop.eup %12366  ;;  %v13204_v31 = vadd.f32 %v763_v24, %v13103_v20  ;;  %v749_v39 = vmul.f32 %v12365_v27, %v13056_v54 }
 0x246   : > { %v13208_v36 = vadd.f32 %v764_v22, %v13103_v20  ;;  %v750_v25 = vmul.f32 %v12367_v38, %v13059_v55 }
 0x247   : > { %v765_v40 = vmul.f32 %v749_v39, %v13097_v11  ;;  %10084 = vmatmul.mubr.msk.f32.gmra.mrb[12].mxu1 %vm329_vm0, %v13157_v53  ;;  %10947 = vmatmul.mubr.msk.f32.gmra.mrb[26].mxu0 %vm329_vm0, %v13204_v31 }
 0x248   : > { %v12369_v59 = vpop.eup %12368  ;;  %v766_v43 = vmul.f32 %v750_v25, %v13097_v11  ;;  %10949 = vmatprep.mubr.msk.f32.mxu0 %vm329_vm0, %v13208_v36  ;;  %966 = vmatprep.mubr.f32.mxu1 %v15584_v28 }
 0x249   : > { %v13221_v54 = vadd.f32 %v765_v40, %v13103_v20  ;;  %v751_v55 = vmul.f32 %v12369_v59, %v13068_v4  ;;  %v15586_v4 = vlaneseq }
 0x24a   : > { %v13225_v44 = vadd.f32 %v766_v43, %v13103_v20 }
 0x24b   : > { %v767_v60 = vmul.f32 %v751_v55, %v13097_v11  ;;  %10085 = vmatmul.mubr.msk.f32.gmra.mrb[14].mxu1 %vm329_vm0, %v13170_v0  ;;  %10950 = vmatmul.mubr.msk.f32.gmra.mrb[28].mxu0 %vm329_vm0, %v13221_v54  ;;  %v13264_v11 = vshrl.u32 %v15586_v4, 7 }
 0x24c   : > { %10952 = vmatprep.mubr.msk.f32.mxu0 %vm329_vm0, %v13225_v44  ;;  %972 = vmatprep.mubr.f32.mxu1 %v15584_v28 }
 0x24d   : > { %v13236_v48 = vadd.f32 %v767_v60, %v13103_v20  ;;  %15627 = vst [vmem:[#allocation21_spill] sm:$0xff] %v13264_v11  ;;  %v13267_v20 = vsub.s32 0, %v13264_v11  ;;  %v13276_v35 = vsub.s32 2, %v13264_v11  ;;  %v13279_v56 = vsub.s32 1, %v13264_v11 }
 0x24f   : > { %10086 = vmatmul.mubr.msk.f32.gmra.mrb[16].mxu1 %vm329_vm0, %v13174_v6  ;;  %10953 = vmatmul.mubr.msk.f32.gmra.mrb[30].mxu0 %vm329_vm0, %v13236_v48  ;;  %v13273_v52 = vrot.slane %v10077_v51, %v13267_v20  ;;  %15628 = vst [vmem:[#allocation22_spill] sm:$0xff] %v13276_v35  ;;  %v13283_v63 = vrot.slane %v10077_v51, %v13276_v35 }
 0x250   : > { %978 = vmatprep.mubr.f32.mxu1 %v15584_v28  ;;  %v13286_v8 = vrot.slane %v10077_v51, %v13279_v56 }
 0x253   : > { %10087 = vmatmul.mubr.msk.f32.gmra.mrb[18].mxu1 %vm329_vm0, %v13187_v23 }
 0x254   : > { %984 = vmatprep.mubr.f32.mxu1 %v15584_v28 }
 0x257   : > { %10088 = vmatmul.mubr.msk.f32.gmra.mrb[20].mxu1 %vm329_vm0, %v13191_v46 }
 0x258   : > { %990 = vmatprep.mubr.f32.mxu1 %v15584_v28 }
 0x25b   : > { %10089 = vmatmul.mubr.msk.f32.gmra.mrb[22].mxu1 %vm329_vm0, %v13204_v31 }
 0x25c   : > { %996 = vmatprep.mubr.f32.mxu1 %v15584_v28 }
 0x25f   : > { %10090 = vmatmul.mubr.msk.f32.gmra.mrb[24].mxu1 %vm329_vm0, %v13208_v36 }
 0x260   : > { %1002 = vmatprep.mubr.f32.mxu1 %v15584_v28 }
 0x263   : > { %10091 = vmatmul.mubr.msk.f32.gmra.mrb[26].mxu1 %vm329_vm0, %v13221_v54 }
 0x264   : > { %1008 = vmatprep.mubr.f32.mxu1 %v15584_v28 }
 0x267   : > { %10092 = vmatmul.mubr.msk.f32.gmra.mrb[28].mxu1 %vm329_vm0, %v13225_v44 }
 0x268   : > { %1014 = vmatprep.mubr.f32.mxu1 %v15584_v28 }
 0x26b   : > { %10093 = vmatmul.mubr.msk.f32.gmra.mrb[30].mxu1 %vm329_vm0, %v13236_v48 }
 0x302   : > { %v926_v32 = vpop.f32.mrb[0].mxu1 }
 0x303   : > { %v927_v62 = vadd.f32 %v926_v32, %v13273_v52  ;;  %v928_v7 = vpop.f32.mrb[1].mxu1 }
 0x304   : > { %v929_v19 = vadd.f32 %v928_v7, %v13286_v8 }
 0x305   : > { %10959 = vmatprep.mubr.f32.mxu0 %v927_v62 }
 0x306   : > { %v932_v5 = vpop.f32.mrb[2].mxu1  ;;  %v10933_v12 = vpop.f32.mrb[16].mxu0 }
 0x307   : > { %v1093_v13 = vadd.f32 %v10933_v12, %v13283_v63  ;;  %v934_v45 = vpop.f32.mrb[3].mxu1  ;;  %v1087_v14 = vpop.f32.mrb[17].mxu0 }
 0x308   : > { %v935_v15 = vadd.f32 %v934_v45, %v13286_v8  ;;  %v1088_v21 = vadd.f32 %v1087_v14, %v13283_v63  ;;  %v933_v14 = vadd.f32 %v932_v5, %v13273_v52 }
 0x30a   : > { %v11798_v24 = vpack.c.bf16 %v935_v15, %v929_v19  ;;  %v13292_v27 = vpack.c.bf16 %v1093_v13, %v1088_v21  ;;  %v938_v22 = vpop.f32.mrb[4].mxu1  ;;  %v10936_v38 = vpop.f32.mrb[18].mxu0 }
 0x30b   : > { %v939_v39 = vadd.f32 %v938_v22, %v13273_v52  ;;  %v1103_v25 = vadd.f32 %v10936_v38, %v13283_v63  ;;  %v940_v40 = vpop.f32.mrb[5].mxu1  ;;  %v1097_v59 = vpop.f32.mrb[19].mxu0 }
 0x30c   : > { %v1098_v43 = vadd.f32 %v1097_v59, %v13283_v63  ;;  %11799 = vmatprep.subr.bf16.mxu0 %v11798_v24  ;;  %v941_v12 = vadd.f32 %v940_v40, %v13286_v8 }
 0x30d   : > { %11801 = vmatpush3.bf16.xpose.msra.mxu0 %v11798_v24  ;;  %10966 = vmatprep.mubr.f32.mxu1 %v939_v39 }
 0x30e   : > { %v13297_v55 = vpack.c.bf16 %v1103_v25, %v1098_v43  ;;  %v944_v60 = vpop.f32.mrb[6].mxu1  ;;  %v10939_v51 = vpop.f32.mrb[20].mxu0 }
 0x30f   : > { %v1113_v32 = vadd.f32 %v10939_v51, %v13283_v63  ;;  %v946_v62 = vpop.f32.mrb[7].mxu1  ;;  %v1107_v7 = vpop.f32.mrb[21].mxu0 }
 0x310   : > { %v947_v13 = vadd.f32 %v946_v62, %v13286_v8  ;;  %v1108_v45 = vadd.f32 %v1107_v7, %v13283_v63 }
 0x312   : > { %v11802_v19 = vpack.c.bf16 %v947_v13, %v941_v12  ;;  %v13304_v15 = vpack.c.bf16 %v1113_v32, %v1108_v45  ;;  %v950_v21 = vpop.f32.mrb[8].mxu1  ;;  %v10942_v24 = vpop.f32.mrb[22].mxu0  ;;  %v945_v45 = vadd.f32 %v944_v60, %v13273_v52 }
 0x313   : > { %v951_v22 = vadd.f32 %v950_v21, %v13273_v52  ;;  %v1123_v38 = vadd.f32 %v10942_v24, %v13283_v63  ;;  %v952_v39 = vpop.f32.mrb[9].mxu1  ;;  %v1117_v25 = vpop.f32.mrb[23].mxu0 }
 0x314   : > { %v1118_v59 = vadd.f32 %v1117_v25, %v13283_v63  ;;  %10960 = vmatmul.mubr.f32.vlgmr.msra.gmra.mrb[32].mxu0 %v933_v14  ;;  %11803 = vmatprep.subr.bf16.mxu1 %v11802_v19  ;;  %v953_v7 = vadd.f32 %v952_v39, %v13286_v8 }
 0x315   : > { %11805 = vmatpush3.bf16.xpose.msra.mxu1 %v11802_v19  ;;  %10973 = vmatprep.mubr.f32.mxu0 %v951_v22 }
 0x316   : > { %v13309_v40 = vpack.c.bf16 %v1123_v38, %v1118_v59  ;;  %v956_v5 = vpop.f32.mrb[10].mxu1  ;;  %v10945_v43 = vpop.f32.mrb[24].mxu0 }
 0x317   : > { %v1133_v51 = vadd.f32 %v10945_v43, %v13283_v63  ;;  %v958_v32 = vpop.f32.mrb[11].mxu1  ;;  %v1127_v62 = vpop.f32.mrb[25].mxu0 }
 0x318   : > { %v959_v12 = vadd.f32 %v958_v32, %v13286_v8  ;;  %v1128_v13 = vadd.f32 %v1127_v62, %v13283_v63 }
 0x31a   : > { %v11806_v14 = vpack.c.bf16 %v959_v12, %v953_v7  ;;  %v13316_v21 = vpack.c.bf16 %v1133_v51, %v1128_v13  ;;  %v962_v19 = vpop.f32.mrb[12].mxu1  ;;  %v10948_v24 = vpop.f32.mrb[26].mxu0 }
 0x31b   : > { %v963_v22 = vadd.f32 %v962_v19, %v13273_v52  ;;  %v1143_v38 = vadd.f32 %v10948_v24, %v13283_v63  ;;  %v964_v25 = vpop.f32.mrb[13].mxu1  ;;  %v1137_v59 = vpop.f32.mrb[27].mxu0  ;;  %v957_v24 = vadd.f32 %v956_v5, %v13273_v52 }
 0x31c   : > { %v1138_v43 = vadd.f32 %v1137_v59, %v13283_v63  ;;  %10967 = vmatmul.mubr.f32.vlgmr.msra.gmra.mrb[32].mxu1 %v945_v45  ;;  %11807 = vmatprep.subr.bf16.mxu0 %v11806_v14  ;;  %v965_v12 = vadd.f32 %v964_v25, %v13286_v8 }
 0x31d   : > { %11809 = vmatpush3.bf16.xpose.msra.mxu0 %v11806_v14  ;;  %10980 = vmatprep.mubr.f32.mxu1 %v963_v22 }
 0x31e   : > { %v13321_v39 = vpack.c.bf16 %v1143_v38, %v1138_v43  ;;  %v968_v60 = vpop.f32.mrb[14].mxu1  ;;  %v10951_v32 = vpop.f32.mrb[28].mxu0 }
 0x31f   : > { %v1153_v51 = vadd.f32 %v10951_v32, %v13283_v63  ;;  %v970_v62 = vpop.f32.mrb[15].mxu1  ;;  %v1147_v7 = vpop.f32.mrb[29].mxu0 }
 0x320   : > { %v971_v13 = vadd.f32 %v970_v62, %v13286_v8  ;;  %v1148_v19 = vadd.f32 %v1147_v7, %v13283_v63 }
 0x322   : > { %v11810_v45 = vpack.c.bf16 %v971_v13, %v965_v12  ;;  %v13328_v59 = vpack.c.bf16 %v1153_v51, %v1148_v19  ;;  %v974_v14 = vpop.f32.mrb[16].mxu1  ;;  %v10954_v22 = vpop.f32.mrb[30].mxu0  ;;  %v969_v12 = vadd.f32 %v968_v60, %v13273_v52 }
 0x323   : > { %v975_v38 = vadd.f32 %v974_v14, %v13273_v52  ;;  %v1163_v43 = vadd.f32 %v10954_v22, %v13283_v63  ;;  %v976_v32 = vpop.f32.mrb[17].mxu1  ;;  %v1157_v28 = vpop.f32.mrb[31].mxu0 }
 0x324   : > { %v1158_v4 = vadd.f32 %v1157_v28, %v13283_v63  ;;  %10974 = vmatmul.mubr.f32.vlgmr.msra.gmra.mrb[34].mxu0 %v957_v24  ;;  %11811 = vmatprep.subr.bf16.mxu1 %v11810_v45  ;;  %v977_v51 = vadd.f32 %v976_v32, %v13286_v8 }
 0x325   : > { %11813 = vmatpush3.bf16.xpose.msra.mxu1 %v11810_v45  ;;  %10987 = vmatprep.mubr.f32.mxu0 %v975_v38 }
 0x326   : > { %v13333_v25 = vpack.c.bf16 %v1163_v43, %v1158_v4  ;;  %v980_v5 = vpop.f32.mrb[18].mxu1 }
 0x327   : > { %v982_v62 = vpop.f32.mrb[19].mxu1  ;;  %v981_v45 = vadd.f32 %v980_v5, %v13273_v52 }
 0x328   : > { %v983_v7 = vadd.f32 %v982_v62, %v13286_v8 }
 0x32a   : > { %v11814_v13 = vpack.c.bf16 %v983_v7, %v977_v51  ;;  %v986_v19 = vpop.f32.mrb[20].mxu1 }
 0x32b   : > { %v987_v14 = vadd.f32 %v986_v19, %v13273_v52  ;;  %v988_v22 = vpop.f32.mrb[21].mxu1 }
 0x32c   : > { %10981 = vmatmul.mubr.f32.vlgmr.msra.gmra.mrb[34].mxu1 %v969_v12  ;;  %11815 = vmatprep.subr.bf16.mxu0 %v11814_v13  ;;  %v989_v63 = vadd.f32 %v988_v22, %v13286_v8 }
 0x32d   : > { %11817 = vmatpush3.bf16.xpose.msra.mxu0 %v11814_v13  ;;  %10994 = vmatprep.mubr.f32.mxu1 %v987_v14 }
 0x32e   : > { %v992_v28 = vpop.f32.mrb[22].mxu1 }
 0x32f   : > { %v994_v4 = vpop.f32.mrb[23].mxu1  ;;  %v993_v19 = vadd.f32 %v992_v28, %v13273_v52 }
 0x330   : > { %v995_v24 = vadd.f32 %v994_v4, %v13286_v8 }
 0x332   : > { %v11818_v38 = vpack.c.bf16 %v995_v24, %v989_v63  ;;  %v998_v43 = vpop.f32.mrb[24].mxu1 }
 0x333   : > { %v999_v60 = vadd.f32 %v998_v43, %v13273_v52  ;;  %v1000_v32 = vpop.f32.mrb[25].mxu1 }
 0x334   : > { %10988 = vmatmul.mubr.f32.vlgmr.msra.gmra.mrb[36].mxu0 %v981_v45  ;;  %11819 = vmatprep.subr.bf16.mxu1 %v11818_v38  ;;  %v1001_v12 = vadd.f32 %v1000_v32, %v13286_v8 }
 0x335   : > { %11821 = vmatpush3.bf16.xpose.msra.mxu1 %v11818_v38  ;;  %11001 = vmatprep.mubr.f32.mxu0 %v999_v60 }
 0x336   : > { %v1004_v62 = vpop.f32.mrb[26].mxu1 }
 0x337   : > { %v1005_v51 = vadd.f32 %v1004_v62, %v13273_v52  ;;  %v1006_v7 = vpop.f32.mrb[27].mxu1 }
 0x338   : > { %v1007_v13 = vadd.f32 %v1006_v7, %v13286_v8 }
 0x33a   : > { %v11822_v5 = vpack.c.bf16 %v1007_v13, %v1001_v12  ;;  %v1010_v14 = vpop.f32.mrb[28].mxu1 }
 0x33b   : > { %v1011_v22 = vadd.f32 %v1010_v14, %v13273_v52  ;;  %v1012_v4 = vpop.f32.mrb[29].mxu1 }
 0x33c   : > { %10995 = vmatmul.mubr.f32.vlgmr.msra.gmra.mrb[36].mxu1 %v993_v19  ;;  %11823 = vmatprep.subr.bf16.mxu0 %v11822_v5  ;;  %v1013_v38 = vadd.f32 %v1012_v4, %v13286_v8 }
 0x33d   : > { %11825 = vmatpush3.bf16.xpose.msra.mxu0 %v11822_v5  ;;  %11008 = vmatprep.mubr.f32.mxu1 %v1011_v22 }
 0x33e   : > { %v1016_v63 = vpop.f32.mrb[30].mxu1  ;;  %11831 = vmatprep.subr.bf16.mxu0 %v13292_v27 }
 0x33f   : > { %v1017_v24 = vadd.f32 %v1016_v63, %v13273_v52  ;;  %v1018_v45 = vpop.f32.mrb[31].mxu1  ;;  %v15629_v52 = vlaneseq }
 0x340   : > { %v1019_v43 = vadd.f32 %v1018_v45, %v13286_v8 }
 0x341   : > { %v13358_v60 = vand.u32 127, %v15629_v52 }
 0x342   : > { %v11826_v28 = vpack.c.bf16 %v1019_v43, %v1013_v38 }
 0x343   : > { %15630 = vst [vmem:[#allocation23_spill] sm:$0xff] %v13358_v60  ;;  %vm786_vm1 = vcmp.lt.s32.totalorder %v13358_v60, 13 }
 0x344   : > { %11002 = vmatmul.mubr.f32.vlgmr.msra.gmra.mrb[38].mxu0 %v1005_v51  ;;  %11827 = vmatprep.subr.bf16.mxu1 %v11826_v28 }
 0x345   : > { %11829 = vmatpush3.bf16.xpose.msra.mxu1 %v11826_v28  ;;  %11833 = vmatpush3.bf16.msra.mxu0 %v13292_v27 }
 0x346   : > { %11835 = vmatprep.subr.bf16.mxu1 %v13297_v55  ;;  %11839 = vmatprep.subr.bf16.mxu0 %v13304_v15 }
 0x34c   : > { %11009 = vmatmul.mubr.f32.vlgmr.msra.gmra.mrb[38].mxu1 %v1017_v24 }
 0x34d   : > { %11837 = vmatpush3.bf16.msra.mxu1 %v13297_v55 }
 0x34e   : > { %11843 = vmatprep.subr.bf16.mxu1 %v13309_v40 }
 0x3e7   : > { %v10961_v8 = vpop.f32.mrb[32].mxu0 }
 0x3e8   : > { %v1232_v32 = vpop.f32.mrb[33].mxu0  ;;  %v13393_v43 = vsel %vm786_vm1, %v10961_v8, -1e+30 }
 0x3e9   : > { %v13363_v62 = vsel %vm786_vm1, %v1232_v32, -1e+30  ;;  %v1787_v28 = vsel %vm329_vm0, %v13393_v43, -inf }
 0x3ea   : > { %v1784_v27 = vsel %vm329_vm0, %v13363_v62, -inf }
 0x3eb   : > { %1785 = vmax.xlane.f32.xlu0 %v1784_v27 }
 0x3ef   : > { %v10968_v51 = vpop.f32.mrb[32].mxu1 }
 0x3f0   : > { %v13369_v55 = vsel %vm786_vm1, %v10968_v51, -1e+30  ;;  %v1307_v7 = vpop.f32.mrb[33].mxu1 }
 0x3f1   : > { %v13373_v12 = vsel %vm786_vm1, %v1307_v7, -1e+30  ;;  %v1793_v13 = vsel %vm329_vm0, %v13369_v55, -inf }
 0x3f2   : > { %1794 = vmax.xlane.f32.xlu1 %v1793_v13  ;;  %v1790_v19 = vsel %vm329_vm0, %v13373_v12, -inf }
 0x3f3   : > { %1791 = vmax.xlane.f32.xlu0 %v1790_v19 }
 0x3f7   : > { %v10975_v5 = vpop.f32.mrb[34].mxu0 }
 0x3f8   : > { %v1382_v14 = vpop.f32.mrb[35].mxu0 }
 0x3ff   : > { %v10982_v22 = vpop.f32.mrb[34].mxu1 }
 0x400   : > { %v13381_v4 = vsel %vm786_vm1, %v10982_v22, -1e+30  ;;  %v1457_v63 = vpop.f32.mrb[35].mxu1 }
 0x401   : > { %v13385_v24 = vsel %vm786_vm1, %v1457_v63, -1e+30  ;;  %v1805_v45 = vsel %vm329_vm0, %v13381_v4, -inf }
 0x402   : > { %1806 = vmax.xlane.f32.xlu1 %v1805_v45  ;;  %v1802_v38 = vsel %vm329_vm0, %v13385_v24, -inf }
 0x403   : > { %1803 = vmax.xlane.f32.xlu0 %v1802_v38 }
 0x407   : > { %v10989_v52 = vpop.f32.mrb[36].mxu0  ;;  %1788 = vmax.xlane.f32.xlu0 %v1787_v28 }
 0x408   : > { %v1532_v32 = vpop.f32.mrb[37].mxu0  ;;  %v13433_v11 = vsel %vm786_vm1, %v10989_v52, -1e+30 }
 0x40f   : > { %v10996_v27 = vpop.f32.mrb[36].mxu1 }
 0x410   : > { %v1607_v51 = vpop.f32.mrb[37].mxu1  ;;  %v13405_v8 = vsel %vm786_vm1, %v10996_v27, -1e+30 }
 0x411   : > { %v13399_v7 = vsel %vm786_vm1, %v1607_v51, -1e+30  ;;  %v1817_v19 = vsel %vm329_vm0, %v13405_v8, -inf }
 0x412   : > { %v1814_v13 = vsel %vm329_vm0, %v13399_v7, -inf }
 0x413   : > { %1815 = vmax.xlane.f32.xlu1 %v1814_v13  ;;  %v13421_v13 = vsel %vm786_vm1, %v10975_v5, -1e+30 }
 0x417   : > { %v11003_v22 = vpop.f32.mrb[38].mxu0  ;;  %1818 = vmax.xlane.f32.xlu1 %v1817_v19 }
 0x418   : > { %v1682_v63 = vpop.f32.mrb[39].mxu0 }
 0x41f   : > { %v11010_v45 = vpop.f32.mrb[38].mxu1 }
 0x420   : > { %v13411_v38 = vsel %vm786_vm1, %v11010_v45, -1e+30  ;;  %v1757_v28 = vpop.f32.mrb[39].mxu1  ;;  %v13427_v45 = vsel %vm786_vm1, %v1382_v14, -1e+30  ;;  %v1811_v14 = vsel %vm329_vm0, %v13433_v11, -inf }
 0x421   : > { %v13415_v51 = vsel %vm786_vm1, %v1757_v28, -1e+30  ;;  %v1829_v27 = vsel %vm329_vm0, %v13411_v38, -inf  ;;  %v1799_v28 = vsel %vm329_vm0, %v13421_v13, -inf  ;;  %v1796_v5 = vsel %vm329_vm0, %v13427_v45, -inf }
 0x422   : > { %1830 = vmax.xlane.f32.xlu1 %v1829_v27  ;;  %v1826_v19 = vsel %vm329_vm0, %v13415_v51, -inf  ;;  %v13439_v27 = vsel %vm786_vm1, %v1532_v32, -1e+30 }
 0x423   : > { %1827 = vmax.xlane.f32.xlu0 %v1826_v19  ;;  %v13445_v19 = vsel %vm786_vm1, %v11003_v22, -1e+30  ;;  %v1808_v52 = vsel %vm329_vm0, %v13439_v27, -inf }
 0x424   : > { %v1823_v32 = vsel %vm329_vm0, %v13445_v19, -inf }
 0x426   : > { %1800 = vmax.xlane.f32.xlu1 %v1799_v28  ;;  %v13451_v28 = vsel %vm786_vm1, %v1682_v63, -1e+30 }
 0x427   : > { %1797 = vmax.xlane.f32.xlu0 %v1796_v5  ;;  %v1820_v5 = vsel %vm329_vm0, %v13451_v28, -inf }
 0x42a   : > { %1812 = vmax.xlane.f32.xlu1 %v1811_v14 }
 0x42b   : > { %1809 = vmax.xlane.f32.xlu0 %v1808_v52 }
 0x42e   : > { %1824 = vmax.xlane.f32.xlu1 %v1823_v32 }
 0x42f   : > { %1821 = vmax.xlane.f32.xlu0 %v1820_v5 }
 0x478   : > { %v1786_v18 = vpop.xlane.xlu0 %1785 }
 0x479   : > { %v1832_v22 = vsub.f32 %v13363_v62, %v1786_v18 }
 0x47b   : > { %v1848_v14 = vmul.f32 1.442695, %v1832_v22 }
 0x47d   : > { %12370 = vpow2.f32 %v1848_v14 }
 0x47f   : > { %v1795_v17 = vpop.xlane.xlu1 %1794 }
 0x480   : > { %v1835_v10 = vsub.f32 %v13369_v55, %v1795_v17  ;;  %v1792_v9 = vpop.xlane.xlu0 %1791 }
 0x481   : > { %v1834_v63 = vsub.f32 %v13373_v12, %v1792_v9 }
 0x482   : > { %v1854_v52 = vmul.f32 1.442695, %v1835_v10 }
 0x483   : > { %v1852_v2 = vmul.f32 1.442695, %v1834_v63 }
 0x484   : > { %12372 = vpow2.f32 %v1854_v52 }
 0x485   : > { %12374 = vpow2.f32 %v1852_v2 }
 0x487   : > { %v12371_v32 = vpop.eup %12370 }
 0x488   : > { %v13462_v1 = vsel %vm786_vm1, %v12371_v32, 0.0 }
 0x489   : > { %v1896_v18 = vsel %vm329_vm0, %v13462_v1, 0.0 }
 0x48a   : > { %1897 = vadd.xlane.f32.xlu0 %v1896_v18 }
 0x48e   : > { %v12373_v62 = vpop.eup %12372 }
 0x48f   : > { %v12375_v5 = vpop.eup %12374  ;;  %v1807_v22 = vpop.xlane.xlu1 %1806  ;;  %v13468_v17 = vsel %vm786_vm1, %v12373_v62, 0.0 }
 0x490   : > { %v1839_v9 = vsub.f32 %v13381_v4, %v1807_v22  ;;  %v1804_v10 = vpop.xlane.xlu0 %1803  ;;  %v1905_v2 = vsel %vm329_vm0, %v13468_v17, 0.0  ;;  %v13475_v55 = vsel %vm786_vm1, %v12375_v5, 0.0 }
 0x491   : > { %v1838_v12 = vsub.f32 %v13385_v24, %v1804_v10  ;;  %1906 = vadd.xlane.f32.xlu1 %v1905_v2  ;;  %v1902_v14 = vsel %vm329_vm0, %v13475_v55, 0.0 }
 0x492   : > { %v1862_v63 = vmul.f32 1.442695, %v1839_v9  ;;  %1903 = vadd.xlane.f32.xlu0 %v1902_v14 }
 0x493   : > { %v1860_v52 = vmul.f32 1.442695, %v1838_v12 }
 0x494   : > { %12376 = vpow2.f32 %v1862_v63  ;;  %v1789_v32 = vpop.xlane.xlu0 %1788 }
 0x495   : > { %12378 = vpow2.f32 %v1860_v52  ;;  %v1833_v4 = vsub.f32 %v13393_v43, %v1789_v32 }
 0x497   : > { %v1850_v18 = vmul.f32 1.442695, %v1833_v4 }
 0x499   : > { %12380 = vpow2.f32 %v1850_v18 }
 0x49e   : > { %v12377_v62 = vpop.eup %12376 }
 0x49f   : > { %v12379_v22 = vpop.eup %12378  ;;  %v13483_v5 = vsel %vm786_vm1, %v12377_v62, 0.0 }
 0x4a0   : > { %v1816_v24 = vpop.xlane.xlu1 %1815  ;;  %v1917_v10 = vsel %vm329_vm0, %v13483_v5, 0.0  ;;  %v13489_v9 = vsel %vm786_vm1, %v12379_v22, 0.0 }
 0x4a1   : > { %v1842_v2 = vsub.f32 %v13399_v7, %v1816_v24  ;;  %1918 = vadd.xlane.f32.xlu1 %v1917_v10  ;;  %v1914_v43 = vsel %vm329_vm0, %v13489_v9, 0.0 }
 0x4a2   : > { %1915 = vadd.xlane.f32.xlu0 %v1914_v43 }
 0x4a3   : > { %v12381_v12 = vpop.eup %12380  ;;  %v1868_v14 = vmul.f32 1.442695, %v1842_v2 }
 0x4a4   : > { %v1819_v63 = vpop.xlane.xlu1 %1818  ;;  %v13496_v52 = vsel %vm786_vm1, %v12381_v12, 0.0 }
 0x4a5   : > { %12382 = vpow2.f32 %v1868_v14  ;;  %v1843_v32 = vsub.f32 %v13405_v8, %v1819_v63  ;;  %v1899_v4 = vsel %vm329_vm0, %v13496_v52, 0.0 }
 0x4a6   : > { %1900 = vadd.xlane.f32.xlu0 %v1899_v4 }
 0x4a7   : > { %v1870_v7 = vmul.f32 1.442695, %v1843_v32 }
 0x4a9   : > { %12384 = vpow2.f32 %v1870_v7 }
 0x4af   : > { %v12383_v18 = vpop.eup %12382  ;;  %v1831_v62 = vpop.xlane.xlu1 %1830 }
 0x4b0   : > { %v1847_v22 = vsub.f32 %v13411_v38, %v1831_v62  ;;  %v1828_v24 = vpop.xlane.xlu0 %1827  ;;  %v13504_v10 = vsel %vm786_vm1, %v12383_v18, 0.0 }
 0x4b1   : > { %v1846_v2 = vsub.f32 %v13415_v51, %v1828_v24  ;;  %v1926_v8 = vsel %vm329_vm0, %v13504_v10, 0.0 }
 0x4b2   : > { %v1878_v43 = vmul.f32 1.442695, %v1847_v22  ;;  %1927 = vadd.xlane.f32.xlu1 %v1926_v8 }
 0x4b3   : > { %v12385_v12 = vpop.eup %12384  ;;  %v1876_v14 = vmul.f32 1.442695, %v1846_v2  ;;  %v1801_v63 = vpop.xlane.xlu1 %1800 }
 0x4b4   : > { %12386 = vpow2.f32 %v1878_v43  ;;  %v1837_v32 = vsub.f32 %v13421_v13, %v1801_v63  ;;  %v1798_v4 = vpop.xlane.xlu0 %1797  ;;  %v13512_v38 = vsel %vm786_vm1, %v12385_v12, 0.0 }
 0x4b5   : > { %12388 = vpow2.f32 %v1876_v14  ;;  %v1836_v7 = vsub.f32 %v13427_v45, %v1798_v4  ;;  %v1929_v51 = vsel %vm329_vm0, %v13512_v38, 0.0 }
 0x4b6   : > { %v1858_v18 = vmul.f32 1.442695, %v1837_v32  ;;  %1930 = vadd.xlane.f32.xlu1 %v1929_v51 }
 0x4b7   : > { %v1856_v62 = vmul.f32 1.442695, %v1836_v7  ;;  %v1813_v22 = vpop.xlane.xlu1 %1812 }
 0x4b8   : > { %12390 = vpow2.f32 %v1858_v18  ;;  %v1841_v24 = vsub.f32 %v13433_v11, %v1813_v22  ;;  %v1810_v2 = vpop.xlane.xlu0 %1809 }
 0x4b9   : > { %12392 = vpow2.f32 %v1856_v62  ;;  %v1840_v13 = vsub.f32 %v13439_v27, %v1810_v2 }
 0x4ba   : > { %v1866_v8 = vmul.f32 1.442695, %v1841_v24 }
 0x4bb   : > { %v1864_v43 = vmul.f32 1.442695, %v1840_v13  ;;  %v1825_v12 = vpop.xlane.xlu1 %1824 }
 0x4bc   : > { %12394 = vpow2.f32 %v1866_v8  ;;  %v1845_v45 = vsub.f32 %v13445_v19, %v1825_v12  ;;  %v1822_v14 = vpop.xlane.xlu0 %1821 }
 0x4bd   : > { %12396 = vpow2.f32 %v1864_v43  ;;  %v1844_v63 = vsub.f32 %v13451_v28, %v1822_v14 }
 0x4be   : > { %v12387_v32 = vpop.eup %12386  ;;  %v1874_v4 = vmul.f32 1.442695, %v1845_v45 }
 0x4bf   : > { %v12389_v7 = vpop.eup %12388  ;;  %v1872_v51 = vmul.f32 1.442695, %v1844_v63  ;;  %v13523_v11 = vsel %vm786_vm1, %v12387_v32, 0.0 }
 0x4c0   : > { %12398 = vpow2.f32 %v1874_v4  ;;  %v1941_v27 = vsel %vm329_vm0, %v13523_v11, 0.0  ;;  %v13529_v18 = vsel %vm786_vm1, %v12389_v7, 0.0 }
 0x4c1   : > { %12400 = vpow2.f32 %v1872_v51  ;;  %1942 = vadd.xlane.f32.xlu1 %v1941_v27  ;;  %v1938_v19 = vsel %vm329_vm0, %v13529_v18, 0.0 }
 0x4c2   : > { %v12391_v28 = vpop.eup %12390  ;;  %1939 = vadd.xlane.f32.xlu0 %v1938_v19 }
 0x4c3   : > { %v12393_v62 = vpop.eup %12392  ;;  %v13535_v22 = vsel %vm786_vm1, %v12391_v28, 0.0 }
 0x4c4   : > { %v1911_v24 = vsel %vm329_vm0, %v13535_v22, 0.0  ;;  %v13541_v2 = vsel %vm786_vm1, %v12393_v62, 0.0 }
 0x4c5   : > { %1912 = vadd.xlane.f32.xlu1 %v1911_v24  ;;  %v1908_v13 = vsel %vm329_vm0, %v13541_v2, 0.0 }
 0x4c6   : > { %v12395_v8 = vpop.eup %12394  ;;  %1909 = vadd.xlane.f32.xlu0 %v1908_v13 }
 0x4c7   : > { %v12397_v43 = vpop.eup %12396  ;;  %v13547_v12 = vsel %vm786_vm1, %v12395_v8, 0.0 }
 0x4c8   : > { %v1923_v45 = vsel %vm329_vm0, %v13547_v12, 0.0  ;;  %v13553_v14 = vsel %vm786_vm1, %v12397_v43, 0.0 }
 0x4c9   : > { %1924 = vadd.xlane.f32.xlu1 %v1923_v45  ;;  %v1920_v63 = vsel %vm329_vm0, %v13553_v14, 0.0 }
 0x4ca   : > { %v12399_v32 = vpop.eup %12398  ;;  %1921 = vadd.xlane.f32.xlu0 %v1920_v63 }
 0x4cb   : > { %v12401_v4 = vpop.eup %12400  ;;  %v13559_v7 = vsel %vm786_vm1, %v12399_v32, 0.0 }
 0x4cc   : > { %v1935_v51 = vsel %vm329_vm0, %v13559_v7, 0.0  ;;  %v13565_v27 = vsel %vm786_vm1, %v12401_v4, 0.0 }
 0x4cd   : > { %1936 = vadd.xlane.f32.xlu1 %v1935_v51  ;;  %v1932_v19 = vsel %vm329_vm0, %v13565_v27, 0.0 }
 0x4ce   : > { %1933 = vadd.xlane.f32.xlu0 %v1932_v19 }
 0x517   : > { %v1898_v28 = vpop.xlane.xlu0 %1897 }
 0x518   : > { %12402 = vrcp.f32 %v1898_v28 }
 0x51e   : > { %v1907_v62 = vpop.xlane.xlu1 %1906 }
 0x51f   : > { %12404 = vrcp.f32 %v1907_v62  ;;  %v1904_v24 = vpop.xlane.xlu0 %1903 }
 0x520   : > { %12406 = vrcp.f32 %v1904_v24 }
 0x522   : > { %v12403_v13 = vpop.eup %12402 }
 0x523   : > { %v1960_v8 = vmul.f32 %v12403_v13, %v1898_v28 }
 0x525   : > { %v1976_v43 = vsub.f32 2.0, %v1960_v8 }
 0x527   : > { %v1992_v45 = vmul.f32 %v12403_v13, %v1976_v43 }
 0x529   : > { %v12405_v63 = vpop.eup %12404  ;;  %v2008_v32 = vmul.f32 %v1992_v45, %v13462_v1 }
 0x52a   : > { %v12407_v4 = vpop.eup %12406  ;;  %v1963_v58 = vmul.f32 %v12405_v63, %v1907_v62 }
 0x52b   : > { %v1962_v51 = vmul.f32 %v12407_v4, %v1904_v24  ;;  %11015 = vmatprep.mubr.msk.f32.mxu0 %vm329_vm0, %v2008_v32 }
 0x52c   : > { %v1979_v57 = vsub.f32 2.0, %v1963_v58 }
 0x52d   : > { %v1978_v19 = vsub.f32 2.0, %v1962_v51 }
 0x52e   : > { %v1995_v50 = vmul.f32 %v12405_v63, %v1979_v57  ;;  %v1919_v49 = vpop.xlane.xlu1 %1918 }
 0x52f   : > { %v1994_v42 = vmul.f32 %v12407_v4, %v1978_v19  ;;  %12408 = vrcp.f32 %v1919_v49  ;;  %v1916_v41 = vpop.xlane.xlu0 %1915 }
 0x530   : > { %12410 = vrcp.f32 %v1916_v41  ;;  %v2011_v13 = vmul.f32 %v1995_v50, %v13468_v17 }
 0x531   : > { %v2010_v28 = vmul.f32 %v1994_v42, %v13475_v55 }
 0x533   : > { %11022 = vmatprep.mubr.msk.f32.mxu1 %vm329_vm0, %v2010_v28  ;;  %v1901_v1 = vpop.xlane.xlu0 %1900 }
 0x534   : > { %12412 = vrcp.f32 %v1901_v1  ;;  %11023 = vmatmul.mubr.msk.f32.vlgmr.msra.gmra.mrb[40].mxu1 %vm329_vm0, %v2011_v13 }
 0x535   : > { %11845 = vmatpush3.bf16.msra.mxu1 %v13309_v40 }
 0x536   : > { %11851 = vmatprep.subr.bf16.mxu1 %v13321_v39 }
 0x539   : > { %v12409_v57 = vpop.eup %12408 }
 0x53a   : > { %v12411_v58 = vpop.eup %12410  ;;  %v1967_v62 = vmul.f32 %v12409_v57, %v1919_v49 }
 0x53b   : > { %v1966_v24 = vmul.f32 %v12411_v58, %v1916_v41 }
 0x53c   : > { %v1983_v8 = vsub.f32 2.0, %v1967_v62  ;;  %v10130_v62 = vld [vmem:[%s15578_s3 + $0x50] sm:$0xff] }
 0x53d   : > { %v1982_v43 = vsub.f32 2.0, %v1966_v24 }
 0x53e   : > { %v12413_v45 = vpop.eup %12412  ;;  %v1999_v42 = vmul.f32 %v12409_v57, %v1983_v8 }
 0x53f   : > { %v1998_v55 = vmul.f32 %v12411_v58, %v1982_v43  ;;  %v1961_v50 = vmul.f32 %v12413_v45, %v1901_v1  ;;  %v1928_v17 = vpop.xlane.xlu1 %1927 }
 0x540   : > { %12414 = vrcp.f32 %v1928_v17  ;;  %v2015_v4 = vmul.f32 %v1999_v42, %v13483_v5 }
 0x541   : > { %v1977_v63 = vsub.f32 2.0, %v1961_v50  ;;  %v2014_v32 = vmul.f32 %v1998_v55, %v13489_v9 }
 0x543   : > { %v1993_v40 = vmul.f32 %v12413_v45, %v1977_v63  ;;  %v1931_v51 = vpop.xlane.xlu1 %1930  ;;  %11036 = vmatprep.mubr.msk.f32.mxu1 %vm329_vm0, %v2014_v32 }
 0x544   : > { %12416 = vrcp.f32 %v1931_v51  ;;  %11037 = vmatmul.mubr.msk.f32.vlgmr.msra.gmra.mrb[42].mxu1 %vm329_vm0, %v2015_v4 }
 0x545   : > { %v2009_v41 = vmul.f32 %v1993_v40, %v13496_v52  ;;  %11853 = vmatpush3.bf16.msra.mxu1 %v13321_v39 }
 0x546   : > { %11859 = vmatprep.subr.bf16.mxu1 %v13333_v25 }
 0x547   : > { %11016 = vmatmul.mubr.msk.f32.vlgmr.msra.gmra.mrb[40].mxu0 %vm329_vm0, %v2009_v41 }
 0x548   : > { %11841 = vmatpush3.bf16.msra.mxu0 %v13304_v15  ;;  %v10127_v15 = vld [vmem:[%s15578_s3 + $0x38] sm:$0xff] }
 0x549   : > { %11847 = vmatprep.subr.bf16.mxu0 %v13316_v21  ;;  %v11894_v45 = vpack.c.bf16 %v10130_v62, %v10127_v15 }
 0x54a   : > { %v12415_v49 = vpop.eup %12414 }
 0x54b   : > { %v1970_v5 = vmul.f32 %v12415_v49, %v1928_v17 }
 0x54d   : > { %v1986_v9 = vsub.f32 2.0, %v1970_v5 }
 0x54e   : > { %v12417_v19 = vpop.eup %12416  ;;  %v1943_v28 = vpop.xlane.xlu1 %1942 }
 0x54f   : > { %v2002_v13 = vmul.f32 %v12415_v49, %v1986_v9  ;;  %v1971_v1 = vmul.f32 %v12417_v19, %v1931_v51  ;;  %12418 = vrcp.f32 %v1943_v28  ;;  %v1940_v57 = vpop.xlane.xlu0 %1939  ;;  %v10129_v9 = vld [vmem:[%s15578_s3 + $0x48] sm:$0xff] }
 0x550   : > { %12420 = vrcp.f32 %v1940_v57 }
 0x551   : > { %v1987_v52 = vsub.f32 2.0, %v1971_v1  ;;  %v2018_v39 = vmul.f32 %v2002_v13, %v13504_v10 }
 0x552   : > { %v1913_v58 = vpop.xlane.xlu1 %1912 }
 0x553   : > { %v2003_v24 = vmul.f32 %v12417_v19, %v1987_v52  ;;  %12422 = vrcp.f32 %v1913_v58  ;;  %11050 = vmatprep.mubr.msk.f32.mxu1 %vm329_vm0, %v2018_v39  ;;  %v1910_v8 = vpop.xlane.xlu0 %1909 }
 0x554   : > { %12424 = vrcp.f32 %v1910_v8 }
 0x555   : > { %v2019_v43 = vmul.f32 %v2003_v24, %v13512_v38 }
 0x556   : > { %v1925_v42 = vpop.xlane.xlu1 %1924 }
 0x557   : > { %12426 = vrcp.f32 %v1925_v42  ;;  %11051 = vmatmul.mubr.msk.f32.vlgmr.msra.gmra.mrb[44].mxu1 %vm329_vm0, %v2019_v43  ;;  %v1922_v10 = vpop.xlane.xlu0 %1921 }
 0x558   : > { %11861 = vmatpush3.bf16.msra.mxu1 %v13333_v25  ;;  %12428 = vrcp.f32 %v1922_v10  ;;  %v10126_v25 = vld [vmem:[%s15578_s3 + $0x30] sm:$0xff] }
 0x559   : > { %v12419_v55 = vpop.eup %12418  ;;  %11895 = vmatprep.subr.bf16.mxu1 %v11894_v45  ;;  %v11896_v39 = vpack.c.bf16 %v10129_v9, %v10126_v25  ;;  %v2674_v9 = vld [vmem:[%s15579_s4 + $0x10] sm:$0xff] }
 0x55a   : > { %v12421_v50 = vpop.eup %12420  ;;  %v1975_v17 = vmul.f32 %v12419_v55, %v1943_v28  ;;  %v1937_v63 = vpop.xlane.xlu1 %1936 }
 0x55b   : > { %v1974_v32 = vmul.f32 %v12421_v50, %v1940_v57  ;;  %12430 = vrcp.f32 %v1937_v63  ;;  %v1934_v4 = vpop.xlane.xlu0 %1933 }
 0x55c   : > { %v1991_v40 = vsub.f32 2.0, %v1975_v17  ;;  %12432 = vrcp.f32 %v1934_v4 }
 0x55d   : > { %v12423_v38 = vpop.eup %12422  ;;  %v1990_v51 = vsub.f32 2.0, %v1974_v32  ;;  %v15631_v32 = vmov 0.0  }
 0x55e   : > { %v12425_v41 = vpop.eup %12424  ;;  %v2007_v49 = vmul.f32 %v12419_v55, %v1991_v40  ;;  %v1965_v5 = vmul.f32 %v12423_v38, %v1913_v58 }
 0x55f   : > { %v2006_v19 = vmul.f32 %v12421_v50, %v1990_v51  ;;  %v1964_v28 = vmul.f32 %v12425_v41, %v1910_v8 }
 0x560   : > { %v1981_v13 = vsub.f32 2.0, %v1965_v5  ;;  %v2023_v62 = vmul.f32 %v2007_v49, %v13523_v11 }
 0x561   : > { %v12427_v1 = vpop.eup %12426  ;;  %v1980_v57 = vsub.f32 2.0, %v1964_v28  ;;  %v2022_v52 = vmul.f32 %v2006_v19, %v13529_v18  ;;  %v2676_v28 = vld [vmem:[%s15579_s4 + $0x20] sm:$0xff] }
 0x562   : > { %v12429_v15 = vpop.eup %12428  ;;  %v1997_v58 = vmul.f32 %v12423_v38, %v1981_v13  ;;  %v1969_v24 = vmul.f32 %v12427_v1, %v1925_v42  ;;  %v2677_v13 = vld [vmem:[%s15579_s4 + $0x28] sm:$0xff] }
 0x563   : > { %v1996_v43 = vmul.f32 %v12425_v41, %v1980_v57  ;;  %v1968_v45 = vmul.f32 %v12429_v15, %v1922_v10  ;;  %11064 = vmatprep.mubr.msk.f32.mxu1 %vm329_vm0, %v2022_v52  ;;  %v2672_v10 = vld [vmem:[%s15579_s4] sm:$0xff]  ;;  %v2673_v41 = vld [vmem:[%s15579_s4 + $0x8] sm:$0xff] }
 0x564   : > { %v1985_v55 = vsub.f32 2.0, %v1969_v24  ;;  %11065 = vmatmul.mubr.msk.f32.vlgmr.msra.gmra.mrb[46].mxu1 %vm329_vm0, %v2023_v62  ;;  %v2013_v40 = vmul.f32 %v1997_v58, %v13535_v22  ;;  %v11862_v5 = vpack.c.bf16 %v2673_v41, %v2672_v10  ;;  %v2680_v57 = vld [vmem:[%s15579_s4 + $0x40] sm:$0xff]  ;;  %v2681_v52 = vld [vmem:[%s15579_s4 + $0x48] sm:$0xff]  ;;  %v2683_v62 = vld [vmem:[%s15579_s4 + $0x58] sm:$0xff] }
 0x565   : > { %v12431_v50 = vpop.eup %12430  ;;  %v1984_v8 = vsub.f32 2.0, %v1968_v45  ;;  %11897 = vmatpush1.bf16.msra.mxu1 %v11896_v39  ;;  %v2012_v17 = vmul.f32 %v1996_v43, %v13541_v2  ;;  %2938 = vmatprep.mubr.f32.mxu1 %v15631_v32  ;;  %v11878_v39 = vpack.c.bf16 %v2681_v52, %v2680_v57  ;;  %v2684_v24 = vld [vmem:[%s15579_s4 + $0x60] sm:$0xff]  ;;  %v2685_v43 = vld [vmem:[%s15579_s4 + $0x68] sm:$0xff] }
 0x566   : > { %v12433_v18 = vpop.eup %12432  ;;  %v2001_v11 = vmul.f32 %v12427_v1, %v1985_v55  ;;  %v1973_v38 = vmul.f32 %v12431_v50, %v1937_v63  ;;  %v11886_v45 = vpack.c.bf16 %v2685_v43, %v2684_v24  ;;  %v2686_v55 = vld [vmem:[%s15579_s4 + $0x70] sm:$0xff] }
 0x567   : > { %v2000_v42 = vmul.f32 %v12429_v15, %v1984_v8  ;;  %v1972_v51 = vmul.f32 %v12433_v18, %v1934_v4  ;;  %11029 = vmatprep.mubr.msk.f32.mxu0 %vm329_vm0, %v2012_v17  ;;  %v2682_v15 = vld [vmem:[%s15579_s4 + $0x50] sm:$0xff]  ;;  %v10128_v17 = vld [vmem:[%s15578_s3 + $0x40] sm:$0xff] }
 0x568   : > { %v1989_v2 = vsub.f32 2.0, %v1973_v38  ;;  %11030 = vmatmul.mubr.msk.f32.vlgmr.msra.gmra.mrb[42].mxu0 %vm329_vm0, %v2013_v40  ;;  %10133 = vmatmul.mubr.msk.f32.vlgmr.msra.gmra.mrb[48].mxu1 %vm329_vm0, %v13107_v37  ;;  %v2017_v4 = vmul.f32 %v2001_v11, %v13547_v12  ;;  %v11882_v58 = vpack.c.bf16 %v2683_v62, %v2682_v15 }
 0x569   : > { %v1988_v22 = vsub.f32 2.0, %v1972_v51  ;;  %11849 = vmatpush3.bf16.msra.mxu0 %v13316_v21  ;;  %v2016_v63 = vmul.f32 %v2000_v42, %v13553_v14  ;;  %2944 = vmatprep.mubr.f32.mxu1 %v15631_v32  ;;  %v2675_v21 = vld [vmem:[%s15579_s4 + $0x18] sm:$0xff] }
 0x56a   : > { %v2005_v49 = vmul.f32 %v12431_v50, %v1989_v2  ;;  %11855 = vmatprep.subr.bf16.mxu0 %v13328_v59  ;;  %v11866_v19 = vpack.c.bf16 %v2675_v21, %v2674_v9  ;;  %v2687_v50 = vld [vmem:[%s15579_s4 + $0x78] sm:$0xff] }
 0x56b   : > { %v2004_v25 = vmul.f32 %v12433_v18, %v1988_v22  ;;  %11043 = vmatprep.mubr.msk.f32.mxu0 %vm329_vm0, %v2016_v63  ;;  %v11890_v8 = vpack.c.bf16 %v2687_v50, %v2686_v55  ;;  %v10131_v18 = vld [vmem:[%s15578_s3 + $0x58] sm:$0xff] }
 0x56c   : > { %11044 = vmatmul.mubr.msk.f32.vlgmr.msra.gmra.mrb[44].mxu0 %vm329_vm0, %v2017_v4  ;;  %10134 = vmatmul.mubr.msk.f32.gmra.mrb[50].mxu1 %vm329_vm0, %v13119_v61  ;;  %v2021_v14 = vmul.f32 %v2005_v49, %v13559_v7  ;;  %v2678_v7 = vld [vmem:[%s15579_s4 + $0x30] sm:$0xff]  ;;  %v11898_v40 = vpack.c.bf16 %v10131_v18, %v10128_v17 }
 0x56d   : > { %11857 = vmatpush3.bf16.msra.mxu0 %v13328_v59  ;;  %v2020_v12 = vmul.f32 %v2004_v25, %v13565_v27  ;;  %2950 = vmatprep.mubr.f32.mxu1 %v15631_v32  ;;  %v11870_v59 = vpack.c.bf16 %v2677_v13, %v2676_v28  ;;  %v2679_v27 = vld [vmem:[%s15579_s4 + $0x38] sm:$0xff] }
 0x56e   : > { %11863 = vmatprep.subr.bf16.mxu0 %v11862_v5  ;;  %v11874_v1 = vpack.c.bf16 %v2679_v27, %v2678_v7  ;;  %v13728_v63 = vld [vmem:[%s15576_s1 + $0x31] ss:$8 sm:$0x7] }
 0x56f   : > { %11057 = vmatprep.mubr.msk.f32.mxu0 %vm329_vm0, %v2020_v12 }
 0x570   : > { %11058 = vmatmul.mubr.msk.f32.vlgmr.msra.gmra.mrb[46].mxu0 %vm329_vm0, %v2021_v14  ;;  %10135 = vmatmul.mubr.msk.f32.gmra.mrb[52].mxu1 %vm329_vm0, %v13123_v3 }
 0x571   : > { %2956 = vmatprep.mubr.f32.mxu1 %v15631_v32  ;;  %11865 = vmatpush3.bf16.msra.mxu0 %v11862_v5  ;;  %v13732_v5 = vrot.slane %v13728_v63, %v13267_v20 }
 0x572   : > { %11867 = vmatprep.subr.bf16.mxu0 %v11866_v19 }
 0x574   : > { %10136 = vmatmul.mubr.msk.f32.gmra.mrb[54].mxu1 %vm329_vm0, %v13136_v16 }
 0x575   : > { %2962 = vmatprep.mubr.f32.mxu1 %v15631_v32  ;;  %11869 = vmatpush3.bf16.msra.mxu0 %v11866_v19  ;;  %v13737_v19 = vrot.slane %v13728_v63, %v13279_v56 }
 0x576   : > { %11871 = vmatprep.subr.bf16.mxu0 %v11870_v59 }
 0x578   : > { %10137 = vmatmul.mubr.msk.f32.gmra.mrb[56].mxu1 %vm329_vm0, %v13140_v29 }
 0x579   : > { %2968 = vmatprep.mubr.f32.mxu1 %v15631_v32  ;;  %11873 = vmatpush3.bf16.msra.mxu0 %v11870_v59 }
 0x57a   : > { %11875 = vmatprep.subr.bf16.mxu0 %v11874_v1 }
 0x57c   : > { %10138 = vmatmul.mubr.msk.f32.gmra.mrb[58].mxu1 %vm329_vm0, %v13153_v47 }
 0x57d   : > { %2974 = vmatprep.mubr.f32.mxu1 %v15631_v32  ;;  %11877 = vmatpush3.bf16.msra.mxu0 %v11874_v1 }
 0x57e   : > { %11879 = vmatprep.subr.bf16.mxu0 %v11878_v39 }
 0x580   : > { %10139 = vmatmul.mubr.msk.f32.gmra.mrb[60].mxu1 %vm329_vm0, %v13157_v53 }
 0x581   : > { %2980 = vmatprep.mubr.f32.mxu1 %v15631_v32  ;;  %11881 = vmatpush3.bf16.msra.mxu0 %v11878_v39 }
 0x582   : > { %11883 = vmatprep.subr.bf16.mxu0 %v11882_v58 }
 0x584   : > { %10140 = vmatmul.mubr.msk.f32.gmra.mrb[62].mxu1 %vm329_vm0, %v13170_v0 }
 0x585   : > { %2986 = vmatprep.mubr.f32.mxu1 %v15631_v32  ;;  %11885 = vmatpush3.bf16.msra.mxu0 %v11882_v58 }
 0x586   : > { %11887 = vmatprep.subr.bf16.mxu0 %v11886_v45 }
 0x588   : > { %10141 = vmatmul.mubr.msk.f32.gmra.mrb[64].mxu1 %vm329_vm0, %v13174_v6 }
 0x589   : > { %2992 = vmatprep.mubr.f32.mxu1 %v15631_v32  ;;  %11889 = vmatpush3.bf16.msra.mxu0 %v11886_v45 }
 0x58a   : > { %11891 = vmatprep.subr.bf16.mxu0 %v11890_v8 }
 0x58c   : > { %10142 = vmatmul.mubr.msk.f32.gmra.mrb[66].mxu1 %vm329_vm0, %v13187_v23 }
 0x58d   : > { %2998 = vmatprep.mubr.f32.mxu1 %v15631_v32  ;;  %11893 = vmatpush3.bf16.msra.mxu0 %v11890_v8 }
 0x58e   : > { %11899 = vmatprep.subr.bf16.mxu0 %v11898_v40 }
 0x590   : > { %10143 = vmatmul.mubr.msk.f32.gmra.mrb[68].mxu1 %vm329_vm0, %v13191_v46 }
 0x591   : > { %3004 = vmatprep.mubr.f32.mxu1 %v15631_v32 }
 0x594   : > { %10144 = vmatmul.mubr.msk.f32.gmra.mrb[70].mxu1 %vm329_vm0, %v13204_v31 }
 0x595   : > { %3010 = vmatprep.mubr.f32.mxu1 %v15631_v32 }
 0x598   : > { %10145 = vmatmul.mubr.msk.f32.gmra.mrb[72].mxu1 %vm329_vm0, %v13208_v36 }
 0x599   : > { %3016 = vmatprep.mubr.f32.mxu1 %v15631_v32 }
 0x59c   : > { %10146 = vmatmul.mubr.msk.f32.gmra.mrb[74].mxu1 %vm329_vm0, %v13221_v54 }
 0x59d   : > { %3022 = vmatprep.mubr.f32.mxu1 %v15631_v32 }
 0x5a0   : > { %10147 = vmatmul.mubr.msk.f32.gmra.mrb[76].mxu1 %vm329_vm0, %v13225_v44 }
 0x5a1   : > { %3028 = vmatprep.mubr.f32.mxu1 %v15631_v32 }
 0x5a4   : > { %10148 = vmatmul.mubr.msk.f32.gmra.mrb[78].mxu1 %vm329_vm0, %v13236_v48 }
 0x607   : > { %v11024_v11 = vpop.f32.mrb[40].mxu1 }
 0x608   : > { %v2177_v38 = vpop.f32.mrb[41].mxu1 }
 0x617   : > { %v11038_v42 = vpop.f32.mrb[42].mxu1 }
 0x618   : > { %v2339_v51 = vpop.f32.mrb[43].mxu1 }
 0x61a   : > { %v11017_v10 = vpop.f32.mrb[40].mxu0 }
 0x61b   : > { %v2096_v41 = vpop.f32.mrb[41].mxu0 }
 0x61c   : > { %11099 = vmatprep.mubr.f32.mxu0 %v2096_v41 }
 0x61d   : > { %11100 = vmatmul.mubr.f32.vlgmr.msra.gmra.mrb[48].mxu0 %v11017_v10 }
 0x61e   : > { %11102 = vmatprep.mubr.f32.mxu0 %v2177_v38  ;;  %11901 = vmatpush3.bf16.msra.mxu0 %v11898_v40 }
 0x621   : > { %11103 = vmatmul.mubr.f32.gmra.mrb[50].mxu0 %v11024_v11 }
 0x62a   : > { %v11052_v2 = vpop.f32.mrb[44].mxu1 }
 0x62b   : > { %v2501_v22 = vpop.f32.mrb[45].mxu1 }
 0x637   : > { %v11066_v4 = vpop.f32.mrb[46].mxu1 }
 0x638   : > { %v2663_v49 = vpop.f32.mrb[47].mxu1 }
 0x63b   : > { %v11031_v25 = vpop.f32.mrb[42].mxu0  ;;  %v2940_v9 = vpop.f32.mrb[48].mxu1 }
 0x63c   : > { %v2941_v21 = vadd.f32 %v2940_v9, %v13732_v5  ;;  %v2258_v12 = vpop.f32.mrb[43].mxu0  ;;  %v2942_v14 = vpop.f32.mrb[49].mxu1 }
 0x63d   : > { %11105 = vmatprep.mubr.f32.mxu0 %v2258_v12  ;;  %v2943_v27 = vadd.f32 %v2942_v14, %v13737_v19 }
 0x63e   : > { %11106 = vmatmul.mubr.f32.gmra.mrb[52].mxu0 %v11031_v25  ;;  %11155 = vmatprep.mubr.f32.mxu1 %v2941_v21 }
 0x63f   : > { %v11045_v28 = vpop.f32.mrb[44].mxu0  ;;  %11108 = vmatprep.mubr.f32.mxu0 %v2339_v51  ;;  %v2946_v13 = vpop.f32.mrb[50].mxu1 }
 0x640   : > { %v2420_v59 = vpop.f32.mrb[45].mxu0  ;;  %v2948_v7 = vpop.f32.mrb[51].mxu1  ;;  %v2947_v55 = vadd.f32 %v2946_v13, %v13732_v5 }
 0x641   : > { %v2949_v1 = vadd.f32 %v2948_v7, %v13737_v19 }
 0x642   : > { %11109 = vmatmul.mubr.f32.gmra.mrb[54].mxu0 %v11038_v42 }
 0x643   : > { %v11902_v57 = vpack.c.bf16 %v2949_v1, %v2943_v27  ;;  %v11059_v52 = vpop.f32.mrb[46].mxu0  ;;  %11111 = vmatprep.mubr.f32.mxu0 %v2420_v59  ;;  %v2952_v39 = vpop.f32.mrb[52].mxu1 }
 0x644   : > { %v2582_v15 = vpop.f32.mrb[47].mxu0  ;;  %v2954_v62 = vpop.f32.mrb[53].mxu1  ;;  %v2953_v18 = vadd.f32 %v2952_v39, %v13732_v5 }
 0x645   : > { %11903 = vmatprep.subr.bf16.mxu1 %v11902_v57  ;;  %v2955_v43 = vadd.f32 %v2954_v62, %v13737_v19 }
 0x646   : > { %11112 = vmatmul.mubr.f32.gmra.mrb[56].mxu0 %v11045_v28  ;;  %11905 = vmatpush3.bf16.xpose.msra.mxu1 %v11902_v57 }
 0x647   : > { %11114 = vmatprep.mubr.f32.mxu0 %v2501_v22  ;;  %v2958_v58 = vpop.f32.mrb[54].mxu1 }
 0x648   : > { %v2960_v24 = vpop.f32.mrb[55].mxu1  ;;  %v2959_v51 = vadd.f32 %v2958_v58, %v13732_v5 }
 0x649   : > { %v2961_v45 = vadd.f32 %v2960_v24, %v13737_v19 }
 0x64a   : > { %11115 = vmatmul.mubr.f32.gmra.mrb[58].mxu0 %v11052_v2 }
 0x64b   : > { %v11906_v50 = vpack.c.bf16 %v2961_v45, %v2955_v43  ;;  %11117 = vmatprep.mubr.f32.mxu0 %v2582_v15  ;;  %v2964_v8 = vpop.f32.mrb[56].mxu1 }
 0x64c   : > { %v2966_v17 = vpop.f32.mrb[57].mxu1  ;;  %v2965_v22 = vadd.f32 %v2964_v8, %v13732_v5 }
 0x64d   : > { %11156 = vmatmul.mubr.f32.vlgmr.msra.gmra.mrb[80].mxu1 %v2947_v55  ;;  %11907 = vmatprep.subr.bf16.mxu1 %v11906_v50  ;;  %v2967_v38 = vadd.f32 %v2966_v17, %v13737_v19 }
 0x64e   : > { %11118 = vmatmul.mubr.f32.gmra.mrb[60].mxu0 %v11059_v52  ;;  %11909 = vmatpush3.bf16.xpose.msra.mxu1 %v11906_v50 }
 0x64f   : > { %11162 = vmatprep.mubr.f32.mxu1 %v2953_v18  ;;  %11120 = vmatprep.mubr.f32.mxu0 %v2663_v49  ;;  %v2970_v40 = vpop.f32.mrb[58].mxu1 }
 0x650   : > { %v2972_v11 = vpop.f32.mrb[59].mxu1  ;;  %v2971_v21 = vadd.f32 %v2970_v40, %v13732_v5 }
 0x651   : > { %v2973_v42 = vadd.f32 %v2972_v11, %v13737_v19 }
 0x652   : > { %11121 = vmatmul.mubr.f32.gmra.mrb[62].mxu0 %v11066_v4 }
 0x653   : > { %v11910_v10 = vpack.c.bf16 %v2973_v42, %v2967_v38  ;;  %v2976_v41 = vpop.f32.mrb[60].mxu1  ;;  %11127 = vmatprep.mubr.msk.f32.mxu0 %vm329_vm0, %v13107_v37 }
 0x654   : > { %v2978_v2 = vpop.f32.mrb[61].mxu1  ;;  %v2977_v13 = vadd.f32 %v2976_v41, %v13732_v5 }
 0x655   : > { %11163 = vmatmul.mubr.f32.vlgmr.msra.gmra.mrb[82].mxu1 %v2959_v51  ;;  %11911 = vmatprep.subr.bf16.mxu1 %v11910_v10  ;;  %v2979_v25 = vadd.f32 %v2978_v2, %v13737_v19 }
 0x656   : > { %11128 = vmatmul.mubr.msk.f32.vlgmr.msra.gmra.mrb[64].mxu0 %vm329_vm0, %v13119_v61  ;;  %11913 = vmatpush3.bf16.xpose.msra.mxu1 %v11910_v10 }
 0x657   : > { %11169 = vmatprep.mubr.f32.mxu1 %v2965_v22  ;;  %v2982_v49 = vpop.f32.mrb[62].mxu1  ;;  %11130 = vmatprep.mubr.msk.f32.mxu0 %vm329_vm0, %v13123_v3 }
 0x658   : > { %v2984_v4 = vpop.f32.mrb[63].mxu1  ;;  %v2983_v57 = vadd.f32 %v2982_v49, %v13732_v5 }
 0x659   : > { %v2985_v9 = vadd.f32 %v2984_v4, %v13737_v19 }
 0x65a   : > { %11131 = vmatmul.mubr.msk.f32.gmra.mrb[66].mxu0 %vm329_vm0, %v13136_v16 }
 0x65b   : > { %v11914_v12 = vpack.c.bf16 %v2985_v9, %v2979_v25  ;;  %v2988_v14 = vpop.f32.mrb[64].mxu1  ;;  %11133 = vmatprep.mubr.msk.f32.mxu0 %vm329_vm0, %v13140_v29 }
 0x65c   : > { %v2990_v28 = vpop.f32.mrb[65].mxu1  ;;  %v2989_v11 = vadd.f32 %v2988_v14, %v13732_v5 }
 0x65d   : > { %11170 = vmatmul.mubr.f32.vlgmr.msra.gmra.mrb[84].mxu1 %v2971_v21  ;;  %11915 = vmatprep.subr.bf16.mxu1 %v11914_v12  ;;  %v2991_v27 = vadd.f32 %v2990_v28, %v13737_v19 }
 0x65e   : > { %11134 = vmatmul.mubr.msk.f32.gmra.mrb[68].mxu0 %vm329_vm0, %v13153_v47  ;;  %11917 = vmatpush3.bf16.xpose.msra.mxu1 %v11914_v12 }
 0x65f   : > { %11176 = vmatprep.mubr.f32.mxu1 %v2977_v13  ;;  %v2994_v59 = vpop.f32.mrb[66].mxu1  ;;  %11136 = vmatprep.mubr.msk.f32.mxu0 %vm329_vm0, %v13157_v53 }
 0x660   : > { %v2996_v7 = vpop.f32.mrb[67].mxu1  ;;  %v2995_v2 = vadd.f32 %v2994_v59, %v13732_v5 }
 0x661   : > { %v2997_v1 = vadd.f32 %v2996_v7, %v13737_v19  ;;  %v2870_v7 = vrot.slane %v13728_v63, %v13276_v35 }
 0x662   : > { %11137 = vmatmul.mubr.msk.f32.gmra.mrb[70].mxu0 %vm329_vm0, %v13170_v0 }
 0x663   : > { %v11918_v52 = vpack.c.bf16 %v2997_v1, %v2991_v27  ;;  %v3000_v39 = vpop.f32.mrb[68].mxu1  ;;  %11139 = vmatprep.mubr.msk.f32.mxu0 %vm329_vm0, %v13174_v6 }
 0x664   : > { %v3001_v15 = vadd.f32 %v3000_v39, %v13732_v5  ;;  %v3002_v62 = vpop.f32.mrb[69].mxu1 }
 0x665   : > { %11177 = vmatmul.mubr.f32.vlgmr.msra.gmra.mrb[86].mxu1 %v2983_v57  ;;  %11919 = vmatprep.subr.bf16.mxu0 %v11918_v52  ;;  %v3003_v43 = vadd.f32 %v3002_v62, %v13737_v19 }
 0x666   : > { %11140 = vmatmul.mubr.msk.f32.gmra.mrb[72].mxu0 %vm329_vm0, %v13187_v23  ;;  %11190 = vmatprep.mubr.f32.mxu1 %v3001_v15 }
 0x667   : > { %11921 = vmatpush3.bf16.xpose.msra.mxu0 %v11918_v52  ;;  %v3006_v58 = vpop.f32.mrb[70].mxu1  ;;  %11142 = vmatprep.mubr.msk.f32.mxu0 %vm329_vm0, %v13191_v46 }
 0x668   : > { %v3008_v24 = vpop.f32.mrb[71].mxu1  ;;  %v3007_v51 = vadd.f32 %v3006_v58, %v13732_v5 }
 0x669   : > { %v3009_v45 = vadd.f32 %v3008_v24, %v13737_v19 }
 0x66a   : > { %11143 = vmatmul.mubr.msk.f32.gmra.mrb[74].mxu0 %vm329_vm0, %v13204_v31 }
 0x66b   : > { %v11922_v55 = vpack.c.bf16 %v3009_v45, %v3003_v43  ;;  %v3012_v50 = vpop.f32.mrb[72].mxu1  ;;  %11145 = vmatprep.mubr.msk.f32.mxu0 %vm329_vm0, %v13208_v36 }
 0x66c   : > { %v3014_v8 = vpop.f32.mrb[73].mxu1  ;;  %v3013_v4 = vadd.f32 %v3012_v50, %v13732_v5 }
 0x66d   : > { %11923 = vmatprep.subr.bf16.mxu1 %v11922_v55  ;;  %v3015_v38 = vadd.f32 %v3014_v8, %v13737_v19 }
 0x66e   : > { %11146 = vmatmul.mubr.msk.f32.gmra.mrb[76].mxu0 %vm329_vm0, %v13221_v54  ;;  %11925 = vmatpush3.bf16.xpose.msra.mxu1 %v11922_v55 }
 0x66f   : > { %v3018_v17 = vpop.f32.mrb[74].mxu1  ;;  %11148 = vmatprep.mubr.msk.f32.mxu0 %vm329_vm0, %v13225_v44 }
 0x670   : > { %v3019_v18 = vadd.f32 %v3018_v17, %v13732_v5  ;;  %v3020_v40 = vpop.f32.mrb[75].mxu1 }
 0x671   : > { %v3021_v42 = vadd.f32 %v3020_v40, %v13737_v19 }
 0x672   : > { %11149 = vmatmul.mubr.msk.f32.gmra.mrb[78].mxu0 %vm329_vm0, %v13236_v48 }
 0x673   : > { %v11926_v10 = vpack.c.bf16 %v3021_v42, %v3015_v38  ;;  %v3024_v41 = vpop.f32.mrb[76].mxu1  ;;  %11183 = vmatprep.mubr.f32.mxu0 %v2989_v11 }
 0x674   : > { %v3025_v22 = vadd.f32 %v3024_v41, %v13732_v5  ;;  %v3026_v49 = vpop.f32.mrb[77].mxu1 }
 0x675   : > { %11191 = vmatmul.mubr.f32.vlgmr.msra.gmra.mrb[88].mxu1 %v3007_v51  ;;  %11927 = vmatprep.subr.bf16.mxu0 %v11926_v10  ;;  %v3027_v12 = vadd.f32 %v3026_v49, %v13737_v19 }
 0x676   : > { %11184 = vmatmul.mubr.f32.vlgmr.msra.gmra.mrb[80].mxu0 %v2995_v2  ;;  %11204 = vmatprep.mubr.f32.mxu1 %v3025_v22 }
 0x677   : > { %11929 = vmatpush3.bf16.xpose.msra.mxu0 %v11926_v10  ;;  %v3030_v25 = vpop.f32.mrb[78].mxu1  ;;  %11197 = vmatprep.mubr.f32.mxu0 %v3013_v4 }
 0x678   : > { %v3031_v9 = vadd.f32 %v3030_v25, %v13732_v5  ;;  %v3032_v21 = vpop.f32.mrb[79].mxu1 }
 0x679   : > { %v3033_v14 = vadd.f32 %v3032_v21, %v13737_v19 }
 0x67b   : > { %v11930_v28 = vpack.c.bf16 %v3033_v14, %v3027_v12 }
 0x67d   : > { %11931 = vmatprep.subr.bf16.mxu1 %v11930_v28 }
 0x67e   : > { %11198 = vmatmul.mubr.f32.vlgmr.msra.gmra.mrb[82].mxu0 %v3019_v18  ;;  %11933 = vmatpush3.bf16.xpose.msra.mxu1 %v11930_v28 }
 0x685   : > { %11205 = vmatmul.mubr.f32.vlgmr.msra.gmra.mrb[90].mxu1 %v3031_v9 }
 0x720   : > { %v13802_v13 = vpop.f32.mrb[80].mxu1 }
 0x721   : > { %v13804_v59 = vpop.f32.mrb[81].mxu1 }
 0x728   : > { %v13808_v27 = vpop.f32.mrb[82].mxu1 }
 0x729   : > { %v11129_v5 = vpop.f32.mrb[64].mxu0  ;;  %v13810_v1 = vpop.f32.mrb[83].mxu1 }
 0x72a   : > { %v3107_v57 = vadd.f32 %v11129_v5, %v2870_v7  ;;  %v3101_v52 = vpop.f32.mrb[65].mxu0 }
 0x72b   : > { %v3102_v19 = vadd.f32 %v3101_v52, %v2870_v7 }
 0x72d   : > { %v11934_v39 = vpack.c.bf16 %v3107_v57, %v3102_v19  ;;  %v11132_v15 = vpop.f32.mrb[66].mxu0 }
 0x72e   : > { %v3117_v62 = vadd.f32 %v11132_v15, %v2870_v7  ;;  %v3111_v58 = vpop.f32.mrb[67].mxu0 }
 0x72f   : > { %v3112_v24 = vadd.f32 %v3111_v58, %v2870_v7  ;;  %11935 = vmatprep.subr.bf16.mxu0 %v11934_v39 }
 0x730   : > { %v11171_v43 = vpop.f32.mrb[84].mxu1  ;;  %11937 = vmatpush3.bf16.msra.mxu0 %v11934_v39 }
 0x731   : > { %v13812_v45 = vpack.c.bf16 %v3117_v62, %v3112_v24  ;;  %v13816_v63 = vsel %vm786_vm1, %v11171_v43, -1e+30  ;;  %v11135_v55 = vpop.f32.mrb[68].mxu0  ;;  %v3396_v50 = vpop.f32.mrb[85].mxu1 }
 0x732   : > { %v3127_v8 = vadd.f32 %v11135_v55, %v2870_v7  ;;  %v13820_v17 = vsel %vm786_vm1, %v3396_v50, -1e+30  ;;  %v3121_v18 = vpop.f32.mrb[69].mxu0  ;;  %v3811_v40 = vsel %vm329_vm0, %v13816_v63, -inf }
 0x733   : > { %v3122_v11 = vadd.f32 %v3121_v18, %v2870_v7  ;;  %3812 = vmax.xlane.f32.xlu1 %v3811_v40  ;;  %11939 = vmatprep.subr.bf16.mxu0 %v13812_v45  ;;  %v3808_v38 = vsel %vm329_vm0, %v13820_v17, -inf }
 0x734   : > { %3809 = vmax.xlane.f32.xlu0 %v3808_v38 }
 0x735   : > { %v11942_v42 = vpack.c.bf16 %v3127_v8, %v3122_v11  ;;  %v11138_v51 = vpop.f32.mrb[70].mxu0 }
 0x736   : > { %v3137_v10 = vadd.f32 %v11138_v51, %v2870_v7  ;;  %v3131_v41 = vpop.f32.mrb[71].mxu0 }
 0x737   : > { %v3132_v2 = vadd.f32 %v3131_v41, %v2870_v7  ;;  %11943 = vmatprep.subr.bf16.mxu1 %v11942_v42 }
 0x738   : > { %v11178_v22 = vpop.f32.mrb[86].mxu1  ;;  %11945 = vmatpush3.bf16.msra.mxu1 %v11942_v42 }
 0x739   : > { %v13827_v49 = vpack.c.bf16 %v3137_v10, %v3132_v2  ;;  %v11141_v4 = vpop.f32.mrb[72].mxu0  ;;  %v3471_v25 = vpop.f32.mrb[87].mxu1 }
 0x73a   : > { %v3147_v9 = vadd.f32 %v11141_v4, %v2870_v7  ;;  %v3141_v21 = vpop.f32.mrb[73].mxu0 }
 0x73b   : > { %v3142_v12 = vadd.f32 %v3141_v21, %v2870_v7 }
 0x73d   : > { %v13829_v14 = vpack.c.bf16 %v3147_v9, %v3142_v12  ;;  %v11144_v28 = vpop.f32.mrb[74].mxu0 }
 0x73e   : > { %v3157_v5 = vadd.f32 %v11144_v28, %v2870_v7  ;;  %v3151_v57 = vpop.f32.mrb[75].mxu0  ;;  %v13863_v28 = vsel %vm786_vm1, %v13802_v13, -1e+30 }
 0x73f   : > { %v3152_v52 = vadd.f32 %v3151_v57, %v2870_v7  ;;  %11951 = vmatprep.subr.bf16.mxu1 %v13829_v14  ;;  %v13870_v57 = vsel %vm786_vm1, %v13804_v59, -1e+30 }
 0x741   : > { %v13832_v19 = vpack.c.bf16 %v3157_v5, %v3152_v52  ;;  %v11147_v39 = vpop.f32.mrb[76].mxu0  ;;  %v3799_v52 = vsel %vm329_vm0, %v13863_v28, -inf }
 0x742   : > { %v3167_v15 = vadd.f32 %v11147_v39, %v2870_v7  ;;  %v3161_v62 = vpop.f32.mrb[77].mxu0  ;;  %v13877_v39 = vsel %vm786_vm1, %v13808_v27, -1e+30 }
 0x743   : > { %v3162_v58 = vadd.f32 %v3161_v62, %v2870_v7  ;;  %v13884_v62 = vsel %vm786_vm1, %v13810_v1, -1e+30 }
 0x744   : > { %v3802_v27 = vsel %vm329_vm0, %v13884_v62, -inf }
 0x745   : > { %v13834_v24 = vpack.c.bf16 %v3167_v15, %v3162_v58  ;;  %v11150_v43 = vpop.f32.mrb[78].mxu0  ;;  %v3796_v15 = vsel %vm329_vm0, %v13870_v57, -inf  ;;  %v3805_v58 = vsel %vm329_vm0, %v13877_v39, -inf }
 0x746   : > { %v3177_v55 = vadd.f32 %v11150_v43, %v2870_v7  ;;  %v3171_v50 = vpop.f32.mrb[79].mxu0  ;;  %v13890_v43 = vsel %vm786_vm1, %v11178_v22, -1e+30 }
 0x747   : > { %v3172_v8 = vadd.f32 %v3171_v50, %v2870_v7  ;;  %v3817_v1 = vsel %vm329_vm0, %v13890_v43, -inf }
 0x748   : > { %v11192_v18 = vpop.f32.mrb[88].mxu1 }
 0x749   : > { %v13836_v40 = vpack.c.bf16 %v3177_v55, %v3172_v8  ;;  %v11185_v11 = vpop.f32.mrb[80].mxu0  ;;  %v3621_v38 = vpop.f32.mrb[89].mxu1  ;;  %v13896_v55 = vsel %vm786_vm1, %v3471_v25, -1e+30  ;;  %v13902_v50 = vsel %vm786_vm1, %v11192_v18, -1e+30 }
 0x74a   : > { %v13840_v42 = vsel %vm786_vm1, %v11185_v11, -1e+30  ;;  %v3546_v51 = vpop.f32.mrb[81].mxu0  ;;  %v3814_v22 = vsel %vm329_vm0, %v13896_v55, -inf  ;;  %v13908_v8 = vsel %vm786_vm1, %v3621_v38, -1e+30 }
 0x74b   : > { %v13844_v10 = vsel %vm786_vm1, %v3546_v51, -1e+30  ;;  %v3823_v41 = vsel %vm329_vm0, %v13840_v42, -inf  ;;  %v3829_v25 = vsel %vm329_vm0, %v13902_v50, -inf  ;;  %v3826_v18 = vsel %vm329_vm0, %v13908_v8, -inf }
 0x74c   : > { %3824 = vmax.xlane.f32.xlu1 %v3823_v41  ;;  %v3820_v7 = vsel %vm329_vm0, %v13844_v10, -inf }
 0x74d   : > { %3821 = vmax.xlane.f32.xlu0 %v3820_v7 }
 0x751   : > { %v11199_v2 = vpop.f32.mrb[82].mxu0 }
 0x752   : > { %v13852_v4 = vsel %vm786_vm1, %v11199_v2, -1e+30  ;;  %v3696_v9 = vpop.f32.mrb[83].mxu0 }
 0x753   : > { %v13856_v21 = vsel %vm786_vm1, %v3696_v9, -1e+30  ;;  %v3835_v12 = vsel %vm329_vm0, %v13852_v4, -inf }
 0x754   : > { %3836 = vmax.xlane.f32.xlu1 %v3835_v12  ;;  %v3832_v5 = vsel %vm329_vm0, %v13856_v21, -inf }
 0x755   : > { %3833 = vmax.xlane.f32.xlu0 %v3832_v5 }
 0x758   : > { %3800 = vmax.xlane.f32.xlu1 %v3799_v52  ;;  %v11206_v13 = vpop.f32.mrb[90].mxu1 }
 0x759   : > { %3797 = vmax.xlane.f32.xlu0 %v3796_v15  ;;  %v3771_v59 = vpop.f32.mrb[91].mxu1  ;;  %v13914_v11 = vsel %vm786_vm1, %v11206_v13, -1e+30 }
 0x75a   : > { %v13920_v51 = vsel %vm786_vm1, %v3771_v59, -1e+30  ;;  %v3841_v38 = vsel %vm329_vm0, %v13914_v11, -inf }
 0x75b   : > { %v3838_v41 = vsel %vm329_vm0, %v13920_v51, -inf }
 0x75c   : > { %3806 = vmax.xlane.f32.xlu1 %v3805_v58 }
 0x75d   : > { %3803 = vmax.xlane.f32.xlu0 %v3802_v27 }
 0x760   : > { %3818 = vmax.xlane.f32.xlu1 %v3817_v1 }
 0x761   : > { %3815 = vmax.xlane.f32.xlu0 %v3814_v22 }
 0x764   : > { %3830 = vmax.xlane.f32.xlu1 %v3829_v25 }
 0x765   : > { %3827 = vmax.xlane.f32.xlu0 %v3826_v18 }
 0x768   : > { %3842 = vmax.xlane.f32.xlu1 %v3841_v38 }
 0x769   : > { %3839 = vmax.xlane.f32.xlu0 %v3838_v41 }
 0x7c0   : > { %v3813_v7 = vpop.xlane.xlu1 %3812 }
 0x7c1   : > { %v3849_v2 = vsub.f32 %v13816_v63, %v3813_v7  ;;  %v3810_v9 = vpop.xlane.xlu0 %3809 }
 0x7c2   : > { %v3848_v12 = vsub.f32 %v13820_v17, %v3810_v9 }
 0x7c3   : > { %v3870_v5 = vmul.f32 1.442695, %v3849_v2 }
 0x7c4   : > { %v3868_v52 = vmul.f32 1.442695, %v3848_v12 }
 0x7c5   : > { %12434 = vpow2.f32 %v3870_v5 }
 0x7c6   : > { %12436 = vpow2.f32 %v3868_v52 }
 0x7cf   : > { %v12435_v13 = vpop.eup %12434 }
 0x7d0   : > { %v12437_v15 = vpop.eup %12436  ;;  %v13930_v59 = vsel %vm786_vm1, %v12435_v13, 0.0 }
 0x7d1   : > { %v3923_v58 = vsel %vm329_vm0, %v13930_v59, 0.0  ;;  %v13936_v27 = vsel %vm786_vm1, %v12437_v15, 0.0 }
 0x7d2   : > { %3924 = vadd.xlane.f32.xlu1 %v3923_v58  ;;  %v3920_v63 = vsel %vm329_vm0, %v13936_v27, 0.0 }
 0x7d3   : > { %3921 = vadd.xlane.f32.xlu0 %v3920_v63 }
 0x7d9   : > { %v3825_v17 = vpop.xlane.xlu1 %3824 }
 0x7da   : > { %v3853_v1 = vsub.f32 %v13840_v42, %v3825_v17  ;;  %v3822_v22 = vpop.xlane.xlu0 %3821 }
 0x7db   : > { %v3852_v25 = vsub.f32 %v13844_v10, %v3822_v22 }
 0x7dc   : > { %v3878_v18 = vmul.f32 1.442695, %v3853_v1 }
 0x7dd   : > { %v3876_v38 = vmul.f32 1.442695, %v3852_v25 }
 0x7de   : > { %12438 = vpow2.f32 %v3878_v18 }
 0x7df   : > { %12440 = vpow2.f32 %v3876_v38 }
 0x7e1   : > { %v3837_v41 = vpop.xlane.xlu1 %3836 }
 0x7e2   : > { %v3857_v7 = vsub.f32 %v13852_v4, %v3837_v41  ;;  %v3834_v2 = vpop.xlane.xlu0 %3833 }
 0x7e3   : > { %v3856_v9 = vsub.f32 %v13856_v21, %v3834_v2 }
 0x7e4   : > { %v3886_v12 = vmul.f32 1.442695, %v3857_v7 }
 0x7e5   : > { %v3884_v5 = vmul.f32 1.442695, %v3856_v9  ;;  %v3801_v52 = vpop.xlane.xlu1 %3800 }
 0x7e6   : > { %12442 = vpow2.f32 %v3886_v12  ;;  %v3845_v13 = vsub.f32 %v13863_v28, %v3801_v52  ;;  %v3798_v42 = vpop.xlane.xlu0 %3797 }
 0x7e7   : > { %12444 = vpow2.f32 %v3884_v5  ;;  %v3844_v10 = vsub.f32 %v13870_v57, %v3798_v42 }
 0x7e8   : > { %v12439_v15 = vpop.eup %12438  ;;  %v3862_v58 = vmul.f32 1.442695, %v3845_v13 }
 0x7e9   : > { %v12441_v63 = vpop.eup %12440  ;;  %v3860_v17 = vmul.f32 1.442695, %v3844_v10  ;;  %v3807_v1 = vpop.xlane.xlu1 %3806  ;;  %v13948_v4 = vsel %vm786_vm1, %v12439_v15, 0.0 }
 0x7ea   : > { %12446 = vpow2.f32 %v3862_v58  ;;  %v3847_v21 = vsub.f32 %v13877_v39, %v3807_v1  ;;  %v3804_v22 = vpop.xlane.xlu0 %3803  ;;  %v3935_v28 = vsel %vm329_vm0, %v13948_v4, 0.0  ;;  %v13955_v25 = vsel %vm786_vm1, %v12441_v63, 0.0 }
 0x7eb   : > { %12448 = vpow2.f32 %v3860_v17  ;;  %v3846_v57 = vsub.f32 %v13884_v62, %v3804_v22  ;;  %3936 = vadd.xlane.f32.xlu1 %v3935_v28  ;;  %v3932_v18 = vsel %vm329_vm0, %v13955_v25, 0.0 }
 0x7ec   : > { %v3866_v38 = vmul.f32 1.442695, %v3847_v21  ;;  %3933 = vadd.xlane.f32.xlu0 %v3932_v18 }
 0x7ed   : > { %v3864_v41 = vmul.f32 1.442695, %v3846_v57  ;;  %v3819_v7 = vpop.xlane.xlu1 %3818 }
 0x7ee   : > { %12450 = vpow2.f32 %v3866_v38  ;;  %v3851_v39 = vsub.f32 %v13890_v43, %v3819_v7  ;;  %v3816_v2 = vpop.xlane.xlu0 %3815 }
 0x7ef   : > { %12452 = vpow2.f32 %v3864_v41  ;;  %v3850_v9 = vsub.f32 %v13896_v55, %v3816_v2 }
 0x7f0   : > { %v12443_v12 = vpop.eup %12442  ;;  %v3874_v5 = vmul.f32 1.442695, %v3851_v39 }
 0x7f1   : > { %v12445_v52 = vpop.eup %12444  ;;  %v3872_v13 = vmul.f32 1.442695, %v3850_v9  ;;  %v3831_v62 = vpop.xlane.xlu1 %3830  ;;  %v13964_v42 = vsel %vm786_vm1, %v12443_v12, 0.0 }
 0x7f2   : > { %12454 = vpow2.f32 %v3874_v5  ;;  %v3855_v10 = vsub.f32 %v13902_v50, %v3831_v62  ;;  %v3828_v15 = vpop.xlane.xlu0 %3827  ;;  %v3947_v43 = vsel %vm329_vm0, %v13964_v42, 0.0  ;;  %v13971_v58 = vsel %vm786_vm1, %v12445_v52, 0.0 }
 0x7f3   : > { %12456 = vpow2.f32 %v3872_v13  ;;  %v3854_v55 = vsub.f32 %v13908_v8, %v3828_v15  ;;  %3948 = vadd.xlane.f32.xlu1 %v3947_v43  ;;  %v3944_v63 = vsel %vm329_vm0, %v13971_v58, 0.0 }
 0x7f4   : > { %v12447_v17 = vpop.eup %12446  ;;  %v3882_v1 = vmul.f32 1.442695, %v3855_v10  ;;  %3945 = vadd.xlane.f32.xlu0 %v3944_v63 }
 0x7f5   : > { %v12449_v21 = vpop.eup %12448  ;;  %v3880_v50 = vmul.f32 1.442695, %v3854_v55  ;;  %v3843_v22 = vpop.xlane.xlu1 %3842  ;;  %v13978_v28 = vsel %vm786_vm1, %v12447_v17, 0.0 }
 0x7f6   : > { %12458 = vpow2.f32 %v3882_v1  ;;  %v3859_v57 = vsub.f32 %v13914_v11, %v3843_v22  ;;  %v3840_v18 = vpop.xlane.xlu0 %3839  ;;  %v3911_v8 = vsel %vm329_vm0, %v13978_v28, 0.0  ;;  %v13985_v38 = vsel %vm786_vm1, %v12449_v21, 0.0 }
 0x7f7   : > { %12460 = vpow2.f32 %v3880_v50  ;;  %v3858_v41 = vsub.f32 %v13920_v51, %v3840_v18  ;;  %3912 = vadd.xlane.f32.xlu1 %v3911_v8  ;;  %v3908_v7 = vsel %vm329_vm0, %v13985_v38, 0.0 }
 0x7f8   : > { %v12451_v39 = vpop.eup %12450  ;;  %v3890_v2 = vmul.f32 1.442695, %v3859_v57  ;;  %3909 = vadd.xlane.f32.xlu0 %v3908_v7 }
 0x7f9   : > { %v12453_v9 = vpop.eup %12452  ;;  %v3888_v11 = vmul.f32 1.442695, %v3858_v41  ;;  %v13992_v12 = vsel %vm786_vm1, %v12451_v39, 0.0 }
 0x7fa   : > { %12462 = vpow2.f32 %v3890_v2  ;;  %v3917_v5 = vsel %vm329_vm0, %v13992_v12, 0.0  ;;  %v13998_v51 = vsel %vm786_vm1, %v12453_v9, 0.0 }
 0x7fb   : > { %12464 = vpow2.f32 %v3888_v11  ;;  %3918 = vadd.xlane.f32.xlu1 %v3917_v5  ;;  %v3914_v52 = vsel %vm329_vm0, %v13998_v51, 0.0 }
 0x7fc   : > { %v12455_v13 = vpop.eup %12454  ;;  %3915 = vadd.xlane.f32.xlu0 %v3914_v52 }
 0x7fd   : > { %v12457_v62 = vpop.eup %12456  ;;  %v14004_v10 = vsel %vm786_vm1, %v12455_v13, 0.0 }
 0x7fe   : > { %v3929_v15 = vsel %vm329_vm0, %v14004_v10, 0.0  ;;  %v14010_v43 = vsel %vm786_vm1, %v12457_v62, 0.0 }
 0x7ff   : > { %3930 = vadd.xlane.f32.xlu1 %v3929_v15  ;;  %v3926_v55 = vsel %vm329_vm0, %v14010_v43, 0.0 }
 0x800   : > { %v12459_v63 = vpop.eup %12458  ;;  %3927 = vadd.xlane.f32.xlu0 %v3926_v55 }
 0x801   : > { %v12461_v17 = vpop.eup %12460  ;;  %v14016_v1 = vsel %vm786_vm1, %v12459_v63, 0.0 }
 0x802   : > { %v3941_v21 = vsel %vm329_vm0, %v14016_v1, 0.0  ;;  %v14022_v50 = vsel %vm786_vm1, %v12461_v17, 0.0 }
 0x803   : > { %3942 = vadd.xlane.f32.xlu1 %v3941_v21  ;;  %v3938_v22 = vsel %vm329_vm0, %v14022_v50, 0.0 }
 0x804   : > { %v12463_v57 = vpop.eup %12462  ;;  %3939 = vadd.xlane.f32.xlu0 %v3938_v22 }
 0x805   : > { %v12465_v18 = vpop.eup %12464  ;;  %v14028_v8 = vsel %vm786_vm1, %v12463_v57, 0.0 }
 0x806   : > { %v3953_v41 = vsel %vm329_vm0, %v14028_v8, 0.0  ;;  %v14034_v7 = vsel %vm786_vm1, %v12465_v18, 0.0 }
 0x807   : > { %3954 = vadd.xlane.f32.xlu1 %v3953_v41  ;;  %v3950_v39 = vsel %vm329_vm0, %v14034_v7, 0.0 }
 0x808   : > { %3951 = vadd.xlane.f32.xlu0 %v3950_v39 }
 0x85f   : > { %v3925_v2 = vpop.xlane.xlu1 %3924 }
 0x860   : > { %12466 = vrcp.f32 %v3925_v2  ;;  %v3922_v9 = vpop.xlane.xlu0 %3921 }
 0x861   : > { %12468 = vrcp.f32 %v3922_v9 }
 0x86a   : > { %v12467_v11 = vpop.eup %12466 }
 0x86b   : > { %v12469_v5 = vpop.eup %12468  ;;  %v3977_v52 = vmul.f32 %v12467_v11, %v3925_v2 }
 0x86c   : > { %v3976_v13 = vmul.f32 %v12469_v5, %v3922_v9 }
 0x86d   : > { %v3993_v62 = vsub.f32 2.0, %v3977_v52 }
 0x86e   : > { %v3992_v15 = vsub.f32 2.0, %v3976_v13 }
 0x86f   : > { %v4009_v55 = vmul.f32 %v12467_v11, %v3993_v62 }
 0x870   : > { %v4008_v63 = vmul.f32 %v12469_v5, %v3992_v15 }
 0x871   : > { %v4025_v21 = vmul.f32 %v4009_v55, %v13930_v59  ;;  %v10198_v55 = vld [vmem:[%s15578_s3 + $0x68] sm:$0xff] }
 0x872   : > { %v4024_v17 = vmul.f32 %v4008_v63, %v13936_v27  ;;  %v10201_v63 = vld [vmem:[%s15578_s3 + $0x80] sm:$0xff] }
 0x874   : > { %11225 = vmatprep.mubr.msk.f32.mxu1 %vm329_vm0, %v4024_v17 }
 0x875   : > { %11226 = vmatmul.mubr.msk.f32.vlgmr.msra.gmra.mrb[92].mxu1 %vm329_vm0, %v4025_v21 }
 0x876   : > { %11953 = vmatpush3.bf16.msra.mxu1 %v13829_v14 }
 0x877   : > { %11959 = vmatprep.subr.bf16.mxu1 %v13834_v24 }
 0x878   : > { %v3937_v22 = vpop.xlane.xlu1 %3936 }
 0x879   : > { %12470 = vrcp.f32 %v3937_v22  ;;  %v3934_v57 = vpop.xlane.xlu0 %3933 }
 0x87a   : > { %12472 = vrcp.f32 %v3934_v57 }
 0x880   : > { %v3949_v18 = vpop.xlane.xlu1 %3948 }
 0x881   : > { %12474 = vrcp.f32 %v3949_v18  ;;  %v3946_v41 = vpop.xlane.xlu0 %3945 }
 0x882   : > { %12476 = vrcp.f32 %v3946_v41 }
 0x883   : > { %v12471_v39 = vpop.eup %12470 }
 0x884   : > { %v12473_v27 = vpop.eup %12472  ;;  %v3981_v2 = vmul.f32 %v12471_v39, %v3937_v22  ;;  %v3913_v59 = vpop.xlane.xlu1 %3912 }
 0x885   : > { %v3980_v9 = vmul.f32 %v12473_v27, %v3934_v57  ;;  %12478 = vrcp.f32 %v3913_v59  ;;  %v3910_v11 = vpop.xlane.xlu0 %3909 }
 0x886   : > { %v3997_v5 = vsub.f32 2.0, %v3981_v2  ;;  %12480 = vrcp.f32 %v3910_v11 }
 0x887   : > { %v3996_v14 = vsub.f32 2.0, %v3980_v9 }
 0x888   : > { %v4013_v52 = vmul.f32 %v12471_v39, %v3997_v5  ;;  %v3919_v13 = vpop.xlane.xlu1 %3918 }
 0x889   : > { %v4012_v62 = vmul.f32 %v12473_v27, %v3996_v14  ;;  %12482 = vrcp.f32 %v3919_v13  ;;  %v3916_v15 = vpop.xlane.xlu0 %3915  ;;  %v11998_v27 = vpack.c.bf16 %v10201_v63, %v10198_v55 }
 0x88a   : > { %12484 = vrcp.f32 %v3916_v15  ;;  %v4029_v57 = vmul.f32 %v4013_v52, %v13948_v4 }
 0x88b   : > { %v12475_v17 = vpop.eup %12474  ;;  %v4028_v21 = vmul.f32 %v4012_v62, %v13955_v25 }
 0x88c   : > { %v12477_v22 = vpop.eup %12476  ;;  %v3985_v39 = vmul.f32 %v12475_v17, %v3949_v18  ;;  %v3931_v2 = vpop.xlane.xlu1 %3930  ;;  %v10197_v18 = vld [vmem:[%s15578_s3 + $0x60] sm:$0xff] }
 0x88d   : > { %v3984_v9 = vmul.f32 %v12477_v22, %v3946_v41  ;;  %12486 = vrcp.f32 %v3931_v2  ;;  %v3928_v5 = vpop.xlane.xlu0 %3927  ;;  %11239 = vmatprep.mubr.msk.f32.mxu1 %vm329_vm0, %v4028_v21  ;;  %v10200_v41 = vld [vmem:[%s15578_s3 + $0x78] sm:$0xff] }
 0x88e   : > { %v4001_v14 = vsub.f32 2.0, %v3985_v39  ;;  %12488 = vrcp.f32 %v3928_v5  ;;  %11240 = vmatmul.mubr.msk.f32.vlgmr.msra.gmra.mrb[94].mxu1 %vm329_vm0, %v4029_v57 }
 0x88f   : > { %v12479_v34 = vpop.eup %12478  ;;  %v4000_v33 = vsub.f32 2.0, %v3984_v9  ;;  %11961 = vmatpush3.bf16.msra.mxu1 %v13834_v24 }
 0x890   : > { %v12481_v25 = vpop.eup %12480  ;;  %v4017_v62 = vmul.f32 %v12475_v17, %v4001_v14  ;;  %v3973_v26 = vmul.f32 %v12479_v34, %v3913_v59  ;;  %v3943_v4 = vpop.xlane.xlu1 %3942  ;;  %11999 = vmatprep.subr.bf16.mxu1 %v11998_v27  ;;  %v12000_v17 = vpack.c.bf16 %v10200_v41, %v10197_v18 }
 0x891   : > { %v4016_v52 = vmul.f32 %v12477_v22, %v4000_v33  ;;  %v3972_v55 = vmul.f32 %v12481_v25, %v3910_v11  ;;  %12490 = vrcp.f32 %v3943_v4  ;;  %v3940_v63 = vpop.xlane.xlu0 %3939 }
 0x892   : > { %v3989_v21 = vsub.f32 2.0, %v3973_v26  ;;  %12492 = vrcp.f32 %v3940_v63  ;;  %v4033_v27 = vmul.f32 %v4017_v62, %v13964_v42 }
 0x893   : > { %v12483_v24 = vpop.eup %12482  ;;  %v3988_v57 = vsub.f32 2.0, %v3972_v55  ;;  %v4032_v59 = vmul.f32 %v4016_v52, %v13971_v58 }
 0x894   : > { %v12485_v39 = vpop.eup %12484  ;;  %v4005_v9 = vmul.f32 %v12479_v34, %v3989_v21  ;;  %v3975_v14 = vmul.f32 %v12483_v24, %v3919_v13  ;;  %v3955_v30 = vpop.xlane.xlu1 %3954 }
 0x895   : > { %v4004_v35 = vmul.f32 %v12481_v25, %v3988_v57  ;;  %v3974_v60 = vmul.f32 %v12485_v39, %v3916_v15  ;;  %12494 = vrcp.f32 %v3955_v30  ;;  %11253 = vmatprep.mubr.msk.f32.mxu1 %vm329_vm0, %v4032_v59  ;;  %v3952_v33 = vpop.xlane.xlu0 %3951 }
 0x896   : > { %v3991_v11 = vsub.f32 2.0, %v3975_v14  ;;  %12496 = vrcp.f32 %v3952_v33  ;;  %11254 = vmatmul.mubr.msk.f32.vlgmr.msra.gmra.mrb[96].mxu1 %vm329_vm0, %v4033_v27  ;;  %v4021_v42 = vmul.f32 %v4005_v9, %v13978_v28  ;;  %v10184_v9 = vld [vmem:[%s15579_s4 + $0x98] sm:$0xff] }
 0x897   : > { %v12487_v26 = vpop.eup %12486  ;;  %v3990_v22 = vsub.f32 2.0, %v3974_v60  ;;  %12001 = vmatpush1.bf16.msra.mxu1 %v12000_v17  ;;  %v4020_v58 = vmul.f32 %v4004_v35, %v13985_v38  ;;  %4951 = vmatprep.mubr.f32.mxu1 %v15631_v32 }
 0x898   : > { %v12489_v34 = vpop.eup %12488  ;;  %v4007_v13 = vmul.f32 %v12483_v24, %v3991_v11  ;;  %v3979_v15 = vmul.f32 %v12487_v26, %v3931_v2  ;;  %v10186_v11 = vld [vmem:[%s15579_s4 + $0xa8] sm:$0xff] }
 0x899   : > { %v4006_v25 = vmul.f32 %v12485_v39, %v3990_v22  ;;  %v3978_v62 = vmul.f32 %v12489_v34, %v3928_v5  ;;  %11211 = vmatprep.mubr.msk.f32.mxu0 %vm329_vm0, %v4020_v58  ;;  %v10187_v22 = vld [vmem:[%s15579_s4 + $0xb0] sm:$0xff]  ;;  %v10188_v58 = vld [vmem:[%s15579_s4 + $0xb8] sm:$0xff] }
 0x89a   : > { %v3995_v18 = vsub.f32 2.0, %v3979_v15  ;;  %11212 = vmatmul.mubr.msk.f32.vlgmr.msra.gmra.mrb[84].mxu0 %vm329_vm0, %v4021_v42  ;;  %10204 = vmatmul.mubr.msk.f32.vlgmr.msra.gmra.mrb[98].mxu1 %vm329_vm0, %v13107_v37  ;;  %v4023_v38 = vmul.f32 %v4007_v13, %v13992_v12  ;;  %v10189_v42 = vld [vmem:[%s15579_s4 + $0xc0] sm:$0xff]  ;;  %v10190_v13 = vld [vmem:[%s15579_s4 + $0xc8] sm:$0xff] }
 0x89b   : > { %v12491_v60 = vpop.eup %12490  ;;  %v3994_v41 = vsub.f32 2.0, %v3978_v62  ;;  %11941 = vmatpush3.bf16.msra.mxu0 %v13812_v45  ;;  %v4022_v35 = vmul.f32 %v4006_v25, %v13998_v51  ;;  %4957 = vmatprep.mubr.f32.mxu1 %v15631_v32  ;;  %v11982_v15 = vpack.c.bf16 %v10190_v13, %v10189_v42  ;;  %v10191_v25 = vld [vmem:[%s15579_s4 + $0xd0] sm:$0xff]  ;;  %v10192_v62 = vld [vmem:[%s15579_s4 + $0xd8] sm:$0xff] }
 0x89c   : > { %v12493_v28 = vpop.eup %12492  ;;  %v4011_v2 = vmul.f32 %v12487_v26, %v3995_v18  ;;  %v3983_v5 = vmul.f32 %v12491_v60, %v3943_v4  ;;  %11947 = vmatprep.subr.bf16.mxu0 %v13827_v49  ;;  %v10193_v18 = vld [vmem:[%s15579_s4 + $0xe0] sm:$0xff] }
 0x89d   : > { %v4010_v52 = vmul.f32 %v12489_v34, %v3994_v41  ;;  %v3982_v55 = vmul.f32 %v12493_v28, %v3940_v63  ;;  %11218 = vmatprep.mubr.msk.f32.mxu0 %vm329_vm0, %v4022_v35  ;;  %v11978_v34 = vpack.c.bf16 %v10188_v58, %v10187_v22  ;;  %v10194_v41 = vld [vmem:[%s15579_s4 + $0xe8] sm:$0xff] }
 0x89e   : > { %v3999_v21 = vsub.f32 2.0, %v3983_v5  ;;  %11219 = vmatmul.mubr.msk.f32.vlgmr.msra.gmra.mrb[86].mxu0 %vm329_vm0, %v4023_v38  ;;  %10205 = vmatmul.mubr.msk.f32.gmra.mrb[100].mxu1 %vm329_vm0, %v13119_v61  ;;  %v4027_v24 = vmul.f32 %v4011_v2, %v14004_v10  ;;  %v11990_v35 = vpack.c.bf16 %v10194_v41, %v10193_v18  ;;  %v10196_v38 = vld [vmem:[%s15579_s4 + $0xf8] sm:$0xff]  ;;  %v10199_v5 = vld [vmem:[%s15578_s3 + $0x70] sm:$0xff] }
 0x89f   : > { %v12495_v45 = vpop.eup %12494  ;;  %v3998_v51 = vsub.f32 2.0, %v3982_v55  ;;  %11949 = vmatpush3.bf16.msra.mxu0 %v13827_v49  ;;  %v4026_v12 = vmul.f32 %v4010_v52, %v14010_v43  ;;  %4963 = vmatprep.mubr.f32.mxu1 %v15631_v32  ;;  %v10202_v52 = vld [vmem:[%s15578_s3 + $0x88] sm:$0xff] }
 0x8a0   : > { %v12497_v4 = vpop.eup %12496  ;;  %v4015_v63 = vmul.f32 %v12491_v60, %v3999_v21  ;;  %v3987_v57 = vmul.f32 %v12495_v45, %v3955_v30  ;;  %11955 = vmatprep.subr.bf16.mxu0 %v13832_v19  ;;  %v11986_v60 = vpack.c.bf16 %v10192_v62, %v10191_v25  ;;  %v12002_v55 = vpack.c.bf16 %v10202_v52, %v10199_v5 }
 0x8a1   : > { %v4014_v59 = vmul.f32 %v12493_v28, %v3998_v51  ;;  %v3986_v17 = vmul.f32 %v12497_v4, %v3952_v33  ;;  %11232 = vmatprep.mubr.msk.f32.mxu0 %vm329_vm0, %v4026_v12  ;;  %v10185_v33 = vld [vmem:[%s15579_s4 + $0xa0] sm:$0xff]  ;;  %v10195_v28 = vld [vmem:[%s15579_s4 + $0xf0] sm:$0xff] }
 0x8a2   : > { %v4003_v39 = vsub.f32 2.0, %v3987_v57  ;;  %11233 = vmatmul.mubr.msk.f32.vlgmr.msra.gmra.mrb[88].mxu0 %vm329_vm0, %v4027_v24  ;;  %10206 = vmatmul.mubr.msk.f32.gmra.mrb[102].mxu1 %vm329_vm0, %v13123_v3  ;;  %v4031_v30 = vmul.f32 %v4015_v63, %v14016_v1  ;;  %v10182_v1 = vld [vmem:[%s15579_s4 + $0x88] sm:$0xff]  ;;  %v11974_v26 = vpack.c.bf16 %v10186_v11, %v10185_v33  ;;  %v11994_v2 = vpack.c.bf16 %v10196_v38, %v10195_v28 }
 0x8a3   : > { %v4002_v49 = vsub.f32 2.0, %v3986_v17  ;;  %11957 = vmatpush3.bf16.msra.mxu0 %v13832_v19  ;;  %v4030_v43 = vmul.f32 %v4014_v59, %v14022_v50  ;;  %4969 = vmatprep.mubr.f32.mxu1 %v15631_v32 }
 0x8a4   : > { %v4019_v10 = vmul.f32 %v12495_v45, %v4003_v39  ;;  %11963 = vmatprep.subr.bf16.mxu0 %v13836_v40 }
 0x8a5   : > { %v4018_v27 = vmul.f32 %v12497_v4, %v4002_v49  ;;  %11246 = vmatprep.mubr.msk.f32.mxu0 %vm329_vm0, %v4030_v43  ;;  %v14197_v4 = vld [vmem:[%s15576_s1 + $0x32] ss:$8 sm:$0x7] }
 0x8a6   : > { %11247 = vmatmul.mubr.msk.f32.vlgmr.msra.gmra.mrb[90].mxu0 %vm329_vm0, %v4031_v30  ;;  %10207 = vmatmul.mubr.msk.f32.gmra.mrb[104].mxu1 %vm329_vm0, %v13136_v16  ;;  %v4035_v50 = vmul.f32 %v4019_v10, %v14028_v8  ;;  %v10183_v8 = vld [vmem:[%s15579_s4 + $0x90] sm:$0xff]  ;;  %v14203_v57 = vrot.slane %v14197_v4, %v13267_v20  ;;  %v14208_v30 = vrot.slane %v14197_v4, %v13279_v56 }
 0x8a7   : > { %11965 = vmatpush3.bf16.msra.mxu0 %v13836_v40  ;;  %v4034_v19 = vmul.f32 %v4018_v27, %v14034_v7  ;;  %4975 = vmatprep.mubr.f32.mxu1 %v15631_v32  ;;  %v10181_v40 = vld [vmem:[%s15579_s4 + $0x80] sm:$0xff]  ;;  %v11970_v14 = vpack.c.bf16 %v10184_v9, %v10183_v8 }
 0x8a8   : > { %v11966_v7 = vpack.c.bf16 %v10182_v1, %v10181_v40 }
 0x8a9   : > { %11260 = vmatprep.mubr.msk.f32.mxu0 %vm329_vm0, %v4034_v19 }
 0x8aa   : > { %11261 = vmatmul.mubr.msk.f32.vlgmr.msra.gmra.mrb[92].mxu0 %vm329_vm0, %v4035_v50  ;;  %10208 = vmatmul.mubr.msk.f32.gmra.mrb[106].mxu1 %vm329_vm0, %v13140_v29 }
 0x8ab   : > { %4981 = vmatprep.mubr.f32.mxu1 %v15631_v32  ;;  %11967 = vmatprep.subr.bf16.mxu0 %v11966_v7 }
 0x8ac   : > { %11969 = vmatpush3.bf16.msra.mxu0 %v11966_v7 }
 0x8ad   : > { %11971 = vmatprep.subr.bf16.mxu0 %v11970_v14 }
 0x8ae   : > { %10209 = vmatmul.mubr.msk.f32.gmra.mrb[108].mxu1 %vm329_vm0, %v13153_v47 }
 0x8af   : > { %4987 = vmatprep.mubr.f32.mxu1 %v15631_v32 }
 0x8b0   : > { %11973 = vmatpush3.bf16.msra.mxu0 %v11970_v14 }
 0x8b1   : > { %11975 = vmatprep.subr.bf16.mxu0 %v11974_v26 }
 0x8b2   : > { %10210 = vmatmul.mubr.msk.f32.gmra.mrb[110].mxu1 %vm329_vm0, %v13157_v53 }
 0x8b3   : > { %4993 = vmatprep.mubr.f32.mxu1 %v15631_v32 }
 0x8b4   : > { %11977 = vmatpush3.bf16.msra.mxu0 %v11974_v26 }
 0x8b5   : > { %11979 = vmatprep.subr.bf16.mxu0 %v11978_v34 }
 0x8b6   : > { %10211 = vmatmul.mubr.msk.f32.gmra.mrb[112].mxu1 %vm329_vm0, %v13170_v0 }
 0x8b7   : > { %4999 = vmatprep.mubr.f32.mxu1 %v15631_v32 }
 0x8b8   : > { %11981 = vmatpush3.bf16.msra.mxu0 %v11978_v34 }
 0x8b9   : > { %11983 = vmatprep.subr.bf16.mxu0 %v11982_v15 }
 0x8ba   : > { %10212 = vmatmul.mubr.msk.f32.gmra.mrb[114].mxu1 %vm329_vm0, %v13174_v6 }
 0x8bb   : > { %5005 = vmatprep.mubr.f32.mxu1 %v15631_v32 }
 0x8bc   : > { %11985 = vmatpush3.bf16.msra.mxu0 %v11982_v15 }
 0x8bd   : > { %11987 = vmatprep.subr.bf16.mxu0 %v11986_v60 }
 0x8be   : > { %10213 = vmatmul.mubr.msk.f32.gmra.mrb[116].mxu1 %vm329_vm0, %v13187_v23 }
 0x8bf   : > { %5011 = vmatprep.mubr.f32.mxu1 %v15631_v32 }
 0x8c0   : > { %11989 = vmatpush3.bf16.msra.mxu0 %v11986_v60 }
 0x8c1   : > { %11991 = vmatprep.subr.bf16.mxu0 %v11990_v35 }
 0x8c2   : > { %10214 = vmatmul.mubr.msk.f32.gmra.mrb[118].mxu1 %vm329_vm0, %v13191_v46 }
 0x8c3   : > { %5017 = vmatprep.mubr.f32.mxu1 %v15631_v32 }
 0x8c4   : > { %11993 = vmatpush3.bf16.msra.mxu0 %v11990_v35 }
 0x8c5   : > { %11995 = vmatprep.subr.bf16.mxu0 %v11994_v2 }
 0x8c6   : > { %10215 = vmatmul.mubr.msk.f32.gmra.mrb[120].mxu1 %vm329_vm0, %v13204_v31 }
 0x8c7   : > { %5023 = vmatprep.mubr.f32.mxu1 %v15631_v32 }
 0x8c8   : > { %11997 = vmatpush3.bf16.msra.mxu0 %v11994_v2 }
 0x8c9   : > { %12003 = vmatprep.subr.bf16.mxu0 %v12002_v55 }
 0x8ca   : > { %10216 = vmatmul.mubr.msk.f32.gmra.mrb[122].mxu1 %vm329_vm0, %v13208_v36 }
 0x8cb   : > { %5029 = vmatprep.mubr.f32.mxu1 %v15631_v32 }
 0x8ce   : > { %10217 = vmatmul.mubr.msk.f32.gmra.mrb[124].mxu1 %vm329_vm0, %v13221_v54 }
 0x8cf   : > { %5035 = vmatprep.mubr.f32.mxu1 %v15631_v32 }
 0x8d2   : > { %10218 = vmatmul.mubr.msk.f32.gmra.mrb[126].mxu1 %vm329_vm0, %v13225_v44 }
 0x8d3   : > { %5041 = vmatprep.mubr.f32.mxu1 %v15631_v32 }
 0x8d6   : > { %10219 = vmatmul.mubr.msk.f32.gmra.mrb[128].mxu1 %vm329_vm0, %v13236_v48 }
 0x948   : > { %v11227_v21 = vpop.f32.mrb[92].mxu1 }
 0x949   : > { %v4270_v45 = vpop.f32.mrb[93].mxu1 }
 0x961   : > { %v11241_v51 = vpop.f32.mrb[94].mxu1 }
 0x962   : > { %v4432_v12 = vpop.f32.mrb[95].mxu1 }
 0x969   : > { %v14199_v24 = vpop.f32.mrb[96].mxu1 }
 0x96a   : > { %v4594_v63 = vpop.f32.mrb[97].mxu1 }
 0x96d   : > { %v11213_v59 = vpop.f32.mrb[84].mxu0  ;;  %v4953_v17 = vpop.f32.mrb[98].mxu1 }
 0x96e   : > { %v4954_v39 = vadd.f32 %v4953_v17, %v14203_v57  ;;  %v4108_v49 = vpop.f32.mrb[85].mxu0  ;;  %v4955_v43 = vpop.f32.mrb[99].mxu1 }
 0x96f   : > { %11295 = vmatprep.mubr.f32.mxu0 %v4108_v49  ;;  %v4956_v40 = vadd.f32 %v4955_v43, %v14208_v30 }
 0x970   : > { %11296 = vmatmul.mubr.f32.vlgmr.msra.gmra.mrb[48].mxu0 %v11213_v59  ;;  %11351 = vmatprep.mubr.f32.mxu1 %v4954_v39 }
 0x971   : > { %v11220_v10 = vpop.f32.mrb[86].mxu0  ;;  %v4959_v27 = vpop.f32.mrb[100].mxu1  ;;  %12005 = vmatpush3.bf16.msra.mxu0 %v12002_v55 }
 0x972   : > { %v4189_v19 = vpop.f32.mrb[87].mxu0  ;;  %v4961_v50 = vpop.f32.mrb[101].mxu1  ;;  %v4960_v13 = vadd.f32 %v4959_v27, %v14203_v57 }
 0x973   : > { %v4962_v1 = vadd.f32 %v4961_v50, %v14208_v30  ;;  %11298 = vmatprep.mubr.f32.mxu0 %v4189_v19 }
 0x974   : > { %11299 = vmatmul.mubr.f32.gmra.mrb[50].mxu0 %v11220_v10 }
 0x975   : > { %v12006_v8 = vpack.c.bf16 %v4962_v1, %v4956_v40  ;;  %v11234_v7 = vpop.f32.mrb[88].mxu0  ;;  %11301 = vmatprep.mubr.f32.mxu0 %v4270_v45  ;;  %v4965_v9 = vpop.f32.mrb[102].mxu1 }
 0x976   : > { %v4351_v14 = vpop.f32.mrb[89].mxu0  ;;  %v4967_v33 = vpop.f32.mrb[103].mxu1  ;;  %v4966_v41 = vadd.f32 %v4965_v9, %v14203_v57 }
 0x977   : > { %12007 = vmatprep.subr.bf16.mxu1 %v12006_v8  ;;  %v4968_v34 = vadd.f32 %v4967_v33, %v14208_v30 }
 0x978   : > { %11302 = vmatmul.mubr.f32.gmra.mrb[52].mxu0 %v11227_v21  ;;  %12009 = vmatpush3.bf16.xpose.msra.mxu1 %v12006_v8 }
 0x979   : > { %v11248_v11 = vpop.f32.mrb[90].mxu0  ;;  %11304 = vmatprep.mubr.f32.mxu0 %v4351_v14  ;;  %v4971_v26 = vpop.f32.mrb[104].mxu1 }
 0x97a   : > { %v4513_v22 = vpop.f32.mrb[91].mxu0  ;;  %v4973_v58 = vpop.f32.mrb[105].mxu1  ;;  %v4972_v5 = vadd.f32 %v4971_v26, %v14203_v57 }
 0x97b   : > { %v4974_v42 = vadd.f32 %v4973_v58, %v14208_v30 }
 0x97c   : > { %11305 = vmatmul.mubr.f32.gmra.mrb[54].mxu0 %v11234_v7 }
 0x97d   : > { %v12010_v15 = vpack.c.bf16 %v4974_v42, %v4968_v34  ;;  %v11262_v25 = vpop.f32.mrb[92].mxu0  ;;  %11307 = vmatprep.mubr.f32.mxu0 %v4432_v12  ;;  %v4977_v62 = vpop.f32.mrb[106].mxu1 }
 0x97e   : > { %v4675_v18 = vpop.f32.mrb[93].mxu0  ;;  %v4979_v60 = vpop.f32.mrb[107].mxu1  ;;  %v4978_v45 = vadd.f32 %v4977_v62, %v14203_v57 }
 0x97f   : > { %11352 = vmatmul.mubr.f32.vlgmr.msra.gmra.mrb[130].mxu1 %v4960_v13  ;;  %12011 = vmatprep.subr.bf16.mxu1 %v12010_v15  ;;  %v4980_v38 = vadd.f32 %v4979_v60, %v14208_v30 }
 0x980   : > { %11308 = vmatmul.mubr.f32.gmra.mrb[56].mxu0 %v11241_v51  ;;  %12013 = vmatpush3.bf16.xpose.msra.mxu1 %v12010_v15 }
 0x981   : > { %11358 = vmatprep.mubr.f32.mxu1 %v4966_v41  ;;  %11310 = vmatprep.mubr.f32.mxu0 %v4513_v22  ;;  %v4983_v35 = vpop.f32.mrb[108].mxu1 }
 0x982   : > { %v4985_v28 = vpop.f32.mrb[109].mxu1 }
 0x983   : > { %v4986_v2 = vadd.f32 %v4985_v28, %v14208_v30 }
 0x984   : > { %11311 = vmatmul.mubr.f32.gmra.mrb[58].mxu0 %v11248_v11 }
 0x985   : > { %v12014_v52 = vpack.c.bf16 %v4986_v2, %v4980_v38  ;;  %11313 = vmatprep.mubr.f32.mxu0 %v4594_v63  ;;  %v4989_v55 = vpop.f32.mrb[110].mxu1  ;;  %v4984_v63 = vadd.f32 %v4983_v35, %v14203_v57 }
 0x986   : > { %v4991_v21 = vpop.f32.mrb[111].mxu1 }
 0x987   : > { %11359 = vmatmul.mubr.f32.vlgmr.msra.gmra.mrb[132].mxu1 %v4972_v5  ;;  %12015 = vmatprep.subr.bf16.mxu1 %v12014_v52  ;;  %v4992_v59 = vadd.f32 %v4991_v21, %v14208_v30 }
 0x988   : > { %11314 = vmatmul.mubr.f32.gmra.mrb[60].mxu0 %v14199_v24  ;;  %12017 = vmatpush3.bf16.xpose.msra.mxu1 %v12014_v52  ;;  %v4990_v24 = vadd.f32 %v4989_v55, %v14203_v57 }
 0x989   : > { %11365 = vmatprep.mubr.f32.mxu1 %v4978_v45  ;;  %11316 = vmatprep.mubr.f32.mxu0 %v4675_v18  ;;  %v4995_v51 = vpop.f32.mrb[112].mxu1 }
 0x98a   : > { %v4997_v12 = vpop.f32.mrb[113].mxu1  ;;  %v4996_v1 = vadd.f32 %v4995_v51, %v14203_v57 }
 0x98b   : > { %v4998_v17 = vadd.f32 %v4997_v12, %v14208_v30 }
 0x98c   : > { %11317 = vmatmul.mubr.f32.gmra.mrb[62].mxu0 %v11262_v25 }
 0x98d   : > { %v12018_v39 = vpack.c.bf16 %v4998_v17, %v4992_v59  ;;  %v5001_v49 = vpop.f32.mrb[114].mxu1  ;;  %11323 = vmatprep.mubr.msk.f32.mxu0 %vm329_vm0, %v13107_v37 }
 0x98e   : > { %v5003_v43 = vpop.f32.mrb[115].mxu1  ;;  %v5002_v21 = vadd.f32 %v5001_v49, %v14203_v57 }
 0x98f   : > { %11366 = vmatmul.mubr.f32.vlgmr.msra.gmra.mrb[134].mxu1 %v4984_v63  ;;  %12019 = vmatprep.subr.bf16.mxu1 %v12018_v39  ;;  %v5004_v50 = vadd.f32 %v5003_v43, %v14208_v30 }
 0x990   : > { %11324 = vmatmul.mubr.msk.f32.vlgmr.msra.gmra.mrb[94].mxu0 %vm329_vm0, %v13119_v61  ;;  %12021 = vmatpush3.bf16.xpose.msra.mxu1 %v12018_v39 }
 0x991   : > { %11372 = vmatprep.mubr.f32.mxu1 %v4990_v24  ;;  %v5007_v10 = vpop.f32.mrb[116].mxu1  ;;  %11326 = vmatprep.mubr.msk.f32.mxu0 %vm329_vm0, %v13123_v3 }
 0x992   : > { %v5008_v27 = vadd.f32 %v5007_v10, %v14203_v57  ;;  %v5009_v19 = vpop.f32.mrb[117].mxu1 }
 0x993   : > { %v5010_v40 = vadd.f32 %v5009_v19, %v14208_v30 }
 0x994   : > { %11327 = vmatmul.mubr.msk.f32.gmra.mrb[96].mxu0 %vm329_vm0, %v13136_v16 }
 0x995   : > { %v12022_v8 = vpack.c.bf16 %v5010_v40, %v5004_v50  ;;  %v5013_v7 = vpop.f32.mrb[118].mxu1  ;;  %11329 = vmatprep.mubr.msk.f32.mxu0 %vm329_vm0, %v13140_v29  ;;  %v15633_v40 = vld [vmem:[#allocation22_spill] sm:$0xff] }
 0x996   : > { %v5014_v9 = vadd.f32 %v5013_v7, %v14203_v57  ;;  %v5015_v14 = vpop.f32.mrb[119].mxu1 }
 0x997   : > { %11373 = vmatmul.mubr.f32.vlgmr.msra.gmra.mrb[136].mxu1 %v4996_v1  ;;  %12023 = vmatprep.subr.bf16.mxu0 %v12022_v8  ;;  %v5016_v26 = vadd.f32 %v5015_v14, %v14208_v30  ;;  %v14300_v1 = vrot.slane %v14197_v4, %v15633_v40 }
 0x998   : > { %11330 = vmatmul.mubr.msk.f32.gmra.mrb[98].mxu0 %vm329_vm0, %v13153_v47  ;;  %11386 = vmatprep.mubr.f32.mxu1 %v5014_v9 }
 0x999   : > { %12025 = vmatpush3.bf16.xpose.msra.mxu0 %v12022_v8  ;;  %v5019_v33 = vpop.f32.mrb[120].mxu1  ;;  %11332 = vmatprep.mubr.msk.f32.mxu0 %vm329_vm0, %v13157_v53 }
 0x99a   : > { %v5021_v11 = vpop.f32.mrb[121].mxu1  ;;  %v5020_v41 = vadd.f32 %v5019_v33, %v14203_v57 }
 0x99b   : > { %v5022_v22 = vadd.f32 %v5021_v11, %v14208_v30 }
 0x99c   : > { %11333 = vmatmul.mubr.msk.f32.gmra.mrb[100].mxu0 %vm329_vm0, %v13170_v0 }
 0x99d   : > { %v12026_v58 = vpack.c.bf16 %v5022_v22, %v5016_v26  ;;  %v5025_v34 = vpop.f32.mrb[122].mxu1  ;;  %11335 = vmatprep.mubr.msk.f32.mxu0 %vm329_vm0, %v13174_v6 }
 0x99e   : > { %v5026_v42 = vadd.f32 %v5025_v34, %v14203_v57  ;;  %v5027_v13 = vpop.f32.mrb[123].mxu1 }
 0x99f   : > { %12027 = vmatprep.subr.bf16.mxu1 %v12026_v58  ;;  %v5028_v18 = vadd.f32 %v5027_v13, %v14208_v30 }
 0x9a0   : > { %11336 = vmatmul.mubr.msk.f32.gmra.mrb[102].mxu0 %vm329_vm0, %v13187_v23  ;;  %12029 = vmatpush3.bf16.xpose.msra.mxu1 %v12026_v58 }
 0x9a1   : > { %v5031_v15 = vpop.f32.mrb[124].mxu1  ;;  %11338 = vmatprep.mubr.msk.f32.mxu0 %vm329_vm0, %v13191_v46 }
 0x9a2   : > { %v5032_v25 = vadd.f32 %v5031_v15, %v14203_v57  ;;  %v5033_v62 = vpop.f32.mrb[125].mxu1 }
 0x9a3   : > { %v5034_v60 = vadd.f32 %v5033_v62, %v14208_v30 }
 0x9a4   : > { %11339 = vmatmul.mubr.msk.f32.gmra.mrb[104].mxu0 %vm329_vm0, %v13204_v31 }
 0x9a5   : > { %v12030_v35 = vpack.c.bf16 %v5034_v60, %v5028_v18  ;;  %v5037_v28 = vpop.f32.mrb[126].mxu1  ;;  %11341 = vmatprep.mubr.msk.f32.mxu0 %vm329_vm0, %v13208_v36 }
 0x9a6   : > { %v5038_v38 = vadd.f32 %v5037_v28, %v14203_v57  ;;  %v5039_v2 = vpop.f32.mrb[127].mxu1 }
 0x9a7   : > { %11387 = vmatmul.mubr.f32.vlgmr.msra.gmra.mrb[138].mxu1 %v5020_v41  ;;  %12031 = vmatprep.subr.bf16.mxu0 %v12030_v35  ;;  %v5040_v45 = vadd.f32 %v5039_v2, %v14208_v30 }
 0x9a8   : > { %11342 = vmatmul.mubr.msk.f32.gmra.mrb[106].mxu0 %vm329_vm0, %v13221_v54  ;;  %11400 = vmatprep.mubr.f32.mxu1 %v5038_v38 }
 0x9a9   : > { %v5043_v5 = vpop.f32.mrb[128].mxu1  ;;  %11344 = vmatprep.mubr.msk.f32.mxu0 %vm329_vm0, %v13225_v44 }
 0x9aa   : > { %v5044_v52 = vadd.f32 %v5043_v5, %v14203_v57  ;;  %v5045_v55 = vpop.f32.mrb[129].mxu1 }
 0x9ab   : > { %v5046_v51 = vadd.f32 %v5045_v55, %v14208_v30 }
 0x9ac   : > { %11345 = vmatmul.mubr.msk.f32.gmra.mrb[108].mxu0 %vm329_vm0, %v13236_v48 }
 0x9ad   : > { %v12034_v12 = vpack.c.bf16 %v5046_v51, %v5040_v45  ;;  %11379 = vmatprep.mubr.f32.mxu0 %v5002_v21 }
 0x9af   : > { %12035 = vmatprep.subr.bf16.mxu1 %v12034_v12 }
 0x9b0   : > { %11380 = vmatmul.mubr.f32.vlgmr.msra.gmra.mrb[110].mxu0 %v5008_v27  ;;  %12037 = vmatpush3.bf16.xpose.msra.mxu1 %v12034_v12 }
 0x9b1   : > { %12033 = vmatpush3.bf16.xpose.msra.mxu0 %v12030_v35  ;;  %11393 = vmatprep.mubr.f32.mxu0 %v5026_v42 }
 0x9b7   : > { %11401 = vmatmul.mubr.f32.vlgmr.msra.gmra.mrb[140].mxu1 %v5044_v52 }
 0x9b8   : > { %11394 = vmatmul.mubr.f32.vlgmr.msra.gmra.mrb[112].mxu0 %v5032_v25 }
 0xa52   : > { %v11353_v59 = vpop.f32.mrb[130].mxu1 }
 0xa53   : > { %v14276_v57 = vsel %vm786_vm1, %v11353_v59, -1e+30  ;;  %v5259_v63 = vpop.f32.mrb[131].mxu1 }
 0xa54   : > { %v14280_v30 = vsel %vm786_vm1, %v5259_v63, -1e+30  ;;  %v5812_v39 = vsel %vm329_vm0, %v14276_v57, -inf }
 0xa55   : > { %5813 = vmax.xlane.f32.xlu1 %v5812_v39  ;;  %v5809_v49 = vsel %vm329_vm0, %v14280_v30, -inf }
 0xa56   : > { %5810 = vmax.xlane.f32.xlu0 %v5809_v49 }
 0xa5a   : > { %v11360_v43 = vpop.f32.mrb[132].mxu1 }
 0xa5b   : > { %v14288_v24 = vsel %vm786_vm1, %v11360_v43, -1e+30  ;;  %v5334_v10 = vpop.f32.mrb[133].mxu1 }
 0xa5c   : > { %v5818_v27 = vsel %vm329_vm0, %v14288_v24, -inf  ;;  %v14294_v19 = vsel %vm786_vm1, %v5334_v10, -1e+30 }
 0xa5d   : > { %v5815_v50 = vsel %vm329_vm0, %v14294_v19, -inf  ;;  %5819 = vmax.xlane.f32.xlu1 %v5818_v27 }
 0xa5e   : > { %5816 = vmax.xlane.f32.xlu0 %v5815_v50 }
 0xa62   : > { %v14302_v8 = vpop.f32.mrb[134].mxu1 }
 0xa63   : > { %v11325_v7 = vpop.f32.mrb[94].mxu0  ;;  %v14304_v9 = vpop.f32.mrb[135].mxu1 }
 0xa64   : > { %v5120_v14 = vadd.f32 %v11325_v7, %v14300_v1  ;;  %v5114_v33 = vpop.f32.mrb[95].mxu0 }
 0xa65   : > { %v5115_v11 = vadd.f32 %v5114_v33, %v14300_v1 }
 0xa67   : > { %v12038_v26 = vpack.c.bf16 %v5120_v14, %v5115_v11  ;;  %v11328_v22 = vpop.f32.mrb[96].mxu0 }
 0xa68   : > { %v5130_v58 = vadd.f32 %v11328_v22, %v14300_v1  ;;  %v5124_v34 = vpop.f32.mrb[97].mxu0 }
 0xa69   : > { %v5125_v42 = vadd.f32 %v5124_v34, %v14300_v1  ;;  %12039 = vmatprep.subr.bf16.mxu0 %v12038_v26 }
 0xa6a   : > { %v11374_v4 = vpop.f32.mrb[136].mxu1  ;;  %12041 = vmatpush3.bf16.msra.mxu0 %v12038_v26 }
 0xa6b   : > { %v12042_v13 = vpack.c.bf16 %v5130_v58, %v5125_v42  ;;  %v14312_v15 = vsel %vm786_vm1, %v11374_v4, -1e+30  ;;  %v11331_v25 = vpop.f32.mrb[98].mxu0  ;;  %v5484_v62 = vpop.f32.mrb[137].mxu1 }
 0xa6c   : > { %v5830_v18 = vsel %vm329_vm0, %v14312_v15, -inf  ;;  %v5140_v60 = vadd.f32 %v11331_v25, %v14300_v1  ;;  %v14319_v41 = vsel %vm786_vm1, %v5484_v62, -1e+30  ;;  %v5134_v35 = vpop.f32.mrb[99].mxu0 }
 0xa6d   : > { %v5827_v28 = vsel %vm329_vm0, %v14319_v41, -inf  ;;  %v5135_v38 = vadd.f32 %v5134_v35, %v14300_v1  ;;  %5831 = vmax.xlane.f32.xlu1 %v5830_v18  ;;  %12043 = vmatprep.subr.bf16.mxu1 %v12042_v13 }
 0xa6e   : > { %5828 = vmax.xlane.f32.xlu0 %v5827_v28  ;;  %12045 = vmatpush3.bf16.msra.mxu1 %v12042_v13 }
 0xa6f   : > { %v14324_v2 = vpack.c.bf16 %v5140_v60, %v5135_v38  ;;  %v11334_v5 = vpop.f32.mrb[100].mxu0 }
 0xa70   : > { %v5150_v52 = vadd.f32 %v11334_v5, %v14300_v1  ;;  %v5144_v55 = vpop.f32.mrb[101].mxu0 }
 0xa71   : > { %v5145_v21 = vadd.f32 %v5144_v55, %v14300_v1  ;;  %12047 = vmatprep.subr.bf16.mxu0 %v14324_v2 }
 0xa73   : > { %v14329_v45 = vpack.c.bf16 %v5150_v52, %v5145_v21  ;;  %v11337_v51 = vpop.f32.mrb[102].mxu0 }
 0xa74   : > { %v5160_v12 = vadd.f32 %v11337_v51, %v14300_v1  ;;  %v5154_v59 = vpop.f32.mrb[103].mxu0 }
 0xa75   : > { %v5155_v63 = vadd.f32 %v5154_v59, %v14300_v1  ;;  %12051 = vmatprep.subr.bf16.mxu1 %v14329_v45 }
 0xa77   : > { %v14334_v39 = vpack.c.bf16 %v5160_v12, %v5155_v63  ;;  %v11340_v49 = vpop.f32.mrb[104].mxu0 }
 0xa78   : > { %v5170_v43 = vadd.f32 %v11340_v49, %v14300_v1  ;;  %v5164_v10 = vpop.f32.mrb[105].mxu0  ;;  %v14380_v49 = vsel %vm786_vm1, %v14304_v9, -1e+30 }
 0xa79   : > { %v5165_v27 = vadd.f32 %v5164_v10, %v14300_v1  ;;  %v5821_v10 = vsel %vm329_vm0, %v14380_v49, -inf }
 0xa7a   : > { %v11388_v50 = vpop.f32.mrb[138].mxu1 }
 0xa7b   : > { %v14338_v7 = vpack.c.bf16 %v5170_v43, %v5165_v27  ;;  %v14342_v14 = vsel %vm786_vm1, %v11388_v50, -1e+30  ;;  %v11343_v33 = vpop.f32.mrb[106].mxu0  ;;  %v5634_v11 = vpop.f32.mrb[139].mxu1 }
 0xa7c   : > { %v5842_v26 = vsel %vm329_vm0, %v14342_v14, -inf  ;;  %v5180_v22 = vadd.f32 %v11343_v33, %v14300_v1  ;;  %v14349_v58 = vsel %vm786_vm1, %v5634_v11, -1e+30  ;;  %v5174_v34 = vpop.f32.mrb[107].mxu0 }
 0xa7d   : > { %v5839_v42 = vsel %vm329_vm0, %v14349_v58, -inf  ;;  %v5175_v4 = vadd.f32 %v5174_v34, %v14300_v1  ;;  %5843 = vmax.xlane.f32.xlu1 %v5842_v26 }
 0xa7e   : > { %5840 = vmax.xlane.f32.xlu0 %v5839_v42 }
 0xa7f   : > { %v14354_v13 = vpack.c.bf16 %v5180_v22, %v5175_v4  ;;  %v11346_v25 = vpop.f32.mrb[108].mxu0 }
 0xa80   : > { %v5190_v62 = vadd.f32 %v11346_v25, %v14300_v1  ;;  %v5184_v18 = vpop.f32.mrb[109].mxu0 }
 0xa81   : > { %v5185_v60 = vadd.f32 %v5184_v18, %v14300_v1  ;;  %v14373_v1 = vsel %vm786_vm1, %v14302_v8, -1e+30 }
 0xa82   : > { %v5824_v43 = vsel %vm329_vm0, %v14373_v1, -inf }
 0xa83   : > { %v14358_v35 = vpack.c.bf16 %v5190_v62, %v5185_v60  ;;  %v11381_v28 = vpop.f32.mrb[110].mxu0 }
 0xa84   : > { %v5559_v38 = vpop.f32.mrb[111].mxu0  ;;  %v14388_v8 = vsel %vm786_vm1, %v11381_v28, -1e+30 }
 0xa85   : > { %v14392_v27 = vsel %vm786_vm1, %v5559_v38, -1e+30  ;;  %v5836_v9 = vsel %vm329_vm0, %v14388_v8, -inf }
 0xa86   : > { %v5833_v50 = vsel %vm329_vm0, %v14392_v27, -inf }
 0xa8a   : > { %v11402_v5 = vpop.f32.mrb[140].mxu1 }
 0xa8b   : > { %v11395_v52 = vpop.f32.mrb[112].mxu0  ;;  %v14362_v55 = vsel %vm786_vm1, %v11402_v5, -1e+30  ;;  %v5784_v21 = vpop.f32.mrb[141].mxu1 }
 0xa8c   : > { %v5854_v51 = vsel %vm329_vm0, %v14362_v55, -inf  ;;  %v5709_v12 = vpop.f32.mrb[113].mxu0  ;;  %v14368_v59 = vsel %vm786_vm1, %v5784_v21, -1e+30  ;;  %v14400_v33 = vsel %vm786_vm1, %v11395_v52, -1e+30 }
 0xa8d   : > { %v5851_v63 = vsel %vm329_vm0, %v14368_v59, -inf  ;;  %5855 = vmax.xlane.f32.xlu1 %v5854_v51  ;;  %v14404_v11 = vsel %vm786_vm1, %v5709_v12, -1e+30  ;;  %v5848_v26 = vsel %vm329_vm0, %v14400_v33, -inf }
 0xa8e   : > { %5852 = vmax.xlane.f32.xlu0 %v5851_v63  ;;  %v5845_v22 = vsel %vm329_vm0, %v14404_v11, -inf }
 0xa91   : > { %5825 = vmax.xlane.f32.xlu1 %v5824_v43 }
 0xa92   : > { %5822 = vmax.xlane.f32.xlu0 %v5821_v10 }
 0xa95   : > { %5837 = vmax.xlane.f32.xlu1 %v5836_v9 }
 0xa96   : > { %5834 = vmax.xlane.f32.xlu0 %v5833_v50 }
 0xa99   : > { %5849 = vmax.xlane.f32.xlu1 %v5848_v26 }
 0xa9a   : > { %5846 = vmax.xlane.f32.xlu0 %v5845_v22 }
 0xae2   : > { %v5814_v34 = vpop.xlane.xlu1 %5813 }
 0xae3   : > { %v5858_v42 = vsub.f32 %v14276_v57, %v5814_v34  ;;  %v5811_v4 = vpop.xlane.xlu0 %5810 }
 0xae4   : > { %v5857_v25 = vsub.f32 %v14280_v30, %v5811_v4 }
 0xae5   : > { %v5875_v62 = vmul.f32 1.442695, %v5858_v42 }
 0xae6   : > { %v5873_v18 = vmul.f32 1.442695, %v5857_v25 }
 0xae7   : > { %12498 = vpow2.f32 %v5875_v62 }
 0xae8   : > { %12500 = vpow2.f32 %v5873_v18 }
 0xaea   : > { %v5820_v60 = vpop.xlane.xlu1 %5819 }
 0xaeb   : > { %v5860_v28 = vsub.f32 %v14288_v24, %v5820_v60  ;;  %v5817_v38 = vpop.xlane.xlu0 %5816 }
 0xaec   : > { %v5859_v5 = vsub.f32 %v14294_v19, %v5817_v38 }
 0xaed   : > { %v5879_v52 = vmul.f32 1.442695, %v5860_v28 }
 0xaee   : > { %v5877_v21 = vmul.f32 1.442695, %v5859_v5 }
 0xaef   : > { %12502 = vpow2.f32 %v5879_v52 }
 0xaf0   : > { %12504 = vpow2.f32 %v5877_v21 }
 0xaf1   : > { %v12499_v51 = vpop.eup %12498 }
 0xaf2   : > { %v12501_v12 = vpop.eup %12500  ;;  %v14416_v57 = vsel %vm786_vm1, %v12499_v51, 0.0 }
 0xaf3   : > { %v5924_v30 = vsel %vm329_vm0, %v14416_v57, 0.0  ;;  %v14422_v63 = vsel %vm786_vm1, %v12501_v12, 0.0 }
 0xaf4   : > { %5925 = vadd.xlane.f32.xlu1 %v5924_v30  ;;  %v5921_v24 = vsel %vm329_vm0, %v14422_v63, 0.0 }
 0xaf5   : > { %5922 = vadd.xlane.f32.xlu0 %v5921_v24 }
 0xaf9   : > { %v12503_v19 = vpop.eup %12502 }
 0xafa   : > { %v12505_v43 = vpop.eup %12504  ;;  %v5832_v10 = vpop.xlane.xlu1 %5831  ;;  %v14428_v9 = vsel %vm786_vm1, %v12503_v19, 0.0 }
 0xafb   : > { %v5864_v50 = vsub.f32 %v14312_v15, %v5832_v10  ;;  %v5829_v26 = vpop.xlane.xlu0 %5828  ;;  %v5930_v22 = vsel %vm329_vm0, %v14428_v9, 0.0  ;;  %v14435_v34 = vsel %vm786_vm1, %v12505_v43, 0.0 }
 0xafc   : > { %v5863_v42 = vsub.f32 %v14319_v41, %v5829_v26  ;;  %5931 = vadd.xlane.f32.xlu1 %v5930_v22  ;;  %v5927_v4 = vsel %vm329_vm0, %v14435_v34, 0.0 }
 0xafd   : > { %v5887_v25 = vmul.f32 1.442695, %v5864_v50  ;;  %5928 = vadd.xlane.f32.xlu0 %v5927_v4 }
 0xafe   : > { %v5885_v62 = vmul.f32 1.442695, %v5863_v42 }
 0xaff   : > { %12506 = vpow2.f32 %v5887_v25 }
 0xb00   : > { %12508 = vpow2.f32 %v5885_v62 }
 0xb09   : > { %v12507_v15 = vpop.eup %12506 }
 0xb0a   : > { %v12509_v18 = vpop.eup %12508  ;;  %v5844_v60 = vpop.xlane.xlu1 %5843  ;;  %v14442_v28 = vsel %vm786_vm1, %v12507_v15, 0.0 }
 0xb0b   : > { %v5868_v38 = vsub.f32 %v14342_v14, %v5844_v60  ;;  %v5841_v5 = vpop.xlane.xlu0 %5840  ;;  %v5942_v41 = vsel %vm329_vm0, %v14442_v28, 0.0  ;;  %v14449_v52 = vsel %vm786_vm1, %v12509_v18, 0.0 }
 0xb0c   : > { %v5867_v21 = vsub.f32 %v14349_v58, %v5841_v5  ;;  %5943 = vadd.xlane.f32.xlu1 %v5942_v41  ;;  %v5939_v51 = vsel %vm329_vm0, %v14449_v52, 0.0 }
 0xb0d   : > { %v5895_v12 = vmul.f32 1.442695, %v5868_v38  ;;  %5940 = vadd.xlane.f32.xlu0 %v5939_v51 }
 0xb0e   : > { %v5893_v30 = vmul.f32 1.442695, %v5867_v21 }
 0xb0f   : > { %12510 = vpow2.f32 %v5895_v12 }
 0xb10   : > { %12512 = vpow2.f32 %v5893_v30 }
 0xb19   : > { %v12511_v14 = vpop.eup %12510 }
 0xb1a   : > { %v12513_v24 = vpop.eup %12512  ;;  %v5856_v19 = vpop.xlane.xlu1 %5855  ;;  %v14456_v43 = vsel %vm786_vm1, %v12511_v14, 0.0 }
 0xb1b   : > { %v5872_v10 = vsub.f32 %v14362_v55, %v5856_v19  ;;  %v5853_v50 = vpop.xlane.xlu0 %5852  ;;  %v5954_v58 = vsel %vm329_vm0, %v14456_v43, 0.0  ;;  %v14463_v26 = vsel %vm786_vm1, %v12513_v24, 0.0 }
 0xb1c   : > { %v5871_v22 = vsub.f32 %v14368_v59, %v5853_v50  ;;  %5955 = vadd.xlane.f32.xlu1 %v5954_v58  ;;  %v5951_v42 = vsel %vm329_vm0, %v14463_v26, 0.0 }
 0xb1d   : > { %v5903_v4 = vmul.f32 1.442695, %v5872_v10  ;;  %5952 = vadd.xlane.f32.xlu0 %v5951_v42 }
 0xb1e   : > { %v5901_v25 = vmul.f32 1.442695, %v5871_v22  ;;  %v5826_v62 = vpop.xlane.xlu1 %5825 }
 0xb1f   : > { %12514 = vpow2.f32 %v5903_v4  ;;  %v5862_v55 = vsub.f32 %v14373_v1, %v5826_v62  ;;  %v5823_v15 = vpop.xlane.xlu0 %5822 }
 0xb20   : > { %12516 = vpow2.f32 %v5901_v25  ;;  %v5861_v18 = vsub.f32 %v14380_v49, %v5823_v15 }
 0xb21   : > { %v5883_v60 = vmul.f32 1.442695, %v5862_v55 }
 0xb22   : > { %v5881_v38 = vmul.f32 1.442695, %v5861_v18  ;;  %v5838_v5 = vpop.xlane.xlu1 %5837 }
 0xb23   : > { %12518 = vpow2.f32 %v5883_v60  ;;  %v5866_v59 = vsub.f32 %v14388_v8, %v5838_v5  ;;  %v5835_v41 = vpop.xlane.xlu0 %5834 }
 0xb24   : > { %12520 = vpow2.f32 %v5881_v38  ;;  %v5865_v21 = vsub.f32 %v14392_v27, %v5835_v41 }
 0xb25   : > { %v5891_v51 = vmul.f32 1.442695, %v5866_v59 }
 0xb26   : > { %v5889_v12 = vmul.f32 1.442695, %v5865_v21  ;;  %v5850_v30 = vpop.xlane.xlu1 %5849 }
 0xb27   : > { %12522 = vpow2.f32 %v5891_v51  ;;  %v5870_v1 = vsub.f32 %v14400_v33, %v5850_v30  ;;  %v5847_v14 = vpop.xlane.xlu0 %5846 }
 0xb28   : > { %12524 = vpow2.f32 %v5889_v12  ;;  %v5869_v49 = vsub.f32 %v14404_v11, %v5847_v14 }
 0xb29   : > { %v12515_v24 = vpop.eup %12514  ;;  %v5899_v19 = vmul.f32 1.442695, %v5870_v1 }
 0xb2a   : > { %v12517_v10 = vpop.eup %12516  ;;  %v5897_v50 = vmul.f32 1.442695, %v5869_v49  ;;  %v14476_v8 = vsel %vm786_vm1, %v12515_v24, 0.0 }
 0xb2b   : > { %12526 = vpow2.f32 %v5899_v19  ;;  %v5966_v27 = vsel %vm329_vm0, %v14476_v8, 0.0  ;;  %v14482_v58 = vsel %vm786_vm1, %v12517_v10, 0.0 }
 0xb2c   : > { %12528 = vpow2.f32 %v5897_v50  ;;  %5967 = vadd.xlane.f32.xlu1 %v5966_v27  ;;  %v5963_v33 = vsel %vm329_vm0, %v14482_v58, 0.0 }
 0xb2d   : > { %v12519_v11 = vpop.eup %12518  ;;  %5964 = vadd.xlane.f32.xlu0 %v5963_v33 }
 0xb2e   : > { %v12521_v22 = vpop.eup %12520  ;;  %v14488_v42 = vsel %vm786_vm1, %v12519_v11, 0.0 }
 0xb2f   : > { %v5936_v4 = vsel %vm329_vm0, %v14488_v42, 0.0  ;;  %v14494_v25 = vsel %vm786_vm1, %v12521_v22, 0.0 }
 0xb30   : > { %5937 = vadd.xlane.f32.xlu1 %v5936_v4  ;;  %v5933_v62 = vsel %vm329_vm0, %v14494_v25, 0.0 }
 0xb31   : > { %v12523_v55 = vpop.eup %12522  ;;  %5934 = vadd.xlane.f32.xlu0 %v5933_v62 }
 0xb32   : > { %v12525_v15 = vpop.eup %12524  ;;  %v14500_v18 = vsel %vm786_vm1, %v12523_v55, 0.0 }
 0xb33   : > { %v5948_v60 = vsel %vm329_vm0, %v14500_v18, 0.0  ;;  %v14506_v38 = vsel %vm786_vm1, %v12525_v15, 0.0 }
 0xb34   : > { %5949 = vadd.xlane.f32.xlu1 %v5948_v60  ;;  %v5945_v5 = vsel %vm329_vm0, %v14506_v38, 0.0 }
 0xb35   : > { %v12527_v59 = vpop.eup %12526  ;;  %5946 = vadd.xlane.f32.xlu0 %v5945_v5 }
 0xb36   : > { %v12529_v41 = vpop.eup %12528  ;;  %v14512_v21 = vsel %vm786_vm1, %v12527_v59, 0.0 }
 0xb37   : > { %v5960_v51 = vsel %vm329_vm0, %v14512_v21, 0.0  ;;  %v14518_v12 = vsel %vm786_vm1, %v12529_v41, 0.0 }
 0xb38   : > { %5961 = vadd.xlane.f32.xlu1 %v5960_v51  ;;  %v5957_v30 = vsel %vm329_vm0, %v14518_v12, 0.0 }
 0xb39   : > { %5958 = vadd.xlane.f32.xlu0 %v5957_v30 }
 0xb81   : > { %v5926_v1 = vpop.xlane.xlu1 %5925 }
 0xb82   : > { %12530 = vrcp.f32 %v5926_v1  ;;  %v5923_v14 = vpop.xlane.xlu0 %5922 }
 0xb83   : > { %12532 = vrcp.f32 %v5923_v14 }
 0xb89   : > { %v5932_v49 = vpop.xlane.xlu1 %5931 }
 0xb8a   : > { %12534 = vrcp.f32 %v5932_v49  ;;  %v5929_v24 = vpop.xlane.xlu0 %5928 }
 0xb8b   : > { %12536 = vrcp.f32 %v5929_v24 }
 0xb8c   : > { %v12531_v19 = vpop.eup %12530 }
 0xb8d   : > { %v12533_v10 = vpop.eup %12532  ;;  %v5986_v50 = vmul.f32 %v12531_v19, %v5926_v1 }
 0xb8e   : > { %v5985_v27 = vmul.f32 %v12533_v10, %v5923_v14 }
 0xb8f   : > { %v6002_v33 = vsub.f32 2.0, %v5986_v50 }
 0xb90   : > { %v6001_v11 = vsub.f32 2.0, %v5985_v27 }
 0xb91   : > { %v6018_v22 = vmul.f32 %v12531_v19, %v6002_v33 }
 0xb92   : > { %v6017_v4 = vmul.f32 %v12533_v10, %v6001_v11 }
 0xb93   : > { %v6034_v60 = vmul.f32 %v6018_v22, %v14416_v57 }
 0xb94   : > { %v12535_v62 = vpop.eup %12534  ;;  %v6033_v55 = vmul.f32 %v6017_v4, %v14422_v63 }
 0xb95   : > { %v12537_v15 = vpop.eup %12536  ;;  %v5988_v5 = vmul.f32 %v12535_v62, %v5932_v49 }
 0xb96   : > { %v5987_v59 = vmul.f32 %v12537_v15, %v5929_v24  ;;  %11407 = vmatprep.mubr.msk.f32.mxu0 %vm329_vm0, %v6033_v55 }
 0xb97   : > { %v6004_v41 = vsub.f32 2.0, %v5988_v5  ;;  %11408 = vmatmul.mubr.msk.f32.vlgmr.msra.gmra.mrb[114].mxu0 %vm329_vm0, %v6034_v60 }
 0xb98   : > { %v6003_v51 = vsub.f32 2.0, %v5987_v59  ;;  %12049 = vmatpush3.bf16.msra.mxu0 %v14324_v2 }
 0xb99   : > { %v6020_v30 = vmul.f32 %v12535_v62, %v6004_v41  ;;  %12055 = vmatprep.subr.bf16.mxu0 %v14334_v39  ;;  %v5944_v1 = vpop.xlane.xlu1 %5943 }
 0xb9a   : > { %v6019_v14 = vmul.f32 %v12537_v15, %v6003_v51  ;;  %12538 = vrcp.f32 %v5944_v1  ;;  %v5941_v63 = vpop.xlane.xlu0 %5940 }
 0xb9b   : > { %12540 = vrcp.f32 %v5941_v63  ;;  %v6036_v49 = vmul.f32 %v6020_v30, %v14428_v9 }
 0xb9c   : > { %v6035_v57 = vmul.f32 %v6019_v14, %v14435_v34 }
 0xb9e   : > { %11414 = vmatprep.mubr.msk.f32.mxu1 %vm329_vm0, %v6035_v57 }
 0xb9f   : > { %11415 = vmatmul.mubr.msk.f32.vlgmr.msra.gmra.mrb[142].mxu1 %vm329_vm0, %v6036_v49 }
 0xba0   : > { %12053 = vmatpush3.bf16.msra.mxu1 %v14329_v45 }
 0xba1   : > { %12059 = vmatprep.subr.bf16.mxu1 %v14338_v7 }
 0xba4   : > { %v12539_v2 = vpop.eup %12538 }
 0xba5   : > { %v12541_v24 = vpop.eup %12540  ;;  %v5992_v19 = vmul.f32 %v12539_v2, %v5944_v1 }
 0xba6   : > { %v5991_v10 = vmul.f32 %v12541_v24, %v5941_v63 }
 0xba7   : > { %v6008_v50 = vsub.f32 2.0, %v5992_v19 }
 0xba8   : > { %v6007_v27 = vsub.f32 2.0, %v5991_v10 }
 0xba9   : > { %v6024_v33 = vmul.f32 %v12539_v2, %v6008_v50  ;;  %v5956_v11 = vpop.xlane.xlu1 %5955 }
 0xbaa   : > { %v6023_v22 = vmul.f32 %v12541_v24, %v6007_v27  ;;  %12542 = vrcp.f32 %v5956_v11  ;;  %v5953_v34 = vpop.xlane.xlu0 %5952 }
 0xbab   : > { %12544 = vrcp.f32 %v5953_v34  ;;  %v6040_v4 = vmul.f32 %v6024_v33, %v14442_v28  ;;  %v10269_v28 = vld [vmem:[%s15578_s3 + $0x98] sm:$0xff] }
 0xbac   : > { %v6039_v9 = vmul.f32 %v6023_v22, %v14449_v52 }
 0xbae   : > { %11428 = vmatprep.mubr.msk.f32.mxu1 %vm329_vm0, %v6039_v9 }
 0xbaf   : > { %11429 = vmatmul.mubr.msk.f32.vlgmr.msra.gmra.mrb[144].mxu1 %vm329_vm0, %v6040_v4  ;;  %v10271_v4 = vld [vmem:[%s15578_s3 + $0xa8] sm:$0xff] }
 0xbb0   : > { %12061 = vmatpush3.bf16.msra.mxu1 %v14338_v7  ;;  %v10272_v7 = vld [vmem:[%s15578_s3 + $0xb0] sm:$0xff] }
 0xbb1   : > { %12067 = vmatprep.subr.bf16.mxu1 %v14358_v35  ;;  %v12102_v63 = vpack.c.bf16 %v10272_v7, %v10269_v28 }
 0xbb4   : > { %v12543_v45 = vpop.eup %12542 }
 0xbb5   : > { %v12545_v62 = vpop.eup %12544  ;;  %v5996_v55 = vmul.f32 %v12543_v45, %v5956_v11 }
 0xbb6   : > { %v5995_v15 = vmul.f32 %v12545_v62, %v5953_v34 }
 0xbb7   : > { %v6012_v60 = vsub.f32 2.0, %v5996_v55 }
 0xbb8   : > { %v6011_v5 = vsub.f32 2.0, %v5995_v15 }
 0xbb9   : > { %v6028_v59 = vmul.f32 %v12543_v45, %v6012_v60  ;;  %v5968_v41 = vpop.xlane.xlu1 %5967 }
 0xbba   : > { %v6027_v51 = vmul.f32 %v12545_v62, %v6011_v5  ;;  %12546 = vrcp.f32 %v5968_v41  ;;  %v5965_v52 = vpop.xlane.xlu0 %5964 }
 0xbbb   : > { %12548 = vrcp.f32 %v5965_v52  ;;  %v6044_v1 = vmul.f32 %v6028_v59, %v14456_v43 }
 0xbbc   : > { %v6043_v30 = vmul.f32 %v6027_v51, %v14463_v26 }
 0xbbd   : > { %v5938_v14 = vpop.xlane.xlu1 %5937 }
 0xbbe   : > { %12550 = vrcp.f32 %v5938_v14  ;;  %11442 = vmatprep.mubr.msk.f32.mxu1 %vm329_vm0, %v6043_v30  ;;  %v5935_v57 = vpop.xlane.xlu0 %5934 }
 0xbbf   : > { %12552 = vrcp.f32 %v5935_v57  ;;  %11443 = vmatmul.mubr.msk.f32.vlgmr.msra.gmra.mrb[146].mxu1 %vm329_vm0, %v6044_v1 }
 0xbc0   : > { %12069 = vmatpush3.bf16.msra.mxu1 %v14358_v35  ;;  %v10268_v35 = vld [vmem:[%s15578_s3 + $0x90] sm:$0xff] }
 0xbc1   : > { %v5950_v49 = vpop.xlane.xlu1 %5949  ;;  %12103 = vmatprep.subr.bf16.mxu1 %v12102_v63  ;;  %v12104_v59 = vpack.c.bf16 %v10271_v4, %v10268_v35  ;;  %v10257_v35 = vld [vmem:[%s15579_s4 + $0x128] sm:$0xff] }
 0xbc2   : > { %12554 = vrcp.f32 %v5950_v49  ;;  %v5947_v2 = vpop.xlane.xlu0 %5946 }
 0xbc3   : > { %12556 = vrcp.f32 %v5947_v2 }
 0xbc4   : > { %v12547_v24 = vpop.eup %12546 }
 0xbc5   : > { %v12549_v26 = vpop.eup %12548  ;;  %v6000_v19 = vmul.f32 %v12547_v24, %v5968_v41  ;;  %v5962_v43 = vpop.xlane.xlu1 %5961 }
 0xbc6   : > { %v5999_v10 = vmul.f32 %v12549_v26, %v5965_v52  ;;  %12558 = vrcp.f32 %v5962_v43  ;;  %v5959_v50 = vpop.xlane.xlu0 %5958 }
 0xbc7   : > { %v6016_v27 = vsub.f32 2.0, %v6000_v19  ;;  %12560 = vrcp.f32 %v5959_v50 }
 0xbc8   : > { %v12551_v33 = vpop.eup %12550  ;;  %v6015_v11 = vsub.f32 2.0, %v5999_v10 }
 0xbc9   : > { %v12553_v22 = vpop.eup %12552  ;;  %v6032_v34 = vmul.f32 %v12547_v24, %v6016_v27  ;;  %v5990_v9 = vmul.f32 %v12551_v33, %v5938_v14 }
 0xbca   : > { %v6031_v45 = vmul.f32 %v12549_v26, %v6015_v11  ;;  %v5989_v62 = vmul.f32 %v12553_v22, %v5935_v57 }
 0xbcb   : > { %v6006_v55 = vsub.f32 2.0, %v5990_v9  ;;  %v6048_v51 = vmul.f32 %v6032_v34, %v14476_v8  ;;  %v10256_v9 = vld [vmem:[%s15579_s4 + $0x120] sm:$0xff] }
 0xbcc   : > { %v12555_v15 = vpop.eup %12554  ;;  %v6047_v60 = vmul.f32 %v6031_v45, %v14482_v58  ;;  %v6005_v5 = vsub.f32 2.0, %v5989_v62  ;;  %v10260_v45 = vld [vmem:[%s15579_s4 + $0x140] sm:$0xff]  ;;  %v10261_v62 = vld [vmem:[%s15579_s4 + $0x148] sm:$0xff] }
 0xbcd   : > { %v12557_v41 = vpop.eup %12556  ;;  %v6022_v52 = vmul.f32 %v12551_v33, %v6006_v55  ;;  %v5994_v28 = vmul.f32 %v12555_v15, %v5950_v49  ;;  %v12086_v55 = vpack.c.bf16 %v10261_v62, %v10260_v45 }
 0xbce   : > { %v6021_v7 = vmul.f32 %v12553_v22, %v6005_v5  ;;  %v5993_v30 = vmul.f32 %v12557_v41, %v5947_v2  ;;  %11456 = vmatprep.mubr.msk.f32.mxu1 %vm329_vm0, %v6047_v60  ;;  %v10252_v2 = vld [vmem:[%s15579_s4 + $0x100] sm:$0xff]  ;;  %v10254_v22 = vld [vmem:[%s15579_s4 + $0x110] sm:$0xff]  ;;  %v10263_v60 = vld [vmem:[%s15579_s4 + $0x158] sm:$0xff] }
 0xbcf   : > { %v6010_v1 = vsub.f32 2.0, %v5994_v28  ;;  %11457 = vmatmul.mubr.msk.f32.vlgmr.msra.gmra.mrb[148].mxu1 %vm329_vm0, %v6048_v51  ;;  %v6038_v24 = vmul.f32 %v6022_v52, %v14488_v42  ;;  %v10266_v52 = vld [vmem:[%s15579_s4 + $0x170] sm:$0xff]  ;;  %v10267_v28 = vld [vmem:[%s15579_s4 + $0x178] sm:$0xff] }
 0xbd0   : > { %v12559_v14 = vpop.eup %12558  ;;  %v6037_v63 = vmul.f32 %v6021_v7, %v14494_v25  ;;  %v6009_v57 = vsub.f32 2.0, %v5993_v30  ;;  %12105 = vmatpush1.bf16.msra.mxu1 %v12104_v59  ;;  %6964 = vmatprep.mubr.f32.mxu1 %v15631_v32  ;;  %v10253_v25 = vld [vmem:[%s15579_s4 + $0x108] sm:$0xff]  ;;  %v10264_v59 = vld [vmem:[%s15579_s4 + $0x160] sm:$0xff]  ;;  %v12098_v7 = vpack.c.bf16 %v10267_v28, %v10266_v52 }
 0xbd1   : > { %v12561_v58 = vpop.eup %12560  ;;  %v6026_v8 = vmul.f32 %v12555_v15, %v6010_v1  ;;  %v5998_v26 = vmul.f32 %v12559_v14, %v5962_v43  ;;  %v12070_v33 = vpack.c.bf16 %v10253_v25, %v10252_v2  ;;  %v10262_v15 = vld [vmem:[%s15579_s4 + $0x150] sm:$0xff]  ;;  %v10270_v30 = vld [vmem:[%s15578_s3 + $0xa0] sm:$0xff]  ;;  %v10273_v1 = vld [vmem:[%s15578_s3 + $0xb8] sm:$0xff] }
 0xbd2   : > { %v6025_v49 = vmul.f32 %v12557_v41, %v6009_v57  ;;  %v5997_v19 = vmul.f32 %v12561_v58, %v5959_v50  ;;  %11421 = vmatprep.mubr.msk.f32.mxu0 %vm329_vm0, %v6037_v63  ;;  %v12090_v5 = vpack.c.bf16 %v10263_v60, %v10262_v15  ;;  %v10265_v41 = vld [vmem:[%s15579_s4 + $0x168] sm:$0xff]  ;;  %v14681_v2 = vld [vmem:[%s15576_s1 + $0x33] ss:$8 sm:$0x7] }
 0xbd3   : > { %v6014_v10 = vsub.f32 2.0, %v5998_v26  ;;  %11422 = vmatmul.mubr.msk.f32.vlgmr.msra.gmra.mrb[116].mxu0 %vm329_vm0, %v6038_v24  ;;  %10275 = vmatmul.mubr.msk.f32.vlgmr.msra.gmra.mrb[150].mxu1 %vm329_vm0, %v13107_v37  ;;  %v6042_v50 = vmul.f32 %v6026_v8, %v14500_v18  ;;  %v12094_v51 = vpack.c.bf16 %v10265_v41, %v10264_v59 }
 0xbd4   : > { %v6041_v42 = vmul.f32 %v6025_v49, %v14506_v38  ;;  %v6013_v43 = vsub.f32 2.0, %v5997_v19  ;;  %12057 = vmatpush3.bf16.msra.mxu0 %v14334_v39  ;;  %6970 = vmatprep.mubr.f32.mxu1 %v15631_v32  ;;  %v10255_v38 = vld [vmem:[%s15579_s4 + $0x118] sm:$0xff] }
 0xbd5   : > { %v6030_v27 = vmul.f32 %v12559_v14, %v6014_v10  ;;  %12063 = vmatprep.subr.bf16.mxu0 %v14354_v13  ;;  %v12074_v34 = vpack.c.bf16 %v10255_v38, %v10254_v22  ;;  %v12106_v14 = vpack.c.bf16 %v10273_v1, %v10270_v30  ;;  %v14690_v22 = vrot.slane %v14681_v2, %v13279_v56 }
 0xbd6   : > { %v6029_v11 = vmul.f32 %v12561_v58, %v6013_v43  ;;  %11435 = vmatprep.mubr.msk.f32.mxu0 %vm329_vm0, %v6041_v42  ;;  %v14685_v42 = vrot.slane %v14681_v2, %v13267_v20 }
 0xbd7   : > { %11436 = vmatmul.mubr.msk.f32.vlgmr.msra.gmra.mrb[118].mxu0 %vm329_vm0, %v6042_v50  ;;  %10276 = vmatmul.mubr.msk.f32.gmra.mrb[152].mxu1 %vm329_vm0, %v13119_v61  ;;  %v6046_v18 = vmul.f32 %v6030_v27, %v14512_v21  ;;  %v10258_v21 = vld [vmem:[%s15579_s4 + $0x130] sm:$0xff] }
 0xbd8   : > { %v6045_v39 = vmul.f32 %v6029_v11, %v14518_v12  ;;  %12065 = vmatpush3.bf16.msra.mxu0 %v14354_v13  ;;  %6976 = vmatprep.mubr.f32.mxu1 %v15631_v32  ;;  %v12078_v13 = vpack.c.bf16 %v10257_v35, %v10256_v9  ;;  %v10259_v12 = vld [vmem:[%s15579_s4 + $0x138] sm:$0xff] }
 0xbd9   : > { %12071 = vmatprep.subr.bf16.mxu0 %v12070_v33  ;;  %v12082_v4 = vpack.c.bf16 %v10259_v12, %v10258_v21 }
 0xbda   : > { %11449 = vmatprep.mubr.msk.f32.mxu0 %vm329_vm0, %v6045_v39 }
 0xbdb   : > { %11450 = vmatmul.mubr.msk.f32.vlgmr.msra.gmra.mrb[120].mxu0 %vm329_vm0, %v6046_v18  ;;  %10277 = vmatmul.mubr.msk.f32.gmra.mrb[154].mxu1 %vm329_vm0, %v13123_v3 }
 0xbdc   : > { %6982 = vmatprep.mubr.f32.mxu1 %v15631_v32  ;;  %12073 = vmatpush3.bf16.msra.mxu0 %v12070_v33 }
 0xbdd   : > { %12075 = vmatprep.subr.bf16.mxu0 %v12074_v34 }
 0xbdf   : > { %10278 = vmatmul.mubr.msk.f32.gmra.mrb[156].mxu1 %vm329_vm0, %v13136_v16 }
 0xbe0   : > { %6988 = vmatprep.mubr.f32.mxu1 %v15631_v32  ;;  %12077 = vmatpush3.bf16.msra.mxu0 %v12074_v34 }
 0xbe1   : > { %12079 = vmatprep.subr.bf16.mxu0 %v12078_v13 }
 0xbe3   : > { %10279 = vmatmul.mubr.msk.f32.gmra.mrb[158].mxu1 %vm329_vm0, %v13140_v29 }
 0xbe4   : > { %6994 = vmatprep.mubr.f32.mxu1 %v15631_v32  ;;  %12081 = vmatpush3.bf16.msra.mxu0 %v12078_v13 }
 0xbe5   : > { %12083 = vmatprep.subr.bf16.mxu0 %v12082_v4 }
 0xbe7   : > { %10280 = vmatmul.mubr.msk.f32.gmra.mrb[160].mxu1 %vm329_vm0, %v13153_v47 }
 0xbe8   : > { %7000 = vmatprep.mubr.f32.mxu1 %v15631_v32  ;;  %12085 = vmatpush3.bf16.msra.mxu0 %v12082_v4 }
 0xbe9   : > { %12087 = vmatprep.subr.bf16.mxu0 %v12086_v55 }
 0xbeb   : > { %10281 = vmatmul.mubr.msk.f32.gmra.mrb[162].mxu1 %vm329_vm0, %v13157_v53 }
 0xbec   : > { %7006 = vmatprep.mubr.f32.mxu1 %v15631_v32  ;;  %12089 = vmatpush3.bf16.msra.mxu0 %v12086_v55 }
 0xbed   : > { %12091 = vmatprep.subr.bf16.mxu0 %v12090_v5 }
 0xbef   : > { %10282 = vmatmul.mubr.msk.f32.gmra.mrb[164].mxu1 %vm329_vm0, %v13170_v0 }
 0xbf0   : > { %7012 = vmatprep.mubr.f32.mxu1 %v15631_v32  ;;  %12093 = vmatpush3.bf16.msra.mxu0 %v12090_v5 }
 0xbf1   : > { %12095 = vmatprep.subr.bf16.mxu0 %v12094_v51 }
 0xbf3   : > { %10283 = vmatmul.mubr.msk.f32.gmra.mrb[166].mxu1 %vm329_vm0, %v13174_v6 }
 0xbf4   : > { %7018 = vmatprep.mubr.f32.mxu1 %v15631_v32  ;;  %12097 = vmatpush3.bf16.msra.mxu0 %v12094_v51 }
 0xbf5   : > { %12099 = vmatprep.subr.bf16.mxu0 %v12098_v7 }
 0xbf7   : > { %10284 = vmatmul.mubr.msk.f32.gmra.mrb[168].mxu1 %vm329_vm0, %v13187_v23 }
 0xbf8   : > { %7024 = vmatprep.mubr.f32.mxu1 %v15631_v32  ;;  %12101 = vmatpush3.bf16.msra.mxu0 %v12098_v7 }
 0xbf9   : > { %12107 = vmatprep.subr.bf16.mxu0 %v12106_v14 }
 0xbfb   : > { %10285 = vmatmul.mubr.msk.f32.gmra.mrb[170].mxu1 %vm329_vm0, %v13191_v46 }
 0xbfc   : > { %7030 = vmatprep.mubr.f32.mxu1 %v15631_v32 }
 0xbff   : > { %10286 = vmatmul.mubr.msk.f32.gmra.mrb[172].mxu1 %vm329_vm0, %v13204_v31 }
 0xc00   : > { %7036 = vmatprep.mubr.f32.mxu1 %v15631_v32 }
 0xc03   : > { %10287 = vmatmul.mubr.msk.f32.gmra.mrb[174].mxu1 %vm329_vm0, %v13208_v36 }
 0xc04   : > { %7042 = vmatprep.mubr.f32.mxu1 %v15631_v32 }
 0xc07   : > { %10288 = vmatmul.mubr.msk.f32.gmra.mrb[176].mxu1 %vm329_vm0, %v13221_v54 }
 0xc08   : > { %7048 = vmatprep.mubr.f32.mxu1 %v15631_v32 }
 0xc0b   : > { %10289 = vmatmul.mubr.msk.f32.gmra.mrb[178].mxu1 %vm329_vm0, %v13225_v44 }
 0xc0c   : > { %7054 = vmatprep.mubr.f32.mxu1 %v15631_v32 }
 0xc0f   : > { %10290 = vmatmul.mubr.msk.f32.gmra.mrb[180].mxu1 %vm329_vm0, %v13236_v48 }
 0xc6a   : > { %v11409_v63 = vpop.f32.mrb[114].mxu0 }
 0xc6b   : > { %v6121_v57 = vpop.f32.mrb[115].mxu0 }
 0xc6c   : > { %11491 = vmatprep.mubr.f32.mxu0 %v6121_v57 }
 0xc6d   : > { %11492 = vmatmul.mubr.f32.vlgmr.msra.gmra.mrb[48].mxu0 %v11409_v63 }
 0xc6e   : > { %12109 = vmatpush3.bf16.msra.mxu0 %v12106_v14 }
 0xc72   : > { %v11416_v58 = vpop.f32.mrb[142].mxu1 }
 0xc73   : > { %v6202_v24 = vpop.f32.mrb[143].mxu1 }
 0xc74   : > { %11494 = vmatprep.mubr.f32.mxu0 %v6202_v24 }
 0xc75   : > { %11495 = vmatmul.mubr.f32.gmra.mrb[50].mxu0 %v11416_v58 }
 0xc82   : > { %v11430_v8 = vpop.f32.mrb[144].mxu1 }
 0xc83   : > { %v6364_v26 = vpop.f32.mrb[145].mxu1 }
 0xc92   : > { %v11444_v49 = vpop.f32.mrb[146].mxu1 }
 0xc93   : > { %v6526_v19 = vpop.f32.mrb[147].mxu1 }
 0xca2   : > { %v11458_v25 = vpop.f32.mrb[148].mxu1 }
 0xca3   : > { %v6688_v10 = vpop.f32.mrb[149].mxu1 }
 0xca6   : > { %v11423_v43 = vpop.f32.mrb[116].mxu0  ;;  %v6966_v50 = vpop.f32.mrb[150].mxu1 }
 0xca7   : > { %v6967_v27 = vadd.f32 %v6966_v50, %v14685_v42  ;;  %v6283_v33 = vpop.f32.mrb[117].mxu0  ;;  %v6968_v11 = vpop.f32.mrb[151].mxu1 }
 0xca8   : > { %11497 = vmatprep.mubr.f32.mxu0 %v6283_v33  ;;  %v6969_v20 = vadd.f32 %v6968_v11, %v14690_v22 }
 0xca9   : > { %11498 = vmatmul.mubr.f32.gmra.mrb[52].mxu0 %v11423_v43  ;;  %11547 = vmatprep.mubr.f32.mxu1 %v6967_v27 }
 0xcaa   : > { %v11437_v38 = vpop.f32.mrb[118].mxu0  ;;  %11500 = vmatprep.mubr.f32.mxu0 %v6364_v26  ;;  %v6972_v39 = vpop.f32.mrb[152].mxu1 }
 0xcab   : > { %v6445_v18 = vpop.f32.mrb[119].mxu0  ;;  %v6974_v34 = vpop.f32.mrb[153].mxu1  ;;  %v6973_v15 = vadd.f32 %v6972_v39, %v14685_v42 }
 0xcac   : > { %v6975_v9 = vadd.f32 %v6974_v34, %v14690_v22 }
 0xcad   : > { %11501 = vmatmul.mubr.f32.gmra.mrb[54].mxu0 %v11430_v8 }
 0xcae   : > { %v12110_v35 = vpack.c.bf16 %v6975_v9, %v6969_v20  ;;  %v11451_v13 = vpop.f32.mrb[120].mxu0  ;;  %11503 = vmatprep.mubr.f32.mxu0 %v6445_v18  ;;  %v6978_v21 = vpop.f32.mrb[154].mxu1 }
 0xcaf   : > { %v6607_v12 = vpop.f32.mrb[121].mxu0  ;;  %v6980_v56 = vpop.f32.mrb[155].mxu1  ;;  %v6979_v41 = vadd.f32 %v6978_v21, %v14685_v42 }
 0xcb0   : > { %12111 = vmatprep.subr.bf16.mxu1 %v12110_v35  ;;  %v6981_v62 = vadd.f32 %v6980_v56, %v14690_v22 }
 0xcb1   : > { %11504 = vmatmul.mubr.f32.gmra.mrb[56].mxu0 %v11437_v38  ;;  %12113 = vmatpush3.bf16.xpose.msra.mxu1 %v12110_v35 }
 0xcb2   : > { %11506 = vmatprep.mubr.f32.mxu0 %v6526_v19  ;;  %v6984_v4 = vpop.f32.mrb[156].mxu1 }
 0xcb3   : > { %v6986_v45 = vpop.f32.mrb[157].mxu1  ;;  %v6985_v30 = vadd.f32 %v6984_v4, %v14685_v42 }
 0xcb4   : > { %v6987_v55 = vadd.f32 %v6986_v45, %v14690_v22 }
 0xcb5   : > { %11507 = vmatmul.mubr.f32.gmra.mrb[58].mxu0 %v11444_v49 }
 0xcb6   : > { %v12114_v60 = vpack.c.bf16 %v6987_v55, %v6981_v62  ;;  %11509 = vmatprep.mubr.f32.mxu0 %v6607_v12  ;;  %v6990_v5 = vpop.f32.mrb[158].mxu1 }
 0xcb7   : > { %v6992_v59 = vpop.f32.mrb[159].mxu1  ;;  %v6991_v57 = vadd.f32 %v6990_v5, %v14685_v42 }
 0xcb8   : > { %11548 = vmatmul.mubr.f32.vlgmr.msra.gmra.mrb[182].mxu1 %v6973_v15  ;;  %12115 = vmatprep.subr.bf16.mxu1 %v12114_v60  ;;  %v6993_v28 = vadd.f32 %v6992_v59, %v14690_v22 }
 0xcb9   : > { %11510 = vmatmul.mubr.f32.gmra.mrb[60].mxu0 %v11451_v13  ;;  %12117 = vmatpush3.bf16.xpose.msra.mxu1 %v12114_v60 }
 0xcba   : > { %11554 = vmatprep.mubr.f32.mxu1 %v6979_v41  ;;  %11512 = vmatprep.mubr.f32.mxu0 %v6688_v10  ;;  %v6996_v51 = vpop.f32.mrb[160].mxu1  ;;  %v14769_v41 = vrot.slane %v14681_v2, %v15633_v40 }
 0xcbb   : > { %v6998_v52 = vpop.f32.mrb[161].mxu1 }
 0xcbc   : > { %v6999_v7 = vadd.f32 %v6998_v52, %v14690_v22 }
 0xcbd   : > { %11513 = vmatmul.mubr.f32.gmra.mrb[62].mxu0 %v11458_v25 }
 0xcbe   : > { %v12118_v1 = vpack.c.bf16 %v6999_v7, %v6993_v28  ;;  %v7002_v14 = vpop.f32.mrb[162].mxu1  ;;  %11519 = vmatprep.mubr.msk.f32.mxu0 %vm329_vm0, %v13107_v37  ;;  %v6997_v37 = vadd.f32 %v6996_v51, %v14685_v42 }
 0xcbf   : > { %v7004_v63 = vpop.f32.mrb[163].mxu1  ;;  %v7003_v25 = vadd.f32 %v7002_v14, %v14685_v42 }
 0xcc0   : > { %11555 = vmatmul.mubr.f32.vlgmr.msra.gmra.mrb[184].mxu1 %v6985_v30  ;;  %12119 = vmatprep.subr.bf16.mxu1 %v12118_v1  ;;  %v7005_v8 = vadd.f32 %v7004_v63, %v14690_v22 }
 0xcc1   : > { %11520 = vmatmul.mubr.msk.f32.vlgmr.msra.gmra.mrb[122].mxu0 %vm329_vm0, %v13119_v61  ;;  %12121 = vmatpush3.bf16.xpose.msra.mxu1 %v12118_v1 }
 0xcc2   : > { %11561 = vmatprep.mubr.f32.mxu1 %v6991_v57  ;;  %v7008_v58 = vpop.f32.mrb[164].mxu1  ;;  %11522 = vmatprep.mubr.msk.f32.mxu0 %vm329_vm0, %v13123_v3 }
 0xcc3   : > { %v7010_v24 = vpop.f32.mrb[165].mxu1 }
 0xcc4   : > { %v7011_v26 = vadd.f32 %v7010_v24, %v14690_v22 }
 0xcc5   : > { %11523 = vmatmul.mubr.msk.f32.gmra.mrb[124].mxu0 %vm329_vm0, %v13136_v16 }
 0xcc6   : > { %v12122_v49 = vpack.c.bf16 %v7011_v26, %v7005_v8  ;;  %v7014_v19 = vpop.f32.mrb[166].mxu1  ;;  %11525 = vmatprep.mubr.msk.f32.mxu0 %vm329_vm0, %v13140_v29  ;;  %v7009_v29 = vadd.f32 %v7008_v58, %v14685_v42 }
 0xcc7   : > { %v7016_v61 = vpop.f32.mrb[167].mxu1 }
 0xcc8   : > { %11562 = vmatmul.mubr.f32.vlgmr.msra.gmra.mrb[186].mxu1 %v6997_v37  ;;  %12123 = vmatprep.subr.bf16.mxu1 %v12122_v49  ;;  %v7017_v10 = vadd.f32 %v7016_v61, %v14690_v22 }
 0xcc9   : > { %11526 = vmatmul.mubr.msk.f32.gmra.mrb[126].mxu0 %vm329_vm0, %v13153_v47  ;;  %12125 = vmatpush3.bf16.xpose.msra.mxu1 %v12122_v49 }
 0xcca   : > { %11568 = vmatprep.mubr.f32.mxu1 %v7003_v25  ;;  %v7020_v3 = vpop.f32.mrb[168].mxu1  ;;  %11528 = vmatprep.mubr.msk.f32.mxu0 %vm329_vm0, %v13157_v53 }
 0xccb   : > { %v7022_v16 = vpop.f32.mrb[169].mxu1  ;;  %v7021_v13 = vadd.f32 %v7020_v3, %v14685_v42 }
 0xccc   : > { %v7023_v43 = vadd.f32 %v7022_v16, %v14690_v22 }
 0xccd   : > { %11529 = vmatmul.mubr.msk.f32.gmra.mrb[128].mxu0 %vm329_vm0, %v13170_v0 }
 0xcce   : > { %v12126_v50 = vpack.c.bf16 %v7023_v43, %v7017_v10  ;;  %v7026_v27 = vpop.f32.mrb[170].mxu1  ;;  %11531 = vmatprep.mubr.msk.f32.mxu0 %vm329_vm0, %v13174_v6 }
 0xccf   : > { %v7027_v47 = vadd.f32 %v7026_v27, %v14685_v42  ;;  %v7028_v33 = vpop.f32.mrb[171].mxu1 }
 0xcd0   : > { %11569 = vmatmul.mubr.f32.vlgmr.msra.gmra.mrb[188].mxu1 %v7009_v29  ;;  %12127 = vmatprep.subr.bf16.mxu0 %v12126_v50  ;;  %v7029_v11 = vadd.f32 %v7028_v33, %v14690_v22 }
 0xcd1   : > { %11532 = vmatmul.mubr.msk.f32.gmra.mrb[130].mxu0 %vm329_vm0, %v13187_v23  ;;  %11582 = vmatprep.mubr.f32.mxu1 %v7027_v47 }
 0xcd2   : > { %12129 = vmatpush3.bf16.xpose.msra.mxu0 %v12126_v50  ;;  %v7032_v53 = vpop.f32.mrb[172].mxu1  ;;  %11534 = vmatprep.mubr.msk.f32.mxu0 %vm329_vm0, %v13191_v46 }
 0xcd3   : > { %v7034_v0 = vpop.f32.mrb[173].mxu1 }
 0xcd4   : > { %v7035_v38 = vadd.f32 %v7034_v0, %v14690_v22 }
 0xcd5   : > { %11535 = vmatmul.mubr.msk.f32.gmra.mrb[132].mxu0 %vm329_vm0, %v13204_v31  ;;  %v7015_v31 = vadd.f32 %v7014_v19, %v14685_v42 }
 0xcd6   : > { %v12130_v6 = vpack.c.bf16 %v7035_v38, %v7029_v11  ;;  %v7038_v39 = vpop.f32.mrb[174].mxu1  ;;  %11537 = vmatprep.mubr.msk.f32.mxu0 %vm329_vm0, %v13208_v36  ;;  %v7033_v36 = vadd.f32 %v7032_v53, %v14685_v42 }
 0xcd7   : > { %v7040_v23 = vpop.f32.mrb[175].mxu1  ;;  %v7039_v12 = vadd.f32 %v7038_v39, %v14685_v42 }
 0xcd8   : > { %12131 = vmatprep.subr.bf16.mxu1 %v12130_v6  ;;  %v7041_v20 = vadd.f32 %v7040_v23, %v14690_v22 }
 0xcd9   : > { %11538 = vmatmul.mubr.msk.f32.gmra.mrb[134].mxu0 %vm329_vm0, %v13221_v54  ;;  %12133 = vmatpush3.bf16.xpose.msra.mxu1 %v12130_v6 }
 0xcda   : > { %v7044_v46 = vpop.f32.mrb[176].mxu1  ;;  %11540 = vmatprep.mubr.msk.f32.mxu0 %vm329_vm0, %v13225_v44 }
 0xcdb   : > { %v7045_v18 = vadd.f32 %v7044_v46, %v14685_v42  ;;  %v7046_v34 = vpop.f32.mrb[177].mxu1 }
 0xcdc   : > { %v7047_v9 = vadd.f32 %v7046_v34, %v14690_v22 }
 0xcdd   : > { %11541 = vmatmul.mubr.msk.f32.gmra.mrb[136].mxu0 %vm329_vm0, %v13236_v48 }
 0xcde   : > { %v12134_v54 = vpack.c.bf16 %v7047_v9, %v7041_v20  ;;  %v7050_v35 = vpop.f32.mrb[178].mxu1  ;;  %11575 = vmatprep.mubr.f32.mxu0 %v7015_v31 }
 0xcdf   : > { %v7051_v44 = vadd.f32 %v7050_v35, %v14685_v42  ;;  %v7052_v21 = vpop.f32.mrb[179].mxu1 }
 0xce0   : > { %11583 = vmatmul.mubr.f32.vlgmr.msra.gmra.mrb[190].mxu1 %v7033_v36  ;;  %12135 = vmatprep.subr.bf16.mxu0 %v12134_v54  ;;  %v7053_v45 = vadd.f32 %v7052_v21, %v14690_v22 }
 0xce1   : > { %11576 = vmatmul.mubr.f32.vlgmr.msra.gmra.mrb[138].mxu0 %v7021_v13  ;;  %11596 = vmatprep.mubr.f32.mxu1 %v7051_v44 }
 0xce2   : > { %12137 = vmatpush3.bf16.xpose.msra.mxu0 %v12134_v54  ;;  %v7056_v56 = vpop.f32.mrb[180].mxu1  ;;  %11589 = vmatprep.mubr.f32.mxu0 %v7039_v12 }
 0xce3   : > { %v7057_v48 = vadd.f32 %v7056_v56, %v14685_v42  ;;  %v7058_v4 = vpop.f32.mrb[181].mxu1 }
 0xce4   : > { %v7059_v62 = vadd.f32 %v7058_v4, %v14690_v22 }
 0xce6   : > { %v12138_v55 = vpack.c.bf16 %v7059_v62, %v7053_v45 }
 0xce8   : > { %12139 = vmatprep.subr.bf16.mxu1 %v12138_v55 }
 0xce9   : > { %11590 = vmatmul.mubr.f32.vlgmr.msra.gmra.mrb[140].mxu0 %v7045_v18  ;;  %12141 = vmatpush3.bf16.xpose.msra.mxu1 %v12138_v55 }
 0xcf0   : > { %11597 = vmatmul.mubr.f32.vlgmr.msra.gmra.mrb[192].mxu1 %v7057_v48 }
 0xd8b   : > { %v11549_v15 = vpop.f32.mrb[182].mxu1 }
 0xd8c   : > { %v14757_v60 = vsel %vm786_vm1, %v11549_v15, -1e+30  ;;  %v7272_v5 = vpop.f32.mrb[183].mxu1 }
 0xd8d   : > { %v7825_v59 = vsel %vm329_vm0, %v14757_v60, -inf  ;;  %v14763_v42 = vsel %vm786_vm1, %v7272_v5, -1e+30 }
 0xd8e   : > { %v7822_v22 = vsel %vm329_vm0, %v14763_v42, -inf  ;;  %7826 = vmax.xlane.f32.xlu1 %v7825_v59 }
 0xd8f   : > { %7823 = vmax.xlane.f32.xlu0 %v7822_v22 }
 0xd93   : > { %v11556_v51 = vpop.f32.mrb[184].mxu1 }
 0xd94   : > { %v14773_v52 = vsel %vm786_vm1, %v11556_v51, -1e+30  ;;  %v11521_v28 = vpop.f32.mrb[122].mxu0  ;;  %v7347_v7 = vpop.f32.mrb[185].mxu1 }
 0xd95   : > { %v7831_v30 = vsel %vm329_vm0, %v14773_v52, -inf  ;;  %v7133_v1 = vadd.f32 %v11521_v28, %v14769_v41  ;;  %v14780_v14 = vsel %vm786_vm1, %v7347_v7, -1e+30  ;;  %v7127_v63 = vpop.f32.mrb[123].mxu0 }
 0xd96   : > { %v7828_v40 = vsel %vm329_vm0, %v14780_v14, -inf  ;;  %v7128_v2 = vadd.f32 %v7127_v63, %v14769_v41  ;;  %7832 = vmax.xlane.f32.xlu1 %v7831_v30 }
 0xd97   : > { %7829 = vmax.xlane.f32.xlu0 %v7828_v40 }
 0xd98   : > { %v12142_v57 = vpack.c.bf16 %v7133_v1, %v7128_v2  ;;  %v11524_v58 = vpop.f32.mrb[124].mxu0 }
 0xd99   : > { %v7143_v24 = vadd.f32 %v11524_v58, %v14769_v41  ;;  %v7137_v8 = vpop.f32.mrb[125].mxu0 }
 0xd9a   : > { %v7138_v26 = vadd.f32 %v7137_v8, %v14769_v41  ;;  %12143 = vmatprep.subr.bf16.mxu0 %v12142_v57 }
 0xd9b   : > { %v11563_v37 = vpop.f32.mrb[186].mxu1  ;;  %12145 = vmatpush3.bf16.msra.mxu0 %v12142_v57 }
 0xd9c   : > { %v14787_v49 = vpack.c.bf16 %v7143_v24, %v7138_v26  ;;  %v14791_v19 = vsel %vm786_vm1, %v11563_v37, -1e+30  ;;  %v11527_v61 = vpop.f32.mrb[126].mxu0  ;;  %v7422_v25 = vpop.f32.mrb[187].mxu1 }
 0xd9d   : > { %v7837_v3 = vsel %vm329_vm0, %v14791_v19, -inf  ;;  %v7153_v16 = vadd.f32 %v11527_v61, %v14769_v41  ;;  %v14798_v10 = vsel %vm786_vm1, %v7422_v25, -1e+30  ;;  %v7147_v43 = vpop.f32.mrb[127].mxu0 }
 0xd9e   : > { %v7834_v29 = vsel %vm329_vm0, %v14798_v10, -inf  ;;  %v7148_v50 = vadd.f32 %v7147_v43, %v14769_v41  ;;  %7838 = vmax.xlane.f32.xlu1 %v7837_v3  ;;  %12147 = vmatprep.subr.bf16.mxu0 %v14787_v49 }
 0xd9f   : > { %7835 = vmax.xlane.f32.xlu0 %v7834_v29 }
 0xda0   : > { %v12150_v27 = vpack.c.bf16 %v7153_v16, %v7148_v50  ;;  %v11530_v47 = vpop.f32.mrb[128].mxu0 }
 0xda1   : > { %v7163_v33 = vadd.f32 %v11530_v47, %v14769_v41  ;;  %v7157_v53 = vpop.f32.mrb[129].mxu0 }
 0xda2   : > { %v7158_v0 = vadd.f32 %v7157_v53, %v14769_v41  ;;  %12151 = vmatprep.subr.bf16.mxu1 %v12150_v27 }
 0xda3   : > { %v11570_v11 = vpop.f32.mrb[188].mxu1  ;;  %12153 = vmatpush3.bf16.msra.mxu1 %v12150_v27 }
 0xda4   : > { %v14806_v38 = vpack.c.bf16 %v7163_v33, %v7158_v0  ;;  %v14810_v6 = vsel %vm786_vm1, %v11570_v11, -1e+30  ;;  %v11533_v39 = vpop.f32.mrb[130].mxu0  ;;  %v7497_v23 = vpop.f32.mrb[189].mxu1 }
 0xda5   : > { %v7843_v46 = vsel %vm329_vm0, %v14810_v6, -inf  ;;  %v7173_v18 = vadd.f32 %v11533_v39, %v14769_v41  ;;  %v14817_v34 = vsel %vm786_vm1, %v7497_v23, -1e+30  ;;  %v7167_v31 = vpop.f32.mrb[131].mxu0 }
 0xda6   : > { %v7840_v20 = vsel %vm329_vm0, %v14817_v34, -inf  ;;  %v7168_v9 = vadd.f32 %v7167_v31, %v14769_v41  ;;  %7844 = vmax.xlane.f32.xlu1 %v7843_v46 }
 0xda7   : > { %7841 = vmax.xlane.f32.xlu0 %v7840_v20 }
 0xda8   : > { %v14822_v36 = vpack.c.bf16 %v7173_v18, %v7168_v9  ;;  %v11536_v54 = vpop.f32.mrb[132].mxu0 }
 0xda9   : > { %v7183_v35 = vadd.f32 %v11536_v54, %v14769_v41  ;;  %v7177_v13 = vpop.f32.mrb[133].mxu0 }
 0xdaa   : > { %v7178_v44 = vadd.f32 %v7177_v13, %v14769_v41  ;;  %12159 = vmatprep.subr.bf16.mxu1 %v14822_v36 }
 0xdac   : > { %v14827_v21 = vpack.c.bf16 %v7183_v35, %v7178_v44  ;;  %v11539_v12 = vpop.f32.mrb[134].mxu0 }
 0xdad   : > { %v7193_v56 = vadd.f32 %v11539_v12, %v14769_v41  ;;  %v7187_v48 = vpop.f32.mrb[135].mxu0 }
 0xdae   : > { %v7188_v4 = vadd.f32 %v7187_v48, %v14769_v41 }
 0xdb0   : > { %v14831_v45 = vpack.c.bf16 %v7193_v56, %v7188_v4  ;;  %v11542_v62 = vpop.f32.mrb[136].mxu0 }
 0xdb1   : > { %v7203_v55 = vadd.f32 %v11542_v62, %v14769_v41  ;;  %v7197_v15 = vpop.f32.mrb[137].mxu0 }
 0xdb2   : > { %v7198_v5 = vadd.f32 %v7197_v15, %v14769_v41 }
 0xdb3   : > { %v11584_v59 = vpop.f32.mrb[190].mxu1 }
 0xdb4   : > { %v14835_v22 = vpack.c.bf16 %v7203_v55, %v7198_v5  ;;  %v11577_v51 = vpop.f32.mrb[138].mxu0  ;;  %v7647_v28 = vpop.f32.mrb[191].mxu1  ;;  %v14849_v41 = vsel %vm786_vm1, %v11584_v59, -1e+30 }
 0xdb5   : > { %v14839_v7 = vsel %vm786_vm1, %v11577_v51, -1e+30  ;;  %v7572_v30 = vpop.f32.mrb[139].mxu0  ;;  %v14855_v2 = vsel %vm786_vm1, %v7647_v28, -1e+30  ;;  %v7855_v57 = vsel %vm329_vm0, %v14849_v41, -inf }
 0xdb6   : > { %v7849_v1 = vsel %vm329_vm0, %v14839_v7, -inf  ;;  %v14845_v63 = vsel %vm786_vm1, %v7572_v30, -1e+30  ;;  %v7852_v58 = vsel %vm329_vm0, %v14855_v2, -inf }
 0xdb7   : > { %v7846_v40 = vsel %vm329_vm0, %v14845_v63, -inf  ;;  %7850 = vmax.xlane.f32.xlu1 %v7849_v1 }
 0xdb8   : > { %7847 = vmax.xlane.f32.xlu0 %v7846_v40 }
 0xdbb   : > { %7856 = vmax.xlane.f32.xlu1 %v7855_v57 }
 0xdbc   : > { %v11591_v24 = vpop.f32.mrb[140].mxu0  ;;  %7853 = vmax.xlane.f32.xlu0 %v7852_v58 }
 0xdbd   : > { %v14863_v8 = vsel %vm786_vm1, %v11591_v24, -1e+30  ;;  %v7722_v26 = vpop.f32.mrb[141].mxu0 }
 0xdbe   : > { %v7861_v37 = vsel %vm329_vm0, %v14863_v8, -inf  ;;  %v14869_v61 = vsel %vm786_vm1, %v7722_v26, -1e+30 }
 0xdbf   : > { %v7858_v25 = vsel %vm329_vm0, %v14869_v61, -inf  ;;  %7862 = vmax.xlane.f32.xlu1 %v7861_v37 }
 0xdc0   : > { %7859 = vmax.xlane.f32.xlu0 %v7858_v25 }
 0xdc3   : > { %v11598_v3 = vpop.f32.mrb[192].mxu1 }
 0xdc4   : > { %v14875_v16 = vsel %vm786_vm1, %v11598_v3, -1e+30  ;;  %v7797_v43 = vpop.f32.mrb[193].mxu1 }
 0xdc5   : > { %v7867_v29 = vsel %vm329_vm0, %v14875_v16, -inf  ;;  %v14881_v50 = vsel %vm786_vm1, %v7797_v43, -1e+30 }
 0xdc6   : > { %v7864_v27 = vsel %vm329_vm0, %v14881_v50, -inf  ;;  %7868 = vmax.xlane.f32.xlu1 %v7867_v29 }
 0xdc7   : > { %7865 = vmax.xlane.f32.xlu0 %v7864_v27 }
 0xe1b   : > { %v7827_v47 = vpop.xlane.xlu1 %7826 }
 0xe1c   : > { %v7871_v33 = vsub.f32 %v14757_v60, %v7827_v47  ;;  %v7824_v53 = vpop.xlane.xlu0 %7823 }
 0xe1d   : > { %v7870_v0 = vsub.f32 %v14763_v42, %v7824_v53 }
 0xe1e   : > { %v7888_v11 = vmul.f32 1.442695, %v7871_v33 }
 0xe1f   : > { %v7886_v39 = vmul.f32 1.442695, %v7870_v0 }
 0xe20   : > { %12562 = vpow2.f32 %v7888_v11 }
 0xe21   : > { %12564 = vpow2.f32 %v7886_v39 }
 0xe23   : > { %v7833_v23 = vpop.xlane.xlu1 %7832 }
 0xe24   : > { %v7873_v46 = vsub.f32 %v14773_v52, %v7833_v23  ;;  %v7830_v18 = vpop.xlane.xlu0 %7829 }
 0xe25   : > { %v7872_v31 = vsub.f32 %v14780_v14, %v7830_v18 }
 0xe26   : > { %v7892_v20 = vmul.f32 1.442695, %v7873_v46 }
 0xe27   : > { %v7890_v9 = vmul.f32 1.442695, %v7872_v31 }
 0xe28   : > { %12566 = vpow2.f32 %v7892_v20 }
 0xe29   : > { %12568 = vpow2.f32 %v7890_v9 }
 0xe2a   : > { %v12563_v54 = vpop.eup %12562 }
 0xe2b   : > { %v12565_v35 = vpop.eup %12564  ;;  %v7839_v60 = vpop.xlane.xlu1 %7838  ;;  %v14891_v42 = vsel %vm786_vm1, %v12563_v54, 0.0 }
 0xe2c   : > { %v7875_v13 = vsub.f32 %v14791_v19, %v7839_v60  ;;  %v7836_v44 = vpop.xlane.xlu0 %7835  ;;  %v7937_v52 = vsel %vm329_vm0, %v14891_v42, 0.0  ;;  %v14898_v14 = vsel %vm786_vm1, %v12565_v35, 0.0 }
 0xe2d   : > { %v7874_v12 = vsub.f32 %v14798_v10, %v7836_v44  ;;  %7938 = vadd.xlane.f32.xlu1 %v7937_v52  ;;  %v7934_v56 = vsel %vm329_vm0, %v14898_v14, 0.0 }
 0xe2e   : > { %v7896_v48 = vmul.f32 1.442695, %v7875_v13  ;;  %7935 = vadd.xlane.f32.xlu0 %v7934_v56 }
 0xe2f   : > { %v7894_v4 = vmul.f32 1.442695, %v7874_v12 }
 0xe30   : > { %12570 = vpow2.f32 %v7896_v48 }
 0xe31   : > { %12572 = vpow2.f32 %v7894_v4 }
 0xe32   : > { %v12567_v19 = vpop.eup %12566 }
 0xe33   : > { %v12569_v62 = vpop.eup %12568  ;;  %v7845_v55 = vpop.xlane.xlu1 %7844  ;;  %v14905_v15 = vsel %vm786_vm1, %v12567_v19, 0.0 }
 0xe34   : > { %v7877_v5 = vsub.f32 %v14810_v6, %v7845_v55  ;;  %v7842_v59 = vpop.xlane.xlu0 %7841  ;;  %v7943_v10 = vsel %vm329_vm0, %v14905_v15, 0.0  ;;  %v14912_v51 = vsel %vm786_vm1, %v12569_v62, 0.0 }
 0xe35   : > { %v7876_v28 = vsub.f32 %v14817_v34, %v7842_v59  ;;  %7944 = vadd.xlane.f32.xlu1 %v7943_v10  ;;  %v7940_v30 = vsel %vm329_vm0, %v14912_v51, 0.0 }
 0xe36   : > { %v7900_v1 = vmul.f32 1.442695, %v7877_v5  ;;  %7941 = vadd.xlane.f32.xlu0 %v7940_v30 }
 0xe37   : > { %v7898_v40 = vmul.f32 1.442695, %v7876_v28 }
 0xe38   : > { %12574 = vpow2.f32 %v7900_v1 }
 0xe39   : > { %12576 = vpow2.f32 %v7898_v40 }
 0xe3a   : > { %v12571_v6 = vpop.eup %12570 }
 0xe3b   : > { %v12573_v57 = vpop.eup %12572  ;;  %v14919_v58 = vsel %vm786_vm1, %v12571_v6, 0.0 }
 0xe3c   : > { %v7949_v24 = vsel %vm329_vm0, %v14919_v58, 0.0  ;;  %v14925_v34 = vsel %vm786_vm1, %v12573_v57, 0.0 }
 0xe3d   : > { %7950 = vadd.xlane.f32.xlu1 %v7949_v24  ;;  %v7946_v26 = vsel %vm329_vm0, %v14925_v34, 0.0 }
 0xe3e   : > { %7947 = vadd.xlane.f32.xlu0 %v7946_v26 }
 0xe42   : > { %v12575_v37 = vpop.eup %12574 }
 0xe43   : > { %v12577_v25 = vpop.eup %12576  ;;  %v14931_v3 = vsel %vm786_vm1, %v12575_v37, 0.0 }
 0xe44   : > { %v7851_v43 = vpop.xlane.xlu1 %7850  ;;  %v7955_v29 = vsel %vm329_vm0, %v14931_v3, 0.0  ;;  %v14937_v27 = vsel %vm786_vm1, %v12577_v25, 0.0 }
 0xe45   : > { %v7879_v47 = vsub.f32 %v14839_v7, %v7851_v43  ;;  %7956 = vadd.xlane.f32.xlu1 %v7955_v29  ;;  %v7848_v33 = vpop.xlane.xlu0 %7847  ;;  %v7952_v53 = vsel %vm329_vm0, %v14937_v27, 0.0 }
 0xe46   : > { %v7878_v0 = vsub.f32 %v14845_v63, %v7848_v33  ;;  %7953 = vadd.xlane.f32.xlu0 %v7952_v53 }
 0xe47   : > { %v7904_v11 = vmul.f32 1.442695, %v7879_v47 }
 0xe48   : > { %v7902_v39 = vmul.f32 1.442695, %v7878_v0  ;;  %v7857_v23 = vpop.xlane.xlu1 %7856 }
 0xe49   : > { %12578 = vpow2.f32 %v7904_v11  ;;  %v7881_v46 = vsub.f32 %v14849_v41, %v7857_v23  ;;  %v7854_v18 = vpop.xlane.xlu0 %7853 }
 0xe4a   : > { %12580 = vpow2.f32 %v7902_v39  ;;  %v7880_v31 = vsub.f32 %v14855_v2, %v7854_v18 }
 0xe4b   : > { %v7908_v20 = vmul.f32 1.442695, %v7881_v46 }
 0xe4c   : > { %v7906_v7 = vmul.f32 1.442695, %v7880_v31  ;;  %v7863_v9 = vpop.xlane.xlu1 %7862 }
 0xe4d   : > { %12582 = vpow2.f32 %v7908_v20  ;;  %v7883_v54 = vsub.f32 %v14863_v8, %v7863_v9  ;;  %v7860_v35 = vpop.xlane.xlu0 %7859 }
 0xe4e   : > { %12584 = vpow2.f32 %v7906_v7  ;;  %v7882_v63 = vsub.f32 %v14869_v61, %v7860_v35 }
 0xe4f   : > { %v7912_v60 = vmul.f32 1.442695, %v7883_v54 }
 0xe50   : > { %v7910_v13 = vmul.f32 1.442695, %v7882_v63 }
 0xe51   : > { %12586 = vpow2.f32 %v7912_v60 }
 0xe52   : > { %12588 = vpow2.f32 %v7910_v13 }
 0xe53   : > { %v12579_v44 = vpop.eup %12578  ;;  %v7869_v41 = vpop.xlane.xlu1 %7868 }
 0xe54   : > { %v12581_v52 = vpop.eup %12580  ;;  %v7885_v12 = vsub.f32 %v14875_v16, %v7869_v41  ;;  %v7866_v2 = vpop.xlane.xlu0 %7865  ;;  %v14950_v56 = vsel %vm786_vm1, %v12579_v44, 0.0 }
 0xe55   : > { %v7884_v8 = vsub.f32 %v14881_v50, %v7866_v2  ;;  %v7961_v48 = vsel %vm329_vm0, %v14950_v56, 0.0  ;;  %v14957_v61 = vsel %vm786_vm1, %v12581_v52, 0.0 }
 0xe56   : > { %v7916_v4 = vmul.f32 1.442695, %v7885_v12  ;;  %7962 = vadd.xlane.f32.xlu1 %v7961_v48  ;;  %v7958_v19 = vsel %vm329_vm0, %v14957_v61, 0.0 }
 0xe57   : > { %v12583_v16 = vpop.eup %12582  ;;  %v7914_v62 = vmul.f32 1.442695, %v7884_v8  ;;  %7959 = vadd.xlane.f32.xlu0 %v7958_v19 }
 0xe58   : > { %v12585_v55 = vpop.eup %12584  ;;  %12590 = vpow2.f32 %v7916_v4  ;;  %v14963_v50 = vsel %vm786_vm1, %v12583_v16, 0.0 }
 0xe59   : > { %12592 = vpow2.f32 %v7914_v62  ;;  %v7967_v5 = vsel %vm329_vm0, %v14963_v50, 0.0  ;;  %v14969_v59 = vsel %vm786_vm1, %v12585_v55, 0.0 }
 0xe5a   : > { %7968 = vadd.xlane.f32.xlu1 %v7967_v5  ;;  %v7964_v10 = vsel %vm329_vm0, %v14969_v59, 0.0 }
 0xe5b   : > { %v12587_v28 = vpop.eup %12586  ;;  %7965 = vadd.xlane.f32.xlu0 %v7964_v10 }
 0xe5c   : > { %v12589_v30 = vpop.eup %12588  ;;  %v14975_v1 = vsel %vm786_vm1, %v12587_v28, 0.0 }
 0xe5d   : > { %v7973_v40 = vsel %vm329_vm0, %v14975_v1, 0.0  ;;  %v14981_v6 = vsel %vm786_vm1, %v12589_v30, 0.0 }
 0xe5e   : > { %7974 = vadd.xlane.f32.xlu1 %v7973_v40  ;;  %v7970_v57 = vsel %vm329_vm0, %v14981_v6, 0.0 }
 0xe5f   : > { %7971 = vadd.xlane.f32.xlu0 %v7970_v57 }
 0xe62   : > { %v12591_v24 = vpop.eup %12590 }
 0xe63   : > { %v12593_v26 = vpop.eup %12592  ;;  %v14987_v37 = vsel %vm786_vm1, %v12591_v24, 0.0 }
 0xe64   : > { %v7979_v25 = vsel %vm329_vm0, %v14987_v37, 0.0  ;;  %v14993_v43 = vsel %vm786_vm1, %v12593_v26, 0.0 }
 0xe65   : > { %7980 = vadd.xlane.f32.xlu1 %v7979_v25  ;;  %v7976_v29 = vsel %vm329_vm0, %v14993_v43, 0.0 }
 0xe66   : > { %7977 = vadd.xlane.f32.xlu0 %v7976_v29 }
 0xeba   : > { %v7939_v47 = vpop.xlane.xlu1 %7938 }
 0xebb   : > { %12594 = vrcp.f32 %v7939_v47  ;;  %v7936_v33 = vpop.xlane.xlu0 %7935 }
 0xebc   : > { %12596 = vrcp.f32 %v7936_v33 }
 0xec2   : > { %v7945_v53 = vpop.xlane.xlu1 %7944 }
 0xec3   : > { %12598 = vrcp.f32 %v7945_v53  ;;  %v7942_v0 = vpop.xlane.xlu0 %7941 }
 0xec4   : > { %12600 = vrcp.f32 %v7942_v0 }
 0xec5   : > { %v12595_v11 = vpop.eup %12594 }
 0xec6   : > { %v12597_v39 = vpop.eup %12596  ;;  %v7999_v23 = vmul.f32 %v12595_v11, %v7939_v47 }
 0xec7   : > { %v7998_v46 = vmul.f32 %v12597_v39, %v7936_v33 }
 0xec8   : > { %v8015_v17 = vsub.f32 2.0, %v7999_v23 }
 0xec9   : > { %v8014_v18 = vsub.f32 2.0, %v7998_v46 }
 0xeca   : > { %v8031_v31 = vmul.f32 %v12595_v11, %v8015_v17  ;;  %v7951_v20 = vpop.xlane.xlu1 %7950 }
 0xecb   : > { %v8030_v7 = vmul.f32 %v12597_v39, %v8014_v18  ;;  %12602 = vrcp.f32 %v7951_v20  ;;  %v7948_v9 = vpop.xlane.xlu0 %7947 }
 0xecc   : > { %12604 = vrcp.f32 %v7948_v9  ;;  %v8047_v60 = vmul.f32 %v8031_v31, %v14891_v42 }
 0xecd   : > { %v12599_v54 = vpop.eup %12598  ;;  %v8046_v35 = vmul.f32 %v8030_v7, %v14898_v14 }
 0xece   : > { %v12601_v63 = vpop.eup %12600  ;;  %v8001_v13 = vmul.f32 %v12599_v54, %v7945_v53 }
 0xecf   : > { %v8000_v44 = vmul.f32 %v12601_v63, %v7942_v0  ;;  %11603 = vmatprep.mubr.msk.f32.mxu0 %vm329_vm0, %v8046_v35 }
 0xed0   : > { %v8017_v41 = vsub.f32 2.0, %v8001_v13  ;;  %11604 = vmatmul.mubr.msk.f32.vlgmr.msra.gmra.mrb[142].mxu0 %vm329_vm0, %v8047_v60 }
 0xed1   : > { %v8016_v52 = vsub.f32 2.0, %v8000_v44  ;;  %12149 = vmatpush3.bf16.msra.mxu0 %v14787_v49 }
 0xed2   : > { %v8033_v12 = vmul.f32 %v12599_v54, %v8017_v41  ;;  %12155 = vmatprep.subr.bf16.mxu0 %v14806_v38  ;;  %v7957_v2 = vpop.xlane.xlu1 %7956 }
 0xed3   : > { %v8032_v8 = vmul.f32 %v12601_v63, %v8016_v52  ;;  %12606 = vrcp.f32 %v7957_v2  ;;  %v7954_v14 = vpop.xlane.xlu0 %7953 }
 0xed4   : > { %12608 = vrcp.f32 %v7954_v14  ;;  %v8049_v19 = vmul.f32 %v8033_v12, %v14905_v15 }
 0xed5   : > { %v12603_v48 = vpop.eup %12602  ;;  %v8048_v42 = vmul.f32 %v8032_v8, %v14912_v51 }
 0xed6   : > { %v12605_v4 = vpop.eup %12604  ;;  %v8003_v16 = vmul.f32 %v12603_v48, %v7951_v20 }
 0xed7   : > { %v8002_v62 = vmul.f32 %v12605_v4, %v7948_v9  ;;  %11610 = vmatprep.mubr.msk.f32.mxu0 %vm329_vm0, %v8048_v42 }
 0xed8   : > { %v8019_v55 = vsub.f32 2.0, %v8003_v16  ;;  %11611 = vmatmul.mubr.msk.f32.vlgmr.msra.gmra.mrb[144].mxu0 %vm329_vm0, %v8049_v19 }
 0xed9   : > { %v8018_v49 = vsub.f32 2.0, %v8002_v62  ;;  %12157 = vmatpush3.bf16.msra.mxu0 %v14806_v38 }
 0xeda   : > { %v8035_v5 = vmul.f32 %v12603_v48, %v8019_v55  ;;  %12163 = vmatprep.subr.bf16.mxu0 %v14827_v21  ;;  %v10324_v48 = vld [vmem:[%s15579_s4 + $0x188] sm:$0xff] }
 0xedb   : > { %v8034_v10 = vmul.f32 %v12605_v4, %v8018_v49 }
 0xedc   : > { %v8051_v15 = vmul.f32 %v8035_v5, %v14919_v58 }
 0xedd   : > { %v12607_v28 = vpop.eup %12606  ;;  %v8050_v51 = vmul.f32 %v8034_v10, %v14925_v34 }
 0xede   : > { %v12609_v30 = vpop.eup %12608  ;;  %v8005_v40 = vmul.f32 %v12607_v28, %v7957_v2 }
 0xedf   : > { %v8004_v57 = vmul.f32 %v12609_v30, %v7954_v14  ;;  %11617 = vmatprep.mubr.msk.f32.mxu1 %vm329_vm0, %v8050_v51  ;;  %v10323_v14 = vld [vmem:[%s15579_s4 + $0x180] sm:$0xff] }
 0xee0   : > { %v8021_v24 = vsub.f32 2.0, %v8005_v40  ;;  %11618 = vmatmul.mubr.msk.f32.vlgmr.msra.gmra.mrb[194].mxu1 %vm329_vm0, %v8051_v15  ;;  %v12174_v16 = vpack.c.bf16 %v10324_v48, %v10323_v14  ;;  %v10325_v15 = vld [vmem:[%s15579_s4 + $0x190] sm:$0xff]  ;;  %v15634_v14 = vld [vmem:[#allocation6_spill] sm:$0xff] }
 0xee1   : > { %v8020_v26 = vsub.f32 2.0, %v8004_v57  ;;  %12161 = vmatpush3.bf16.msra.mxu1 %v14822_v36  ;;  %v10327_v57 = vld [vmem:[%s15579_s4 + $0x1a0] sm:$0xff] }
 0xee2   : > { %v8037_v38 = vmul.f32 %v12607_v28, %v8021_v24  ;;  %12167 = vmatprep.subr.bf16.mxu1 %v14831_v45  ;;  %v10328_v24 = vld [vmem:[%s15579_s4 + $0x1a8] sm:$0xff] }
 0xee3   : > { %v8036_v25 = vmul.f32 %v12609_v30, %v8020_v26  ;;  %v7963_v29 = vpop.xlane.xlu1 %7962  ;;  %v12182_v26 = vpack.c.bf16 %v10328_v24, %v10327_v57 }
 0xee4   : > { %12610 = vrcp.f32 %v7963_v29  ;;  %v7960_v34 = vpop.xlane.xlu0 %7959  ;;  %v8053_v58 = vmul.f32 %v8037_v38, %v14931_v3 }
 0xee5   : > { %v8052_v47 = vmul.f32 %v8036_v25, %v14937_v27  ;;  %12612 = vrcp.f32 %v7960_v34  ;;  %v10331_v25 = vld [vmem:[%s15579_s4 + $0x1c0] sm:$0xff] }
 0xee7   : > { %v7969_v33 = vpop.xlane.xlu1 %7968  ;;  %11624 = vmatprep.mubr.msk.f32.mxu0 %vm329_vm0, %v8052_v47  ;;  %v10333_v47 = vld [vmem:[%s15579_s4 + $0x1d0] sm:$0xff] }
 0xee8   : > { %12614 = vrcp.f32 %v7969_v33  ;;  %11625 = vmatmul.mubr.msk.f32.vlgmr.msra.gmra.mrb[146].mxu0 %vm329_vm0, %v8053_v58  ;;  %v7966_v53 = vpop.xlane.xlu0 %7965  ;;  %v10334_v58 = vld [vmem:[%s15579_s4 + $0x1d8] sm:$0xff] }
 0xee9   : > { %12165 = vmatpush3.bf16.msra.mxu0 %v14827_v21  ;;  %12616 = vrcp.f32 %v7966_v53 }
 0xeea   : > { %12171 = vmatprep.subr.bf16.mxu0 %v14835_v22 }
 0xeeb   : > { %v7975_v36 = vpop.xlane.xlu1 %7974 }
 0xeec   : > { %12618 = vrcp.f32 %v7975_v36  ;;  %v7972_v0 = vpop.xlane.xlu0 %7971 }
 0xeed   : > { %12620 = vrcp.f32 %v7972_v0 }
 0xeee   : > { %v12611_v27 = vpop.eup %12610 }
 0xeef   : > { %v12613_v11 = vpop.eup %12612  ;;  %v8007_v39 = vmul.f32 %v12611_v27, %v7963_v29  ;;  %v10332_v29 = vld [vmem:[%s15579_s4 + $0x1c8] sm:$0xff] }
 0xef0   : > { %v8006_v3 = vmul.f32 %v12613_v11, %v7960_v34  ;;  %v12190_v34 = vpack.c.bf16 %v10332_v29, %v10331_v25  ;;  %v15640_v25 = vld [vmem:[#allocation11_spill] sm:$0xff] }
 0xef1   : > { %v8023_v23 = vsub.f32 2.0, %v8007_v39 }
 0xef2   : > { %v12615_v46 = vpop.eup %12614  ;;  %v8022_v17 = vsub.f32 2.0, %v8006_v3  ;;  %v7981_v18 = vpop.xlane.xlu1 %7980 }
 0xef3   : > { %v12617_v31 = vpop.eup %12616  ;;  %v8039_v20 = vmul.f32 %v12611_v27, %v8023_v23  ;;  %v8009_v7 = vmul.f32 %v12615_v46, %v7969_v33  ;;  %12622 = vrcp.f32 %v7981_v18  ;;  %v7978_v21 = vpop.xlane.xlu0 %7977  ;;  %v12194_v33 = vpack.c.bf16 %v10334_v58, %v10333_v47  ;;  %v10337_v27 = vld [vmem:[%s15579_s4 + $0x1f0] sm:$0xff] }
 0xef4   : > { %v8038_v9 = vmul.f32 %v12613_v11, %v8022_v17  ;;  %v8008_v54 = vmul.f32 %v12617_v31, %v7966_v53  ;;  %12624 = vrcp.f32 %v7978_v21  ;;  %v10335_v53 = vld [vmem:[%s15579_s4 + $0x1e0] sm:$0xff]  ;;  %v10338_v11 = vld [vmem:[%s15579_s4 + $0x1f8] sm:$0xff] }
 0xef5   : > { %v8025_v35 = vsub.f32 2.0, %v8009_v7  ;;  %v8055_v41 = vmul.f32 %v8039_v20, %v14950_v56  ;;  %v12202_v39 = vpack.c.bf16 %v10338_v11, %v10337_v27  ;;  %v15642_v11 = vld [vmem:[#allocation13_spill] sm:$0xff] }
 0xef6   : > { %v12619_v63 = vpop.eup %12618  ;;  %v8054_v60 = vmul.f32 %v8038_v9, %v14957_v61  ;;  %v8024_v13 = vsub.f32 2.0, %v8008_v54 }
 0xef7   : > { %v12621_v44 = vpop.eup %12620  ;;  %v8041_v52 = vmul.f32 %v12615_v46, %v8025_v35  ;;  %v8011_v12 = vmul.f32 %v12619_v63, %v7975_v36  ;;  %v10336_v36 = vld [vmem:[%s15579_s4 + $0x1e8] sm:$0xff] }
 0xef8   : > { %v8040_v2 = vmul.f32 %v12617_v31, %v8024_v13  ;;  %v8010_v8 = vmul.f32 %v12621_v44, %v7972_v0  ;;  %11631 = vmatprep.mubr.msk.f32.mxu1 %vm329_vm0, %v8054_v60  ;;  %v12198_v0 = vpack.c.bf16 %v10336_v36, %v10335_v53 }
 0xef9   : > { %v8027_v42 = vsub.f32 2.0, %v8011_v12  ;;  %11632 = vmatmul.mubr.msk.f32.vlgmr.msra.gmra.mrb[196].mxu1 %vm329_vm0, %v8055_v41  ;;  %v8057_v4 = vmul.f32 %v8041_v52, %v14963_v50  ;;  %v15090_v41 = vld [vmem:[%s15576_s1 + $0x37] ss:$0 sm:$0xff] }
 0xefa   : > { %v8056_v61 = vmul.f32 %v8040_v2, %v14969_v59  ;;  %v8026_v56 = vsub.f32 2.0, %v8010_v8  ;;  %12169 = vmatpush3.bf16.msra.mxu1 %v14831_v45 }
 0xefb   : > { %v8043_v19 = vmul.f32 %v12619_v63, %v8027_v42  ;;  %v15635_v42 = vld [vmem:[#allocation5_spill] sm:$0xff] }
 0xefc   : > { %v8042_v62 = vmul.f32 %v12621_v44, %v8026_v56  ;;  %11638 = vmatprep.mubr.msk.f32.mxu0 %vm329_vm0, %v8056_v61 }
 0xefd   : > { %v12623_v55 = vpop.eup %12622  ;;  %11639 = vmatmul.mubr.msk.f32.vlgmr.msra.gmra.mrb[148].mxu0 %vm329_vm0, %v8057_v4  ;;  %v8059_v59 = vmul.f32 %v8043_v19, %v14975_v1 }
 0xefe   : > { %v12625_v49 = vpop.eup %12624  ;;  %v8058_v5 = vmul.f32 %v8042_v62, %v14981_v6  ;;  %v8013_v10 = vmul.f32 %v12623_v55, %v7981_v18  ;;  %12173 = vmatpush3.bf16.msra.mxu0 %v14835_v22  ;;  %v10326_v22 = vld [vmem:[%s15579_s4 + $0x198] sm:$0xff] }
 0xeff   : > { %v8012_v28 = vmul.f32 %v12625_v49, %v7978_v21  ;;  %12175 = vmatprep.subr.bf16.mxu0 %v12174_v16  ;;  %v12178_v40 = vpack.c.bf16 %v10326_v22, %v10325_v15  ;;  %v15638_v22 = vld [vmem:[#allocation9_spill] sm:$0xff] }
 0xf00   : > { %v8029_v45 = vsub.f32 2.0, %v8013_v10  ;;  %11645 = vmatprep.mubr.msk.f32.mxu1 %vm329_vm0, %v8058_v5  ;;  %v15637_v10 = vld [vmem:[#allocation8_spill] sm:$0xff] }
 0xf01   : > { %v8028_v50 = vsub.f32 2.0, %v8012_v28  ;;  %11646 = vmatmul.mubr.msk.f32.vlgmr.msra.gmra.mrb[198].mxu1 %vm329_vm0, %v8059_v59 }
 0xf02   : > { %v8045_v51 = vmul.f32 %v12623_v55, %v8029_v45 }
 0xf03   : > { %v8044_v30 = vmul.f32 %v12625_v49, %v8028_v50  ;;  %v15636_v49 = vld [vmem:[#allocation7_spill] sm:$0xff] }
 0xf04   : > { %v8061_v6 = vmul.f32 %v8045_v51, %v14987_v37  ;;  %v10329_v37 = vld [vmem:[%s15579_s4 + $0x1b0] sm:$0xff] }
 0xf05   : > { %v8060_v1 = vmul.f32 %v8044_v30, %v14993_v43  ;;  %v10330_v43 = vld [vmem:[%s15579_s4 + $0x1b8] sm:$0xff] }
 0xf06   : > { %v12186_v38 = vpack.c.bf16 %v10330_v43, %v10329_v37 }
 0xf07   : > { %11652 = vmatprep.mubr.msk.f32.mxu0 %vm329_vm0, %v8060_v1 }
 0xf08   : > { %11653 = vmatmul.mubr.msk.f32.vlgmr.msra.gmra.mrb[150].mxu0 %vm329_vm0, %v8061_v6  ;;  %v15639_v6 = vld [vmem:[#allocation10_spill] sm:$0xff] }
 0xf09   : > { %12177 = vmatpush3.bf16.msra.mxu0 %v12174_v16 }
 0xf0a   : > { %12179 = vmatprep.subr.bf16.mxu0 %v12178_v40 }
 0xf0d   : > { %12181 = vmatpush3.bf16.msra.mxu0 %v12178_v40 }
 0xf0e   : > { %12183 = vmatprep.subr.bf16.mxu0 %v12182_v26 }
 0xf11   : > { %12185 = vmatpush3.bf16.msra.mxu0 %v12182_v26 }
 0xf12   : > { %12187 = vmatprep.subr.bf16.mxu0 %v12186_v38 }
 0xf15   : > { %12189 = vmatpush3.bf16.msra.mxu0 %v12186_v38 }
 0xf16   : > { %12191 = vmatprep.subr.bf16.mxu0 %v12190_v34 }
 0xf19   : > { %12193 = vmatpush3.bf16.msra.mxu0 %v12190_v34  ;;  %v15641_v34 = vld [vmem:[#allocation12_spill] sm:$0xff] }
 0xf1a   : > { %12195 = vmatprep.subr.bf16.mxu0 %v12194_v33 }
 0xf1d   : > { %12197 = vmatpush3.bf16.msra.mxu0 %v12194_v33 }
 0xf1e   : > { %12199 = vmatprep.subr.bf16.mxu0 %v12198_v0 }
 0xf21   : > { %12201 = vmatpush3.bf16.msra.mxu0 %v12198_v0 }
 0xf22   : > { %12203 = vmatprep.subr.bf16.mxu0 %v12202_v39 }
 0xf25   : > { %12205 = vmatpush3.bf16.msra.mxu0 %v12202_v39 }
 0xfa3   : > { %v11605_v3 = vpop.f32.mrb[142].mxu0 }
 0xfa4   : > { %v8134_v23 = vpop.f32.mrb[143].mxu0 }
 0xfa5   : > { %11687 = vmatprep.mubr.f32.mxu0 %v8134_v23 }
 0xfa6   : > { %11688 = vmatmul.mubr.f32.vlgmr.msra.gmra.mrb[48].mxu0 %v11605_v3  ;;  %v15643_v3 = vld [vmem:[#allocation14_spill] sm:$0xff] }
 0xfab   : > { %v11612_v46 = vpop.f32.mrb[144].mxu0 }
 0xfac   : > { %v8215_v17 = vpop.f32.mrb[145].mxu0 }
 0xfad   : > { %11690 = vmatprep.mubr.f32.mxu0 %v8215_v17 }
 0xfae   : > { %11691 = vmatmul.mubr.f32.gmra.mrb[50].mxu0 %v11612_v46 }
 0xfb3   : > { %v11619_v18 = vpop.f32.mrb[194].mxu1 }
 0xfb4   : > { %v8296_v31 = vpop.f32.mrb[195].mxu1 }
 0xfb5   : > { %11693 = vmatprep.mubr.f32.mxu0 %v8296_v31 }
 0xfb6   : > { %11694 = vmatmul.mubr.f32.gmra.mrb[52].mxu0 %v11619_v18 }
 0xfbb   : > { %v11626_v20 = vpop.f32.mrb[146].mxu0 }
 0xfbc   : > { %v8377_v7 = vpop.f32.mrb[147].mxu0 }
 0xfbd   : > { %11696 = vmatprep.mubr.f32.mxu0 %v8377_v7 }
 0xfbe   : > { %11697 = vmatmul.mubr.f32.gmra.mrb[54].mxu0 %v11626_v20 }
 0xfcc   : > { %v11633_v21 = vpop.f32.mrb[196].mxu1 }
 0xfcd   : > { %v8458_v9 = vpop.f32.mrb[197].mxu1 }
 0xfce   : > { %11699 = vmatprep.mubr.f32.mxu0 %v8458_v9 }
 0xfcf   : > { %11700 = vmatmul.mubr.f32.gmra.mrb[56].mxu0 %v11633_v21  ;;  %v15644_v21 = vld [vmem:[#allocation15_spill] sm:$0xff] }
 0xfd0   : > { %v11640_v54 = vpop.f32.mrb[148].mxu0 }
 0xfd1   : > { %v8539_v35 = vpop.f32.mrb[149].mxu0 }
 0xfd2   : > { %11702 = vmatprep.mubr.f32.mxu0 %v8539_v35 }
 0xfd3   : > { %11703 = vmatmul.mubr.f32.gmra.mrb[58].mxu0 %v11640_v54  ;;  %v15645_v54 = vld [vmem:[#allocation16_spill] sm:$0xff] }
 0xfd4   : > { %v11647_v63 = vpop.f32.mrb[198].mxu1 }
 0xfd5   : > { %v8620_v60 = vpop.f32.mrb[199].mxu1 }
 0xfd6   : > { %11705 = vmatprep.mubr.f32.mxu0 %v8620_v60 }
 0xfd7   : > { %11706 = vmatmul.mubr.f32.gmra.mrb[60].mxu0 %v11647_v63 }
 0xfdb   : > { %v11654_v13 = vpop.f32.mrb[150].mxu0 }
 0xfdc   : > { %v8701_v44 = vpop.f32.mrb[151].mxu0 }
 0xfdd   : > { %11708 = vmatprep.mubr.f32.mxu0 %v8701_v44 }
 0xfde   : > { %11709 = vmatmul.mubr.f32.gmra.mrb[62].mxu0 %v11654_v13 }
 0xfdf   : > { %11783 = vmatprep.mubr.msk.f32.mxu0 %vm12726_vm11, %v15631_v32 }
0x1079   : > { %v11689_v52 = vpop.f32.mrb[48].mxu0 }
0x107a   : > { %v12229_v12 = vadd.f32 %v11689_v52, %v15090_v41  ;;  %v8793_v2 = vpop.f32.mrb[49].mxu0 }
0x107b   : > { %v12230_v8 = vadd.f32 %v8793_v2, %v15090_v41  ;;  %v15646_v2 = vld [vmem:[#allocation17_spill] sm:$0xff] }
0x107c   : > { %v15095_v48 = vadd.f32 %v12229_v12, %v15634_v14  ;;  %v15647_v14 = vld [vmem:[#allocation18_spill] sm:$0xff] }
0x107d   : > { %v15098_v61 = vadd.f32 %v12230_v8, %v15635_v42 }
0x107e   : > { %v8909_v56 = vsel %vm329_vm0, %v15095_v48, 0.0 }
0x107f   : > { %8910 = vadd.xlane.f32.xlu1 %v8909_v56  ;;  %v8906_v4 = vsel %vm329_vm0, %v15098_v61, 0.0 }
0x1080   : > { %8907 = vadd.xlane.f32.xlu0 %v8906_v4 }
0x1081   : > { %v11692_v19 = vpop.f32.mrb[50].mxu0 }
0x1082   : > { %v12231_v16 = vadd.f32 %v11692_v19, %v15090_v41  ;;  %v8803_v62 = vpop.f32.mrb[51].mxu0 }
0x1083   : > { %v12232_v55 = vadd.f32 %v8803_v62, %v15090_v41 }
0x1084   : > { %v15107_v5 = vadd.f32 %v12231_v16, %v15636_v49  ;;  %v15648_v49 = vld [vmem:[#allocation19_spill] sm:$0xff] }
0x1085   : > { %v15110_v59 = vadd.f32 %v12232_v55, %v15637_v10 }
0x1086   : > { %v8915_v28 = vsel %vm329_vm0, %v15107_v5, 0.0 }
0x1087   : > { %8916 = vadd.xlane.f32.xlu1 %v8915_v28  ;;  %v8912_v45 = vsel %vm329_vm0, %v15110_v59, 0.0  ;;  %v15649_v28 = vld [vmem:[#allocation20_spill] sm:$0xff] }
0x1088   : > { %8913 = vadd.xlane.f32.xlu0 %v8912_v45 }
0x1089   : > { %v11695_v50 = vpop.f32.mrb[52].mxu0 }
0x108a   : > { %v12233_v51 = vadd.f32 %v11695_v50, %v15090_v41  ;;  %v8813_v30 = vpop.f32.mrb[53].mxu0 }
0x108b   : > { %v12234_v15 = vadd.f32 %v8813_v30, %v15090_v41 }
0x108c   : > { %v15119_v1 = vadd.f32 %v12233_v51, %v15638_v22 }
0x108d   : > { %v15122_v40 = vadd.f32 %v12234_v15, %v15639_v6 }
0x108e   : > { %v8921_v57 = vsel %vm329_vm0, %v15119_v1, 0.0 }
0x108f   : > { %8922 = vadd.xlane.f32.xlu1 %v8921_v57  ;;  %v8918_v24 = vsel %vm329_vm0, %v15122_v40, 0.0 }
0x1090   : > { %8919 = vadd.xlane.f32.xlu0 %v8918_v24 }
0x1091   : > { %v11698_v26 = vpop.f32.mrb[54].mxu0 }
0x1092   : > { %v12235_v37 = vadd.f32 %v11698_v26, %v15090_v41  ;;  %v8823_v43 = vpop.f32.mrb[55].mxu0 }
0x1093   : > { %v12236_v38 = vadd.f32 %v8823_v43, %v15090_v41 }
0x1094   : > { %v15131_v29 = vadd.f32 %v12235_v37, %v15640_v25 }
0x1095   : > { %v15134_v47 = vadd.f32 %v12236_v38, %v15641_v34 }
0x1096   : > { %v8927_v58 = vsel %vm329_vm0, %v15131_v29, 0.0 }
0x1097   : > { %8928 = vadd.xlane.f32.xlu1 %v8927_v58  ;;  %v8924_v33 = vsel %vm329_vm0, %v15134_v47, 0.0 }
0x1098   : > { %8925 = vadd.xlane.f32.xlu0 %v8924_v33 }
0x10a2   : > { %v11701_v53 = vpop.f32.mrb[56].mxu0 }
0x10a3   : > { %v12237_v36 = vadd.f32 %v11701_v53, %v15090_v41  ;;  %v8833_v0 = vpop.f32.mrb[57].mxu0 }
0x10a4   : > { %v12238_v27 = vadd.f32 %v8833_v0, %v15090_v41 }
0x10a5   : > { %v15143_v39 = vadd.f32 %v12237_v36, %v15642_v11 }
0x10a6   : > { %v15146_v23 = vadd.f32 %v12238_v27, %v15643_v3  ;;  %v11704_v46 = vpop.f32.mrb[58].mxu0 }
0x10a7   : > { %v12239_v17 = vadd.f32 %v11704_v46, %v15090_v41  ;;  %v8843_v18 = vpop.f32.mrb[59].mxu0  ;;  %v8933_v31 = vsel %vm329_vm0, %v15143_v39, 0.0 }
0x10a8   : > { %v12240_v20 = vadd.f32 %v8843_v18, %v15090_v41  ;;  %8934 = vadd.xlane.f32.xlu1 %v8933_v31  ;;  %v8930_v7 = vsel %vm329_vm0, %v15146_v23, 0.0 }
0x10a9   : > { %v15155_v9 = vadd.f32 %v12239_v17, %v15644_v21  ;;  %8931 = vadd.xlane.f32.xlu0 %v8930_v7 }
0x10aa   : > { %v15158_v35 = vadd.f32 %v12240_v20, %v15645_v54  ;;  %v11707_v63 = vpop.f32.mrb[60].mxu0 }
0x10ab   : > { %v12241_v60 = vadd.f32 %v11707_v63, %v15090_v41  ;;  %v8853_v13 = vpop.f32.mrb[61].mxu0  ;;  %v8939_v44 = vsel %vm329_vm0, %v15155_v9, 0.0 }
0x10ac   : > { %v12242_v52 = vadd.f32 %v8853_v13, %v15090_v41  ;;  %8940 = vadd.xlane.f32.xlu1 %v8939_v44  ;;  %v8936_v12 = vsel %vm329_vm0, %v15158_v35, 0.0 }
0x10ad   : > { %v15167_v8 = vadd.f32 %v12241_v60, %v15646_v2  ;;  %8937 = vadd.xlane.f32.xlu0 %v8936_v12 }
0x10ae   : > { %v15170_v42 = vadd.f32 %v12242_v52, %v15647_v14 }
0x10af   : > { %v8945_v56 = vsel %vm329_vm0, %v15167_v8, 0.0 }
0x10b0   : > { %8946 = vadd.xlane.f32.xlu1 %v8945_v56  ;;  %v8942_v4 = vsel %vm329_vm0, %v15170_v42, 0.0 }
0x10b1   : > { %8943 = vadd.xlane.f32.xlu0 %v8942_v4  ;;  %v11710_v19 = vpop.f32.mrb[62].mxu0 }
0x10b2   : > { %v12243_v16 = vadd.f32 %v11710_v19, %v15090_v41  ;;  %v8863_v62 = vpop.f32.mrb[63].mxu0 }
0x10b3   : > { %v12244_v55 = vadd.f32 %v8863_v62, %v15090_v41  ;;  %v9147_v62 = vld [vmem:[%s15580_s5 + $0x8] sm:$0xff] }
0x10b4   : > { %v15179_v10 = vadd.f32 %v12243_v16, %v15648_v49  ;;  %v9146_v16 = vld [vmem:[%s15580_s5] sm:$0xff] }
0x10b5   : > { %v15182_v45 = vadd.f32 %v12244_v55, %v15649_v28  ;;  %v12206_v55 = vpack.c.bf16 %v9147_v62, %v9146_v16 }
0x10b6   : > { %v8951_v50 = vsel %vm329_vm0, %v15179_v10, 0.0 }
0x10b7   : > { %8952 = vadd.xlane.f32.xlu1 %v8951_v50  ;;  %v8948_v51 = vsel %vm329_vm0, %v15182_v45, 0.0  ;;  %12207 = vmatprep.subr.bf16.mxu1 %v12206_v55 }
0x10b8   : > { %8949 = vadd.xlane.f32.xlu0 %v8948_v51  ;;  %12209 = vmatpush3.bf16.msra.mxu1 %v12206_v55 }
0x110c   : > { %v8911_v30 = vpop.xlane.xlu1 %8910 }
0x110d   : > { %v8955_v15 = vmul.f32 0.0625, %v8911_v30  ;;  %v8908_v22 = vpop.xlane.xlu0 %8907 }
0x110e   : > { %v8954_v6 = vmul.f32 0.0625, %v8908_v22 }
0x110f   : > { %v15189_v41 = vsub.f32 %v15095_v48, %v8955_v15 }
0x1110   : > { %v15192_v57 = vsub.f32 %v15098_v61, %v8954_v6 }
0x1111   : > { %v8987_v24 = vmul.f32 %v15189_v41, %v15189_v41 }
0x1112   : > { %v8986_v26 = vmul.f32 %v15192_v57, %v15192_v57 }
0x1113   : > { %v9005_v37 = vsel %vm329_vm0, %v8987_v24, 0.0 }
0x1114   : > { %v8917_v43 = vpop.xlane.xlu1 %8916  ;;  %9006 = vadd.xlane.f32.xlu1 %v9005_v37  ;;  %v9002_v38 = vsel %vm329_vm0, %v8986_v26, 0.0 }
0x1115   : > { %v8957_v25 = vmul.f32 0.0625, %v8917_v43  ;;  %v8914_v34 = vpop.xlane.xlu0 %8913  ;;  %9003 = vadd.xlane.f32.xlu0 %v9002_v38 }
0x1116   : > { %v8956_v58 = vmul.f32 0.0625, %v8914_v34 }
0x1117   : > { %v15201_v33 = vsub.f32 %v15107_v5, %v8957_v25 }
0x1118   : > { %v15204_v53 = vsub.f32 %v15110_v59, %v8956_v58 }
0x1119   : > { %v8989_v36 = vmul.f32 %v15201_v33, %v15201_v33 }
0x111a   : > { %v8988_v0 = vmul.f32 %v15204_v53, %v15204_v53 }
0x111b   : > { %v9011_v27 = vsel %vm329_vm0, %v8989_v36, 0.0 }
0x111c   : > { %v8923_v11 = vpop.xlane.xlu1 %8922  ;;  %9012 = vadd.xlane.f32.xlu1 %v9011_v27  ;;  %v9008_v3 = vsel %vm329_vm0, %v8988_v0, 0.0 }
0x111d   : > { %v8959_v46 = vmul.f32 0.0625, %v8923_v11  ;;  %v8920_v17 = vpop.xlane.xlu0 %8919  ;;  %9009 = vadd.xlane.f32.xlu0 %v9008_v3 }
0x111e   : > { %v8958_v18 = vmul.f32 0.0625, %v8920_v17 }
0x111f   : > { %v15213_v31 = vsub.f32 %v15119_v1, %v8959_v46 }
0x1120   : > { %v15216_v20 = vsub.f32 %v15122_v40, %v8958_v18 }
0x1121   : > { %v8991_v7 = vmul.f32 %v15213_v31, %v15213_v31 }
0x1122   : > { %v8990_v21 = vmul.f32 %v15216_v20, %v15216_v20 }
0x1123   : > { %v9017_v54 = vsel %vm329_vm0, %v8991_v7, 0.0 }
0x1124   : > { %v8929_v63 = vpop.xlane.xlu1 %8928  ;;  %9018 = vadd.xlane.f32.xlu1 %v9017_v54  ;;  %v9014_v60 = vsel %vm329_vm0, %v8990_v21, 0.0 }
0x1125   : > { %v8961_v13 = vmul.f32 0.0625, %v8929_v63  ;;  %v8926_v44 = vpop.xlane.xlu0 %8925  ;;  %9015 = vadd.xlane.f32.xlu0 %v9014_v60 }
0x1126   : > { %v8960_v52 = vmul.f32 0.0625, %v8926_v44 }
0x1127   : > { %v15225_v12 = vsub.f32 %v15131_v29, %v8961_v13 }
0x1128   : > { %v15228_v2 = vsub.f32 %v15134_v47, %v8960_v52 }
0x1129   : > { %v8993_v14 = vmul.f32 %v15225_v12, %v15225_v12 }
0x112a   : > { %v8992_v56 = vmul.f32 %v15228_v2, %v15228_v2 }
0x112b   : > { %v9023_v4 = vsel %vm329_vm0, %v8993_v14, 0.0 }
0x112c   : > { %9024 = vadd.xlane.f32.xlu1 %v9023_v4  ;;  %v9020_v19 = vsel %vm329_vm0, %v8992_v56, 0.0 }
0x112d   : > { %9021 = vadd.xlane.f32.xlu0 %v9020_v19 }
0x1135   : > { %v8935_v49 = vpop.xlane.xlu1 %8934 }
0x1136   : > { %v8963_v28 = vmul.f32 0.0625, %v8935_v49  ;;  %v8932_v50 = vpop.xlane.xlu0 %8931 }
0x1137   : > { %v8962_v51 = vmul.f32 0.0625, %v8932_v50  ;;  %v9359_v50 = vld [vmem:[%s15581_s6 + $0x8] sm:$0xff] }
0x1138   : > { %v15243_v30 = vsub.f32 %v15143_v39, %v8963_v28  ;;  %v9358_v28 = vld [vmem:[%s15581_s6] sm:$0xff] }
0x1139   : > { %v15246_v15 = vsub.f32 %v15146_v23, %v8962_v51  ;;  %v8941_v22 = vpop.xlane.xlu1 %8940  ;;  %v12210_v51 = vpack.c.bf16 %v9359_v50, %v9358_v28 }
0x113a   : > { %v8965_v6 = vmul.f32 0.0625, %v8941_v22  ;;  %v8938_v24 = vpop.xlane.xlu0 %8937  ;;  %v8995_v26 = vmul.f32 %v15243_v30, %v15243_v30 }
0x113b   : > { %v8964_v37 = vmul.f32 0.0625, %v8938_v24  ;;  %v8994_v43 = vmul.f32 %v15246_v15, %v15246_v15  ;;  %12211 = vmatprep.subr.bf16.mxu1 %v12210_v51 }
0x113c   : > { %v15253_v38 = vsub.f32 %v15155_v9, %v8965_v6  ;;  %v9029_v25 = vsel %vm329_vm0, %v8995_v26, 0.0 }
0x113d   : > { %v15257_v34 = vsub.f32 %v15158_v35, %v8964_v37  ;;  %v8947_v58 = vpop.xlane.xlu1 %8946  ;;  %9030 = vadd.xlane.f32.xlu1 %v9029_v25  ;;  %v9026_v36 = vsel %vm329_vm0, %v8994_v43, 0.0 }
0x113e   : > { %v8967_v0 = vmul.f32 0.0625, %v8947_v58  ;;  %v8944_v27 = vpop.xlane.xlu0 %8943  ;;  %9027 = vadd.xlane.f32.xlu0 %v9026_v36  ;;  %v8997_v11 = vmul.f32 %v15253_v38, %v15253_v38 }
0x113f   : > { %v8966_v3 = vmul.f32 0.0625, %v8944_v27  ;;  %v8996_v46 = vmul.f32 %v15257_v34, %v15257_v34 }
0x1140   : > { %v15265_v17 = vsub.f32 %v15167_v8, %v8967_v0  ;;  %v9035_v18 = vsel %vm329_vm0, %v8997_v11, 0.0 }
0x1141   : > { %v15269_v7 = vsub.f32 %v15170_v42, %v8966_v3  ;;  %9036 = vadd.xlane.f32.xlu1 %v9035_v18  ;;  %v9032_v21 = vsel %vm329_vm0, %v8996_v46, 0.0  ;;  %v15299_v46 = vld [vmem:[%s15576_s1 + $0x48] ss:$0 sm:$0xff] }
0x1142   : > { %9033 = vadd.xlane.f32.xlu0 %v9032_v21  ;;  %v8999_v54 = vmul.f32 %v15265_v17, %v15265_v17 }
0x1143   : > { %v8998_v63 = vmul.f32 %v15269_v7, %v15269_v7 }
0x1144   : > { %v8953_v60 = vpop.xlane.xlu1 %8952  ;;  %v9041_v13 = vsel %vm329_vm0, %v8999_v54, 0.0 }
0x1145   : > { %v8969_v44 = vmul.f32 0.0625, %v8953_v60  ;;  %9042 = vadd.xlane.f32.xlu1 %v9041_v13  ;;  %v8950_v52 = vpop.xlane.xlu0 %8949  ;;  %v9038_v14 = vsel %vm329_vm0, %v8998_v63, 0.0 }
0x1146   : > { %v8968_v56 = vmul.f32 0.0625, %v8950_v52  ;;  %9039 = vadd.xlane.f32.xlu0 %v9038_v14  ;;  %v15306_v52 = vld [vmem:[%s15576_s1 + $0x49] ss:$0 sm:$0xff] }
0x1147   : > { %v15279_v4 = vsub.f32 %v15179_v10, %v8969_v44 }
0x1148   : > { %v15282_v19 = vsub.f32 %v15182_v45, %v8968_v56 }
0x1149   : > { %v9001_v16 = vmul.f32 %v15279_v4, %v15279_v4 }
0x114a   : > { %v9000_v62 = vmul.f32 %v15282_v19, %v15282_v19 }
0x114b   : > { %v9047_v55 = vsel %vm329_vm0, %v9001_v16, 0.0 }
0x114c   : > { %9048 = vadd.xlane.f32.xlu1 %v9047_v55  ;;  %v9044_v49 = vsel %vm329_vm0, %v9000_v62, 0.0  ;;  %v9361_v62 = vld [vmem:[%s15581_s6 + $0x18] sm:$0xff] }
0x114d   : > { %9045 = vadd.xlane.f32.xlu0 %v9044_v49 }
0x11a1   : > { %v9007_v22 = vpop.xlane.xlu1 %9006 }
0x11a2   : > { %v9051_v6 = vmul.f32 0.0625, %v9007_v22  ;;  %v9004_v24 = vpop.xlane.xlu0 %9003  ;;  %v9362_v22 = vld [vmem:[%s15581_s6 + $0x20] sm:$0xff] }
0x11a3   : > { %v9050_v26 = vmul.f32 0.0625, %v9004_v24 }
0x11a4   : > { %v9067_v37 = vadd.f32 1e-05, %v9051_v6  ;;  %v9363_v6 = vld [vmem:[%s15581_s6 + $0x28] sm:$0xff] }
0x11a5   : > { %v9066_v43 = vadd.f32 1e-05, %v9050_v26 }
0x11a6   : > { %12626 = vrsqrt.f32 %v9067_v37 }
0x11a7   : > { %12628 = vrsqrt.f32 %v9066_v43 }
0x11a9   : > { %v9013_v25 = vpop.xlane.xlu1 %9012 }
0x11aa   : > { %v9053_v58 = vmul.f32 0.0625, %v9013_v25  ;;  %v9010_v36 = vpop.xlane.xlu0 %9009 }
0x11ab   : > { %v9052_v0 = vmul.f32 0.0625, %v9010_v36 }
0x11ac   : > { %v9069_v27 = vadd.f32 1e-05, %v9053_v58 }
0x11ad   : > { %v9068_v11 = vadd.f32 1e-05, %v9052_v0 }
0x11ae   : > { %12630 = vrsqrt.f32 %v9069_v27  ;;  %v12218_v27 = vpack.c.bf16 %v9363_v6, %v9362_v22 }
0x11af   : > { %12632 = vrsqrt.f32 %v9068_v11 }
0x11b0   : > { %v12627_v3 = vpop.eup %12626 }
0x11b1   : > { %v12629_v18 = vpop.eup %12628  ;;  %v9099_v21 = vmul.f32 %v12627_v3, %v15189_v41  ;;  %v9019_v54 = vpop.xlane.xlu1 %9018  ;;  %v9360_v41 = vld [vmem:[%s15581_s6 + $0x10] sm:$0xff] }
0x11b2   : > { %v9055_v63 = vmul.f32 0.0625, %v9019_v54  ;;  %v9016_v60 = vpop.xlane.xlu0 %9015  ;;  %v9098_v13 = vmul.f32 %v12629_v18, %v15192_v57  ;;  %v12214_v28 = vpack.c.bf16 %v9361_v62, %v9360_v41 }
0x11b3   : > { %v9054_v44 = vmul.f32 0.0625, %v9016_v60  ;;  %v9115_v14 = vmul.f32 %v9099_v21, %v15299_v46 }
0x11b4   : > { %v9071_v56 = vadd.f32 1e-05, %v9055_v63  ;;  %v9114_v16 = vmul.f32 %v9098_v13, %v15299_v46 }
0x11b5   : > { %v9070_v57 = vadd.f32 1e-05, %v9054_v44  ;;  %v9131_v49 = vadd.f32 %v9115_v14, %v15306_v52 }
0x11b6   : > { %12634 = vrsqrt.f32 %v9071_v56  ;;  %v9130_v55 = vadd.f32 %v9114_v16, %v15306_v52 }
0x11b7   : > { %12636 = vrsqrt.f32 %v9070_v57 }
0x11b8   : > { %v12631_v50 = vpop.eup %12630  ;;  %11715 = vmatprep.mubr.msk.f32.mxu1 %vm329_vm0, %v9130_v55 }
0x11b9   : > { %v12633_v24 = vpop.eup %12632  ;;  %v9025_v26 = vpop.xlane.xlu1 %9024  ;;  %11716 = vmatmul.mubr.msk.f32.vlgmr.msra.gmra.mrb[200].mxu1 %vm329_vm0, %v9131_v49  ;;  %v9101_v37 = vmul.f32 %v12631_v50, %v15201_v33 }
0x11ba   : > { %v9057_v43 = vmul.f32 0.0625, %v9025_v26  ;;  %v9022_v25 = vpop.xlane.xlu0 %9021  ;;  %v9100_v58 = vmul.f32 %v12633_v24, %v15204_v53  ;;  %12213 = vmatpush3.bf16.msra.mxu1 %v12210_v51 }
0x11bb   : > { %v9056_v36 = vmul.f32 0.0625, %v9022_v25  ;;  %v9117_v0 = vmul.f32 %v9101_v37, %v15299_v46  ;;  %12215 = vmatprep.subr.bf16.mxu1 %v12214_v28 }
0x11bc   : > { %v9073_v11 = vadd.f32 1e-05, %v9057_v43  ;;  %v9116_v3 = vmul.f32 %v9100_v58, %v15299_v46 }
0x11bd   : > { %v9072_v18 = vadd.f32 1e-05, %v9056_v36  ;;  %v9133_v33 = vadd.f32 %v9117_v0, %v15306_v52 }
0x11be   : > { %12638 = vrsqrt.f32 %v9073_v11  ;;  %v9132_v21 = vadd.f32 %v9116_v3, %v15306_v52  ;;  %12217 = vmatpush3.bf16.msra.mxu1 %v12214_v28 }
0x11bf   : > { %12640 = vrsqrt.f32 %v9072_v18  ;;  %12219 = vmatprep.subr.bf16.mxu1 %v12218_v27 }
0x11c0   : > { %v12635_v54 = vpop.eup %12634  ;;  %11718 = vmatprep.mubr.msk.f32.mxu1 %vm329_vm0, %v9132_v21 }
0x11c1   : > { %v12637_v53 = vpop.eup %12636  ;;  %11719 = vmatmul.mubr.msk.f32.gmra.mrb[202].mxu1 %vm329_vm0, %v9133_v33  ;;  %v9103_v51 = vmul.f32 %v12635_v54, %v15213_v31 }
0x11c2   : > { %v9102_v63 = vmul.f32 %v12637_v53, %v15216_v20  ;;  %12221 = vmatpush3.bf16.msra.mxu1 %v12218_v27 }
0x11c3   : > { %v9119_v60 = vmul.f32 %v9103_v51, %v15299_v46 }
0x11c4   : > { %v9118_v13 = vmul.f32 %v9102_v63, %v15299_v46 }
0x11c5   : > { %v9135_v14 = vadd.f32 %v9119_v60, %v15306_v52 }
0x11c6   : > { %v9134_v44 = vadd.f32 %v9118_v13, %v15306_v52 }
0x11c8   : > { %v12639_v56 = vpop.eup %12638  ;;  %11721 = vmatprep.mubr.msk.f32.mxu1 %vm329_vm0, %v9134_v44 }
0x11c9   : > { %v12641_v16 = vpop.eup %12640  ;;  %11722 = vmatmul.mubr.msk.f32.gmra.mrb[204].mxu1 %vm329_vm0, %v9135_v14  ;;  %v9105_v41 = vmul.f32 %v12639_v56, %v15225_v12 }
0x11ca   : > { %v9031_v31 = vpop.xlane.xlu1 %9030  ;;  %v9104_v20 = vmul.f32 %v12641_v16, %v15228_v2 }
0x11cb   : > { %v9059_v62 = vmul.f32 0.0625, %v9031_v31  ;;  %v9028_v57 = vpop.xlane.xlu0 %9027  ;;  %v9121_v55 = vmul.f32 %v9105_v41, %v15299_v46 }
0x11cc   : > { %v9058_v49 = vmul.f32 0.0625, %v9028_v57  ;;  %v9120_v28 = vmul.f32 %v9104_v20, %v15299_v46 }
0x11cd   : > { %v9075_v50 = vadd.f32 1e-05, %v9059_v62  ;;  %v9137_v12 = vadd.f32 %v9121_v55, %v15306_v52 }
0x11ce   : > { %v9074_v22 = vadd.f32 1e-05, %v9058_v49  ;;  %v9037_v6 = vpop.xlane.xlu1 %9036  ;;  %v9136_v24 = vadd.f32 %v9120_v28, %v15306_v52 }
0x11cf   : > { %12642 = vrsqrt.f32 %v9075_v50  ;;  %v9061_v26 = vmul.f32 0.0625, %v9037_v6  ;;  %v9034_v37 = vpop.xlane.xlu0 %9033 }
0x11d0   : > { %12644 = vrsqrt.f32 %v9074_v22  ;;  %v9060_v43 = vmul.f32 0.0625, %v9034_v37  ;;  %11724 = vmatprep.mubr.msk.f32.mxu1 %vm329_vm0, %v9136_v24 }
0x11d1   : > { %v9077_v2 = vadd.f32 1e-05, %v9061_v26  ;;  %11725 = vmatmul.mubr.msk.f32.gmra.mrb[206].mxu1 %vm329_vm0, %v9137_v12 }
0x11d2   : > { %v9076_v25 = vadd.f32 1e-05, %v9060_v43  ;;  %v9043_v58 = vpop.xlane.xlu1 %9042 }
0x11d3   : > { %12646 = vrsqrt.f32 %v9077_v2  ;;  %v9063_v36 = vmul.f32 0.0625, %v9043_v58  ;;  %v9040_v0 = vpop.xlane.xlu0 %9039 }
0x11d4   : > { %12648 = vrsqrt.f32 %v9076_v25  ;;  %v9062_v27 = vmul.f32 0.0625, %v9040_v0 }
0x11d5   : > { %v9079_v11 = vadd.f32 1e-05, %v9063_v36 }
0x11d6   : > { %v9078_v3 = vadd.f32 1e-05, %v9062_v27 }
0x11d7   : > { %12650 = vrsqrt.f32 %v9079_v11 }
0x11d8   : > { %12652 = vrsqrt.f32 %v9078_v3 }
0x11d9   : > { %v12643_v18 = vpop.eup %12642  ;;  %v9049_v21 = vpop.xlane.xlu1 %9048 }
0x11da   : > { %v12645_v33 = vpop.eup %12644  ;;  %v9065_v54 = vmul.f32 0.0625, %v9049_v21  ;;  %v9046_v53 = vpop.xlane.xlu0 %9045  ;;  %v9107_v51 = vmul.f32 %v12643_v18, %v15243_v30 }
0x11db   : > { %v9064_v63 = vmul.f32 0.0625, %v9046_v53  ;;  %v9106_v60 = vmul.f32 %v12645_v33, %v15246_v15 }
0x11dc   : > { %v9081_v13 = vadd.f32 1e-05, %v9065_v54  ;;  %v9123_v44 = vmul.f32 %v9107_v51, %v15299_v46 }
0x11dd   : > { %v12647_v14 = vpop.eup %12646  ;;  %v9080_v56 = vadd.f32 1e-05, %v9064_v63  ;;  %v9122_v16 = vmul.f32 %v9106_v60, %v15299_v46 }
0x11de   : > { %v12649_v41 = vpop.eup %12648  ;;  %12654 = vrsqrt.f32 %v9081_v13  ;;  %v9109_v31 = vmul.f32 %v12647_v14, %v15253_v38  ;;  %v9139_v30 = vadd.f32 %v9123_v44, %v15306_v52 }
0x11df   : > { %12656 = vrsqrt.f32 %v9080_v56  ;;  %v9138_v20 = vadd.f32 %v9122_v16, %v15306_v52  ;;  %v9108_v62 = vmul.f32 %v12649_v41, %v15257_v34 }
0x11e0   : > { %v9125_v15 = vmul.f32 %v9109_v31, %v15299_v46 }
0x11e1   : > { %v12651_v57 = vpop.eup %12650  ;;  %11727 = vmatprep.mubr.msk.f32.mxu1 %vm329_vm0, %v9138_v20  ;;  %v9124_v55 = vmul.f32 %v9108_v62, %v15299_v46 }
0x11e2   : > { %v12653_v49 = vpop.eup %12652  ;;  %11728 = vmatmul.mubr.msk.f32.gmra.mrb[208].mxu1 %vm329_vm0, %v9139_v30  ;;  %v9111_v28 = vmul.f32 %v12651_v57, %v15265_v17  ;;  %v9141_v34 = vadd.f32 %v9125_v15, %v15306_v52 }
0x11e3   : > { %v9140_v38 = vadd.f32 %v9124_v55, %v15306_v52  ;;  %v9110_v50 = vmul.f32 %v12653_v49, %v15269_v7 }
0x11e4   : > { %v9127_v22 = vmul.f32 %v9111_v28, %v15299_v46 }
0x11e5   : > { %11730 = vmatprep.mubr.msk.f32.mxu1 %vm329_vm0, %v9140_v38  ;;  %v9126_v6 = vmul.f32 %v9110_v50, %v15299_v46 }
0x11e6   : > { %11731 = vmatmul.mubr.msk.f32.gmra.mrb[210].mxu1 %vm329_vm0, %v9141_v34  ;;  %v9143_v37 = vadd.f32 %v9127_v22, %v15306_v52 }
0x11e7   : > { %v9142_v24 = vadd.f32 %v9126_v6, %v15306_v52 }
0x11e8   : > { %v12655_v26 = vpop.eup %12654 }
0x11e9   : > { %v12657_v17 = vpop.eup %12656  ;;  %11733 = vmatprep.mubr.msk.f32.mxu1 %vm329_vm0, %v9142_v24  ;;  %v9113_v7 = vmul.f32 %v12655_v26, %v15279_v4  ;;  %v9364_v4 = vld [vmem:[%s15581_s6 + $0x30] sm:$0xff] }
0x11ea   : > { %11734 = vmatmul.mubr.msk.f32.gmra.mrb[212].mxu1 %vm329_vm0, %v9143_v37  ;;  %v9112_v12 = vmul.f32 %v12657_v17, %v15282_v19  ;;  %v9365_v19 = vld [vmem:[%s15581_s6 + $0x38] sm:$0xff] }
0x11eb   : > { %v9129_v43 = vmul.f32 %v9113_v7, %v15299_v46  ;;  %v12222_v36 = vpack.c.bf16 %v9365_v19, %v9364_v4 }
0x11ec   : > { %v9128_v2 = vmul.f32 %v9112_v12, %v15299_v46  ;;  %v9148_v46 = vld [vmem:[%s15576_s1 + $0x4a] ss:$0 sm:$0xff] }
0x11ed   : > { %v9145_v58 = vadd.f32 %v9129_v43, %v15306_v52  ;;  %12223 = vmatprep.subr.bf16.mxu1 %v12222_v36 }
0x11ee   : > { %v9144_v25 = vadd.f32 %v9128_v2, %v15306_v52  ;;  %12225 = vmatpush3.bf16.msra.mxu1 %v12222_v36 }
0x11f0   : > { %11736 = vmatprep.mubr.msk.f32.mxu1 %vm329_vm0, %v9144_v25 }
0x11f1   : > { %11737 = vmatmul.mubr.msk.f32.gmra.mrb[214].mxu1 %vm329_vm0, %v9145_v58 }
0x128c   : > { %v11717_v52 = vpop.f32.mrb[200].mxu1 }
0x128d   : > { %v9269_v0 = vadd.f32 %v11717_v52, %v9148_v46  ;;  %v9263_v27 = vpop.f32.mrb[201].mxu1 }
0x128e   : > { %v9264_v11 = vadd.f32 %v9263_v27, %v9148_v46  ;;  %v15650_v27 = vld [vmem:[#allocation21_spill] sm:$0xff] }
0x128f   : > { %v9343_v18 = vmax.f32 %v9269_v0, 0.0 }
0x1290   : > { %v9342_v3 = vmax.f32 %v9264_v11, 0.0  ;;  %v9579_v11 = vadd.s32 8, %v15650_v27 }
0x1292   : > { %11755 = vmatprep.mubr.msk.f32.mxu1 %vm9367_vm2, %v9342_v3  ;;  %v15411_v3 = vld [vmem:[%s15576_s1 + $0x4b] ss:$0 sm:$0xff]  ;;  %vm9581_vm3 = vcmp.lt.s32.totalorder %v9579_v11, 13 }
0x1293   : > { %11756 = vmatmul.mubr.msk.f32.vlgmr.msra.gmra.mrb[216].mxu1 %vm9367_vm2, %v9343_v18 }
0x1294   : > { %v11720_v21 = vpop.f32.mrb[202].mxu1 }
0x1295   : > { %v9279_v33 = vadd.f32 %v11720_v21, %v9148_v46  ;;  %v9273_v54 = vpop.f32.mrb[203].mxu1 }
0x1296   : > { %v9274_v53 = vadd.f32 %v9273_v54, %v9148_v46 }
0x1297   : > { %v9345_v63 = vmax.f32 %v9279_v33, 0.0 }
0x1298   : > { %v9344_v51 = vmax.f32 %v9274_v53, 0.0 }
0x129a   : > { %11758 = vmatprep.mubr.msk.f32.mxu1 %vm9367_vm2, %v9344_v51 }
0x129b   : > { %11759 = vmatmul.mubr.msk.f32.gmra.mrb[218].mxu1 %vm9367_vm2, %v9345_v63 }
0x129c   : > { %v11723_v60 = vpop.f32.mrb[204].mxu1 }
0x129d   : > { %v9289_v13 = vadd.f32 %v11723_v60, %v9148_v46  ;;  %v9283_v44 = vpop.f32.mrb[205].mxu1 }
0x129e   : > { %v9284_v14 = vadd.f32 %v9283_v44, %v9148_v46 }
0x129f   : > { %v9347_v16 = vmax.f32 %v9289_v13, 0.0 }
0x12a0   : > { %v9346_v56 = vmax.f32 %v9284_v14, 0.0 }
0x12a2   : > { %11761 = vmatprep.mubr.msk.f32.mxu1 %vm9367_vm2, %v9346_v56 }
0x12a3   : > { %11762 = vmatmul.mubr.msk.f32.gmra.mrb[220].mxu1 %vm9367_vm2, %v9347_v16 }
0x12a4   : > { %v11726_v41 = vpop.f32.mrb[206].mxu1 }
0x12a5   : > { %v9299_v31 = vadd.f32 %v11726_v41, %v9148_v46  ;;  %v9293_v20 = vpop.f32.mrb[207].mxu1 }
0x12a6   : > { %v9294_v62 = vadd.f32 %v9293_v20, %v9148_v46 }
0x12a7   : > { %v9349_v15 = vmax.f32 %v9299_v31, 0.0 }
0x12a8   : > { %v9348_v30 = vmax.f32 %v9294_v62, 0.0 }
0x12aa   : > { %11764 = vmatprep.mubr.msk.f32.mxu1 %vm9367_vm2, %v9348_v30 }
0x12ab   : > { %11765 = vmatmul.mubr.msk.f32.gmra.mrb[222].mxu1 %vm9367_vm2, %v9349_v15 }
0x12b5   : > { %v11729_v57 = vpop.f32.mrb[208].mxu1 }
0x12b6   : > { %v9309_v55 = vadd.f32 %v11729_v57, %v9148_v46  ;;  %v9303_v49 = vpop.f32.mrb[209].mxu1 }
0x12b7   : > { %v9304_v28 = vadd.f32 %v9303_v49, %v9148_v46 }
0x12b8   : > { %v9351_v34 = vmax.f32 %v9309_v55, 0.0 }
0x12b9   : > { %v9350_v38 = vmax.f32 %v9304_v28, 0.0  ;;  %v11732_v50 = vpop.f32.mrb[210].mxu1 }
0x12ba   : > { %v9319_v22 = vadd.f32 %v11732_v50, %v9148_v46  ;;  %v9313_v6 = vpop.f32.mrb[211].mxu1 }
0x12bb   : > { %v9314_v24 = vadd.f32 %v9313_v6, %v9148_v46  ;;  %11767 = vmatprep.mubr.msk.f32.mxu1 %vm9367_vm2, %v9350_v38 }
0x12bc   : > { %11768 = vmatmul.mubr.msk.f32.gmra.mrb[224].mxu1 %vm9367_vm2, %v9351_v34  ;;  %v9353_v17 = vmax.f32 %v9319_v22, 0.0 }
0x12bd   : > { %v9352_v26 = vmax.f32 %v9314_v24, 0.0  ;;  %v11735_v37 = vpop.f32.mrb[212].mxu1 }
0x12be   : > { %v9329_v7 = vadd.f32 %v11735_v37, %v9148_v46  ;;  %v9323_v12 = vpop.f32.mrb[213].mxu1 }
0x12bf   : > { %v9324_v43 = vadd.f32 %v9323_v12, %v9148_v46  ;;  %11770 = vmatprep.mubr.msk.f32.mxu1 %vm9367_vm2, %v9352_v26 }
0x12c0   : > { %11771 = vmatmul.mubr.msk.f32.gmra.mrb[226].mxu1 %vm9367_vm2, %v9353_v17  ;;  %v9355_v25 = vmax.f32 %v9329_v7, 0.0 }
0x12c1   : > { %v9354_v2 = vmax.f32 %v9324_v43, 0.0 }
0x12c3   : > { %11773 = vmatprep.mubr.msk.f32.mxu1 %vm9367_vm2, %v9354_v2 }
0x12c4   : > { %v11738_v58 = vpop.f32.mrb[214].mxu1  ;;  %11774 = vmatmul.mubr.msk.f32.gmra.mrb[228].mxu1 %vm9367_vm2, %v9355_v25 }
0x12c5   : > { %v9339_v4 = vadd.f32 %v11738_v58, %v9148_v46  ;;  %v9333_v19 = vpop.f32.mrb[215].mxu1 }
0x12c6   : > { %v9334_v36 = vadd.f32 %v9333_v19, %v9148_v46  ;;  %v15415_v46 = vsel %vm9581_vm3, 1.0, %v15631_v32 }
0x12c7   : > { %v9357_v0 = vmax.f32 %v9339_v4, 0.0 }
0x12c8   : > { %v9356_v52 = vmax.f32 %v9334_v36, 0.0 }
0x12ca   : > { %11776 = vmatprep.mubr.msk.f32.mxu1 %vm9367_vm2, %v9356_v52 }
0x12cb   : > { %11777 = vmatmul.mubr.msk.f32.gmra.mrb[230].mxu1 %vm9367_vm2, %v9357_v0 }
0x1366   : > { %v11757_v18 = vpop.f32.mrb[216].mxu1 }
0x1367   : > { %v9488_v21 = vadd.f32 %v11757_v18, %v15411_v3  ;;  %v9482_v33 = vpop.f32.mrb[217].mxu1 }
0x1368   : > { %v9483_v54 = vadd.f32 %v9482_v33, %v15411_v3 }
0x1369   : > { %v9562_v53 = vadd.f32 %v9488_v21, %v15095_v48 }
0x136a   : > { %v9561_v51 = vadd.f32 %v9483_v54, %v15098_v61 }
0x136b   : > { %v9587_v63 = vmul.f32 %v15415_v46, %v9562_v53 }
0x136c   : > { %v9602_v60 = vsel %vm329_vm0, %v9561_v51, 0.0 }
0x136d   : > { %v9603_v13 = vsel %vm329_vm0, %v9587_v63, 0.0 }
0x136e   : > { %v9604_v44 = vadd.f32 %v9603_v13, %v9602_v60  ;;  %v11760_v14 = vpop.f32.mrb[218].mxu1 }
0x136f   : > { %v9498_v56 = vadd.f32 %v11760_v14, %v15411_v3  ;;  %v9492_v16 = vpop.f32.mrb[219].mxu1 }
0x1370   : > { %v9493_v41 = vadd.f32 %v9492_v16, %v15411_v3  ;;  %v9605_v33 = vrot.slane %v9604_v44, 4 }
0x1371   : > { %v9564_v31 = vadd.f32 %v9498_v56, %v15107_v5 }
0x1372   : > { %v9563_v20 = vadd.f32 %v9493_v41, %v15110_v59 }
0x1373   : > { %v9589_v48 = vmul.f32 %v15415_v46, %v9564_v31 }
0x1374   : > { %v9611_v61 = vsel %vm329_vm0, %v9563_v20, 0.0 }
0x1375   : > { %v9612_v62 = vsel %vm329_vm0, %v9589_v48, 0.0  ;;  %v9606_v48 = vadd.f32 %v9605_v33, %v9604_v44 }
0x1376   : > { %v9613_v30 = vadd.f32 %v9612_v62, %v9611_v61  ;;  %v11763_v15 = vpop.f32.mrb[220].mxu1 }
0x1377   : > { %v9508_v57 = vadd.f32 %v11763_v15, %v15411_v3  ;;  %v9502_v55 = vpop.f32.mrb[221].mxu1 }
0x1378   : > { %v9503_v49 = vadd.f32 %v9502_v55, %v15411_v3  ;;  %v9614_v36 = vrot.slane %v9613_v30, 4 }
0x1379   : > { %v9566_v28 = vadd.f32 %v9508_v57, %v15119_v1 }
0x137a   : > { %v9565_v38 = vadd.f32 %v9503_v49, %v15122_v40  ;;  %v9615_v60 = vadd.f32 %v9614_v36, %v9613_v30 }
0x137b   : > { %v9591_v5 = vmul.f32 %v15415_v46, %v9566_v28 }
0x137c   : > { %v9620_v59 = vsel %vm329_vm0, %v9565_v38, 0.0  ;;  %v9616_v57 = vrot.slane %v9615_v60, 2 }
0x137d   : > { %v9621_v50 = vsel %vm329_vm0, %v9591_v5, 0.0  ;;  %v9607_v5 = vrot.slane %v9606_v48, 2 }
0x137e   : > { %v9622_v34 = vadd.f32 %v9621_v50, %v9620_v59  ;;  %v11766_v22 = vpop.f32.mrb[222].mxu1 }
0x137f   : > { %v9518_v6 = vadd.f32 %v11766_v22, %v15411_v3  ;;  %v9512_v24 = vpop.f32.mrb[223].mxu1 }
0x1380   : > { %v9513_v26 = vadd.f32 %v9512_v24, %v15411_v3  ;;  %v9623_v11 = vrot.slane %v9622_v34, 4 }
0x1381   : > { %v9568_v37 = vadd.f32 %v9518_v6, %v15131_v29 }
0x1382   : > { %v9567_v17 = vadd.f32 %v9513_v26, %v15134_v47  ;;  %v9624_v16 = vadd.f32 %v9623_v11, %v9622_v34  ;;  %v9617_v26 = vadd.f32 %v9616_v57, %v9615_v60 }
0x1383   : > { %v9593_v1 = vmul.f32 %v15415_v46, %v9568_v37 }
0x1384   : > { %v9629_v40 = vsel %vm329_vm0, %v9567_v17, 0.0  ;;  %v9625_v49 = vrot.slane %v9624_v16, 2 }
0x1385   : > { %v9630_v7 = vsel %vm329_vm0, %v9593_v1, 0.0 }
0x1386   : > { %v9631_v12 = vadd.f32 %v9630_v7, %v9629_v40  ;;  %v9626_v37 = vadd.f32 %v9625_v49, %v9624_v16  ;;  %v9608_v7 = vadd.f32 %v9607_v5, %v9606_v48 }
0x1388   : > { %v9632_v54 = vrot.slane %v9631_v12, 4  ;;  %v9627_v36 = vrot.slane %v9626_v37, 1 }
0x138a   : > { %v9633_v61 = vadd.f32 %v9632_v54, %v9631_v12  ;;  %v9628_v54 = vadd.f32 %v9627_v36, %v9626_v37 }
0x138c   : > { %v9634_v59 = vrot.slane %v9633_v61, 2 }
0x138e   : > { %v9635_v12 = vadd.f32 %v9634_v59, %v9633_v61 }
0x138f   : > { %v11769_v43 = vpop.f32.mrb[224].mxu1 }
0x1390   : > { %v9528_v2 = vadd.f32 %v11769_v43, %v15411_v3  ;;  %v9522_v25 = vpop.f32.mrb[225].mxu1 }
0x1391   : > { %v9523_v58 = vadd.f32 %v9522_v25, %v15411_v3 }
0x1392   : > { %v9570_v4 = vadd.f32 %v9528_v2, %v15143_v39 }
0x1393   : > { %v9569_v19 = vadd.f32 %v9523_v58, %v15146_v23  ;;  %v11772_v29 = vpop.f32.mrb[226].mxu1 }
0x1394   : > { %v9595_v47 = vmul.f32 %v15415_v46, %v9570_v4  ;;  %v9538_v52 = vadd.f32 %v11772_v29, %v15411_v3  ;;  %v9532_v0 = vpop.f32.mrb[227].mxu1  ;;  %v9618_v4 = vrot.slane %v9617_v26, 1 }
0x1395   : > { %v9638_v18 = vsel %vm329_vm0, %v9569_v19, 0.0  ;;  %v9533_v21 = vadd.f32 %v9532_v0, %v15411_v3  ;;  %v9636_v0 = vrot.slane %v9635_v12, 1 }
0x1396   : > { %v9639_v53 = vsel %vm329_vm0, %v9595_v47, 0.0  ;;  %v9572_v39 = vadd.f32 %v9538_v52, %v15155_v9  ;;  %v9609_v52 = vrot.slane %v9608_v7, 1 }
0x1397   : > { %v9640_v51 = vadd.f32 %v9639_v53, %v9638_v18  ;;  %v9571_v23 = vadd.f32 %v9533_v21, %v15158_v35  ;;  %v11775_v63 = vpop.f32.mrb[228].mxu1  ;;  %v9619_v21 = vadd.f32 %v9618_v4, %v9617_v26 }
0x1398   : > { %v9597_v13 = vmul.f32 %v15415_v46, %v9572_v39  ;;  %v9548_v14 = vadd.f32 %v11775_v63, %v15411_v3  ;;  %v9542_v56 = vpop.f32.mrb[229].mxu1  ;;  %v9610_v39 = vadd.f32 %v9609_v52, %v9608_v7 }
0x1399   : > { %v9641_v41 = vrot.slane %v9640_v51, 4  ;;  %v9647_v31 = vsel %vm329_vm0, %v9571_v23, 0.0  ;;  %v9543_v20 = vadd.f32 %v9542_v56, %v15411_v3  ;;  %v9675_v63 = vmul.f32 0.07692308, %v9619_v21 }
0x139a   : > { %v9648_v9 = vsel %vm329_vm0, %v9597_v13, 0.0  ;;  %v9574_v62 = vadd.f32 %v9548_v14, %v15167_v8  ;;  %v9676_v14 = vmul.f32 0.07692308, %v9628_v54  ;;  %v9674_v16 = vmul.f32 0.07692308, %v9610_v39 }
0x139b   : > { %v9642_v35 = vadd.f32 %v9641_v41, %v9640_v51  ;;  %v9649_v15 = vadd.f32 %v9648_v9, %v9647_v31  ;;  %v9573_v30 = vadd.f32 %v9543_v20, %v15170_v42 }
0x139c   : > { %v9599_v55 = vmul.f32 %v15415_v46, %v9574_v62  ;;  %v9693_v9 = vsel %vm9692_vm4, %v9675_v63, %v9674_v16 }
0x139d   : > { %v9650_v28 = vrot.slane %v9649_v15, 4  ;;  %v9656_v38 = vsel %vm329_vm0, %v9573_v30, 0.0  ;;  %v9643_v34 = vrot.slane %v9642_v35, 2 }
0x139e   : > { %v9657_v44 = vsel %vm329_vm0, %v9599_v55, 0.0  ;;  %v11778_v50 = vpop.f32.mrb[230].mxu1 }
0x139f   : > { %v9651_v22 = vadd.f32 %v9650_v28, %v9649_v15  ;;  %v9658_v6 = vadd.f32 %v9657_v44, %v9656_v38  ;;  %v9558_v8 = vadd.f32 %v11778_v50, %v15411_v3  ;;  %v9552_v24 = vpop.f32.mrb[231].mxu1  ;;  %v9644_v2 = vadd.f32 %v9643_v34, %v9642_v35 }
0x13a0   : > { %v9553_v42 = vadd.f32 %v9552_v24, %v15411_v3  ;;  %v9695_v35 = vsel %vm9694_vm5, %v9676_v14, %v9693_v9 }
0x13a1   : > { %v9652_v17 = vrot.slane %v9651_v22, 2  ;;  %v9659_v1 = vrot.slane %v9658_v6, 4  ;;  %v9576_v40 = vadd.f32 %v9558_v8, %v15179_v10  ;;  %v9645_v10 = vrot.slane %v9644_v2, 1 }
0x13a2   : > { %v9575_v43 = vadd.f32 %v9553_v42, %v15182_v45 }
0x13a3   : > { %v9660_v25 = vadd.f32 %v9659_v1, %v9658_v6  ;;  %v9601_v58 = vmul.f32 %v15415_v46, %v9576_v40  ;;  %v9653_v19 = vadd.f32 %v9652_v17, %v9651_v22  ;;  %v9637_v46 = vadd.f32 %v9636_v0, %v9635_v12 }
0x13a4   : > { %v9665_v29 = vsel %vm329_vm0, %v9575_v43, 0.0  ;;  %v9646_v23 = vadd.f32 %v9645_v10, %v9644_v2 }
0x13a5   : > { %v9661_v47 = vrot.slane %v9660_v25, 2  ;;  %v9666_v3 = vsel %vm329_vm0, %v9601_v58, 0.0  ;;  %v9654_v33 = vrot.slane %v9653_v19, 1  ;;  %v9677_v41 = vmul.f32 0.07692308, %v9637_v46 }
0x13a6   : > { %v9667_v11 = vadd.f32 %v9666_v3, %v9665_v29  ;;  %v9678_v20 = vmul.f32 0.07692308, %v9646_v23 }
0x13a7   : > { %v9662_v18 = vadd.f32 %v9661_v47, %v9660_v25  ;;  %v9655_v60 = vadd.f32 %v9654_v33, %v9653_v19  ;;  %v9697_v30 = vsel %vm9696_vm6, %v9677_v41, %v9695_v35 }
0x13a8   : > { %v9668_v45 = vrot.slane %v9667_v11, 4  ;;  %v9699_v57 = vsel %vm9698_vm7, %v9678_v20, %v9697_v30 }
0x13a9   : > { %v9663_v53 = vrot.slane %v9662_v18, 1  ;;  %v9679_v61 = vmul.f32 0.07692308, %v9655_v60  ;;  %v9813_v60 = vld [vmem:[%s15582_s7 + $0x8] sm:$0xff] }
0x13aa   : > { %v9669_v51 = vadd.f32 %v9668_v45, %v9667_v11 }
0x13ab   : > { %v9664_v56 = vadd.f32 %v9663_v53, %v9662_v18  ;;  %v9701_v49 = vsel %vm9700_vm8, %v9679_v61, %v9699_v57 }
0x13ac   : > { %v9670_v13 = vrot.slane %v9669_v51, 2 }
0x13ad   : > { %v9680_v62 = vmul.f32 0.07692308, %v9664_v56 }
0x13ae   : > { %v9671_v31 = vadd.f32 %v9670_v13, %v9669_v51  ;;  %v12725_v13 = vmov 0.0|0.0  }
0x13af   : > { %v9703_v28 = vsel %vm9702_vm9, %v9680_v62, %v9701_v49  ;;  %12226 = vmatprep.subr.bf16.mxu0 %v12725_v13 }
0x13b0   : > { %v9672_v48 = vrot.slane %v9671_v31, 1 }
0x13b2   : > { %v9673_v15 = vadd.f32 %v9672_v48, %v9671_v31 }
0x13b4   : > { %v9681_v55 = vmul.f32 0.07692308, %v9673_v15 }
0x13b6   : > { %v9705_v38 = vsel %vm9704_vm10, %v9681_v55, %v9703_v28 }
0x13b7   : > { %v9707_v5 = vsel %vm329_vm0, %v9705_v38, 0.0 }
0x13b8   : > { %9708 = vadd.xlane.f32.xlu0 %v9707_v5 }
0x1445   : > { %v9709_v59 = vpop.xlane.xlu0 %9708 }
0x1446   : > { %v9710_v44 = vmul.f32 0.0625, %v9709_v59 }
0x1448   : > { %v9712_v50 = vrot.slane %v9710_v44, 1  ;;  %v9713_v34 = vrot.slane %v9710_v44, 2  ;;  %v9714_v22 = vrot.slane %v9710_v44, 3  ;;  %v9715_v6 = vrot.slane %v9710_v44, 4 }
0x1449   : > { %v9716_v8 = vrot.slane %v9710_v44, 5  ;;  %v9717_v24 = vrot.slane %v9710_v44, 6  ;;  %v9718_v26 = vrot.slane %v9710_v44, 7  ;;  %v9727_v42 = vsub.f32 %v9674_v16, %v9710_v44 }
0x144a   : > { %v9728_v37 = vsub.f32 %v9675_v63, %v9712_v50  ;;  %v9729_v17 = vsub.f32 %v9676_v14, %v9713_v34  ;;  %v9730_v1 = vsub.f32 %v9677_v41, %v9714_v22  ;;  %v9731_v40 = vsub.f32 %v9678_v20, %v9715_v6  ;;  %v9812_v63 = vld [vmem:[%s15582_s7] sm:$0xff]  ;;  %v9682_v20 = vld [vmem:[%s15576_s1 + $0x4c] ss:$0 sm:$0xff] }
0x144b   : > { %v9732_v7 = vsub.f32 %v9679_v61, %v9716_v8  ;;  %v9733_v12 = vsub.f32 %v9680_v62, %v9717_v24  ;;  %v9734_v43 = vsub.f32 %v9681_v55, %v9718_v26  ;;  %v9735_v19 = vmul.f32 %v9727_v42, %v9727_v42  ;;  %v9683_v8 = vld [vmem:[%s15576_s1 + $0x4d] ss:$0 sm:$0xff] }
0x144c   : > { %v9736_v2 = vmul.f32 %v9728_v37, %v9728_v37  ;;  %v9737_v25 = vmul.f32 %v9729_v17, %v9729_v17  ;;  %v9738_v58 = vmul.f32 %v9730_v1, %v9730_v1  ;;  %v9739_v4 = vmul.f32 %v9731_v40, %v9731_v40 }
0x144d   : > { %v9740_v29 = vmul.f32 %v9732_v7, %v9732_v7  ;;  %v9741_v3 = vmul.f32 %v9733_v12, %v9733_v12  ;;  %v9742_v52 = vmul.f32 %v9734_v43, %v9734_v43  ;;  %v12227_v14 = vpack.c.bf16 %v9813_v60, %v9812_v63 }
0x144e   : > { %v9751_v36 = vrot.slane %v9736_v2, 7  ;;  %v9753_v47 = vrot.slane %v9737_v25, 6  ;;  %v9755_v11 = vrot.slane %v9738_v58, 5  ;;  %v9757_v18 = vrot.slane %v9739_v4, 4 }
0x144f   : > { %v9759_v33 = vrot.slane %v9740_v29, 3  ;;  %v9761_v54 = vrot.slane %v9741_v3, 2  ;;  %v9763_v39 = vrot.slane %v9742_v52, 1  ;;  %12228 = vmatpush3.bf16.msra.mxu0 %v12227_v14 }
0x1450   : > { %v9752_v0 = vsel %vm9692_vm4, %v9751_v36, %v9735_v19 }
0x1451   : > { %v9754_v10 = vsel %vm9694_vm5, %v9753_v47, %v9752_v0 }
0x1452   : > { %v9756_v21 = vsel %vm9696_vm6, %v9755_v11, %v9754_v10 }
0x1453   : > { %v9758_v45 = vsel %vm9698_vm7, %v9757_v18, %v9756_v21 }
0x1454   : > { %v9760_v53 = vsel %vm9700_vm8, %v9759_v33, %v9758_v45  ;;  %v12727_v33 = vmov 1966171168  }
0x1455   : > { %v9762_v46 = vsel %vm9702_vm9, %v9761_v54, %v9760_v53  ;;  %v9913_v45 = vunpack.c.l.s4 %v12727_v33  ;;  %v9814_v53 = vld [vmem:[%s15576_s1 + $0x4e] ss:$0 sm:$0xff] }
0x1456   : > { %v9764_v51 = vsel %vm9704_vm10, %v9763_v39, %v9762_v46 }
0x1457   : > { %v9766_v23 = vsel %vm329_vm0, %v9764_v51, 0.0  ;;  %v9914_v54 = vunpack.c.0.s8 %v9913_v45 }
0x1458   : > { %9767 = vadd.xlane.f32.xlu1 %v9766_v23 }
0x1459   : > { %v9917_v51 = vsub.s32 %v9914_v54, %v15650_v27 }
0x14e5   : > { %v9768_v56 = vpop.xlane.xlu1 %9767 }
0x14e6   : > { %v9769_v16 = vmul.f32 0.0625, %v9768_v56 }
0x14e8   : > { %v9770_v41 = vadd.f32 1e-05, %v9769_v16 }
0x14ea   : > { %12658 = vrsqrt.f32 %v9770_v41 }
0x14f4   : > { %v12659_v31 = vpop.eup %12658 }
0x14f5   : > { %v9773_v48 = vrot.slane %v12659_v31, 1  ;;  %v9774_v61 = vrot.slane %v12659_v31, 2  ;;  %v9775_v9 = vrot.slane %v12659_v31, 3  ;;  %v9776_v62 = vrot.slane %v12659_v31, 4 }
0x14f6   : > { %v9777_v35 = vrot.slane %v12659_v31, 5  ;;  %v9778_v15 = vrot.slane %v12659_v31, 6  ;;  %v9779_v30 = vrot.slane %v12659_v31, 7  ;;  %v9788_v57 = vmul.f32 %v12659_v31, %v9727_v42 }
0x14f7   : > { %v9789_v55 = vmul.f32 %v9773_v48, %v9728_v37  ;;  %v9790_v32 = vmul.f32 %v9774_v61, %v9729_v17  ;;  %v9791_v49 = vmul.f32 %v9775_v9, %v9730_v1  ;;  %v9792_v28 = vmul.f32 %v9776_v62, %v9731_v40 }
0x14f8   : > { %v9793_v38 = vmul.f32 %v9777_v35, %v9732_v7  ;;  %v9794_v5 = vmul.f32 %v9778_v15, %v9733_v12  ;;  %v9795_v59 = vmul.f32 %v9779_v30, %v9734_v43  ;;  %v9796_v44 = vmul.f32 %v9788_v57, %v9682_v20 }
0x14f9   : > { %v9797_v50 = vmul.f32 %v9789_v55, %v9682_v20  ;;  %v9798_v34 = vmul.f32 %v9790_v32, %v9682_v20  ;;  %v9799_v22 = vmul.f32 %v9791_v49, %v9682_v20  ;;  %v9800_v6 = vmul.f32 %v9792_v28, %v9682_v20 }
0x14fa   : > { %v9801_v24 = vmul.f32 %v9793_v38, %v9682_v20  ;;  %v9802_v26 = vmul.f32 %v9794_v5, %v9682_v20  ;;  %v9803_v2 = vmul.f32 %v9795_v59, %v9682_v20  ;;  %v9804_v40 = vadd.f32 %v9796_v44, %v9683_v8 }
0x14fb   : > { %v9805_v42 = vadd.f32 %v9797_v50, %v9683_v8  ;;  %v9806_v37 = vadd.f32 %v9798_v34, %v9683_v8  ;;  %v9807_v17 = vadd.f32 %v9799_v22, %v9683_v8  ;;  %v9808_v1 = vadd.f32 %v9800_v6, %v9683_v8 }
0x14fc   : > { %v9809_v7 = vadd.f32 %v9801_v24, %v9683_v8  ;;  %v9810_v25 = vadd.f32 %v9802_v26, %v9683_v8  ;;  %v9811_v58 = vadd.f32 %v9803_v2, %v9683_v8 }
0x14fd   : > { %v9823_v12 = vrot.slane %v9805_v42, 7  ;;  %v9825_v43 = vrot.slane %v9806_v37, 6  ;;  %v9827_v19 = vrot.slane %v9807_v17, 5  ;;  %v9829_v36 = vrot.slane %v9808_v1, 4 }
0x14fe   : > { %v9831_v3 = vrot.slane %v9809_v7, 3  ;;  %v9833_v0 = vrot.slane %v9810_v25, 2  ;;  %v9835_v10 = vrot.slane %v9811_v58, 1 }
0x14ff   : > { %v9824_v4 = vsel %vm9692_vm4, %v9823_v12, %v9804_v40 }
0x1500   : > { %v9826_v29 = vsel %vm9694_vm5, %v9825_v43, %v9824_v4 }
0x1501   : > { %v9828_v47 = vsel %vm9696_vm6, %v9827_v19, %v9826_v29 }
0x1502   : > { %v9830_v52 = vsel %vm9698_vm7, %v9829_v36, %v9828_v47 }
0x1503   : > { %v9832_v11 = vsel %vm9700_vm8, %v9831_v3, %v9830_v52 }
0x1504   : > { %v9834_v18 = vsel %vm9702_vm9, %v9833_v0, %v9832_v11 }
0x1505   : > { %v9836_v21 = vsel %vm9704_vm10, %v9835_v10, %v9834_v18 }
0x1506   : > { %11784 = vmatmul.mubr.msk.f32.vlgmr.msra.gmra.mrb[152].mxu0 %vm329_vm0, %v9836_v21 }
0x15d9   : > { %v9905_v39 = vpop.f32.mrb[152].mxu0 }
0x15da   : > { %v9906_v46 = vadd.f32 %v9905_v39, %v9814_v53  ;;  %v11785_v23 = vpop.f32.mrb[153].mxu0 }
0x15dc   : > { %v9909_v63 = vmax.f32 %v9906_v46, 0.0 }
0x15de   : > { %v9911_v60 = vcombine.high %v9909_v63, %v9909_v63  ;;  %v9918_v13 = vrot.slane %v9909_v63, %v9917_v51 }
0x15e0   : > { %v9925_v14 = vrot.slane %v9911_v60, %v9917_v51  ;;  %v9926_v56 = vcombine.high %v9918_v13, %v9918_v13  ;;  %v9934_v16 = vrot.slane %v9918_v13, %v9917_v51 }
0x15e2   : > { %v9927_v41 = vcombine.high %v9925_v14, %v9925_v14  ;;  %v9941_v31 = vrot.slane %v9925_v14, %v9917_v51  ;;  %v9948_v20 = vrot.slane %v9926_v56, %v9917_v51  ;;  %v9956_v48 = vcombine.high %v9934_v16, %v9934_v16  ;;  %9969 = vst.msk [vmem:[%s301_s12] sm:$0x1] %vm9968_vm12, %v9934_v16 }
0x15e4   : > { %v9955_v27 = vrot.slane %v9927_v41, %v9917_v51  ;;  %v9957_v61 = vcombine.high %v9941_v31, %v9941_v31  ;;  %v9958_v9 = vcombine.high %v9948_v20, %v9948_v20  ;;  %9970 = vst.msk [vmem:[%s301_s12 + $0x1] sm:$0x1] %vm9968_vm12, %v9948_v20  ;;  %9971 = vst.msk [vmem:[%s301_s12 + $0x2] sm:$0x1] %vm9968_vm12, %v9956_v48 }
0x15e5   : > { %9973 = vst.msk [vmem:[%s301_s12 + $0x4] sm:$0x1] %vm9968_vm12, %v9941_v31 }
0x15e6   : > { %v9959_v62 = vcombine.high %v9955_v27, %v9955_v27  ;;  %9972 = vst.msk [vmem:[%s301_s12 + $0x3] sm:$0x1] %vm9968_vm12, %v9958_v9  ;;  %9974 = vst.msk [vmem:[%s301_s12 + $0x5] sm:$0x1] %vm9968_vm12, %v9955_v27 }
0x15e7   : > { %9975 = vst.msk [vmem:[%s301_s12 + $0x6] sm:$0x1] %vm9968_vm12, %v9957_v61 }
0x15e8   : > { %9976 = vst.msk [vmem:[%s301_s12 + $0x7] sm:$0x1] %vm9968_vm12, %v9959_v62 }
0x15e9   : > { %12673 = shalt.err (!%p12670_p3)
}
0x15ea   : > { %s12674_s25 = scalar_lea.hbm %s15524_s20, 128  ;;  %s12678_s12 = scalar_lea.hbm %s15583_s8, 256 }
0x15eb   : > { %p12675_p4 = scmp.ne.s32.totalorder %s15524_s20, %s12674_s25  ;;  %p12679_p9 = scmp.lt.u32.totalorder %s15524_s20, %s15583_s8 }
0x15ec   : > { %p12680_p10 = scmp.lt.u32.totalorder %s12678_s12, %s12674_s25  ;;  %p12682_p12 = scmp.lt.u32.totalorder %s12674_s25, %s15524_s20 }
0x15ed   : > { %p12676_p7 = pnand %p12675_p4, %p12814_p5 }
0x15ee   : > { %p12681_p11 = por %p12680_p10, %p12679_p9 }
0x15ef   : > { %p12677_p8 = pneg %p12676_p7 }
0x15f0   : > { %p12683_p13 = por %p12682_p12, %p12681_p11 }
0x15f2   : > { %p12684_p0 = pnand %p12683_p13, %p12677_p8 }
0x15f4   : > { %12687 = shalt.err (!%p12684_p0)
}
0x15f5   : > { %s12729_s19 = smov 16   ;;  %s12730_s21 = smov 1  }
0x15f6   : > { %12293 = dma.vmem_to_hbm [thread:$0]  (%p12814_p5), %s15526_s17, 128, %s15524_s20, %s15534_s9, %s12729_s19, %s12729_s19, %s12730_s21  }
0x15f7 PF: > { %p12299_p1 = scmp.ge.s32.totalorder %s12722_s30, 2  ;;  %s10006_s22 = sand.u32 1, %s12710_s27  }
0x15f8   : > { %s10007_s23 = scalar_lea.sflag [#allocation3], %s10006_s22 }
0x15f9   : > { %p12296_p2 = pnand %p12299_p1, %p12818_p6 }
0x15fb   : > { %12705 = dma.done.wait (!%p12296_p2), %s10007_s23, 128  }
0x15fc   : > { %12707 = vsyncadd (!%p12296_p2), %s10007_s23, 4294967168  ;;  %p18_p3 = scmp.ge.s32.totalorder %s12801_s11, 4   ;;  %s15651_s27 = smov %s12714_s28 }
0x15fd   : > { %s15652_s28 = smov %s12718_s29  ;;  %s15653_s29 = smov %s12812_s14 }
0x15fe   : > { %s15654_s30 = smov %s12801_s11  ;;  %20 = sbr.rel (!%p18_p3) target bundleno = 3 (0x3), region = 97 }
0x1605   :  { %10012 = vsyncpa [#allocation3], 1 }
0x1606   :  { %10014 = vsyncpa [#allocation3 + $0x1], 1 }

</bundles_post_ra>
